<compile_context>
chip_gen: v5e
topology: v5e:2x2
jax: 0.10.0
libtpu: 0.0.40
codegen_flags: <defaults>
</compile_context>

<pallas_src>
import functools
import math

import jax
import jax.numpy as jnp
import numpy as np
from jax.experimental import pallas as pl
from jax.experimental.pallas import tpu as pltpu

# ----------------------------- model config ---------------------------------
PAD = 0
VOCAB = 20            # phoneme vocab
D_MODEL = 32          # encoder_dim == decoder_dim
N_LAYERS = 2          # encoder_n_layer == decoder_n_layer
N_HEAD = 2
D_K = D_MODEL // N_HEAD
D_FFN = 64            # fft conv1d filter size
FFT_K1 = 9            # fft_conv1d_kernel = (9, 1), padding 4
VP_FILTER = 32        # variance predictor filter size
VP_KERNEL = 3         # variance predictor kernel size (padding 1)
N_BINS = 8            # pitch / energy quantization bins
NUM_MELS = 16         # mel_config.num_mels
MAX_POS = 64          # positional table size
LN_EPS = 1e-5
BLOB_W = 128          # lane width of the packed weight blobs

MXU_DTYPE = jnp.bfloat16   # bf16 operands, f32 accumulation on the MXU


# ----------------------------- in-kernel helpers ------------------------------
def _mm(a, b):
    """MXU matmul, bf16 operands (weights are pre-cast on the host), f32 acc."""
    if a.dtype != MXU_DTYPE:
        a = a.astype(MXU_DTYPE)
    if b.dtype != MXU_DTYPE:
        b = b.astype(MXU_DTYPE)
    return jnp.dot(a, b, preferred_element_type=jnp.float32)


def _layer_norm(x, gamma, beta):
    mean = jnp.mean(x, axis=-1, keepdims=True)
    var = jnp.mean(jnp.square(x - mean), axis=-1, keepdims=True)
    return (x - mean) * jax.lax.rsqrt(var + LN_EPS) * gamma + beta


def _v(ref, layout, name):
    """Static view into a packed weight blob."""
    off, r, c = layout[name]
    return ref[off:off + r, 0:c]


def _shift_rows(x, off):
    """y[r] = x[r + off], zeros outside [0, rows).  `off` is a static int."""
    if off == 0:
        return x
    m, c = x.shape
    zeros = jnp.zeros((abs(off), c), x.dtype)
    if off > 0:
        return jnp.concatenate([x[off:, :], zeros], axis=0)
    return jnp.concatenate([zeros, x[:m + off, :]], axis=0)


def _conv_taps(x, tmod, t_len, w_of_tap, k):
    """'same' 1-D conv over time with the batch stacked along rows.

    One stacked (B*T, Cin)@(Cin, Cout) GEMM per tap (tap accumulation, no
    lane-axis im2col concat).  Rows whose tap would cross a batch boundary or
    the sequence edge are zeroed, reproducing per-sequence zero padding."""
    half = k // 2
    acc = None
    for tap in range(k):
        off = tap - half
        xt = _shift_rows(x, off)
        if off != 0:
            valid = jnp.logical_and(tmod + off >= 0, tmod + off < t_len)
            xt = jnp.where(valid, xt, 0.0)
        y = _mm(xt, w_of_tap(tap))
        acc = y if acc is None else acc + y
    return acc


def _mha_stacked(x, nonpad_bt, mat_ref, vec_ref, lm, lv, name, B, T):
    """Multi-head self-attention + residual + LayerNorm, batch stacked in rows."""
    qkv = _mm(x, _v(mat_ref, lm, f"{name}_wqkv")) + _v(vec_ref, lv, f"{name}_bqkv")
    scale = 1.0 / math.sqrt(D_K)
    rows = []
    for b in range(B):                                   # static, B is tiny
        qkv_b = qkv[b * T:(b + 1) * T, :]
        key_np = nonpad_bt[b:b + 1, :]                   # (1, T): 1 where key != PAD
        heads = []
        for h in range(N_HEAD):
            q = qkv_b[:, h * D_K:(h + 1) * D_K]
            k = qkv_b[:, (N_HEAD + h) * D_K:(N_HEAD + h + 1) * D_K]
            v = qkv_b[:, (2 * N_HEAD + h) * D_K:(2 * N_HEAD + h + 1) * D_K]
            s = jax.lax.dot_general(q.astype(MXU_DTYPE), k.astype(MXU_DTYPE),
                                    (((1,), (1,)), ((), ())),
                                    preferred_element_type=jnp.float32) * scale
            s = jnp.where(key_np > 0.5, s, -1e9)         # mask PAD keys (f32 scores)
            p = jax.nn.softmax(s, axis=-1)
            heads.append(_mm(p, v))
        rows.append(jnp.concatenate(heads, axis=1))      # (T, H*dk)
    attn = jnp.concatenate(rows, axis=0)                 # (B*T, H*dk)
    out = _mm(attn, _v(mat_ref, lm, f"{name}_wo")) + _v(vec_ref, lv, f"{name}_bo")
    return _layer_norm(out + x, _v(vec_ref, lv, f"{name}_ln1g"),
                       _v(vec_ref, lv, f"{name}_ln1b"))


def _conv_ffn_stacked(x, tmod, mat_ref, vec_ref, lm, lv, name, T):
    """Position-wise conv FFN (k=9 'same' -> relu -> k=1) + residual + LN."""
    h = _conv_taps(x, tmod, T,
                   lambda tap: _v(mat_ref, lm, f"{name}_w1_{tap}"), FFT_K1)
    h = jnp.maximum(h + _v(vec_ref, lv, f"{name}_fb1"), 0.0)
    out = _mm(h, _v(mat_ref, lm, f"{name}_w2")) + _v(vec_ref, lv, f"{name}_fb2")
    return _layer_norm(out + x, _v(vec_ref, lv, f"{name}_ln2g"),
                       _v(vec_ref, lv, f"{name}_ln2b"))


def _fft_stack(x, npc, nonpad_bt, tmod, mat_ref, vec_ref, lm, lv, prefix, B, T):
    for l in range(N_LAYERS):
        name = f"{prefix}{l}"
        x = _mha_stacked(x, nonpad_bt, mat_ref, vec_ref, lm, lv, name, B, T) * npc
        x = _conv_ffn_stacked(x, tmod, mat_ref, vec_ref, lm, lv, name, T) * npc
    return x


def _var_predict_stacked(x, tmod, mat_ref, vec_ref, lm, lv, name, T):
    """conv3->relu->LN->conv3->relu->LN->linear, emitted as a lane-dense row."""
    h = _conv_taps(x, tmod, T,
                   lambda tap: _v(mat_ref, lm, f"{name}_w1_{tap}"), VP_KERNEL)
    h = jnp.maximum(h + _v(vec_ref, lv, f"{name}_b1"), 0.0)
    h = _layer_norm(h, _v(vec_ref, lv, f"{name}_g1"), _v(vec_ref, lv, f"{name}_be1"))
    h = _conv_taps(h, tmod, T,
                   lambda tap: _v(mat_ref, lm, f"{name}_w2_{tap}"), VP_KERNEL)
    h = jnp.maximum(h + _v(vec_ref, lv, f"{name}_b2"), 0.0)
    h = _layer_norm(h, _v(vec_ref, lv, f"{name}_g2"), _v(vec_ref, lv, f"{name}_be2"))
    wl = _v(vec_ref, lv, f"{name}_wl")                   # (1, F) transposed weight
    bl = _v(vec_ref, lv, f"{name}_bl")                   # (1, 1)
    row = jax.lax.dot_general(wl.astype(MXU_DTYPE), h.astype(MXU_DTYPE),
                              (((1,), (1,)), ((), ())),
                              preferred_element_type=jnp.float32)
    return row + bl                                      # (1, B*T) lane-dense


# ------------------------------- kernels ------------------------------------
def encoder_kernel(x_ref, npbt_ref, npc_ref, mat_ref, vec_ref,
                   out_ref, dur_ref, *, lm, lv, B, T):
    """Full encoder FFT stack + duration predictor, whole batch in one step."""
    x = x_ref[...]                                       # (B*T, D) f32
    nonpad_bt = npbt_ref[...]                            # (B, T)
    npc = npc_ref[...]                                   # (B*T, 1)
    tmod = jax.lax.broadcasted_iota(jnp.int32, (B * T, 1), 0) % T
    x = _fft_stack(x, npc, nonpad_bt, tmod, mat_ref, vec_ref, lm, lv, "enc", B, T)
    out_ref[...] = x
    dur_ref[...] = _var_predict_stacked(x, tmod, mat_ref, vec_ref, lm, lv, "dp", T)


def decoder_kernel(x_ref, pos_ref, npbt_ref, npc_ref, pe_t_ref, mat_ref, vec_ref,
                   mel_ref, pe_ref, *, lm, lv, B, T):
    """Pitch+energy predictors, variance-adaptor embedding adds, positional
    encoding, full decoder FFT stack, mask_tensor and mel_linear, fused."""
    x = x_ref[...]                                       # (B*Tm, D) LR output
    nonpad_bt = npbt_ref[...]                            # (B, Tm)
    npc = npc_ref[...]                                   # (B*Tm, 1)
    tmod = jax.lax.broadcasted_iota(jnp.int32, (B * T, 1), 0) % T

    # ---- pitch / energy predictors (on the LR output, before any adds) ----
    p_row = _var_predict_stacked(x, tmod, mat_ref, vec_ref, lm, lv, "pp", T)
    e_row = _var_predict_stacked(x, tmod, mat_ref, vec_ref, lm, lv, "ep", T)
    pe_ref[...] = jnp.concatenate([p_row, e_row], axis=0)        # (2, B*Tm)

    # ---- variance-adaptor embedding adds: bucketize + one-hot @ table ----
    targets = pe_t_ref[...]                              # (B*Tm, 2) [pitch | energy]
    bin_iota = jax.lax.broadcasted_iota(jnp.int32, (B * T, N_BINS), 1)

    def bucket_embed(col, bins_name, emb_name):
        bins = _v(vec_ref, lv, bins_name)                # (1, N_BINS-1)
        idx = jnp.sum((col > bins).astype(jnp.int32), axis=1, keepdims=True)
        onehot = (bin_iota == idx).astype(jnp.float32)
        return jnp.dot(onehot, _v(vec_ref, lv, emb_name),
                       preferred_element_type=jnp.float32)

    x = x + bucket_embed(targets[:, 0:1], "pitch_bins", "pitch_emb")
    x = x + bucket_embed(targets[:, 1:2], "energy_bins", "energy_emb")

    # ---- positional encoding: one-hot(mel_pos) @ pos_table ----
    pos_iota = jax.lax.broadcasted_iota(jnp.int32, (B * T, MAX_POS), 1)
    pos_oh = (pos_iota == pos_ref[...]).astype(jnp.float32)
    x = x + jnp.dot(pos_oh, _v(vec_ref, lv, "pos_table"),
                    preferred_element_type=jnp.float32)

    # ---- decoder FFT stack (pad frames end exactly 0 => mask_tensor no-op) ----
    x = _fft_stack(x, npc, nonpad_bt, tmod, mat_ref, vec_ref, lm, lv, "dec", B, T)

    # ---- mel_linear (applied after masking, as in the reference) ----
    mel_ref[...] = _mm(x, _v(mat_ref, lm, "mel_w")) + _v(vec_ref, lv, "mel_b")


# ------------------------------ wrappers -------------------------------------
_SINGLE_STEP = pltpu.CompilerParams(dimension_semantics=("arbitrary",))


def _full_spec(shape):
    zeros = (0,) * len(shape)
    return pl.BlockSpec(shape, lambda i: zeros)


def run_encoder(x, nonpad_bt, nonpad_col, mat_blob, vec_blob, lm, lv):
    B, T = nonpad_bt.shape
    kern = functools.partial(encoder_kernel, lm=lm, lv=lv, B=B, T=T)
    args = (x, nonpad_bt, nonpad_col, mat_blob, vec_blob)
    return pl.pallas_call(
        kern,
        out_shape=(jax.ShapeDtypeStruct((B * T, D_MODEL), jnp.float32),
                   jax.ShapeDtypeStruct((1, B * T), jnp.float32)),
        grid=(1,),
        in_specs=[_full_spec(a.shape) for a in args],
        out_specs=(_full_spec((B * T, D_MODEL)), _full_spec((1, B * T))),
        compiler_params=_SINGLE_STEP,
    )(*args)


def run_decoder(x, pos_col, nonpad_bt, nonpad_col, pe_targets, mat_blob, vec_blob,
                lm, lv):
    B, Tm = nonpad_bt.shape
    kern = functools.partial(decoder_kernel, lm=lm, lv=lv, B=B, T=Tm)
    args = (x, pos_col, nonpad_bt, nonpad_col, pe_targets, mat_blob, vec_blob)
    return pl.pallas_call(
        kern,
        out_shape=(jax.ShapeDtypeStruct((B * Tm, NUM_MELS), jnp.float32),
                   jax.ShapeDtypeStruct((2, B * Tm), jnp.float32)),
        grid=(1,),
        in_specs=[_full_spec(a.shape) for a in args],
        out_specs=(_full_spec((B * Tm, NUM_MELS)), _full_spec((2, B * Tm))),
        compiler_params=_SINGLE_STEP,
    )(*args)


# --------------------------- plain-JAX glue -----------------------------------
def length_regulate(x, durations, mel_max_length):
    """LengthRegulator expansion (repeat phoneme i durations[i] times, zero-pad)."""
    B, T, D = x.shape

    def one(xb, db):
        cum = jnp.cumsum(db)
        total = cum[-1]
        frame = jnp.arange(mel_max_length)
        idx = jnp.sum(frame[:, None] >= cum[None, :], axis=1)
        valid = (frame < total).astype(xb.dtype)[:, None]
        idx = jnp.clip(idx, 0, T - 1)
        return xb[idx] * valid

    return jax.vmap(one)(x, durations)


def sinusoid_table(n_pos, d):
    pos = np.arange(n_pos)[:, None].astype(np.float64)
    i = np.arange(d)[None, :]
    angle = pos / np.power(10000.0, 2 * (i // 2) / d)
    table = np.zeros((n_pos, d))
    table[:, 0::2] = np.sin(angle[:, 0::2])
    table[:, 1::2] = np.cos(angle[:, 1::2])
    table[0, :] = 0.0                                     # padding_idx = 0
    return jnp.asarray(table, jnp.float32)


# ----------------------------- parameters ------------------------------------
def pack_blob(entries, dtype, row_mult, width=BLOB_W):
    """Pack named 2-D weights into one lane-dense (rows, 128) blob + layout."""
    pieces, layout, off = [], {}, 0
    for name, arr in entries:
        arr = jnp.asarray(arr, jnp.float32)
        if arr.ndim == 1:
            arr = arr[None, :]
        r, c = arr.shape
        rp = (-r) % row_mult
        pieces.append(jnp.pad(arr, ((0, rp), (0, width - c))))
        layout[name] = (off, r, c)
        off += r + rp
    return jnp.concatenate(pieces, axis=0).astype(dtype), layout


def init_params(key):
    ks = iter(jax.random.split(key, 256))

    def nrm(shape, scale=0.1):
        return scale * jax.random.normal(next(ks), shape, dtype=jnp.float32)

    def fft_entries(prefix, mats, vecs):
        hdk = N_HEAD * D_K
        for l in range(N_LAYERS):
            p = f"{prefix}{l}"
            mats.append((f"{p}_wqkv", nrm((D_MODEL, 3 * hdk))))
            mats.append((f"{p}_wo", nrm((hdk, D_MODEL))))
            for tap in range(FFT_K1):
                mats.append((f"{p}_w1_{tap}", nrm((D_MODEL, D_FFN))))
            mats.append((f"{p}_w2", nrm((D_FFN, D_MODEL))))
            vecs += [(f"{p}_bqkv", jnp.zeros((3 * hdk,), jnp.float32)),
                     (f"{p}_bo", jnp.zeros((D_MODEL,), jnp.float32)),
                     (f"{p}_ln1g", jnp.ones((D_MODEL,), jnp.float32)),
                     (f"{p}_ln1b", jnp.zeros((D_MODEL,), jnp.float32)),
                     (f"{p}_fb1", jnp.zeros((D_FFN,), jnp.float32)),
                     (f"{p}_fb2", jnp.zeros((D_MODEL,), jnp.float32)),
                     (f"{p}_ln2g", jnp.ones((D_MODEL,), jnp.float32)),
                     (f"{p}_ln2b", jnp.zeros((D_MODEL,), jnp.float32))]

    def vp_entries(p, c_in, mats, vecs):
        for tap in range(VP_KERNEL):
            mats.append((f"{p}_w1_{tap}", nrm((c_in, VP_FILTER))))
        for tap in range(VP_KERNEL):
            mats.append((f"{p}_w2_{tap}", nrm((VP_FILTER, VP_FILTER))))
        vecs += [(f"{p}_b1", jnp.zeros((VP_FILTER,), jnp.float32)),
                 (f"{p}_g1", jnp.ones((VP_FILTER,), jnp.float32)),
                 (f"{p}_be1", jnp.zeros((VP_FILTER,), jnp.float32)),
                 (f"{p}_b2", jnp.zeros((VP_FILTER,), jnp.float32)),
                 (f"{p}_g2", jnp.ones((VP_FILTER,), jnp.float32)),
                 (f"{p}_be2", jnp.zeros((VP_FILTER,), jnp.float32)),
                 (f"{p}_wl", nrm((1, VP_FILTER))),        # stored transposed
                 (f"{p}_bl", jnp.zeros((1, 1), jnp.float32))]

    enc_m, enc_v, dec_m, dec_v = [], [], [], []
    fft_entries("enc", enc_m, enc_v)
    vp_entries("dp", D_MODEL, enc_m, enc_v)               # duration predictor
    fft_entries("dec", dec_m, dec_v)
    vp_entries("pp", D_MODEL, dec_m, dec_v)                # pitch predictor
    vp_entries("ep", D_MODEL, dec_m, dec_v)                # energy predictor

    pos_tab = sinusoid_table(MAX_POS, D_MODEL)
    dec_m.append(("mel_w", nrm((D_MODEL, NUM_MELS))))
    dec_v += [("mel_b", jnp.zeros((NUM_MELS,), jnp.float32)),
              ("pos_table", pos_tab),
              ("pitch_emb", nrm((N_BINS, D_MODEL))),
              ("energy_emb", nrm((N_BINS, D_MODEL))),
              ("pitch_bins", jnp.linspace(0.0, 1.0, N_BINS - 1, dtype=jnp.float32)),
              ("energy_bins", jnp.linspace(0.0, 1.0, N_BINS - 1, dtype=jnp.float32))]

    enc_mat, lm_e = pack_blob(enc_m, MXU_DTYPE, row_mult=16)
    enc_vec, lv_e = pack_blob(enc_v, jnp.float32, row_mult=8)
    dec_mat, lm_d = pack_blob(dec_m, MXU_DTYPE, row_mult=16)
    dec_vec, lv_d = pack_blob(dec_v, jnp.float32, row_mult=8)

    word_emb = nrm((VOCAB, D_MODEL)).at[PAD].set(0.0)
    params = dict(src_word_emb=word_emb, pos_table=pos_tab,
                  enc_mat=enc_mat, enc_vec=enc_vec,
                  dec_mat=dec_mat, dec_vec=dec_vec)
    layouts = dict(enc_mat=lm_e, enc_vec=lv_e, dec_mat=lm_d, dec_vec=lv_d)
    return params, layouts


# ------------------------------- forward --------------------------------------
def build_forward(layouts):
    lm_e, lv_e = layouts["enc_mat"], layouts["enc_vec"]
    lm_d, lv_d = layouts["dec_mat"], layouts["dec_vec"]

    @functools.partial(jax.jit, static_argnames=("mel_max_length",))
    def forward(params, src_seq, src_pos, mel_pos, mel_max_length,
                length_target, pitch_target, energy_target):
        """Training-mode forward of FastSpeech2 (self.training == True)."""
        B, T = src_seq.shape
        Tm = mel_max_length

        # -------- Encoder + duration predictor (fused pallas_call #1) --------
        x = params["src_word_emb"][src_seq] + params["pos_table"][src_pos]
        nonpad = (src_seq != PAD).astype(jnp.float32)                  # (B, T)
        enc_out_flat, dur_row = run_encoder(
            x.reshape(B * T, D_MODEL), nonpad, nonpad.reshape(B * T, 1),
            params["enc_mat"], params["enc_vec"], lm_e, lv_e)
        duration_pred = dur_row.reshape(B, T) * nonpad                 # mask PAD

        # -------- Length regulator (plain-JAX gather / expand) --------
        x = length_regulate(enc_out_flat.reshape(B, T, D_MODEL),
                            length_target, Tm)                         # (B, Tm, D)

        # -------- Decoder + variance adaptor + mel_linear (pallas_call #2) ----
        dec_nonpad = (mel_pos != PAD).astype(jnp.float32)               # (B, Tm)
        pe_targets = jnp.stack([pitch_target.reshape(-1),
                                energy_target.reshape(-1)], axis=1)     # (B*Tm, 2)
        mel_flat, pe_rows = run_decoder(
            x.reshape(B * Tm, D_MODEL), mel_pos.reshape(B * Tm, 1),
            dec_nonpad, dec_nonpad.reshape(B * Tm, 1), pe_targets,
            params["dec_mat"], params["dec_vec"], lm_d, lv_d)
        pitch_pred = pe_rows[0].reshape(B, Tm) * dec_nonpad
        energy_pred = pe_rows[1].reshape(B, Tm) * dec_nonpad
        mel = mel_flat.reshape(B, Tm, NUM_MELS)
        return mel, duration_pred, pitch_pred, energy_pred

    return forward


# --------------------------------- main ----------------------------------------
if __name__ == "__main__":
    key = jax.random.PRNGKey(0)
    pkey, dkey = jax.random.split(key)
    params, layouts = init_params(pkey)
    fastspeech2_forward = build_forward(layouts)

    B, T, Tm = 2, 8, 16
    src_seq = jnp.array([[3, 7, 2, 9, 4, 6, 8, 5],
                         [11, 5, 3, 14, 2, 7, 0, 0]], jnp.int32)
    src_pos = jnp.array([[1, 2, 3, 4, 5, 6, 7, 8],
                         [1, 2, 3, 4, 5, 6, 0, 0]], jnp.int32)
    length_target = jnp.array([[2, 2, 2, 2, 2, 2, 2, 2],
                               [3, 3, 2, 2, 2, 2, 0, 0]], jnp.int32)
    mel_len = jnp.sum(length_target, axis=1)                           # [16, 14]
    frame = jnp.arange(Tm)
    mel_pos = jnp.where(frame[None, :] < mel_len[:, None],
                        frame[None, :] + 1, 0).astype(jnp.int32)
    pitch_target = jax.random.uniform(jax.random.fold_in(dkey, 1), (B, Tm), jnp.float32)
    energy_target = jax.random.uniform(jax.random.fold_in(dkey, 2), (B, Tm), jnp.float32)

    mel, dur, pit, ene = fastspeech2_forward(
        params, src_seq, src_pos, mel_pos, mel_max_length=Tm,
        length_target=length_target, pitch_target=pitch_target,
        energy_target=energy_target)
    jax.block_until_ready(mel)
    jax.block_until_ready(dur)
    jax.block_until_ready(pit)
    jax.block_until_ready(ene)

    assert mel.shape == (B, Tm, NUM_MELS)
    assert dur.shape == (B, T)
    assert pit.shape == (B, Tm) and ene.shape == (B, Tm)
    assert bool(jnp.all(jnp.isfinite(mel)))
    assert bool(jnp.all(jnp.isfinite(dur)))
    assert bool(jnp.all(jnp.isfinite(pit)))
    assert bool(jnp.all(jnp.isfinite(ene)))
    print("KERNEL_OK")
</pallas_src>

<mosaic_0001>
module attributes {stable_mosaic.version = 11 : i64} {
  func.func @encoder_kernel(%arg0: i32, %arg1: memref<16x32xf32, #tpu.memory_space<vmem>>, %arg2: memref<2x8xf32, #tpu.memory_space<vmem>>, %arg3: memref<16x1xf32, #tpu.memory_space<vmem>>, %arg4: memref<1024x128xbf16, #tpu.memory_space<vmem>>, %arg5: memref<192x128xf32, #tpu.memory_space<vmem>>, %arg6: memref<16x32xf32, #tpu.memory_space<vmem>>, %arg7: memref<1x16xf32, #tpu.memory_space<vmem>>) attributes {dimension_semantics = [#tpu.dimension_semantics<arbitrary>], iteration_bounds = array<i64: 1>, scalar_prefetch = 0 : i64, scratch_operands = 0 : i64, tpu.core_type = #tpu.core_type<tc>, window_params = [{pipeline_mode = #tpu.pipeline_mode<synchronous>, transform_indices = @transform_0, window_bounds = array<i64: 16, 32>}, {pipeline_mode = #tpu.pipeline_mode<synchronous>, transform_indices = @transform_1, window_bounds = array<i64: 2, 8>}, {pipeline_mode = #tpu.pipeline_mode<synchronous>, transform_indices = @transform_2, window_bounds = array<i64: 16, 1>}, {pipeline_mode = #tpu.pipeline_mode<synchronous>, transform_indices = @transform_3, window_bounds = array<i64: 1024, 128>}, {pipeline_mode = #tpu.pipeline_mode<synchronous>, transform_indices = @transform_4, window_bounds = array<i64: 192, 128>}, {pipeline_mode = #tpu.pipeline_mode<synchronous>, transform_indices = @transform_5, window_bounds = array<i64: 16, 32>}, {pipeline_mode = #tpu.pipeline_mode<synchronous>, transform_indices = @transform_6, window_bounds = array<i64: 1, 16>}]} {
    %c0 = arith.constant 0 : index
    %c0_0 = arith.constant 0 : index
    %0 = vector.load %arg1[%c0, %c0_0] : memref<16x32xf32, #tpu.memory_space<vmem>>, vector<16x32xf32>
    %c0_1 = arith.constant 0 : index
    %c0_2 = arith.constant 0 : index
    %1 = vector.load %arg2[%c0_1, %c0_2] : memref<2x8xf32, #tpu.memory_space<vmem>>, vector<2x8xf32>
    %c0_3 = arith.constant 0 : index
    %c0_4 = arith.constant 0 : index
    %2 = vector.load %arg3[%c0_3, %c0_4] : memref<16x1xf32, #tpu.memory_space<vmem>>, vector<16x1xf32>
    %3 = tpu.iota {dimensions = array<i32: 0>} : vector<16x1xi32>
    %c8_i32 = arith.constant 8 : i32
    %c0_i32 = arith.constant 0 : i32
    %4 = arith.cmpi eq, %c8_i32, %c0_i32 : i32
    %c1_i32 = arith.constant 1 : i32
    %5 = arith.select %4, %c1_i32, %c8_i32 : i32
    %6 = vector.broadcast %5 : i32 to vector<16x1xi32>
    %7 = arith.remsi %3, %6 : vector<16x1xi32>
    %c0_i32_5 = arith.constant 0 : i32
    %8 = vector.broadcast %c0_i32_5 : i32 to vector<16x1xi32>
    %9 = arith.cmpi ne, %7, %8 : vector<16x1xi32>
    %c0_i32_6 = arith.constant 0 : i32
    %10 = vector.broadcast %c0_i32_6 : i32 to vector<16x1xi32>
    %11 = arith.cmpi slt, %7, %10 : vector<16x1xi32>
    %c0_i32_7 = arith.constant 0 : i32
    %12 = arith.cmpi slt, %5, %c0_i32_7 : i32
    %13 = vector.broadcast %12 : i1 to vector<16x1xi1>
    %14 = vector.broadcast %13 : vector<16x1xi1> to vector<16x1xi1>
    %15 = arith.xori %11, %14 : vector<16x1xi1>
    %16 = arith.andi %15, %9 : vector<16x1xi1>
    %17 = vector.broadcast %5 : i32 to vector<16x1xi32>
    %18 = arith.addi %7, %17 : vector<16x1xi32>
    %19 = arith.select %16, %18, %7 : vector<16x1xi1>, vector<16x1xi32>
    %c0_8 = arith.constant 0 : index
    %c0_9 = arith.constant 0 : index
    %20 = vector.load %arg4[%c0_8, %c0_9] : memref<1024x128xbf16, #tpu.memory_space<vmem>>, vector<32x96xbf16>
    %21 = arith.truncf %0 : vector<16x32xf32> to vector<16x32xbf16>
    %cst = arith.constant dense<0.000000e+00> : vector<16x96xf32>
    %22 = tpu.matmul %21, %20, %cst {dimension_numbers = #tpu.dot_dimension_numbers<[1], [0], [0], [1], [0, 0, 1, 1], [], []>} : vector<16x32xbf16>, vector<32x96xbf16>, vector<16x96xf32> -> vector<16x96xf32>
    %c0_10 = arith.constant 0 : index
    %c0_11 = arith.constant 0 : index
    %23 = vector.load %arg5[%c0_10, %c0_11] : memref<192x128xf32, #tpu.memory_space<vmem>>, vector<1x96xf32>
    %24 = vector.broadcast %23 : vector<1x96xf32> to vector<16x96xf32>
    %25 = arith.addf %22, %24 : vector<16x96xf32>
    %26 = vector.extract_strided_slice %25 {offsets = [0, 0], sizes = [8, 96], strides = [1, 1]} : vector<16x96xf32> to vector<8x96xf32>
    %27 = vector.extract_strided_slice %1 {offsets = [0, 0], sizes = [1, 8], strides = [1, 1]} : vector<2x8xf32> to vector<1x8xf32>
    %28 = vector.extract_strided_slice %26 {offsets = [0, 0], sizes = [8, 16], strides = [1, 1]} : vector<8x96xf32> to vector<8x16xf32>
    %29 = vector.extract_strided_slice %26 {offsets = [0, 32], sizes = [8, 16], strides = [1, 1]} : vector<8x96xf32> to vector<8x16xf32>
    %30 = vector.extract_strided_slice %26 {offsets = [0, 64], sizes = [8, 16], strides = [1, 1]} : vector<8x96xf32> to vector<8x16xf32>
    %31 = arith.truncf %28 : vector<8x16xf32> to vector<8x16xbf16>
    %32 = arith.truncf %29 : vector<8x16xf32> to vector<8x16xbf16>
    %cst_12 = arith.constant dense<0.000000e+00> : vector<8x8xf32>
    %33 = tpu.matmul %31, %32, %cst_12 {dimension_numbers = #tpu.dot_dimension_numbers<[1], [1], [0], [0], [0, 0, 1, 0], [], []>} : vector<8x16xbf16>, vector<8x16xbf16>, vector<8x8xf32> -> vector<8x8xf32>
    %cst_13 = arith.constant 2.500000e-01 : f32
    %34 = vector.broadcast %cst_13 : f32 to vector<8x8xf32>
    %35 = arith.mulf %33, %34 : vector<8x8xf32>
    %cst_14 = arith.constant 5.000000e-01 : f32
    %36 = vector.broadcast %cst_14 : f32 to vector<1x8xf32>
    %37 = arith.cmpf ogt, %27, %36 : vector<1x8xf32>
    %cst_15 = arith.constant -1.000000e+09 : f32
    %38 = vector.shape_cast %37 : vector<1x8xi1> to vector<1x8xi1>
    %39 = vector.broadcast %38 : vector<1x8xi1> to vector<8x8xi1>
    %40 = vector.broadcast %cst_15 : f32 to vector<8x8xf32>
    %41 = arith.select %39, %35, %40 : vector<8x8xi1>, vector<8x8xf32>
    %cst_16 = arith.constant dense<0xFF800000> : vector<8xf32>
    %42 = vector.multi_reduction <maximumf>, %41, %cst_16 [1] : vector<8x8xf32> to vector<8xf32>
    %cst_17 = arith.constant 0xFF800000 : f32
    %43 = vector.broadcast %cst_17 : f32 to vector<8xf32>
    %44 = arith.maximumf %43, %42 : vector<8xf32>
    %45 = vector.shape_cast %44 : vector<8xf32> to vector<8x1xf32>
    %46 = vector.broadcast %45 : vector<8x1xf32> to vector<8x8xf32>
    %47 = arith.subf %41, %46 : vector<8x8xf32>
    %48 = math.exp %47 : vector<8x8xf32>
    %cst_18 = arith.constant dense<0.000000e+00> : vector<8xf32>
    %49 = vector.multi_reduction <add>, %48, %cst_18 [1] : vector<8x8xf32> to vector<8xf32>
    %50 = vector.shape_cast %49 : vector<8xf32> to vector<8x1xf32>
    %51 = vector.broadcast %50 : vector<8x1xf32> to vector<8x8xf32>
    %52 = arith.divf %48, %51 : vector<8x8xf32>
    %53 = arith.truncf %52 : vector<8x8xf32> to vector<8x8xbf16>
    %54 = arith.truncf %30 : vector<8x16xf32> to vector<8x16xbf16>
    %cst_19 = arith.constant dense<0.000000e+00> : vector<8x16xf32>
    %55 = tpu.matmul %53, %54, %cst_19 {dimension_numbers = #tpu.dot_dimension_numbers<[1], [0], [0], [1], [0, 0, 1, 1], [], []>} : vector<8x8xbf16>, vector<8x16xbf16>, vector<8x16xf32> -> vector<8x16xf32>
    %56 = vector.extract_strided_slice %26 {offsets = [0, 16], sizes = [8, 16], strides = [1, 1]} : vector<8x96xf32> to vector<8x16xf32>
    %57 = vector.extract_strided_slice %26 {offsets = [0, 48], sizes = [8, 16], strides = [1, 1]} : vector<8x96xf32> to vector<8x16xf32>
    %58 = vector.extract_strided_slice %26 {offsets = [0, 80], sizes = [8, 16], strides = [1, 1]} : vector<8x96xf32> to vector<8x16xf32>
    %59 = arith.truncf %56 : vector<8x16xf32> to vector<8x16xbf16>
    %60 = arith.truncf %57 : vector<8x16xf32> to vector<8x16xbf16>
    %cst_20 = arith.constant dense<0.000000e+00> : vector<8x8xf32>
    %61 = tpu.matmul %59, %60, %cst_20 {dimension_numbers = #tpu.dot_dimension_numbers<[1], [1], [0], [0], [0, 0, 1, 0], [], []>} : vector<8x16xbf16>, vector<8x16xbf16>, vector<8x8xf32> -> vector<8x8xf32>
    %cst_21 = arith.constant 2.500000e-01 : f32
    %62 = vector.broadcast %cst_21 : f32 to vector<8x8xf32>
    %63 = arith.mulf %61, %62 : vector<8x8xf32>
    %cst_22 = arith.constant 5.000000e-01 : f32
    %64 = vector.broadcast %cst_22 : f32 to vector<1x8xf32>
    %65 = arith.cmpf ogt, %27, %64 : vector<1x8xf32>
    %cst_23 = arith.constant -1.000000e+09 : f32
    %66 = vector.shape_cast %65 : vector<1x8xi1> to vector<1x8xi1>
    %67 = vector.broadcast %66 : vector<1x8xi1> to vector<8x8xi1>
    %68 = vector.broadcast %cst_23 : f32 to vector<8x8xf32>
    %69 = arith.select %67, %63, %68 : vector<8x8xi1>, vector<8x8xf32>
    %cst_24 = arith.constant dense<0xFF800000> : vector<8xf32>
    %70 = vector.multi_reduction <maximumf>, %69, %cst_24 [1] : vector<8x8xf32> to vector<8xf32>
    %cst_25 = arith.constant 0xFF800000 : f32
    %71 = vector.broadcast %cst_25 : f32 to vector<8xf32>
    %72 = arith.maximumf %71, %70 : vector<8xf32>
    %73 = vector.shape_cast %72 : vector<8xf32> to vector<8x1xf32>
    %74 = vector.broadcast %73 : vector<8x1xf32> to vector<8x8xf32>
    %75 = arith.subf %69, %74 : vector<8x8xf32>
    %76 = math.exp %75 : vector<8x8xf32>
    %cst_26 = arith.constant dense<0.000000e+00> : vector<8xf32>
    %77 = vector.multi_reduction <add>, %76, %cst_26 [1] : vector<8x8xf32> to vector<8xf32>
    %78 = vector.shape_cast %77 : vector<8xf32> to vector<8x1xf32>
    %79 = vector.broadcast %78 : vector<8x1xf32> to vector<8x8xf32>
    %80 = arith.divf %76, %79 : vector<8x8xf32>
    %81 = arith.truncf %80 : vector<8x8xf32> to vector<8x8xbf16>
    %82 = arith.truncf %58 : vector<8x16xf32> to vector<8x16xbf16>
    %cst_27 = arith.constant dense<0.000000e+00> : vector<8x16xf32>
    %83 = tpu.matmul %81, %82, %cst_27 {dimension_numbers = #tpu.dot_dimension_numbers<[1], [0], [0], [1], [0, 0, 1, 1], [], []>} : vector<8x8xbf16>, vector<8x16xbf16>, vector<8x16xf32> -> vector<8x16xf32>
    %84 = tpu.concatenate %55, %83 in 1 : vector<8x16xf32>, vector<8x16xf32> -> vector<8x32xf32>
    %85 = vector.extract_strided_slice %25 {offsets = [8, 0], sizes = [8, 96], strides = [1, 1]} : vector<16x96xf32> to vector<8x96xf32>
    %86 = vector.extract_strided_slice %1 {offsets = [1, 0], sizes = [1, 8], strides = [1, 1]} : vector<2x8xf32> to vector<1x8xf32>
    %87 = vector.extract_strided_slice %85 {offsets = [0, 0], sizes = [8, 16], strides = [1, 1]} : vector<8x96xf32> to vector<8x16xf32>
    %88 = vector.extract_strided_slice %85 {offsets = [0, 32], sizes = [8, 16], strides = [1, 1]} : vector<8x96xf32> to vector<8x16xf32>
    %89 = vector.extract_strided_slice %85 {offsets = [0, 64], sizes = [8, 16], strides = [1, 1]} : vector<8x96xf32> to vector<8x16xf32>
    %90 = arith.truncf %87 : vector<8x16xf32> to vector<8x16xbf16>
    %91 = arith.truncf %88 : vector<8x16xf32> to vector<8x16xbf16>
    %cst_28 = arith.constant dense<0.000000e+00> : vector<8x8xf32>
    %92 = tpu.matmul %90, %91, %cst_28 {dimension_numbers = #tpu.dot_dimension_numbers<[1], [1], [0], [0], [0, 0, 1, 0], [], []>} : vector<8x16xbf16>, vector<8x16xbf16>, vector<8x8xf32> -> vector<8x8xf32>
    %cst_29 = arith.constant 2.500000e-01 : f32
    %93 = vector.broadcast %cst_29 : f32 to vector<8x8xf32>
    %94 = arith.mulf %92, %93 : vector<8x8xf32>
    %cst_30 = arith.constant 5.000000e-01 : f32
    %95 = vector.broadcast %cst_30 : f32 to vector<1x8xf32>
    %96 = arith.cmpf ogt, %86, %95 : vector<1x8xf32>
    %cst_31 = arith.constant -1.000000e+09 : f32
    %97 = vector.shape_cast %96 : vector<1x8xi1> to vector<1x8xi1>
    %98 = vector.broadcast %97 : vector<1x8xi1> to vector<8x8xi1>
    %99 = vector.broadcast %cst_31 : f32 to vector<8x8xf32>
    %100 = arith.select %98, %94, %99 : vector<8x8xi1>, vector<8x8xf32>
    %cst_32 = arith.constant dense<0xFF800000> : vector<8xf32>
    %101 = vector.multi_reduction <maximumf>, %100, %cst_32 [1] : vector<8x8xf32> to vector<8xf32>
    %cst_33 = arith.constant 0xFF800000 : f32
    %102 = vector.broadcast %cst_33 : f32 to vector<8xf32>
    %103 = arith.maximumf %102, %101 : vector<8xf32>
    %104 = vector.shape_cast %103 : vector<8xf32> to vector<8x1xf32>
    %105 = vector.broadcast %104 : vector<8x1xf32> to vector<8x8xf32>
    %106 = arith.subf %100, %105 : vector<8x8xf32>
    %107 = math.exp %106 : vector<8x8xf32>
    %cst_34 = arith.constant dense<0.000000e+00> : vector<8xf32>
    %108 = vector.multi_reduction <add>, %107, %cst_34 [1] : vector<8x8xf32> to vector<8xf32>
    %109 = vector.shape_cast %108 : vector<8xf32> to vector<8x1xf32>
    %110 = vector.broadcast %109 : vector<8x1xf32> to vector<8x8xf32>
    %111 = arith.divf %107, %110 : vector<8x8xf32>
    %112 = arith.truncf %111 : vector<8x8xf32> to vector<8x8xbf16>
    %113 = arith.truncf %89 : vector<8x16xf32> to vector<8x16xbf16>
    %cst_35 = arith.constant dense<0.000000e+00> : vector<8x16xf32>
    %114 = tpu.matmul %112, %113, %cst_35 {dimension_numbers = #tpu.dot_dimension_numbers<[1], [0], [0], [1], [0, 0, 1, 1], [], []>} : vector<8x8xbf16>, vector<8x16xbf16>, vector<8x16xf32> -> vector<8x16xf32>
    %115 = vector.extract_strided_slice %85 {offsets = [0, 16], sizes = [8, 16], strides = [1, 1]} : vector<8x96xf32> to vector<8x16xf32>
    %116 = vector.extract_strided_slice %85 {offsets = [0, 48], sizes = [8, 16], strides = [1, 1]} : vector<8x96xf32> to vector<8x16xf32>
    %117 = vector.extract_strided_slice %85 {offsets = [0, 80], sizes = [8, 16], strides = [1, 1]} : vector<8x96xf32> to vector<8x16xf32>
    %118 = arith.truncf %115 : vector<8x16xf32> to vector<8x16xbf16>
    %119 = arith.truncf %116 : vector<8x16xf32> to vector<8x16xbf16>
    %cst_36 = arith.constant dense<0.000000e+00> : vector<8x8xf32>
    %120 = tpu.matmul %118, %119, %cst_36 {dimension_numbers = #tpu.dot_dimension_numbers<[1], [1], [0], [0], [0, 0, 1, 0], [], []>} : vector<8x16xbf16>, vector<8x16xbf16>, vector<8x8xf32> -> vector<8x8xf32>
    %cst_37 = arith.constant 2.500000e-01 : f32
    %121 = vector.broadcast %cst_37 : f32 to vector<8x8xf32>
    %122 = arith.mulf %120, %121 : vector<8x8xf32>
    %cst_38 = arith.constant 5.000000e-01 : f32
    %123 = vector.broadcast %cst_38 : f32 to vector<1x8xf32>
    %124 = arith.cmpf ogt, %86, %123 : vector<1x8xf32>
    %cst_39 = arith.constant -1.000000e+09 : f32
    %125 = vector.shape_cast %124 : vector<1x8xi1> to vector<1x8xi1>
    %126 = vector.broadcast %125 : vector<1x8xi1> to vector<8x8xi1>
    %127 = vector.broadcast %cst_39 : f32 to vector<8x8xf32>
    %128 = arith.select %126, %122, %127 : vector<8x8xi1>, vector<8x8xf32>
    %cst_40 = arith.constant dense<0xFF800000> : vector<8xf32>
    %129 = vector.multi_reduction <maximumf>, %128, %cst_40 [1] : vector<8x8xf32> to vector<8xf32>
    %cst_41 = arith.constant 0xFF800000 : f32
    %130 = vector.broadcast %cst_41 : f32 to vector<8xf32>
    %131 = arith.maximumf %130, %129 : vector<8xf32>
    %132 = vector.shape_cast %131 : vector<8xf32> to vector<8x1xf32>
    %133 = vector.broadcast %132 : vector<8x1xf32> to vector<8x8xf32>
    %134 = arith.subf %128, %133 : vector<8x8xf32>
    %135 = math.exp %134 : vector<8x8xf32>
    %cst_42 = arith.constant dense<0.000000e+00> : vector<8xf32>
    %136 = vector.multi_reduction <add>, %135, %cst_42 [1] : vector<8x8xf32> to vector<8xf32>
    %137 = vector.shape_cast %136 : vector<8xf32> to vector<8x1xf32>
    %138 = vector.broadcast %137 : vector<8x1xf32> to vector<8x8xf32>
    %139 = arith.divf %135, %138 : vector<8x8xf32>
    %140 = arith.truncf %139 : vector<8x8xf32> to vector<8x8xbf16>
    %141 = arith.truncf %117 : vector<8x16xf32> to vector<8x16xbf16>
    %cst_43 = arith.constant dense<0.000000e+00> : vector<8x16xf32>
    %142 = tpu.matmul %140, %141, %cst_43 {dimension_numbers = #tpu.dot_dimension_numbers<[1], [0], [0], [1], [0, 0, 1, 1], [], []>} : vector<8x8xbf16>, vector<8x16xbf16>, vector<8x16xf32> -> vector<8x16xf32>
    %143 = tpu.concatenate %114, %142 in 1 : vector<8x16xf32>, vector<8x16xf32> -> vector<8x32xf32>
    %144 = tpu.concatenate %84, %143 in 0 : vector<8x32xf32>, vector<8x32xf32> -> vector<16x32xf32>
    %c32 = arith.constant 32 : index
    %c0_44 = arith.constant 0 : index
    %145 = vector.load %arg4[%c32, %c0_44] : memref<1024x128xbf16, #tpu.memory_space<vmem>>, vector<32x32xbf16>
    %146 = arith.truncf %144 : vector<16x32xf32> to vector<16x32xbf16>
    %cst_45 = arith.constant dense<0.000000e+00> : vector<16x32xf32>
    %147 = tpu.matmul %146, %145, %cst_45 {dimension_numbers = #tpu.dot_dimension_numbers<[1], [0], [0], [1], [0, 0, 1, 1], [], []>} : vector<16x32xbf16>, vector<32x32xbf16>, vector<16x32xf32> -> vector<16x32xf32>
    %c8 = arith.constant 8 : index
    %c0_46 = arith.constant 0 : index
    %148 = vector.load %arg5[%c8, %c0_46] : memref<192x128xf32, #tpu.memory_space<vmem>>, vector<1x32xf32>
    %149 = vector.broadcast %148 : vector<1x32xf32> to vector<16x32xf32>
    %150 = arith.addf %147, %149 : vector<16x32xf32>
    %151 = arith.addf %150, %0 : vector<16x32xf32>
    %c16 = arith.constant 16 : index
    %c0_47 = arith.constant 0 : index
    %152 = vector.load %arg5[%c16, %c0_47] : memref<192x128xf32, #tpu.memory_space<vmem>>, vector<1x32xf32>
    %c24 = arith.constant 24 : index
    %c0_48 = arith.constant 0 : index
    %153 = vector.load %arg5[%c24, %c0_48] : memref<192x128xf32, #tpu.memory_space<vmem>>, vector<1x32xf32>
    %cst_49 = arith.constant dense<0.000000e+00> : vector<16xf32>
    %154 = vector.multi_reduction <add>, %151, %cst_49 [1] : vector<16x32xf32> to vector<16xf32>
    %155 = vector.shape_cast %154 : vector<16xf32> to vector<16x1xf32>
    %cst_50 = arith.constant 3.200000e+01 : f32
    %156 = vector.broadcast %cst_50 : f32 to vector<16x1xf32>
    %157 = arith.divf %155, %156 : vector<16x1xf32>
    %158 = vector.broadcast %157 : vector<16x1xf32> to vector<16x32xf32>
    %159 = arith.subf %151, %158 : vector<16x32xf32>
    %160 = arith.mulf %159, %159 : vector<16x32xf32>
    %cst_51 = arith.constant dense<0.000000e+00> : vector<16xf32>
    %161 = vector.multi_reduction <add>, %160, %cst_51 [1] : vector<16x32xf32> to vector<16xf32>
    %162 = vector.shape_cast %161 : vector<16xf32> to vector<16x1xf32>
    %cst_52 = arith.constant 3.200000e+01 : f32
    %163 = vector.broadcast %cst_52 : f32 to vector<16x1xf32>
    %164 = arith.divf %162, %163 : vector<16x1xf32>
    %165 = vector.broadcast %157 : vector<16x1xf32> to vector<16x32xf32>
    %166 = arith.subf %151, %165 : vector<16x32xf32>
    %cst_53 = arith.constant 9.99999974E-6 : f32
    %167 = vector.broadcast %cst_53 : f32 to vector<16x1xf32>
    %168 = arith.addf %164, %167 : vector<16x1xf32>
    %169 = math.rsqrt %168 : vector<16x1xf32>
    %170 = vector.broadcast %169 : vector<16x1xf32> to vector<16x32xf32>
    %171 = arith.mulf %166, %170 : vector<16x32xf32>
    %172 = vector.broadcast %152 : vector<1x32xf32> to vector<16x32xf32>
    %173 = arith.mulf %171, %172 : vector<16x32xf32>
    %174 = vector.broadcast %153 : vector<1x32xf32> to vector<16x32xf32>
    %175 = arith.addf %173, %174 : vector<16x32xf32>
    %176 = vector.broadcast %2 : vector<16x1xf32> to vector<16x32xf32>
    %177 = arith.mulf %175, %176 : vector<16x32xf32>
    %cst_54 = arith.constant 0.000000e+00 : f32
    %178 = vector.broadcast %cst_54 : f32 to vector<4x32xf32>
    %179 = vector.extract_strided_slice %177 {offsets = [0, 0], sizes = [12, 32], strides = [1, 1]} : vector<16x32xf32> to vector<12x32xf32>
    %180 = tpu.concatenate %178, %179 in 0 : vector<4x32xf32>, vector<12x32xf32> -> vector<16x32xf32>
    %c-4_i32 = arith.constant -4 : i32
    %181 = vector.broadcast %c-4_i32 : i32 to vector<16x1xi32>
    %182 = arith.addi %19, %181 : vector<16x1xi32>
    %c0_i32_55 = arith.constant 0 : i32
    %183 = vector.broadcast %c0_i32_55 : i32 to vector<16x1xi32>
    %184 = arith.cmpi sge, %182, %183 : vector<16x1xi32>
    %c-4_i32_56 = arith.constant -4 : i32
    %185 = vector.broadcast %c-4_i32_56 : i32 to vector<16x1xi32>
    %186 = arith.addi %19, %185 : vector<16x1xi32>
    %c8_i32_57 = arith.constant 8 : i32
    %187 = vector.broadcast %c8_i32_57 : i32 to vector<16x1xi32>
    %188 = arith.cmpi slt, %186, %187 : vector<16x1xi32>
    %189 = arith.andi %184, %188 : vector<16x1xi1>
    %cst_58 = arith.constant 0.000000e+00 : f32
    %190 = vector.shape_cast %189 : vector<16x1xi1> to vector<16x1xi1>
    %191 = vector.broadcast %190 : vector<16x1xi1> to vector<16x32xi1>
    %192 = vector.broadcast %cst_58 : f32 to vector<16x32xf32>
    %193 = arith.select %191, %180, %192 : vector<16x32xi1>, vector<16x32xf32>
    %c64 = arith.constant 64 : index
    %c0_59 = arith.constant 0 : index
    %194 = vector.load %arg4[%c64, %c0_59] : memref<1024x128xbf16, #tpu.memory_space<vmem>>, vector<32x64xbf16>
    %195 = arith.truncf %193 : vector<16x32xf32> to vector<16x32xbf16>
    %cst_60 = arith.constant dense<0.000000e+00> : vector<16x64xf32>
    %196 = tpu.matmul %195, %194, %cst_60 {dimension_numbers = #tpu.dot_dimension_numbers<[1], [0], [0], [1], [0, 0, 1, 1], [], []>} : vector<16x32xbf16>, vector<32x64xbf16>, vector<16x64xf32> -> vector<16x64xf32>
    %cst_61 = arith.constant 0.000000e+00 : f32
    %197 = vector.broadcast %cst_61 : f32 to vector<3x32xf32>
    %198 = vector.extract_strided_slice %177 {offsets = [0, 0], sizes = [13, 32], strides = [1, 1]} : vector<16x32xf32> to vector<13x32xf32>
    %199 = tpu.concatenate %197, %198 in 0 : vector<3x32xf32>, vector<13x32xf32> -> vector<16x32xf32>
    %c-3_i32 = arith.constant -3 : i32
    %200 = vector.broadcast %c-3_i32 : i32 to vector<16x1xi32>
    %201 = arith.addi %19, %200 : vector<16x1xi32>
    %c0_i32_62 = arith.constant 0 : i32
    %202 = vector.broadcast %c0_i32_62 : i32 to vector<16x1xi32>
    %203 = arith.cmpi sge, %201, %202 : vector<16x1xi32>
    %c-3_i32_63 = arith.constant -3 : i32
    %204 = vector.broadcast %c-3_i32_63 : i32 to vector<16x1xi32>
    %205 = arith.addi %19, %204 : vector<16x1xi32>
    %c8_i32_64 = arith.constant 8 : i32
    %206 = vector.broadcast %c8_i32_64 : i32 to vector<16x1xi32>
    %207 = arith.cmpi slt, %205, %206 : vector<16x1xi32>
    %208 = arith.andi %203, %207 : vector<16x1xi1>
    %cst_65 = arith.constant 0.000000e+00 : f32
    %209 = vector.shape_cast %208 : vector<16x1xi1> to vector<16x1xi1>
    %210 = vector.broadcast %209 : vector<16x1xi1> to vector<16x32xi1>
    %211 = vector.broadcast %cst_65 : f32 to vector<16x32xf32>
    %212 = arith.select %210, %199, %211 : vector<16x32xi1>, vector<16x32xf32>
    %c96 = arith.constant 96 : index
    %c0_66 = arith.constant 0 : index
    %213 = vector.load %arg4[%c96, %c0_66] : memref<1024x128xbf16, #tpu.memory_space<vmem>>, vector<32x64xbf16>
    %214 = arith.truncf %212 : vector<16x32xf32> to vector<16x32xbf16>
    %cst_67 = arith.constant dense<0.000000e+00> : vector<16x64xf32>
    %215 = tpu.matmul %214, %213, %cst_67 {dimension_numbers = #tpu.dot_dimension_numbers<[1], [0], [0], [1], [0, 0, 1, 1], [], []>} : vector<16x32xbf16>, vector<32x64xbf16>, vector<16x64xf32> -> vector<16x64xf32>
    %216 = arith.addf %196, %215 : vector<16x64xf32>
    %cst_68 = arith.constant 0.000000e+00 : f32
    %217 = vector.broadcast %cst_68 : f32 to vector<2x32xf32>
    %218 = vector.extract_strided_slice %177 {offsets = [0, 0], sizes = [14, 32], strides = [1, 1]} : vector<16x32xf32> to vector<14x32xf32>
    %219 = tpu.concatenate %217, %218 in 0 : vector<2x32xf32>, vector<14x32xf32> -> vector<16x32xf32>
    %c-2_i32 = arith.constant -2 : i32
    %220 = vector.broadcast %c-2_i32 : i32 to vector<16x1xi32>
    %221 = arith.addi %19, %220 : vector<16x1xi32>
    %c0_i32_69 = arith.constant 0 : i32
    %222 = vector.broadcast %c0_i32_69 : i32 to vector<16x1xi32>
    %223 = arith.cmpi sge, %221, %222 : vector<16x1xi32>
    %c-2_i32_70 = arith.constant -2 : i32
    %224 = vector.broadcast %c-2_i32_70 : i32 to vector<16x1xi32>
    %225 = arith.addi %19, %224 : vector<16x1xi32>
    %c8_i32_71 = arith.constant 8 : i32
    %226 = vector.broadcast %c8_i32_71 : i32 to vector<16x1xi32>
    %227 = arith.cmpi slt, %225, %226 : vector<16x1xi32>
    %228 = arith.andi %223, %227 : vector<16x1xi1>
    %cst_72 = arith.constant 0.000000e+00 : f32
    %229 = vector.shape_cast %228 : vector<16x1xi1> to vector<16x1xi1>
    %230 = vector.broadcast %229 : vector<16x1xi1> to vector<16x32xi1>
    %231 = vector.broadcast %cst_72 : f32 to vector<16x32xf32>
    %232 = arith.select %230, %219, %231 : vector<16x32xi1>, vector<16x32xf32>
    %c128 = arith.constant 128 : index
    %c0_73 = arith.constant 0 : index
    %233 = vector.load %arg4[%c128, %c0_73] : memref<1024x128xbf16, #tpu.memory_space<vmem>>, vector<32x64xbf16>
    %234 = arith.truncf %232 : vector<16x32xf32> to vector<16x32xbf16>
    %cst_74 = arith.constant dense<0.000000e+00> : vector<16x64xf32>
    %235 = tpu.matmul %234, %233, %cst_74 {dimension_numbers = #tpu.dot_dimension_numbers<[1], [0], [0], [1], [0, 0, 1, 1], [], []>} : vector<16x32xbf16>, vector<32x64xbf16>, vector<16x64xf32> -> vector<16x64xf32>
    %236 = arith.addf %216, %235 : vector<16x64xf32>
    %cst_75 = arith.constant 0.000000e+00 : f32
    %237 = vector.broadcast %cst_75 : f32 to vector<1x32xf32>
    %238 = vector.extract_strided_slice %177 {offsets = [0, 0], sizes = [15, 32], strides = [1, 1]} : vector<16x32xf32> to vector<15x32xf32>
    %239 = tpu.concatenate %237, %238 in 0 : vector<1x32xf32>, vector<15x32xf32> -> vector<16x32xf32>
    %c-1_i32 = arith.constant -1 : i32
    %240 = vector.broadcast %c-1_i32 : i32 to vector<16x1xi32>
    %241 = arith.addi %19, %240 : vector<16x1xi32>
    %c0_i32_76 = arith.constant 0 : i32
    %242 = vector.broadcast %c0_i32_76 : i32 to vector<16x1xi32>
    %243 = arith.cmpi sge, %241, %242 : vector<16x1xi32>
    %c-1_i32_77 = arith.constant -1 : i32
    %244 = vector.broadcast %c-1_i32_77 : i32 to vector<16x1xi32>
    %245 = arith.addi %19, %244 : vector<16x1xi32>
    %c8_i32_78 = arith.constant 8 : i32
    %246 = vector.broadcast %c8_i32_78 : i32 to vector<16x1xi32>
    %247 = arith.cmpi slt, %245, %246 : vector<16x1xi32>
    %248 = arith.andi %243, %247 : vector<16x1xi1>
    %cst_79 = arith.constant 0.000000e+00 : f32
    %249 = vector.shape_cast %248 : vector<16x1xi1> to vector<16x1xi1>
    %250 = vector.broadcast %249 : vector<16x1xi1> to vector<16x32xi1>
    %251 = vector.broadcast %cst_79 : f32 to vector<16x32xf32>
    %252 = arith.select %250, %239, %251 : vector<16x32xi1>, vector<16x32xf32>
    %c160 = arith.constant 160 : index
    %c0_80 = arith.constant 0 : index
    %253 = vector.load %arg4[%c160, %c0_80] : memref<1024x128xbf16, #tpu.memory_space<vmem>>, vector<32x64xbf16>
    %254 = arith.truncf %252 : vector<16x32xf32> to vector<16x32xbf16>
    %cst_81 = arith.constant dense<0.000000e+00> : vector<16x64xf32>
    %255 = tpu.matmul %254, %253, %cst_81 {dimension_numbers = #tpu.dot_dimension_numbers<[1], [0], [0], [1], [0, 0, 1, 1], [], []>} : vector<16x32xbf16>, vector<32x64xbf16>, vector<16x64xf32> -> vector<16x64xf32>
    %256 = arith.addf %236, %255 : vector<16x64xf32>
    %c192 = arith.constant 192 : index
    %c0_82 = arith.constant 0 : index
    %257 = vector.load %arg4[%c192, %c0_82] : memref<1024x128xbf16, #tpu.memory_space<vmem>>, vector<32x64xbf16>
    %258 = arith.truncf %177 : vector<16x32xf32> to vector<16x32xbf16>
    %cst_83 = arith.constant dense<0.000000e+00> : vector<16x64xf32>
    %259 = tpu.matmul %258, %257, %cst_83 {dimension_numbers = #tpu.dot_dimension_numbers<[1], [0], [0], [1], [0, 0, 1, 1], [], []>} : vector<16x32xbf16>, vector<32x64xbf16>, vector<16x64xf32> -> vector<16x64xf32>
    %260 = arith.addf %256, %259 : vector<16x64xf32>
    %cst_84 = arith.constant 0.000000e+00 : f32
    %261 = vector.broadcast %cst_84 : f32 to vector<1x32xf32>
    %262 = vector.extract_strided_slice %177 {offsets = [1, 0], sizes = [15, 32], strides = [1, 1]} : vector<16x32xf32> to vector<15x32xf32>
    %263 = tpu.concatenate %262, %261 in 0 : vector<15x32xf32>, vector<1x32xf32> -> vector<16x32xf32>
    %c1_i32_85 = arith.constant 1 : i32
    %264 = vector.broadcast %c1_i32_85 : i32 to vector<16x1xi32>
    %265 = arith.addi %19, %264 : vector<16x1xi32>
    %c0_i32_86 = arith.constant 0 : i32
    %266 = vector.broadcast %c0_i32_86 : i32 to vector<16x1xi32>
    %267 = arith.cmpi sge, %265, %266 : vector<16x1xi32>
    %c1_i32_87 = arith.constant 1 : i32
    %268 = vector.broadcast %c1_i32_87 : i32 to vector<16x1xi32>
    %269 = arith.addi %19, %268 : vector<16x1xi32>
    %c8_i32_88 = arith.constant 8 : i32
    %270 = vector.broadcast %c8_i32_88 : i32 to vector<16x1xi32>
    %271 = arith.cmpi slt, %269, %270 : vector<16x1xi32>
    %272 = arith.andi %267, %271 : vector<16x1xi1>
    %cst_89 = arith.constant 0.000000e+00 : f32
    %273 = vector.shape_cast %272 : vector<16x1xi1> to vector<16x1xi1>
    %274 = vector.broadcast %273 : vector<16x1xi1> to vector<16x32xi1>
    %275 = vector.broadcast %cst_89 : f32 to vector<16x32xf32>
    %276 = arith.select %274, %263, %275 : vector<16x32xi1>, vector<16x32xf32>
    %c224 = arith.constant 224 : index
    %c0_90 = arith.constant 0 : index
    %277 = vector.load %arg4[%c224, %c0_90] : memref<1024x128xbf16, #tpu.memory_space<vmem>>, vector<32x64xbf16>
    %278 = arith.truncf %276 : vector<16x32xf32> to vector<16x32xbf16>
    %cst_91 = arith.constant dense<0.000000e+00> : vector<16x64xf32>
    %279 = tpu.matmul %278, %277, %cst_91 {dimension_numbers = #tpu.dot_dimension_numbers<[1], [0], [0], [1], [0, 0, 1, 1], [], []>} : vector<16x32xbf16>, vector<32x64xbf16>, vector<16x64xf32> -> vector<16x64xf32>
    %280 = arith.addf %260, %279 : vector<16x64xf32>
    %cst_92 = arith.constant 0.000000e+00 : f32
    %281 = vector.broadcast %cst_92 : f32 to vector<2x32xf32>
    %282 = vector.extract_strided_slice %177 {offsets = [2, 0], sizes = [14, 32], strides = [1, 1]} : vector<16x32xf32> to vector<14x32xf32>
    %283 = tpu.concatenate %282, %281 in 0 : vector<14x32xf32>, vector<2x32xf32> -> vector<16x32xf32>
    %c2_i32 = arith.constant 2 : i32
    %284 = vector.broadcast %c2_i32 : i32 to vector<16x1xi32>
    %285 = arith.addi %19, %284 : vector<16x1xi32>
    %c0_i32_93 = arith.constant 0 : i32
    %286 = vector.broadcast %c0_i32_93 : i32 to vector<16x1xi32>
    %287 = arith.cmpi sge, %285, %286 : vector<16x1xi32>
    %c2_i32_94 = arith.constant 2 : i32
    %288 = vector.broadcast %c2_i32_94 : i32 to vector<16x1xi32>
    %289 = arith.addi %19, %288 : vector<16x1xi32>
    %c8_i32_95 = arith.constant 8 : i32
    %290 = vector.broadcast %c8_i32_95 : i32 to vector<16x1xi32>
    %291 = arith.cmpi slt, %289, %290 : vector<16x1xi32>
    %292 = arith.andi %287, %291 : vector<16x1xi1>
    %cst_96 = arith.constant 0.000000e+00 : f32
    %293 = vector.shape_cast %292 : vector<16x1xi1> to vector<16x1xi1>
    %294 = vector.broadcast %293 : vector<16x1xi1> to vector<16x32xi1>
    %295 = vector.broadcast %cst_96 : f32 to vector<16x32xf32>
    %296 = arith.select %294, %283, %295 : vector<16x32xi1>, vector<16x32xf32>
    %c256 = arith.constant 256 : index
    %c0_97 = arith.constant 0 : index
    %297 = vector.load %arg4[%c256, %c0_97] : memref<1024x128xbf16, #tpu.memory_space<vmem>>, vector<32x64xbf16>
    %298 = arith.truncf %296 : vector<16x32xf32> to vector<16x32xbf16>
    %cst_98 = arith.constant dense<0.000000e+00> : vector<16x64xf32>
    %299 = tpu.matmul %298, %297, %cst_98 {dimension_numbers = #tpu.dot_dimension_numbers<[1], [0], [0], [1], [0, 0, 1, 1], [], []>} : vector<16x32xbf16>, vector<32x64xbf16>, vector<16x64xf32> -> vector<16x64xf32>
    %300 = arith.addf %280, %299 : vector<16x64xf32>
    %cst_99 = arith.constant 0.000000e+00 : f32
    %301 = vector.broadcast %cst_99 : f32 to vector<3x32xf32>
    %302 = vector.extract_strided_slice %177 {offsets = [3, 0], sizes = [13, 32], strides = [1, 1]} : vector<16x32xf32> to vector<13x32xf32>
    %303 = tpu.concatenate %302, %301 in 0 : vector<13x32xf32>, vector<3x32xf32> -> vector<16x32xf32>
    %c3_i32 = arith.constant 3 : i32
    %304 = vector.broadcast %c3_i32 : i32 to vector<16x1xi32>
    %305 = arith.addi %19, %304 : vector<16x1xi32>
    %c0_i32_100 = arith.constant 0 : i32
    %306 = vector.broadcast %c0_i32_100 : i32 to vector<16x1xi32>
    %307 = arith.cmpi sge, %305, %306 : vector<16x1xi32>
    %c3_i32_101 = arith.constant 3 : i32
    %308 = vector.broadcast %c3_i32_101 : i32 to vector<16x1xi32>
    %309 = arith.addi %19, %308 : vector<16x1xi32>
    %c8_i32_102 = arith.constant 8 : i32
    %310 = vector.broadcast %c8_i32_102 : i32 to vector<16x1xi32>
    %311 = arith.cmpi slt, %309, %310 : vector<16x1xi32>
    %312 = arith.andi %307, %311 : vector<16x1xi1>
    %cst_103 = arith.constant 0.000000e+00 : f32
    %313 = vector.shape_cast %312 : vector<16x1xi1> to vector<16x1xi1>
    %314 = vector.broadcast %313 : vector<16x1xi1> to vector<16x32xi1>
    %315 = vector.broadcast %cst_103 : f32 to vector<16x32xf32>
    %316 = arith.select %314, %303, %315 : vector<16x32xi1>, vector<16x32xf32>
    %c288 = arith.constant 288 : index
    %c0_104 = arith.constant 0 : index
    %317 = vector.load %arg4[%c288, %c0_104] : memref<1024x128xbf16, #tpu.memory_space<vmem>>, vector<32x64xbf16>
    %318 = arith.truncf %316 : vector<16x32xf32> to vector<16x32xbf16>
    %cst_105 = arith.constant dense<0.000000e+00> : vector<16x64xf32>
    %319 = tpu.matmul %318, %317, %cst_105 {dimension_numbers = #tpu.dot_dimension_numbers<[1], [0], [0], [1], [0, 0, 1, 1], [], []>} : vector<16x32xbf16>, vector<32x64xbf16>, vector<16x64xf32> -> vector<16x64xf32>
    %320 = arith.addf %300, %319 : vector<16x64xf32>
    %cst_106 = arith.constant 0.000000e+00 : f32
    %321 = vector.broadcast %cst_106 : f32 to vector<4x32xf32>
    %322 = vector.extract_strided_slice %177 {offsets = [4, 0], sizes = [12, 32], strides = [1, 1]} : vector<16x32xf32> to vector<12x32xf32>
    %323 = tpu.concatenate %322, %321 in 0 : vector<12x32xf32>, vector<4x32xf32> -> vector<16x32xf32>
    %c4_i32 = arith.constant 4 : i32
    %324 = vector.broadcast %c4_i32 : i32 to vector<16x1xi32>
    %325 = arith.addi %19, %324 : vector<16x1xi32>
    %c0_i32_107 = arith.constant 0 : i32
    %326 = vector.broadcast %c0_i32_107 : i32 to vector<16x1xi32>
    %327 = arith.cmpi sge, %325, %326 : vector<16x1xi32>
    %c4_i32_108 = arith.constant 4 : i32
    %328 = vector.broadcast %c4_i32_108 : i32 to vector<16x1xi32>
    %329 = arith.addi %19, %328 : vector<16x1xi32>
    %c8_i32_109 = arith.constant 8 : i32
    %330 = vector.broadcast %c8_i32_109 : i32 to vector<16x1xi32>
    %331 = arith.cmpi slt, %329, %330 : vector<16x1xi32>
    %332 = arith.andi %327, %331 : vector<16x1xi1>
    %cst_110 = arith.constant 0.000000e+00 : f32
    %333 = vector.shape_cast %332 : vector<16x1xi1> to vector<16x1xi1>
    %334 = vector.broadcast %333 : vector<16x1xi1> to vector<16x32xi1>
    %335 = vector.broadcast %cst_110 : f32 to vector<16x32xf32>
    %336 = arith.select %334, %323, %335 : vector<16x32xi1>, vector<16x32xf32>
    %c320 = arith.constant 320 : index
    %c0_111 = arith.constant 0 : index
    %337 = vector.load %arg4[%c320, %c0_111] : memref<1024x128xbf16, #tpu.memory_space<vmem>>, vector<32x64xbf16>
    %338 = arith.truncf %336 : vector<16x32xf32> to vector<16x32xbf16>
    %cst_112 = arith.constant dense<0.000000e+00> : vector<16x64xf32>
    %339 = tpu.matmul %338, %337, %cst_112 {dimension_numbers = #tpu.dot_dimension_numbers<[1], [0], [0], [1], [0, 0, 1, 1], [], []>} : vector<16x32xbf16>, vector<32x64xbf16>, vector<16x64xf32> -> vector<16x64xf32>
    %340 = arith.addf %320, %339 : vector<16x64xf32>
    %c32_113 = arith.constant 32 : index
    %c0_114 = arith.constant 0 : index
    %341 = vector.load %arg5[%c32_113, %c0_114] : memref<192x128xf32, #tpu.memory_space<vmem>>, vector<1x64xf32>
    %342 = vector.broadcast %341 : vector<1x64xf32> to vector<16x64xf32>
    %343 = arith.addf %340, %342 : vector<16x64xf32>
    %cst_115 = arith.constant 0.000000e+00 : f32
    %344 = vector.broadcast %cst_115 : f32 to vector<16x64xf32>
    %345 = arith.maximumf %343, %344 : vector<16x64xf32>
    %c352 = arith.constant 352 : index
    %c0_116 = arith.constant 0 : index
    %346 = vector.load %arg4[%c352, %c0_116] : memref<1024x128xbf16, #tpu.memory_space<vmem>>, vector<64x32xbf16>
    %347 = arith.truncf %345 : vector<16x64xf32> to vector<16x64xbf16>
    %cst_117 = arith.constant dense<0.000000e+00> : vector<16x32xf32>
    %348 = tpu.matmul %347, %346, %cst_117 {dimension_numbers = #tpu.dot_dimension_numbers<[1], [0], [0], [1], [0, 0, 1, 1], [], []>} : vector<16x64xbf16>, vector<64x32xbf16>, vector<16x32xf32> -> vector<16x32xf32>
    %c40 = arith.constant 40 : index
    %c0_118 = arith.constant 0 : index
    %349 = vector.load %arg5[%c40, %c0_118] : memref<192x128xf32, #tpu.memory_space<vmem>>, vector<1x32xf32>
    %350 = vector.broadcast %349 : vector<1x32xf32> to vector<16x32xf32>
    %351 = arith.addf %348, %350 : vector<16x32xf32>
    %352 = arith.addf %351, %177 : vector<16x32xf32>
    %c48 = arith.constant 48 : index
    %c0_119 = arith.constant 0 : index
    %353 = vector.load %arg5[%c48, %c0_119] : memref<192x128xf32, #tpu.memory_space<vmem>>, vector<1x32xf32>
    %c56 = arith.constant 56 : index
    %c0_120 = arith.constant 0 : index
    %354 = vector.load %arg5[%c56, %c0_120] : memref<192x128xf32, #tpu.memory_space<vmem>>, vector<1x32xf32>
    %cst_121 = arith.constant dense<0.000000e+00> : vector<16xf32>
    %355 = vector.multi_reduction <add>, %352, %cst_121 [1] : vector<16x32xf32> to vector<16xf32>
    %356 = vector.shape_cast %355 : vector<16xf32> to vector<16x1xf32>
    %cst_122 = arith.constant 3.200000e+01 : f32
    %357 = vector.broadcast %cst_122 : f32 to vector<16x1xf32>
    %358 = arith.divf %356, %357 : vector<16x1xf32>
    %359 = vector.broadcast %358 : vector<16x1xf32> to vector<16x32xf32>
    %360 = arith.subf %352, %359 : vector<16x32xf32>
    %361 = arith.mulf %360, %360 : vector<16x32xf32>
    %cst_123 = arith.constant dense<0.000000e+00> : vector<16xf32>
    %362 = vector.multi_reduction <add>, %361, %cst_123 [1] : vector<16x32xf32> to vector<16xf32>
    %363 = vector.shape_cast %362 : vector<16xf32> to vector<16x1xf32>
    %cst_124 = arith.constant 3.200000e+01 : f32
    %364 = vector.broadcast %cst_124 : f32 to vector<16x1xf32>
    %365 = arith.divf %363, %364 : vector<16x1xf32>
    %366 = vector.broadcast %358 : vector<16x1xf32> to vector<16x32xf32>
    %367 = arith.subf %352, %366 : vector<16x32xf32>
    %cst_125 = arith.constant 9.99999974E-6 : f32
    %368 = vector.broadcast %cst_125 : f32 to vector<16x1xf32>
    %369 = arith.addf %365, %368 : vector<16x1xf32>
    %370 = math.rsqrt %369 : vector<16x1xf32>
    %371 = vector.broadcast %370 : vector<16x1xf32> to vector<16x32xf32>
    %372 = arith.mulf %367, %371 : vector<16x32xf32>
    %373 = vector.broadcast %353 : vector<1x32xf32> to vector<16x32xf32>
    %374 = arith.mulf %372, %373 : vector<16x32xf32>
    %375 = vector.broadcast %354 : vector<1x32xf32> to vector<16x32xf32>
    %376 = arith.addf %374, %375 : vector<16x32xf32>
    %377 = vector.broadcast %2 : vector<16x1xf32> to vector<16x32xf32>
    %378 = arith.mulf %376, %377 : vector<16x32xf32>
    %c416 = arith.constant 416 : index
    %c0_126 = arith.constant 0 : index
    %379 = vector.load %arg4[%c416, %c0_126] : memref<1024x128xbf16, #tpu.memory_space<vmem>>, vector<32x96xbf16>
    %380 = arith.truncf %378 : vector<16x32xf32> to vector<16x32xbf16>
    %cst_127 = arith.constant dense<0.000000e+00> : vector<16x96xf32>
    %381 = tpu.matmul %380, %379, %cst_127 {dimension_numbers = #tpu.dot_dimension_numbers<[1], [0], [0], [1], [0, 0, 1, 1], [], []>} : vector<16x32xbf16>, vector<32x96xbf16>, vector<16x96xf32> -> vector<16x96xf32>
    %c64_128 = arith.constant 64 : index
    %c0_129 = arith.constant 0 : index
    %382 = vector.load %arg5[%c64_128, %c0_129] : memref<192x128xf32, #tpu.memory_space<vmem>>, vector<1x96xf32>
    %383 = vector.broadcast %382 : vector<1x96xf32> to vector<16x96xf32>
    %384 = arith.addf %381, %383 : vector<16x96xf32>
    %385 = vector.extract_strided_slice %384 {offsets = [0, 0], sizes = [8, 96], strides = [1, 1]} : vector<16x96xf32> to vector<8x96xf32>
    %386 = vector.extract_strided_slice %1 {offsets = [0, 0], sizes = [1, 8], strides = [1, 1]} : vector<2x8xf32> to vector<1x8xf32>
    %387 = vector.extract_strided_slice %385 {offsets = [0, 0], sizes = [8, 16], strides = [1, 1]} : vector<8x96xf32> to vector<8x16xf32>
    %388 = vector.extract_strided_slice %385 {offsets = [0, 32], sizes = [8, 16], strides = [1, 1]} : vector<8x96xf32> to vector<8x16xf32>
    %389 = vector.extract_strided_slice %385 {offsets = [0, 64], sizes = [8, 16], strides = [1, 1]} : vector<8x96xf32> to vector<8x16xf32>
    %390 = arith.truncf %387 : vector<8x16xf32> to vector<8x16xbf16>
    %391 = arith.truncf %388 : vector<8x16xf32> to vector<8x16xbf16>
    %cst_130 = arith.constant dense<0.000000e+00> : vector<8x8xf32>
    %392 = tpu.matmul %390, %391, %cst_130 {dimension_numbers = #tpu.dot_dimension_numbers<[1], [1], [0], [0], [0, 0, 1, 0], [], []>} : vector<8x16xbf16>, vector<8x16xbf16>, vector<8x8xf32> -> vector<8x8xf32>
    %cst_131 = arith.constant 2.500000e-01 : f32
    %393 = vector.broadcast %cst_131 : f32 to vector<8x8xf32>
    %394 = arith.mulf %392, %393 : vector<8x8xf32>
    %cst_132 = arith.constant 5.000000e-01 : f32
    %395 = vector.broadcast %cst_132 : f32 to vector<1x8xf32>
    %396 = arith.cmpf ogt, %386, %395 : vector<1x8xf32>
    %cst_133 = arith.constant -1.000000e+09 : f32
    %397 = vector.shape_cast %396 : vector<1x8xi1> to vector<1x8xi1>
    %398 = vector.broadcast %397 : vector<1x8xi1> to vector<8x8xi1>
    %399 = vector.broadcast %cst_133 : f32 to vector<8x8xf32>
    %400 = arith.select %398, %394, %399 : vector<8x8xi1>, vector<8x8xf32>
    %cst_134 = arith.constant dense<0xFF800000> : vector<8xf32>
    %401 = vector.multi_reduction <maximumf>, %400, %cst_134 [1] : vector<8x8xf32> to vector<8xf32>
    %cst_135 = arith.constant 0xFF800000 : f32
    %402 = vector.broadcast %cst_135 : f32 to vector<8xf32>
    %403 = arith.maximumf %402, %401 : vector<8xf32>
    %404 = vector.shape_cast %403 : vector<8xf32> to vector<8x1xf32>
    %405 = vector.broadcast %404 : vector<8x1xf32> to vector<8x8xf32>
    %406 = arith.subf %400, %405 : vector<8x8xf32>
    %407 = math.exp %406 : vector<8x8xf32>
    %cst_136 = arith.constant dense<0.000000e+00> : vector<8xf32>
    %408 = vector.multi_reduction <add>, %407, %cst_136 [1] : vector<8x8xf32> to vector<8xf32>
    %409 = vector.shape_cast %408 : vector<8xf32> to vector<8x1xf32>
    %410 = vector.broadcast %409 : vector<8x1xf32> to vector<8x8xf32>
    %411 = arith.divf %407, %410 : vector<8x8xf32>
    %412 = arith.truncf %411 : vector<8x8xf32> to vector<8x8xbf16>
    %413 = arith.truncf %389 : vector<8x16xf32> to vector<8x16xbf16>
    %cst_137 = arith.constant dense<0.000000e+00> : vector<8x16xf32>
    %414 = tpu.matmul %412, %413, %cst_137 {dimension_numbers = #tpu.dot_dimension_numbers<[1], [0], [0], [1], [0, 0, 1, 1], [], []>} : vector<8x8xbf16>, vector<8x16xbf16>, vector<8x16xf32> -> vector<8x16xf32>
    %415 = vector.extract_strided_slice %385 {offsets = [0, 16], sizes = [8, 16], strides = [1, 1]} : vector<8x96xf32> to vector<8x16xf32>
    %416 = vector.extract_strided_slice %385 {offsets = [0, 48], sizes = [8, 16], strides = [1, 1]} : vector<8x96xf32> to vector<8x16xf32>
    %417 = vector.extract_strided_slice %385 {offsets = [0, 80], sizes = [8, 16], strides = [1, 1]} : vector<8x96xf32> to vector<8x16xf32>
    %418 = arith.truncf %415 : vector<8x16xf32> to vector<8x16xbf16>
    %419 = arith.truncf %416 : vector<8x16xf32> to vector<8x16xbf16>
    %cst_138 = arith.constant dense<0.000000e+00> : vector<8x8xf32>
    %420 = tpu.matmul %418, %419, %cst_138 {dimension_numbers = #tpu.dot_dimension_numbers<[1], [1], [0], [0], [0, 0, 1, 0], [], []>} : vector<8x16xbf16>, vector<8x16xbf16>, vector<8x8xf32> -> vector<8x8xf32>
    %cst_139 = arith.constant 2.500000e-01 : f32
    %421 = vector.broadcast %cst_139 : f32 to vector<8x8xf32>
    %422 = arith.mulf %420, %421 : vector<8x8xf32>
    %cst_140 = arith.constant 5.000000e-01 : f32
    %423 = vector.broadcast %cst_140 : f32 to vector<1x8xf32>
    %424 = arith.cmpf ogt, %386, %423 : vector<1x8xf32>
    %cst_141 = arith.constant -1.000000e+09 : f32
    %425 = vector.shape_cast %424 : vector<1x8xi1> to vector<1x8xi1>
    %426 = vector.broadcast %425 : vector<1x8xi1> to vector<8x8xi1>
    %427 = vector.broadcast %cst_141 : f32 to vector<8x8xf32>
    %428 = arith.select %426, %422, %427 : vector<8x8xi1>, vector<8x8xf32>
    %cst_142 = arith.constant dense<0xFF800000> : vector<8xf32>
    %429 = vector.multi_reduction <maximumf>, %428, %cst_142 [1] : vector<8x8xf32> to vector<8xf32>
    %cst_143 = arith.constant 0xFF800000 : f32
    %430 = vector.broadcast %cst_143 : f32 to vector<8xf32>
    %431 = arith.maximumf %430, %429 : vector<8xf32>
    %432 = vector.shape_cast %431 : vector<8xf32> to vector<8x1xf32>
    %433 = vector.broadcast %432 : vector<8x1xf32> to vector<8x8xf32>
    %434 = arith.subf %428, %433 : vector<8x8xf32>
    %435 = math.exp %434 : vector<8x8xf32>
    %cst_144 = arith.constant dense<0.000000e+00> : vector<8xf32>
    %436 = vector.multi_reduction <add>, %435, %cst_144 [1] : vector<8x8xf32> to vector<8xf32>
    %437 = vector.shape_cast %436 : vector<8xf32> to vector<8x1xf32>
    %438 = vector.broadcast %437 : vector<8x1xf32> to vector<8x8xf32>
    %439 = arith.divf %435, %438 : vector<8x8xf32>
    %440 = arith.truncf %439 : vector<8x8xf32> to vector<8x8xbf16>
    %441 = arith.truncf %417 : vector<8x16xf32> to vector<8x16xbf16>
    %cst_145 = arith.constant dense<0.000000e+00> : vector<8x16xf32>
    %442 = tpu.matmul %440, %441, %cst_145 {dimension_numbers = #tpu.dot_dimension_numbers<[1], [0], [0], [1], [0, 0, 1, 1], [], []>} : vector<8x8xbf16>, vector<8x16xbf16>, vector<8x16xf32> -> vector<8x16xf32>
    %443 = tpu.concatenate %414, %442 in 1 : vector<8x16xf32>, vector<8x16xf32> -> vector<8x32xf32>
    %444 = vector.extract_strided_slice %384 {offsets = [8, 0], sizes = [8, 96], strides = [1, 1]} : vector<16x96xf32> to vector<8x96xf32>
    %445 = vector.extract_strided_slice %1 {offsets = [1, 0], sizes = [1, 8], strides = [1, 1]} : vector<2x8xf32> to vector<1x8xf32>
    %446 = vector.extract_strided_slice %444 {offsets = [0, 0], sizes = [8, 16], strides = [1, 1]} : vector<8x96xf32> to vector<8x16xf32>
    %447 = vector.extract_strided_slice %444 {offsets = [0, 32], sizes = [8, 16], strides = [1, 1]} : vector<8x96xf32> to vector<8x16xf32>
    %448 = vector.extract_strided_slice %444 {offsets = [0, 64], sizes = [8, 16], strides = [1, 1]} : vector<8x96xf32> to vector<8x16xf32>
    %449 = arith.truncf %446 : vector<8x16xf32> to vector<8x16xbf16>
    %450 = arith.truncf %447 : vector<8x16xf32> to vector<8x16xbf16>
    %cst_146 = arith.constant dense<0.000000e+00> : vector<8x8xf32>
    %451 = tpu.matmul %449, %450, %cst_146 {dimension_numbers = #tpu.dot_dimension_numbers<[1], [1], [0], [0], [0, 0, 1, 0], [], []>} : vector<8x16xbf16>, vector<8x16xbf16>, vector<8x8xf32> -> vector<8x8xf32>
    %cst_147 = arith.constant 2.500000e-01 : f32
    %452 = vector.broadcast %cst_147 : f32 to vector<8x8xf32>
    %453 = arith.mulf %451, %452 : vector<8x8xf32>
    %cst_148 = arith.constant 5.000000e-01 : f32
    %454 = vector.broadcast %cst_148 : f32 to vector<1x8xf32>
    %455 = arith.cmpf ogt, %445, %454 : vector<1x8xf32>
    %cst_149 = arith.constant -1.000000e+09 : f32
    %456 = vector.shape_cast %455 : vector<1x8xi1> to vector<1x8xi1>
    %457 = vector.broadcast %456 : vector<1x8xi1> to vector<8x8xi1>
    %458 = vector.broadcast %cst_149 : f32 to vector<8x8xf32>
    %459 = arith.select %457, %453, %458 : vector<8x8xi1>, vector<8x8xf32>
    %cst_150 = arith.constant dense<0xFF800000> : vector<8xf32>
    %460 = vector.multi_reduction <maximumf>, %459, %cst_150 [1] : vector<8x8xf32> to vector<8xf32>
    %cst_151 = arith.constant 0xFF800000 : f32
    %461 = vector.broadcast %cst_151 : f32 to vector<8xf32>
    %462 = arith.maximumf %461, %460 : vector<8xf32>
    %463 = vector.shape_cast %462 : vector<8xf32> to vector<8x1xf32>
    %464 = vector.broadcast %463 : vector<8x1xf32> to vector<8x8xf32>
    %465 = arith.subf %459, %464 : vector<8x8xf32>
    %466 = math.exp %465 : vector<8x8xf32>
    %cst_152 = arith.constant dense<0.000000e+00> : vector<8xf32>
    %467 = vector.multi_reduction <add>, %466, %cst_152 [1] : vector<8x8xf32> to vector<8xf32>
    %468 = vector.shape_cast %467 : vector<8xf32> to vector<8x1xf32>
    %469 = vector.broadcast %468 : vector<8x1xf32> to vector<8x8xf32>
    %470 = arith.divf %466, %469 : vector<8x8xf32>
    %471 = arith.truncf %470 : vector<8x8xf32> to vector<8x8xbf16>
    %472 = arith.truncf %448 : vector<8x16xf32> to vector<8x16xbf16>
    %cst_153 = arith.constant dense<0.000000e+00> : vector<8x16xf32>
    %473 = tpu.matmul %471, %472, %cst_153 {dimension_numbers = #tpu.dot_dimension_numbers<[1], [0], [0], [1], [0, 0, 1, 1], [], []>} : vector<8x8xbf16>, vector<8x16xbf16>, vector<8x16xf32> -> vector<8x16xf32>
    %474 = vector.extract_strided_slice %444 {offsets = [0, 16], sizes = [8, 16], strides = [1, 1]} : vector<8x96xf32> to vector<8x16xf32>
    %475 = vector.extract_strided_slice %444 {offsets = [0, 48], sizes = [8, 16], strides = [1, 1]} : vector<8x96xf32> to vector<8x16xf32>
    %476 = vector.extract_strided_slice %444 {offsets = [0, 80], sizes = [8, 16], strides = [1, 1]} : vector<8x96xf32> to vector<8x16xf32>
    %477 = arith.truncf %474 : vector<8x16xf32> to vector<8x16xbf16>
    %478 = arith.truncf %475 : vector<8x16xf32> to vector<8x16xbf16>
    %cst_154 = arith.constant dense<0.000000e+00> : vector<8x8xf32>
    %479 = tpu.matmul %477, %478, %cst_154 {dimension_numbers = #tpu.dot_dimension_numbers<[1], [1], [0], [0], [0, 0, 1, 0], [], []>} : vector<8x16xbf16>, vector<8x16xbf16>, vector<8x8xf32> -> vector<8x8xf32>
    %cst_155 = arith.constant 2.500000e-01 : f32
    %480 = vector.broadcast %cst_155 : f32 to vector<8x8xf32>
    %481 = arith.mulf %479, %480 : vector<8x8xf32>
    %cst_156 = arith.constant 5.000000e-01 : f32
    %482 = vector.broadcast %cst_156 : f32 to vector<1x8xf32>
    %483 = arith.cmpf ogt, %445, %482 : vector<1x8xf32>
    %cst_157 = arith.constant -1.000000e+09 : f32
    %484 = vector.shape_cast %483 : vector<1x8xi1> to vector<1x8xi1>
    %485 = vector.broadcast %484 : vector<1x8xi1> to vector<8x8xi1>
    %486 = vector.broadcast %cst_157 : f32 to vector<8x8xf32>
    %487 = arith.select %485, %481, %486 : vector<8x8xi1>, vector<8x8xf32>
    %cst_158 = arith.constant dense<0xFF800000> : vector<8xf32>
    %488 = vector.multi_reduction <maximumf>, %487, %cst_158 [1] : vector<8x8xf32> to vector<8xf32>
    %cst_159 = arith.constant 0xFF800000 : f32
    %489 = vector.broadcast %cst_159 : f32 to vector<8xf32>
    %490 = arith.maximumf %489, %488 : vector<8xf32>
    %491 = vector.shape_cast %490 : vector<8xf32> to vector<8x1xf32>
    %492 = vector.broadcast %491 : vector<8x1xf32> to vector<8x8xf32>
    %493 = arith.subf %487, %492 : vector<8x8xf32>
    %494 = math.exp %493 : vector<8x8xf32>
    %cst_160 = arith.constant dense<0.000000e+00> : vector<8xf32>
    %495 = vector.multi_reduction <add>, %494, %cst_160 [1] : vector<8x8xf32> to vector<8xf32>
    %496 = vector.shape_cast %495 : vector<8xf32> to vector<8x1xf32>
    %497 = vector.broadcast %496 : vector<8x1xf32> to vector<8x8xf32>
    %498 = arith.divf %494, %497 : vector<8x8xf32>
    %499 = arith.truncf %498 : vector<8x8xf32> to vector<8x8xbf16>
    %500 = arith.truncf %476 : vector<8x16xf32> to vector<8x16xbf16>
    %cst_161 = arith.constant dense<0.000000e+00> : vector<8x16xf32>
    %501 = tpu.matmul %499, %500, %cst_161 {dimension_numbers = #tpu.dot_dimension_numbers<[1], [0], [0], [1], [0, 0, 1, 1], [], []>} : vector<8x8xbf16>, vector<8x16xbf16>, vector<8x16xf32> -> vector<8x16xf32>
    %502 = tpu.concatenate %473, %501 in 1 : vector<8x16xf32>, vector<8x16xf32> -> vector<8x32xf32>
    %503 = tpu.concatenate %443, %502 in 0 : vector<8x32xf32>, vector<8x32xf32> -> vector<16x32xf32>
    %c448 = arith.constant 448 : index
    %c0_162 = arith.constant 0 : index
    %504 = vector.load %arg4[%c448, %c0_162] : memref<1024x128xbf16, #tpu.memory_space<vmem>>, vector<32x32xbf16>
    %505 = arith.truncf %503 : vector<16x32xf32> to vector<16x32xbf16>
    %cst_163 = arith.constant dense<0.000000e+00> : vector<16x32xf32>
    %506 = tpu.matmul %505, %504, %cst_163 {dimension_numbers = #tpu.dot_dimension_numbers<[1], [0], [0], [1], [0, 0, 1, 1], [], []>} : vector<16x32xbf16>, vector<32x32xbf16>, vector<16x32xf32> -> vector<16x32xf32>
    %c72 = arith.constant 72 : index
    %c0_164 = arith.constant 0 : index
    %507 = vector.load %arg5[%c72, %c0_164] : memref<192x128xf32, #tpu.memory_space<vmem>>, vector<1x32xf32>
    %508 = vector.broadcast %507 : vector<1x32xf32> to vector<16x32xf32>
    %509 = arith.addf %506, %508 : vector<16x32xf32>
    %510 = arith.addf %509, %378 : vector<16x32xf32>
    %c80 = arith.constant 80 : index
    %c0_165 = arith.constant 0 : index
    %511 = vector.load %arg5[%c80, %c0_165] : memref<192x128xf32, #tpu.memory_space<vmem>>, vector<1x32xf32>
    %c88 = arith.constant 88 : index
    %c0_166 = arith.constant 0 : index
    %512 = vector.load %arg5[%c88, %c0_166] : memref<192x128xf32, #tpu.memory_space<vmem>>, vector<1x32xf32>
    %cst_167 = arith.constant dense<0.000000e+00> : vector<16xf32>
    %513 = vector.multi_reduction <add>, %510, %cst_167 [1] : vector<16x32xf32> to vector<16xf32>
    %514 = vector.shape_cast %513 : vector<16xf32> to vector<16x1xf32>
    %cst_168 = arith.constant 3.200000e+01 : f32
    %515 = vector.broadcast %cst_168 : f32 to vector<16x1xf32>
    %516 = arith.divf %514, %515 : vector<16x1xf32>
    %517 = vector.broadcast %516 : vector<16x1xf32> to vector<16x32xf32>
    %518 = arith.subf %510, %517 : vector<16x32xf32>
    %519 = arith.mulf %518, %518 : vector<16x32xf32>
    %cst_169 = arith.constant dense<0.000000e+00> : vector<16xf32>
    %520 = vector.multi_reduction <add>, %519, %cst_169 [1] : vector<16x32xf32> to vector<16xf32>
    %521 = vector.shape_cast %520 : vector<16xf32> to vector<16x1xf32>
    %cst_170 = arith.constant 3.200000e+01 : f32
    %522 = vector.broadcast %cst_170 : f32 to vector<16x1xf32>
    %523 = arith.divf %521, %522 : vector<16x1xf32>
    %524 = vector.broadcast %516 : vector<16x1xf32> to vector<16x32xf32>
    %525 = arith.subf %510, %524 : vector<16x32xf32>
    %cst_171 = arith.constant 9.99999974E-6 : f32
    %526 = vector.broadcast %cst_171 : f32 to vector<16x1xf32>
    %527 = arith.addf %523, %526 : vector<16x1xf32>
    %528 = math.rsqrt %527 : vector<16x1xf32>
    %529 = vector.broadcast %528 : vector<16x1xf32> to vector<16x32xf32>
    %530 = arith.mulf %525, %529 : vector<16x32xf32>
    %531 = vector.broadcast %511 : vector<1x32xf32> to vector<16x32xf32>
    %532 = arith.mulf %530, %531 : vector<16x32xf32>
    %533 = vector.broadcast %512 : vector<1x32xf32> to vector<16x32xf32>
    %534 = arith.addf %532, %533 : vector<16x32xf32>
    %535 = vector.broadcast %2 : vector<16x1xf32> to vector<16x32xf32>
    %536 = arith.mulf %534, %535 : vector<16x32xf32>
    %cst_172 = arith.constant 0.000000e+00 : f32
    %537 = vector.broadcast %cst_172 : f32 to vector<4x32xf32>
    %538 = vector.extract_strided_slice %536 {offsets = [0, 0], sizes = [12, 32], strides = [1, 1]} : vector<16x32xf32> to vector<12x32xf32>
    %539 = tpu.concatenate %537, %538 in 0 : vector<4x32xf32>, vector<12x32xf32> -> vector<16x32xf32>
    %c-4_i32_173 = arith.constant -4 : i32
    %540 = vector.broadcast %c-4_i32_173 : i32 to vector<16x1xi32>
    %541 = arith.addi %19, %540 : vector<16x1xi32>
    %c0_i32_174 = arith.constant 0 : i32
    %542 = vector.broadcast %c0_i32_174 : i32 to vector<16x1xi32>
    %543 = arith.cmpi sge, %541, %542 : vector<16x1xi32>
    %c-4_i32_175 = arith.constant -4 : i32
    %544 = vector.broadcast %c-4_i32_175 : i32 to vector<16x1xi32>
    %545 = arith.addi %19, %544 : vector<16x1xi32>
    %c8_i32_176 = arith.constant 8 : i32
    %546 = vector.broadcast %c8_i32_176 : i32 to vector<16x1xi32>
    %547 = arith.cmpi slt, %545, %546 : vector<16x1xi32>
    %548 = arith.andi %543, %547 : vector<16x1xi1>
    %cst_177 = arith.constant 0.000000e+00 : f32
    %549 = vector.shape_cast %548 : vector<16x1xi1> to vector<16x1xi1>
    %550 = vector.broadcast %549 : vector<16x1xi1> to vector<16x32xi1>
    %551 = vector.broadcast %cst_177 : f32 to vector<16x32xf32>
    %552 = arith.select %550, %539, %551 : vector<16x32xi1>, vector<16x32xf32>
    %c480 = arith.constant 480 : index
    %c0_178 = arith.constant 0 : index
    %553 = vector.load %arg4[%c480, %c0_178] : memref<1024x128xbf16, #tpu.memory_space<vmem>>, vector<32x64xbf16>
    %554 = arith.truncf %552 : vector<16x32xf32> to vector<16x32xbf16>
    %cst_179 = arith.constant dense<0.000000e+00> : vector<16x64xf32>
    %555 = tpu.matmul %554, %553, %cst_179 {dimension_numbers = #tpu.dot_dimension_numbers<[1], [0], [0], [1], [0, 0, 1, 1], [], []>} : vector<16x32xbf16>, vector<32x64xbf16>, vector<16x64xf32> -> vector<16x64xf32>
    %cst_180 = arith.constant 0.000000e+00 : f32
    %556 = vector.broadcast %cst_180 : f32 to vector<3x32xf32>
    %557 = vector.extract_strided_slice %536 {offsets = [0, 0], sizes = [13, 32], strides = [1, 1]} : vector<16x32xf32> to vector<13x32xf32>
    %558 = tpu.concatenate %556, %557 in 0 : vector<3x32xf32>, vector<13x32xf32> -> vector<16x32xf32>
    %c-3_i32_181 = arith.constant -3 : i32
    %559 = vector.broadcast %c-3_i32_181 : i32 to vector<16x1xi32>
    %560 = arith.addi %19, %559 : vector<16x1xi32>
    %c0_i32_182 = arith.constant 0 : i32
    %561 = vector.broadcast %c0_i32_182 : i32 to vector<16x1xi32>
    %562 = arith.cmpi sge, %560, %561 : vector<16x1xi32>
    %c-3_i32_183 = arith.constant -3 : i32
    %563 = vector.broadcast %c-3_i32_183 : i32 to vector<16x1xi32>
    %564 = arith.addi %19, %563 : vector<16x1xi32>
    %c8_i32_184 = arith.constant 8 : i32
    %565 = vector.broadcast %c8_i32_184 : i32 to vector<16x1xi32>
    %566 = arith.cmpi slt, %564, %565 : vector<16x1xi32>
    %567 = arith.andi %562, %566 : vector<16x1xi1>
    %cst_185 = arith.constant 0.000000e+00 : f32
    %568 = vector.shape_cast %567 : vector<16x1xi1> to vector<16x1xi1>
    %569 = vector.broadcast %568 : vector<16x1xi1> to vector<16x32xi1>
    %570 = vector.broadcast %cst_185 : f32 to vector<16x32xf32>
    %571 = arith.select %569, %558, %570 : vector<16x32xi1>, vector<16x32xf32>
    %c512 = arith.constant 512 : index
    %c0_186 = arith.constant 0 : index
    %572 = vector.load %arg4[%c512, %c0_186] : memref<1024x128xbf16, #tpu.memory_space<vmem>>, vector<32x64xbf16>
    %573 = arith.truncf %571 : vector<16x32xf32> to vector<16x32xbf16>
    %cst_187 = arith.constant dense<0.000000e+00> : vector<16x64xf32>
    %574 = tpu.matmul %573, %572, %cst_187 {dimension_numbers = #tpu.dot_dimension_numbers<[1], [0], [0], [1], [0, 0, 1, 1], [], []>} : vector<16x32xbf16>, vector<32x64xbf16>, vector<16x64xf32> -> vector<16x64xf32>
    %575 = arith.addf %555, %574 : vector<16x64xf32>
    %cst_188 = arith.constant 0.000000e+00 : f32
    %576 = vector.broadcast %cst_188 : f32 to vector<2x32xf32>
    %577 = vector.extract_strided_slice %536 {offsets = [0, 0], sizes = [14, 32], strides = [1, 1]} : vector<16x32xf32> to vector<14x32xf32>
    %578 = tpu.concatenate %576, %577 in 0 : vector<2x32xf32>, vector<14x32xf32> -> vector<16x32xf32>
    %c-2_i32_189 = arith.constant -2 : i32
    %579 = vector.broadcast %c-2_i32_189 : i32 to vector<16x1xi32>
    %580 = arith.addi %19, %579 : vector<16x1xi32>
    %c0_i32_190 = arith.constant 0 : i32
    %581 = vector.broadcast %c0_i32_190 : i32 to vector<16x1xi32>
    %582 = arith.cmpi sge, %580, %581 : vector<16x1xi32>
    %c-2_i32_191 = arith.constant -2 : i32
    %583 = vector.broadcast %c-2_i32_191 : i32 to vector<16x1xi32>
    %584 = arith.addi %19, %583 : vector<16x1xi32>
    %c8_i32_192 = arith.constant 8 : i32
    %585 = vector.broadcast %c8_i32_192 : i32 to vector<16x1xi32>
    %586 = arith.cmpi slt, %584, %585 : vector<16x1xi32>
    %587 = arith.andi %582, %586 : vector<16x1xi1>
    %cst_193 = arith.constant 0.000000e+00 : f32
    %588 = vector.shape_cast %587 : vector<16x1xi1> to vector<16x1xi1>
    %589 = vector.broadcast %588 : vector<16x1xi1> to vector<16x32xi1>
    %590 = vector.broadcast %cst_193 : f32 to vector<16x32xf32>
    %591 = arith.select %589, %578, %590 : vector<16x32xi1>, vector<16x32xf32>
    %c544 = arith.constant 544 : index
    %c0_194 = arith.constant 0 : index
    %592 = vector.load %arg4[%c544, %c0_194] : memref<1024x128xbf16, #tpu.memory_space<vmem>>, vector<32x64xbf16>
    %593 = arith.truncf %591 : vector<16x32xf32> to vector<16x32xbf16>
    %cst_195 = arith.constant dense<0.000000e+00> : vector<16x64xf32>
    %594 = tpu.matmul %593, %592, %cst_195 {dimension_numbers = #tpu.dot_dimension_numbers<[1], [0], [0], [1], [0, 0, 1, 1], [], []>} : vector<16x32xbf16>, vector<32x64xbf16>, vector<16x64xf32> -> vector<16x64xf32>
    %595 = arith.addf %575, %594 : vector<16x64xf32>
    %cst_196 = arith.constant 0.000000e+00 : f32
    %596 = vector.broadcast %cst_196 : f32 to vector<1x32xf32>
    %597 = vector.extract_strided_slice %536 {offsets = [0, 0], sizes = [15, 32], strides = [1, 1]} : vector<16x32xf32> to vector<15x32xf32>
    %598 = tpu.concatenate %596, %597 in 0 : vector<1x32xf32>, vector<15x32xf32> -> vector<16x32xf32>
    %c-1_i32_197 = arith.constant -1 : i32
    %599 = vector.broadcast %c-1_i32_197 : i32 to vector<16x1xi32>
    %600 = arith.addi %19, %599 : vector<16x1xi32>
    %c0_i32_198 = arith.constant 0 : i32
    %601 = vector.broadcast %c0_i32_198 : i32 to vector<16x1xi32>
    %602 = arith.cmpi sge, %600, %601 : vector<16x1xi32>
    %c-1_i32_199 = arith.constant -1 : i32
    %603 = vector.broadcast %c-1_i32_199 : i32 to vector<16x1xi32>
    %604 = arith.addi %19, %603 : vector<16x1xi32>
    %c8_i32_200 = arith.constant 8 : i32
    %605 = vector.broadcast %c8_i32_200 : i32 to vector<16x1xi32>
    %606 = arith.cmpi slt, %604, %605 : vector<16x1xi32>
    %607 = arith.andi %602, %606 : vector<16x1xi1>
    %cst_201 = arith.constant 0.000000e+00 : f32
    %608 = vector.shape_cast %607 : vector<16x1xi1> to vector<16x1xi1>
    %609 = vector.broadcast %608 : vector<16x1xi1> to vector<16x32xi1>
    %610 = vector.broadcast %cst_201 : f32 to vector<16x32xf32>
    %611 = arith.select %609, %598, %610 : vector<16x32xi1>, vector<16x32xf32>
    %c576 = arith.constant 576 : index
    %c0_202 = arith.constant 0 : index
    %612 = vector.load %arg4[%c576, %c0_202] : memref<1024x128xbf16, #tpu.memory_space<vmem>>, vector<32x64xbf16>
    %613 = arith.truncf %611 : vector<16x32xf32> to vector<16x32xbf16>
    %cst_203 = arith.constant dense<0.000000e+00> : vector<16x64xf32>
    %614 = tpu.matmul %613, %612, %cst_203 {dimension_numbers = #tpu.dot_dimension_numbers<[1], [0], [0], [1], [0, 0, 1, 1], [], []>} : vector<16x32xbf16>, vector<32x64xbf16>, vector<16x64xf32> -> vector<16x64xf32>
    %615 = arith.addf %595, %614 : vector<16x64xf32>
    %c608 = arith.constant 608 : index
    %c0_204 = arith.constant 0 : index
    %616 = vector.load %arg4[%c608, %c0_204] : memref<1024x128xbf16, #tpu.memory_space<vmem>>, vector<32x64xbf16>
    %617 = arith.truncf %536 : vector<16x32xf32> to vector<16x32xbf16>
    %cst_205 = arith.constant dense<0.000000e+00> : vector<16x64xf32>
    %618 = tpu.matmul %617, %616, %cst_205 {dimension_numbers = #tpu.dot_dimension_numbers<[1], [0], [0], [1], [0, 0, 1, 1], [], []>} : vector<16x32xbf16>, vector<32x64xbf16>, vector<16x64xf32> -> vector<16x64xf32>
    %619 = arith.addf %615, %618 : vector<16x64xf32>
    %cst_206 = arith.constant 0.000000e+00 : f32
    %620 = vector.broadcast %cst_206 : f32 to vector<1x32xf32>
    %621 = vector.extract_strided_slice %536 {offsets = [1, 0], sizes = [15, 32], strides = [1, 1]} : vector<16x32xf32> to vector<15x32xf32>
    %622 = tpu.concatenate %621, %620 in 0 : vector<15x32xf32>, vector<1x32xf32> -> vector<16x32xf32>
    %c1_i32_207 = arith.constant 1 : i32
    %623 = vector.broadcast %c1_i32_207 : i32 to vector<16x1xi32>
    %624 = arith.addi %19, %623 : vector<16x1xi32>
    %c0_i32_208 = arith.constant 0 : i32
    %625 = vector.broadcast %c0_i32_208 : i32 to vector<16x1xi32>
    %626 = arith.cmpi sge, %624, %625 : vector<16x1xi32>
    %c1_i32_209 = arith.constant 1 : i32
    %627 = vector.broadcast %c1_i32_209 : i32 to vector<16x1xi32>
    %628 = arith.addi %19, %627 : vector<16x1xi32>
    %c8_i32_210 = arith.constant 8 : i32
    %629 = vector.broadcast %c8_i32_210 : i32 to vector<16x1xi32>
    %630 = arith.cmpi slt, %628, %629 : vector<16x1xi32>
    %631 = arith.andi %626, %630 : vector<16x1xi1>
    %cst_211 = arith.constant 0.000000e+00 : f32
    %632 = vector.shape_cast %631 : vector<16x1xi1> to vector<16x1xi1>
    %633 = vector.broadcast %632 : vector<16x1xi1> to vector<16x32xi1>
    %634 = vector.broadcast %cst_211 : f32 to vector<16x32xf32>
    %635 = arith.select %633, %622, %634 : vector<16x32xi1>, vector<16x32xf32>
    %c640 = arith.constant 640 : index
    %c0_212 = arith.constant 0 : index
    %636 = vector.load %arg4[%c640, %c0_212] : memref<1024x128xbf16, #tpu.memory_space<vmem>>, vector<32x64xbf16>
    %637 = arith.truncf %635 : vector<16x32xf32> to vector<16x32xbf16>
    %cst_213 = arith.constant dense<0.000000e+00> : vector<16x64xf32>
    %638 = tpu.matmul %637, %636, %cst_213 {dimension_numbers = #tpu.dot_dimension_numbers<[1], [0], [0], [1], [0, 0, 1, 1], [], []>} : vector<16x32xbf16>, vector<32x64xbf16>, vector<16x64xf32> -> vector<16x64xf32>
    %639 = arith.addf %619, %638 : vector<16x64xf32>
    %cst_214 = arith.constant 0.000000e+00 : f32
    %640 = vector.broadcast %cst_214 : f32 to vector<2x32xf32>
    %641 = vector.extract_strided_slice %536 {offsets = [2, 0], sizes = [14, 32], strides = [1, 1]} : vector<16x32xf32> to vector<14x32xf32>
    %642 = tpu.concatenate %641, %640 in 0 : vector<14x32xf32>, vector<2x32xf32> -> vector<16x32xf32>
    %c2_i32_215 = arith.constant 2 : i32
    %643 = vector.broadcast %c2_i32_215 : i32 to vector<16x1xi32>
    %644 = arith.addi %19, %643 : vector<16x1xi32>
    %c0_i32_216 = arith.constant 0 : i32
    %645 = vector.broadcast %c0_i32_216 : i32 to vector<16x1xi32>
    %646 = arith.cmpi sge, %644, %645 : vector<16x1xi32>
    %c2_i32_217 = arith.constant 2 : i32
    %647 = vector.broadcast %c2_i32_217 : i32 to vector<16x1xi32>
    %648 = arith.addi %19, %647 : vector<16x1xi32>
    %c8_i32_218 = arith.constant 8 : i32
    %649 = vector.broadcast %c8_i32_218 : i32 to vector<16x1xi32>
    %650 = arith.cmpi slt, %648, %649 : vector<16x1xi32>
    %651 = arith.andi %646, %650 : vector<16x1xi1>
    %cst_219 = arith.constant 0.000000e+00 : f32
    %652 = vector.shape_cast %651 : vector<16x1xi1> to vector<16x1xi1>
    %653 = vector.broadcast %652 : vector<16x1xi1> to vector<16x32xi1>
    %654 = vector.broadcast %cst_219 : f32 to vector<16x32xf32>
    %655 = arith.select %653, %642, %654 : vector<16x32xi1>, vector<16x32xf32>
    %c672 = arith.constant 672 : index
    %c0_220 = arith.constant 0 : index
    %656 = vector.load %arg4[%c672, %c0_220] : memref<1024x128xbf16, #tpu.memory_space<vmem>>, vector<32x64xbf16>
    %657 = arith.truncf %655 : vector<16x32xf32> to vector<16x32xbf16>
    %cst_221 = arith.constant dense<0.000000e+00> : vector<16x64xf32>
    %658 = tpu.matmul %657, %656, %cst_221 {dimension_numbers = #tpu.dot_dimension_numbers<[1], [0], [0], [1], [0, 0, 1, 1], [], []>} : vector<16x32xbf16>, vector<32x64xbf16>, vector<16x64xf32> -> vector<16x64xf32>
    %659 = arith.addf %639, %658 : vector<16x64xf32>
    %cst_222 = arith.constant 0.000000e+00 : f32
    %660 = vector.broadcast %cst_222 : f32 to vector<3x32xf32>
    %661 = vector.extract_strided_slice %536 {offsets = [3, 0], sizes = [13, 32], strides = [1, 1]} : vector<16x32xf32> to vector<13x32xf32>
    %662 = tpu.concatenate %661, %660 in 0 : vector<13x32xf32>, vector<3x32xf32> -> vector<16x32xf32>
    %c3_i32_223 = arith.constant 3 : i32
    %663 = vector.broadcast %c3_i32_223 : i32 to vector<16x1xi32>
    %664 = arith.addi %19, %663 : vector<16x1xi32>
    %c0_i32_224 = arith.constant 0 : i32
    %665 = vector.broadcast %c0_i32_224 : i32 to vector<16x1xi32>
    %666 = arith.cmpi sge, %664, %665 : vector<16x1xi32>
    %c3_i32_225 = arith.constant 3 : i32
    %667 = vector.broadcast %c3_i32_225 : i32 to vector<16x1xi32>
    %668 = arith.addi %19, %667 : vector<16x1xi32>
    %c8_i32_226 = arith.constant 8 : i32
    %669 = vector.broadcast %c8_i32_226 : i32 to vector<16x1xi32>
    %670 = arith.cmpi slt, %668, %669 : vector<16x1xi32>
    %671 = arith.andi %666, %670 : vector<16x1xi1>
    %cst_227 = arith.constant 0.000000e+00 : f32
    %672 = vector.shape_cast %671 : vector<16x1xi1> to vector<16x1xi1>
    %673 = vector.broadcast %672 : vector<16x1xi1> to vector<16x32xi1>
    %674 = vector.broadcast %cst_227 : f32 to vector<16x32xf32>
    %675 = arith.select %673, %662, %674 : vector<16x32xi1>, vector<16x32xf32>
    %c704 = arith.constant 704 : index
    %c0_228 = arith.constant 0 : index
    %676 = vector.load %arg4[%c704, %c0_228] : memref<1024x128xbf16, #tpu.memory_space<vmem>>, vector<32x64xbf16>
    %677 = arith.truncf %675 : vector<16x32xf32> to vector<16x32xbf16>
    %cst_229 = arith.constant dense<0.000000e+00> : vector<16x64xf32>
    %678 = tpu.matmul %677, %676, %cst_229 {dimension_numbers = #tpu.dot_dimension_numbers<[1], [0], [0], [1], [0, 0, 1, 1], [], []>} : vector<16x32xbf16>, vector<32x64xbf16>, vector<16x64xf32> -> vector<16x64xf32>
    %679 = arith.addf %659, %678 : vector<16x64xf32>
    %cst_230 = arith.constant 0.000000e+00 : f32
    %680 = vector.broadcast %cst_230 : f32 to vector<4x32xf32>
    %681 = vector.extract_strided_slice %536 {offsets = [4, 0], sizes = [12, 32], strides = [1, 1]} : vector<16x32xf32> to vector<12x32xf32>
    %682 = tpu.concatenate %681, %680 in 0 : vector<12x32xf32>, vector<4x32xf32> -> vector<16x32xf32>
    %c4_i32_231 = arith.constant 4 : i32
    %683 = vector.broadcast %c4_i32_231 : i32 to vector<16x1xi32>
    %684 = arith.addi %19, %683 : vector<16x1xi32>
    %c0_i32_232 = arith.constant 0 : i32
    %685 = vector.broadcast %c0_i32_232 : i32 to vector<16x1xi32>
    %686 = arith.cmpi sge, %684, %685 : vector<16x1xi32>
    %c4_i32_233 = arith.constant 4 : i32
    %687 = vector.broadcast %c4_i32_233 : i32 to vector<16x1xi32>
    %688 = arith.addi %19, %687 : vector<16x1xi32>
    %c8_i32_234 = arith.constant 8 : i32
    %689 = vector.broadcast %c8_i32_234 : i32 to vector<16x1xi32>
    %690 = arith.cmpi slt, %688, %689 : vector<16x1xi32>
    %691 = arith.andi %686, %690 : vector<16x1xi1>
    %cst_235 = arith.constant 0.000000e+00 : f32
    %692 = vector.shape_cast %691 : vector<16x1xi1> to vector<16x1xi1>
    %693 = vector.broadcast %692 : vector<16x1xi1> to vector<16x32xi1>
    %694 = vector.broadcast %cst_235 : f32 to vector<16x32xf32>
    %695 = arith.select %693, %682, %694 : vector<16x32xi1>, vector<16x32xf32>
    %c736 = arith.constant 736 : index
    %c0_236 = arith.constant 0 : index
    %696 = vector.load %arg4[%c736, %c0_236] : memref<1024x128xbf16, #tpu.memory_space<vmem>>, vector<32x64xbf16>
    %697 = arith.truncf %695 : vector<16x32xf32> to vector<16x32xbf16>
    %cst_237 = arith.constant dense<0.000000e+00> : vector<16x64xf32>
    %698 = tpu.matmul %697, %696, %cst_237 {dimension_numbers = #tpu.dot_dimension_numbers<[1], [0], [0], [1], [0, 0, 1, 1], [], []>} : vector<16x32xbf16>, vector<32x64xbf16>, vector<16x64xf32> -> vector<16x64xf32>
    %699 = arith.addf %679, %698 : vector<16x64xf32>
    %c96_238 = arith.constant 96 : index
    %c0_239 = arith.constant 0 : index
    %700 = vector.load %arg5[%c96_238, %c0_239] : memref<192x128xf32, #tpu.memory_space<vmem>>, vector<1x64xf32>
    %701 = vector.broadcast %700 : vector<1x64xf32> to vector<16x64xf32>
    %702 = arith.addf %699, %701 : vector<16x64xf32>
    %cst_240 = arith.constant 0.000000e+00 : f32
    %703 = vector.broadcast %cst_240 : f32 to vector<16x64xf32>
    %704 = arith.maximumf %702, %703 : vector<16x64xf32>
    %c768 = arith.constant 768 : index
    %c0_241 = arith.constant 0 : index
    %705 = vector.load %arg4[%c768, %c0_241] : memref<1024x128xbf16, #tpu.memory_space<vmem>>, vector<64x32xbf16>
    %706 = arith.truncf %704 : vector<16x64xf32> to vector<16x64xbf16>
    %cst_242 = arith.constant dense<0.000000e+00> : vector<16x32xf32>
    %707 = tpu.matmul %706, %705, %cst_242 {dimension_numbers = #tpu.dot_dimension_numbers<[1], [0], [0], [1], [0, 0, 1, 1], [], []>} : vector<16x64xbf16>, vector<64x32xbf16>, vector<16x32xf32> -> vector<16x32xf32>
    %c104 = arith.constant 104 : index
    %c0_243 = arith.constant 0 : index
    %708 = vector.load %arg5[%c104, %c0_243] : memref<192x128xf32, #tpu.memory_space<vmem>>, vector<1x32xf32>
    %709 = vector.broadcast %708 : vector<1x32xf32> to vector<16x32xf32>
    %710 = arith.addf %707, %709 : vector<16x32xf32>
    %711 = arith.addf %710, %536 : vector<16x32xf32>
    %c112 = arith.constant 112 : index
    %c0_244 = arith.constant 0 : index
    %712 = vector.load %arg5[%c112, %c0_244] : memref<192x128xf32, #tpu.memory_space<vmem>>, vector<1x32xf32>
    %c120 = arith.constant 120 : index
    %c0_245 = arith.constant 0 : index
    %713 = vector.load %arg5[%c120, %c0_245] : memref<192x128xf32, #tpu.memory_space<vmem>>, vector<1x32xf32>
    %cst_246 = arith.constant dense<0.000000e+00> : vector<16xf32>
    %714 = vector.multi_reduction <add>, %711, %cst_246 [1] : vector<16x32xf32> to vector<16xf32>
    %715 = vector.shape_cast %714 : vector<16xf32> to vector<16x1xf32>
    %cst_247 = arith.constant 3.200000e+01 : f32
    %716 = vector.broadcast %cst_247 : f32 to vector<16x1xf32>
    %717 = arith.divf %715, %716 : vector<16x1xf32>
    %718 = vector.broadcast %717 : vector<16x1xf32> to vector<16x32xf32>
    %719 = arith.subf %711, %718 : vector<16x32xf32>
    %720 = arith.mulf %719, %719 : vector<16x32xf32>
    %cst_248 = arith.constant dense<0.000000e+00> : vector<16xf32>
    %721 = vector.multi_reduction <add>, %720, %cst_248 [1] : vector<16x32xf32> to vector<16xf32>
    %722 = vector.shape_cast %721 : vector<16xf32> to vector<16x1xf32>
    %cst_249 = arith.constant 3.200000e+01 : f32
    %723 = vector.broadcast %cst_249 : f32 to vector<16x1xf32>
    %724 = arith.divf %722, %723 : vector<16x1xf32>
    %725 = vector.broadcast %717 : vector<16x1xf32> to vector<16x32xf32>
    %726 = arith.subf %711, %725 : vector<16x32xf32>
    %cst_250 = arith.constant 9.99999974E-6 : f32
    %727 = vector.broadcast %cst_250 : f32 to vector<16x1xf32>
    %728 = arith.addf %724, %727 : vector<16x1xf32>
    %729 = math.rsqrt %728 : vector<16x1xf32>
    %730 = vector.broadcast %729 : vector<16x1xf32> to vector<16x32xf32>
    %731 = arith.mulf %726, %730 : vector<16x32xf32>
    %732 = vector.broadcast %712 : vector<1x32xf32> to vector<16x32xf32>
    %733 = arith.mulf %731, %732 : vector<16x32xf32>
    %734 = vector.broadcast %713 : vector<1x32xf32> to vector<16x32xf32>
    %735 = arith.addf %733, %734 : vector<16x32xf32>
    %736 = vector.broadcast %2 : vector<16x1xf32> to vector<16x32xf32>
    %737 = arith.mulf %735, %736 : vector<16x32xf32>
    %c0_251 = arith.constant 0 : index
    %c0_252 = arith.constant 0 : index
    %738 = vector.load %arg6[%c0_251, %c0_252] : memref<16x32xf32, #tpu.memory_space<vmem>>, vector<16x32xf32>
    tpu.vector_store %arg6[%c0_251, %c0_252], %737 {strides = array<i32>} : memref<16x32xf32, #tpu.memory_space<vmem>>, vector<16x32xf32>,
    %cst_253 = arith.constant 0.000000e+00 : f32
    %739 = vector.broadcast %cst_253 : f32 to vector<1x32xf32>
    %740 = vector.extract_strided_slice %737 {offsets = [0, 0], sizes = [15, 32], strides = [1, 1]} : vector<16x32xf32> to vector<15x32xf32>
    %741 = tpu.concatenate %739, %740 in 0 : vector<1x32xf32>, vector<15x32xf32> -> vector<16x32xf32>
    %c-1_i32_254 = arith.constant -1 : i32
    %742 = vector.broadcast %c-1_i32_254 : i32 to vector<16x1xi32>
    %743 = arith.addi %19, %742 : vector<16x1xi32>
    %c0_i32_255 = arith.constant 0 : i32
    %744 = vector.broadcast %c0_i32_255 : i32 to vector<16x1xi32>
    %745 = arith.cmpi sge, %743, %744 : vector<16x1xi32>
    %c-1_i32_256 = arith.constant -1 : i32
    %746 = vector.broadcast %c-1_i32_256 : i32 to vector<16x1xi32>
    %747 = arith.addi %19, %746 : vector<16x1xi32>
    %c8_i32_257 = arith.constant 8 : i32
    %748 = vector.broadcast %c8_i32_257 : i32 to vector<16x1xi32>
    %749 = arith.cmpi slt, %747, %748 : vector<16x1xi32>
    %750 = arith.andi %745, %749 : vector<16x1xi1>
    %cst_258 = arith.constant 0.000000e+00 : f32
    %751 = vector.shape_cast %750 : vector<16x1xi1> to vector<16x1xi1>
    %752 = vector.broadcast %751 : vector<16x1xi1> to vector<16x32xi1>
    %753 = vector.broadcast %cst_258 : f32 to vector<16x32xf32>
    %754 = arith.select %752, %741, %753 : vector<16x32xi1>, vector<16x32xf32>
    %c832 = arith.constant 832 : index
    %c0_259 = arith.constant 0 : index
    %755 = vector.load %arg4[%c832, %c0_259] : memref<1024x128xbf16, #tpu.memory_space<vmem>>, vector<32x32xbf16>
    %756 = arith.truncf %754 : vector<16x32xf32> to vector<16x32xbf16>
    %cst_260 = arith.constant dense<0.000000e+00> : vector<16x32xf32>
    %757 = tpu.matmul %756, %755, %cst_260 {dimension_numbers = #tpu.dot_dimension_numbers<[1], [0], [0], [1], [0, 0, 1, 1], [], []>} : vector<16x32xbf16>, vector<32x32xbf16>, vector<16x32xf32> -> vector<16x32xf32>
    %c864 = arith.constant 864 : index
    %c0_261 = arith.constant 0 : index
    %758 = vector.load %arg4[%c864, %c0_261] : memref<1024x128xbf16, #tpu.memory_space<vmem>>, vector<32x32xbf16>
    %759 = arith.truncf %737 : vector<16x32xf32> to vector<16x32xbf16>
    %cst_262 = arith.constant dense<0.000000e+00> : vector<16x32xf32>
    %760 = tpu.matmul %759, %758, %cst_262 {dimension_numbers = #tpu.dot_dimension_numbers<[1], [0], [0], [1], [0, 0, 1, 1], [], []>} : vector<16x32xbf16>, vector<32x32xbf16>, vector<16x32xf32> -> vector<16x32xf32>
    %761 = arith.addf %757, %760 : vector<16x32xf32>
    %cst_263 = arith.constant 0.000000e+00 : f32
    %762 = vector.broadcast %cst_263 : f32 to vector<1x32xf32>
    %763 = vector.extract_strided_slice %737 {offsets = [1, 0], sizes = [15, 32], strides = [1, 1]} : vector<16x32xf32> to vector<15x32xf32>
    %764 = tpu.concatenate %763, %762 in 0 : vector<15x32xf32>, vector<1x32xf32> -> vector<16x32xf32>
    %c1_i32_264 = arith.constant 1 : i32
    %765 = vector.broadcast %c1_i32_264 : i32 to vector<16x1xi32>
    %766 = arith.addi %19, %765 : vector<16x1xi32>
    %c0_i32_265 = arith.constant 0 : i32
    %767 = vector.broadcast %c0_i32_265 : i32 to vector<16x1xi32>
    %768 = arith.cmpi sge, %766, %767 : vector<16x1xi32>
    %c1_i32_266 = arith.constant 1 : i32
    %769 = vector.broadcast %c1_i32_266 : i32 to vector<16x1xi32>
    %770 = arith.addi %19, %769 : vector<16x1xi32>
    %c8_i32_267 = arith.constant 8 : i32
    %771 = vector.broadcast %c8_i32_267 : i32 to vector<16x1xi32>
    %772 = arith.cmpi slt, %770, %771 : vector<16x1xi32>
    %773 = arith.andi %768, %772 : vector<16x1xi1>
    %cst_268 = arith.constant 0.000000e+00 : f32
    %774 = vector.shape_cast %773 : vector<16x1xi1> to vector<16x1xi1>
    %775 = vector.broadcast %774 : vector<16x1xi1> to vector<16x32xi1>
    %776 = vector.broadcast %cst_268 : f32 to vector<16x32xf32>
    %777 = arith.select %775, %764, %776 : vector<16x32xi1>, vector<16x32xf32>
    %c896 = arith.constant 896 : index
    %c0_269 = arith.constant 0 : index
    %778 = vector.load %arg4[%c896, %c0_269] : memref<1024x128xbf16, #tpu.memory_space<vmem>>, vector<32x32xbf16>
    %779 = arith.truncf %777 : vector<16x32xf32> to vector<16x32xbf16>
    %cst_270 = arith.constant dense<0.000000e+00> : vector<16x32xf32>
    %780 = tpu.matmul %779, %778, %cst_270 {dimension_numbers = #tpu.dot_dimension_numbers<[1], [0], [0], [1], [0, 0, 1, 1], [], []>} : vector<16x32xbf16>, vector<32x32xbf16>, vector<16x32xf32> -> vector<16x32xf32>
    %781 = arith.addf %761, %780 : vector<16x32xf32>
    %c128_271 = arith.constant 128 : index
    %c0_272 = arith.constant 0 : index
    %782 = vector.load %arg5[%c128_271, %c0_272] : memref<192x128xf32, #tpu.memory_space<vmem>>, vector<1x32xf32>
    %783 = vector.broadcast %782 : vector<1x32xf32> to vector<16x32xf32>
    %784 = arith.addf %781, %783 : vector<16x32xf32>
    %cst_273 = arith.constant 0.000000e+00 : f32
    %785 = vector.broadcast %cst_273 : f32 to vector<16x32xf32>
    %786 = arith.maximumf %784, %785 : vector<16x32xf32>
    %c136 = arith.constant 136 : index
    %c0_274 = arith.constant 0 : index
    %787 = vector.load %arg5[%c136, %c0_274] : memref<192x128xf32, #tpu.memory_space<vmem>>, vector<1x32xf32>
    %c144 = arith.constant 144 : index
    %c0_275 = arith.constant 0 : index
    %788 = vector.load %arg5[%c144, %c0_275] : memref<192x128xf32, #tpu.memory_space<vmem>>, vector<1x32xf32>
    %cst_276 = arith.constant dense<0.000000e+00> : vector<16xf32>
    %789 = vector.multi_reduction <add>, %786, %cst_276 [1] : vector<16x32xf32> to vector<16xf32>
    %790 = vector.shape_cast %789 : vector<16xf32> to vector<16x1xf32>
    %cst_277 = arith.constant 3.200000e+01 : f32
    %791 = vector.broadcast %cst_277 : f32 to vector<16x1xf32>
    %792 = arith.divf %790, %791 : vector<16x1xf32>
    %793 = vector.broadcast %792 : vector<16x1xf32> to vector<16x32xf32>
    %794 = arith.subf %786, %793 : vector<16x32xf32>
    %795 = arith.mulf %794, %794 : vector<16x32xf32>
    %cst_278 = arith.constant dense<0.000000e+00> : vector<16xf32>
    %796 = vector.multi_reduction <add>, %795, %cst_278 [1] : vector<16x32xf32> to vector<16xf32>
    %797 = vector.shape_cast %796 : vector<16xf32> to vector<16x1xf32>
    %cst_279 = arith.constant 3.200000e+01 : f32
    %798 = vector.broadcast %cst_279 : f32 to vector<16x1xf32>
    %799 = arith.divf %797, %798 : vector<16x1xf32>
    %800 = vector.broadcast %792 : vector<16x1xf32> to vector<16x32xf32>
    %801 = arith.subf %786, %800 : vector<16x32xf32>
    %cst_280 = arith.constant 9.99999974E-6 : f32
    %802 = vector.broadcast %cst_280 : f32 to vector<16x1xf32>
    %803 = arith.addf %799, %802 : vector<16x1xf32>
    %804 = math.rsqrt %803 : vector<16x1xf32>
    %805 = vector.broadcast %804 : vector<16x1xf32> to vector<16x32xf32>
    %806 = arith.mulf %801, %805 : vector<16x32xf32>
    %807 = vector.broadcast %787 : vector<1x32xf32> to vector<16x32xf32>
    %808 = arith.mulf %806, %807 : vector<16x32xf32>
    %809 = vector.broadcast %788 : vector<1x32xf32> to vector<16x32xf32>
    %810 = arith.addf %808, %809 : vector<16x32xf32>
    %cst_281 = arith.constant 0.000000e+00 : f32
    %811 = vector.broadcast %cst_281 : f32 to vector<1x32xf32>
    %812 = vector.extract_strided_slice %810 {offsets = [0, 0], sizes = [15, 32], strides = [1, 1]} : vector<16x32xf32> to vector<15x32xf32>
    %813 = tpu.concatenate %811, %812 in 0 : vector<1x32xf32>, vector<15x32xf32> -> vector<16x32xf32>
    %c-1_i32_282 = arith.constant -1 : i32
    %814 = vector.broadcast %c-1_i32_282 : i32 to vector<16x1xi32>
    %815 = arith.addi %19, %814 : vector<16x1xi32>
    %c0_i32_283 = arith.constant 0 : i32
    %816 = vector.broadcast %c0_i32_283 : i32 to vector<16x1xi32>
    %817 = arith.cmpi sge, %815, %816 : vector<16x1xi32>
    %c-1_i32_284 = arith.constant -1 : i32
    %818 = vector.broadcast %c-1_i32_284 : i32 to vector<16x1xi32>
    %819 = arith.addi %19, %818 : vector<16x1xi32>
    %c8_i32_285 = arith.constant 8 : i32
    %820 = vector.broadcast %c8_i32_285 : i32 to vector<16x1xi32>
    %821 = arith.cmpi slt, %819, %820 : vector<16x1xi32>
    %822 = arith.andi %817, %821 : vector<16x1xi1>
    %cst_286 = arith.constant 0.000000e+00 : f32
    %823 = vector.shape_cast %822 : vector<16x1xi1> to vector<16x1xi1>
    %824 = vector.broadcast %823 : vector<16x1xi1> to vector<16x32xi1>
    %825 = vector.broadcast %cst_286 : f32 to vector<16x32xf32>
    %826 = arith.select %824, %813, %825 : vector<16x32xi1>, vector<16x32xf32>
    %c928 = arith.constant 928 : index
    %c0_287 = arith.constant 0 : index
    %827 = vector.load %arg4[%c928, %c0_287] : memref<1024x128xbf16, #tpu.memory_space<vmem>>, vector<32x32xbf16>
    %828 = arith.truncf %826 : vector<16x32xf32> to vector<16x32xbf16>
    %cst_288 = arith.constant dense<0.000000e+00> : vector<16x32xf32>
    %829 = tpu.matmul %828, %827, %cst_288 {dimension_numbers = #tpu.dot_dimension_numbers<[1], [0], [0], [1], [0, 0, 1, 1], [], []>} : vector<16x32xbf16>, vector<32x32xbf16>, vector<16x32xf32> -> vector<16x32xf32>
    %c960 = arith.constant 960 : index
    %c0_289 = arith.constant 0 : index
    %830 = vector.load %arg4[%c960, %c0_289] : memref<1024x128xbf16, #tpu.memory_space<vmem>>, vector<32x32xbf16>
    %831 = arith.truncf %810 : vector<16x32xf32> to vector<16x32xbf16>
    %cst_290 = arith.constant dense<0.000000e+00> : vector<16x32xf32>
    %832 = tpu.matmul %831, %830, %cst_290 {dimension_numbers = #tpu.dot_dimension_numbers<[1], [0], [0], [1], [0, 0, 1, 1], [], []>} : vector<16x32xbf16>, vector<32x32xbf16>, vector<16x32xf32> -> vector<16x32xf32>
    %833 = arith.addf %829, %832 : vector<16x32xf32>
    %cst_291 = arith.constant 0.000000e+00 : f32
    %834 = vector.broadcast %cst_291 : f32 to vector<1x32xf32>
    %835 = vector.extract_strided_slice %810 {offsets = [1, 0], sizes = [15, 32], strides = [1, 1]} : vector<16x32xf32> to vector<15x32xf32>
    %836 = tpu.concatenate %835, %834 in 0 : vector<15x32xf32>, vector<1x32xf32> -> vector<16x32xf32>
    %c1_i32_292 = arith.constant 1 : i32
    %837 = vector.broadcast %c1_i32_292 : i32 to vector<16x1xi32>
    %838 = arith.addi %19, %837 : vector<16x1xi32>
    %c0_i32_293 = arith.constant 0 : i32
    %839 = vector.broadcast %c0_i32_293 : i32 to vector<16x1xi32>
    %840 = arith.cmpi sge, %838, %839 : vector<16x1xi32>
    %c1_i32_294 = arith.constant 1 : i32
    %841 = vector.broadcast %c1_i32_294 : i32 to vector<16x1xi32>
    %842 = arith.addi %19, %841 : vector<16x1xi32>
    %c8_i32_295 = arith.constant 8 : i32
    %843 = vector.broadcast %c8_i32_295 : i32 to vector<16x1xi32>
    %844 = arith.cmpi slt, %842, %843 : vector<16x1xi32>
    %845 = arith.andi %840, %844 : vector<16x1xi1>
    %cst_296 = arith.constant 0.000000e+00 : f32
    %846 = vector.shape_cast %845 : vector<16x1xi1> to vector<16x1xi1>
    %847 = vector.broadcast %846 : vector<16x1xi1> to vector<16x32xi1>
    %848 = vector.broadcast %cst_296 : f32 to vector<16x32xf32>
    %849 = arith.select %847, %836, %848 : vector<16x32xi1>, vector<16x32xf32>
    %c992 = arith.constant 992 : index
    %c0_297 = arith.constant 0 : index
    %850 = vector.load %arg4[%c992, %c0_297] : memref<1024x128xbf16, #tpu.memory_space<vmem>>, vector<32x32xbf16>
    %851 = arith.truncf %849 : vector<16x32xf32> to vector<16x32xbf16>
    %cst_298 = arith.constant dense<0.000000e+00> : vector<16x32xf32>
    %852 = tpu.matmul %851, %850, %cst_298 {dimension_numbers = #tpu.dot_dimension_numbers<[1], [0], [0], [1], [0, 0, 1, 1], [], []>} : vector<16x32xbf16>, vector<32x32xbf16>, vector<16x32xf32> -> vector<16x32xf32>
    %853 = arith.addf %833, %852 : vector<16x32xf32>
    %c152 = arith.constant 152 : index
    %c0_299 = arith.constant 0 : index
    %854 = vector.load %arg5[%c152, %c0_299] : memref<192x128xf32, #tpu.memory_space<vmem>>, vector<1x32xf32>
    %855 = vector.broadcast %854 : vector<1x32xf32> to vector<16x32xf32>
    %856 = arith.addf %853, %855 : vector<16x32xf32>
    %cst_300 = arith.constant 0.000000e+00 : f32
    %857 = vector.broadcast %cst_300 : f32 to vector<16x32xf32>
    %858 = arith.maximumf %856, %857 : vector<16x32xf32>
    %c160_301 = arith.constant 160 : index
    %c0_302 = arith.constant 0 : index
    %859 = vector.load %arg5[%c160_301, %c0_302] : memref<192x128xf32, #tpu.memory_space<vmem>>, vector<1x32xf32>
    %c168 = arith.constant 168 : index
    %c0_303 = arith.constant 0 : index
    %860 = vector.load %arg5[%c168, %c0_303] : memref<192x128xf32, #tpu.memory_space<vmem>>, vector<1x32xf32>
    %cst_304 = arith.constant dense<0.000000e+00> : vector<16xf32>
    %861 = vector.multi_reduction <add>, %858, %cst_304 [1] : vector<16x32xf32> to vector<16xf32>
    %862 = vector.shape_cast %861 : vector<16xf32> to vector<16x1xf32>
    %cst_305 = arith.constant 3.200000e+01 : f32
    %863 = vector.broadcast %cst_305 : f32 to vector<16x1xf32>
    %864 = arith.divf %862, %863 : vector<16x1xf32>
    %865 = vector.broadcast %864 : vector<16x1xf32> to vector<16x32xf32>
    %866 = arith.subf %858, %865 : vector<16x32xf32>
    %867 = arith.mulf %866, %866 : vector<16x32xf32>
    %cst_306 = arith.constant dense<0.000000e+00> : vector<16xf32>
    %868 = vector.multi_reduction <add>, %867, %cst_306 [1] : vector<16x32xf32> to vector<16xf32>
    %869 = vector.shape_cast %868 : vector<16xf32> to vector<16x1xf32>
    %cst_307 = arith.constant 3.200000e+01 : f32
    %870 = vector.broadcast %cst_307 : f32 to vector<16x1xf32>
    %871 = arith.divf %869, %870 : vector<16x1xf32>
    %872 = vector.broadcast %864 : vector<16x1xf32> to vector<16x32xf32>
    %873 = arith.subf %858, %872 : vector<16x32xf32>
    %cst_308 = arith.constant 9.99999974E-6 : f32
    %874 = vector.broadcast %cst_308 : f32 to vector<16x1xf32>
    %875 = arith.addf %871, %874 : vector<16x1xf32>
    %876 = math.rsqrt %875 : vector<16x1xf32>
    %877 = vector.broadcast %876 : vector<16x1xf32> to vector<16x32xf32>
    %878 = arith.mulf %873, %877 : vector<16x32xf32>
    %879 = vector.broadcast %859 : vector<1x32xf32> to vector<16x32xf32>
    %880 = arith.mulf %878, %879 : vector<16x32xf32>
    %881 = vector.broadcast %860 : vector<1x32xf32> to vector<16x32xf32>
    %882 = arith.addf %880, %881 : vector<16x32xf32>
    %c176 = arith.constant 176 : index
    %c0_309 = arith.constant 0 : index
    %883 = vector.load %arg5[%c176, %c0_309] : memref<192x128xf32, #tpu.memory_space<vmem>>, vector<1x32xf32>
    %c184 = arith.constant 184 : index
    %c0_310 = arith.constant 0 : index
    %884 = vector.load %arg5[%c184, %c0_310] : memref<192x128xf32, #tpu.memory_space<vmem>>, vector<1x1xf32>
    %885 = arith.truncf %883 : vector<1x32xf32> to vector<1x32xbf16>
    %886 = arith.truncf %882 : vector<16x32xf32> to vector<16x32xbf16>
    %cst_311 = arith.constant dense<0.000000e+00> : vector<1x16xf32>
    %887 = tpu.matmul %885, %886, %cst_311 {dimension_numbers = #tpu.dot_dimension_numbers<[1], [1], [0], [0], [0, 0, 1, 0], [], []>} : vector<1x32xbf16>, vector<16x32xbf16>, vector<1x16xf32> -> vector<1x16xf32>
    %888 = vector.broadcast %884 : vector<1x1xf32> to vector<1x16xf32>
    %889 = arith.addf %887, %888 : vector<1x16xf32>
    %c0_312 = arith.constant 0 : index
    %c0_313 = arith.constant 0 : index
    %890 = vector.load %arg7[%c0_312, %c0_313] : memref<1x16xf32, #tpu.memory_space<vmem>>, vector<1x16xf32>
    tpu.vector_store %arg7[%c0_312, %c0_313], %889 {strides = array<i32>} : memref<1x16xf32, #tpu.memory_space<vmem>>, vector<1x16xf32>,
    return
  }
  func.func @transform_0(%arg0: i32) -> (i32, i32) {
    %c0_i32 = arith.constant 0 : i32
    %c0_i32_0 = arith.constant 0 : i32
    %c0_i32_1 = arith.constant 0 : i32
    return %c0_i32, %c0_i32_0 : i32, i32
  }
  func.func @transform_1(%arg0: i32) -> (i32, i32) {
    %c0_i32 = arith.constant 0 : i32
    %c0_i32_0 = arith.constant 0 : i32
    %c0_i32_1 = arith.constant 0 : i32
    return %c0_i32, %c0_i32_0 : i32, i32
  }
  func.func @transform_2(%arg0: i32) -> (i32, i32) {
    %c0_i32 = arith.constant 0 : i32
    %c0_i32_0 = arith.constant 0 : i32
    %c0_i32_1 = arith.constant 0 : i32
    return %c0_i32, %c0_i32_0 : i32, i32
  }
  func.func @transform_3(%arg0: i32) -> (i32, i32) {
    %c0_i32 = arith.constant 0 : i32
    %c0_i32_0 = arith.constant 0 : i32
    %c0_i32_1 = arith.constant 0 : i32
    return %c0_i32, %c0_i32_0 : i32, i32
  }
  func.func @transform_4(%arg0: i32) -> (i32, i32) {
    %c0_i32 = arith.constant 0 : i32
    %c0_i32_0 = arith.constant 0 : i32
    %c0_i32_1 = arith.constant 0 : i32
    return %c0_i32, %c0_i32_0 : i32, i32
  }
  func.func @transform_5(%arg0: i32) -> (i32, i32) {
    %c0_i32 = arith.constant 0 : i32
    %c0_i32_0 = arith.constant 0 : i32
    %c0_i32_1 = arith.constant 0 : i32
    return %c0_i32, %c0_i32_0 : i32, i32
  }
  func.func @transform_6(%arg0: i32) -> (i32, i32) {
    %c0_i32 = arith.constant 0 : i32
    %c0_i32_0 = arith.constant 0 : i32
    %c0_i32_1 = arith.constant 0 : i32
    return %c0_i32, %c0_i32_0 : i32, i32
  }
}

module attributes {stable_mosaic.version = 11 : i64} {
  func.func @decoder_kernel(%arg0: i32, %arg1: memref<32x32xf32, #tpu.memory_space<vmem>>, %arg2: memref<32x1xi32, #tpu.memory_space<vmem>>, %arg3: memref<2x16xf32, #tpu.memory_space<vmem>>, %arg4: memref<32x1xf32, #tpu.memory_space<vmem>>, %arg5: memref<32x2xf32, #tpu.memory_space<vmem>>, %arg6: memref<1248x128xbf16, #tpu.memory_space<vmem>>, %arg7: memref<360x128xf32, #tpu.memory_space<vmem>>, %arg8: memref<32x16xf32, #tpu.memory_space<vmem>>, %arg9: memref<2x32xf32, #tpu.memory_space<vmem>>) attributes {dimension_semantics = [#tpu.dimension_semantics<arbitrary>], iteration_bounds = array<i64: 1>, scalar_prefetch = 0 : i64, scratch_operands = 0 : i64, tpu.core_type = #tpu.core_type<tc>, window_params = [{pipeline_mode = #tpu.pipeline_mode<synchronous>, transform_indices = @transform_0, window_bounds = array<i64: 32, 32>}, {pipeline_mode = #tpu.pipeline_mode<synchronous>, transform_indices = @transform_1, window_bounds = array<i64: 32, 1>}, {pipeline_mode = #tpu.pipeline_mode<synchronous>, transform_indices = @transform_2, window_bounds = array<i64: 2, 16>}, {pipeline_mode = #tpu.pipeline_mode<synchronous>, transform_indices = @transform_3, window_bounds = array<i64: 32, 1>}, {pipeline_mode = #tpu.pipeline_mode<synchronous>, transform_indices = @transform_4, window_bounds = array<i64: 32, 2>}, {pipeline_mode = #tpu.pipeline_mode<synchronous>, transform_indices = @transform_5, window_bounds = array<i64: 1248, 128>}, {pipeline_mode = #tpu.pipeline_mode<synchronous>, transform_indices = @transform_6, window_bounds = array<i64: 360, 128>}, {pipeline_mode = #tpu.pipeline_mode<synchronous>, transform_indices = @transform_7, window_bounds = array<i64: 32, 16>}, {pipeline_mode = #tpu.pipeline_mode<synchronous>, transform_indices = @transform_8, window_bounds = array<i64: 2, 32>}]} {
    %c0 = arith.constant 0 : index
    %c0_0 = arith.constant 0 : index
    %0 = vector.load %arg1[%c0, %c0_0] : memref<32x32xf32, #tpu.memory_space<vmem>>, vector<32x32xf32>
    %c0_1 = arith.constant 0 : index
    %c0_2 = arith.constant 0 : index
    %1 = vector.load %arg3[%c0_1, %c0_2] : memref<2x16xf32, #tpu.memory_space<vmem>>, vector<2x16xf32>
    %c0_3 = arith.constant 0 : index
    %c0_4 = arith.constant 0 : index
    %2 = vector.load %arg4[%c0_3, %c0_4] : memref<32x1xf32, #tpu.memory_space<vmem>>, vector<32x1xf32>
    %3 = tpu.iota {dimensions = array<i32: 0>} : vector<32x1xi32>
    %c16_i32 = arith.constant 16 : i32
    %c0_i32 = arith.constant 0 : i32
    %4 = arith.cmpi eq, %c16_i32, %c0_i32 : i32
    %c1_i32 = arith.constant 1 : i32
    %5 = arith.select %4, %c1_i32, %c16_i32 : i32
    %6 = vector.broadcast %5 : i32 to vector<32x1xi32>
    %7 = arith.remsi %3, %6 : vector<32x1xi32>
    %c0_i32_5 = arith.constant 0 : i32
    %8 = vector.broadcast %c0_i32_5 : i32 to vector<32x1xi32>
    %9 = arith.cmpi ne, %7, %8 : vector<32x1xi32>
    %c0_i32_6 = arith.constant 0 : i32
    %10 = vector.broadcast %c0_i32_6 : i32 to vector<32x1xi32>
    %11 = arith.cmpi slt, %7, %10 : vector<32x1xi32>
    %c0_i32_7 = arith.constant 0 : i32
    %12 = arith.cmpi slt, %5, %c0_i32_7 : i32
    %13 = vector.broadcast %12 : i1 to vector<32x1xi1>
    %14 = vector.broadcast %13 : vector<32x1xi1> to vector<32x1xi1>
    %15 = arith.xori %11, %14 : vector<32x1xi1>
    %16 = arith.andi %15, %9 : vector<32x1xi1>
    %17 = vector.broadcast %5 : i32 to vector<32x1xi32>
    %18 = arith.addi %7, %17 : vector<32x1xi32>
    %19 = arith.select %16, %18, %7 : vector<32x1xi1>, vector<32x1xi32>
    %cst = arith.constant 0.000000e+00 : f32
    %20 = vector.broadcast %cst : f32 to vector<1x32xf32>
    %21 = vector.extract_strided_slice %0 {offsets = [0, 0], sizes = [31, 32], strides = [1, 1]} : vector<32x32xf32> to vector<31x32xf32>
    %22 = tpu.concatenate %20, %21 in 0 : vector<1x32xf32>, vector<31x32xf32> -> vector<32x32xf32>
    %c-1_i32 = arith.constant -1 : i32
    %23 = vector.broadcast %c-1_i32 : i32 to vector<32x1xi32>
    %24 = arith.addi %19, %23 : vector<32x1xi32>
    %c0_i32_8 = arith.constant 0 : i32
    %25 = vector.broadcast %c0_i32_8 : i32 to vector<32x1xi32>
    %26 = arith.cmpi sge, %24, %25 : vector<32x1xi32>
    %c-1_i32_9 = arith.constant -1 : i32
    %27 = vector.broadcast %c-1_i32_9 : i32 to vector<32x1xi32>
    %28 = arith.addi %19, %27 : vector<32x1xi32>
    %c16_i32_10 = arith.constant 16 : i32
    %29 = vector.broadcast %c16_i32_10 : i32 to vector<32x1xi32>
    %30 = arith.cmpi slt, %28, %29 : vector<32x1xi32>
    %31 = arith.andi %26, %30 : vector<32x1xi1>
    %cst_11 = arith.constant 0.000000e+00 : f32
    %32 = vector.shape_cast %31 : vector<32x1xi1> to vector<32x1xi1>
    %33 = vector.broadcast %32 : vector<32x1xi1> to vector<32x32xi1>
    %34 = vector.broadcast %cst_11 : f32 to vector<32x32xf32>
    %35 = arith.select %33, %22, %34 : vector<32x32xi1>, vector<32x32xf32>
    %c832 = arith.constant 832 : index
    %c0_12 = arith.constant 0 : index
    %36 = vector.load %arg6[%c832, %c0_12] : memref<1248x128xbf16, #tpu.memory_space<vmem>>, vector<32x32xbf16>
    %37 = arith.truncf %35 : vector<32x32xf32> to vector<32x32xbf16>
    %cst_13 = arith.constant dense<0.000000e+00> : vector<32x32xf32>
    %38 = tpu.matmul %37, %36, %cst_13 {dimension_numbers = #tpu.dot_dimension_numbers<[1], [0], [0], [1], [0, 0, 1, 1], [], []>} : vector<32x32xbf16>, vector<32x32xbf16>, vector<32x32xf32> -> vector<32x32xf32>
    %c864 = arith.constant 864 : index
    %c0_14 = arith.constant 0 : index
    %39 = vector.load %arg6[%c864, %c0_14] : memref<1248x128xbf16, #tpu.memory_space<vmem>>, vector<32x32xbf16>
    %40 = arith.truncf %0 : vector<32x32xf32> to vector<32x32xbf16>
    %cst_15 = arith.constant dense<0.000000e+00> : vector<32x32xf32>
    %41 = tpu.matmul %40, %39, %cst_15 {dimension_numbers = #tpu.dot_dimension_numbers<[1], [0], [0], [1], [0, 0, 1, 1], [], []>} : vector<32x32xbf16>, vector<32x32xbf16>, vector<32x32xf32> -> vector<32x32xf32>
    %42 = arith.addf %38, %41 : vector<32x32xf32>
    %cst_16 = arith.constant 0.000000e+00 : f32
    %43 = vector.broadcast %cst_16 : f32 to vector<1x32xf32>
    %44 = vector.extract_strided_slice %0 {offsets = [1, 0], sizes = [31, 32], strides = [1, 1]} : vector<32x32xf32> to vector<31x32xf32>
    %45 = tpu.concatenate %44, %43 in 0 : vector<31x32xf32>, vector<1x32xf32> -> vector<32x32xf32>
    %c1_i32_17 = arith.constant 1 : i32
    %46 = vector.broadcast %c1_i32_17 : i32 to vector<32x1xi32>
    %47 = arith.addi %19, %46 : vector<32x1xi32>
    %c0_i32_18 = arith.constant 0 : i32
    %48 = vector.broadcast %c0_i32_18 : i32 to vector<32x1xi32>
    %49 = arith.cmpi sge, %47, %48 : vector<32x1xi32>
    %c1_i32_19 = arith.constant 1 : i32
    %50 = vector.broadcast %c1_i32_19 : i32 to vector<32x1xi32>
    %51 = arith.addi %19, %50 : vector<32x1xi32>
    %c16_i32_20 = arith.constant 16 : i32
    %52 = vector.broadcast %c16_i32_20 : i32 to vector<32x1xi32>
    %53 = arith.cmpi slt, %51, %52 : vector<32x1xi32>
    %54 = arith.andi %49, %53 : vector<32x1xi1>
    %cst_21 = arith.constant 0.000000e+00 : f32
    %55 = vector.shape_cast %54 : vector<32x1xi1> to vector<32x1xi1>
    %56 = vector.broadcast %55 : vector<32x1xi1> to vector<32x32xi1>
    %57 = vector.broadcast %cst_21 : f32 to vector<32x32xf32>
    %58 = arith.select %56, %45, %57 : vector<32x32xi1>, vector<32x32xf32>
    %c896 = arith.constant 896 : index
    %c0_22 = arith.constant 0 : index
    %59 = vector.load %arg6[%c896, %c0_22] : memref<1248x128xbf16, #tpu.memory_space<vmem>>, vector<32x32xbf16>
    %60 = arith.truncf %58 : vector<32x32xf32> to vector<32x32xbf16>
    %cst_23 = arith.constant dense<0.000000e+00> : vector<32x32xf32>
    %61 = tpu.matmul %60, %59, %cst_23 {dimension_numbers = #tpu.dot_dimension_numbers<[1], [0], [0], [1], [0, 0, 1, 1], [], []>} : vector<32x32xbf16>, vector<32x32xbf16>, vector<32x32xf32> -> vector<32x32xf32>
    %62 = arith.addf %42, %61 : vector<32x32xf32>
    %c128 = arith.constant 128 : index
    %c0_24 = arith.constant 0 : index
    %63 = vector.load %arg7[%c128, %c0_24] : memref<360x128xf32, #tpu.memory_space<vmem>>, vector<1x32xf32>
    %64 = vector.broadcast %63 : vector<1x32xf32> to vector<32x32xf32>
    %65 = arith.addf %62, %64 : vector<32x32xf32>
    %cst_25 = arith.constant 0.000000e+00 : f32
    %66 = vector.broadcast %cst_25 : f32 to vector<32x32xf32>
    %67 = arith.maximumf %65, %66 : vector<32x32xf32>
    %c136 = arith.constant 136 : index
    %c0_26 = arith.constant 0 : index
    %68 = vector.load %arg7[%c136, %c0_26] : memref<360x128xf32, #tpu.memory_space<vmem>>, vector<1x32xf32>
    %c144 = arith.constant 144 : index
    %c0_27 = arith.constant 0 : index
    %69 = vector.load %arg7[%c144, %c0_27] : memref<360x128xf32, #tpu.memory_space<vmem>>, vector<1x32xf32>
    %cst_28 = arith.constant dense<0.000000e+00> : vector<32xf32>
    %70 = vector.multi_reduction <add>, %67, %cst_28 [1] : vector<32x32xf32> to vector<32xf32>
    %71 = vector.shape_cast %70 : vector<32xf32> to vector<32x1xf32>
    %cst_29 = arith.constant 3.200000e+01 : f32
    %72 = vector.broadcast %cst_29 : f32 to vector<32x1xf32>
    %73 = arith.divf %71, %72 : vector<32x1xf32>
    %74 = vector.broadcast %73 : vector<32x1xf32> to vector<32x32xf32>
    %75 = arith.subf %67, %74 : vector<32x32xf32>
    %76 = arith.mulf %75, %75 : vector<32x32xf32>
    %cst_30 = arith.constant dense<0.000000e+00> : vector<32xf32>
    %77 = vector.multi_reduction <add>, %76, %cst_30 [1] : vector<32x32xf32> to vector<32xf32>
    %78 = vector.shape_cast %77 : vector<32xf32> to vector<32x1xf32>
    %cst_31 = arith.constant 3.200000e+01 : f32
    %79 = vector.broadcast %cst_31 : f32 to vector<32x1xf32>
    %80 = arith.divf %78, %79 : vector<32x1xf32>
    %81 = vector.broadcast %73 : vector<32x1xf32> to vector<32x32xf32>
    %82 = arith.subf %67, %81 : vector<32x32xf32>
    %cst_32 = arith.constant 9.99999974E-6 : f32
    %83 = vector.broadcast %cst_32 : f32 to vector<32x1xf32>
    %84 = arith.addf %80, %83 : vector<32x1xf32>
    %85 = math.rsqrt %84 : vector<32x1xf32>
    %86 = vector.broadcast %85 : vector<32x1xf32> to vector<32x32xf32>
    %87 = arith.mulf %82, %86 : vector<32x32xf32>
    %88 = vector.broadcast %68 : vector<1x32xf32> to vector<32x32xf32>
    %89 = arith.mulf %87, %88 : vector<32x32xf32>
    %90 = vector.broadcast %69 : vector<1x32xf32> to vector<32x32xf32>
    %91 = arith.addf %89, %90 : vector<32x32xf32>
    %cst_33 = arith.constant 0.000000e+00 : f32
    %92 = vector.broadcast %cst_33 : f32 to vector<1x32xf32>
    %93 = vector.extract_strided_slice %91 {offsets = [0, 0], sizes = [31, 32], strides = [1, 1]} : vector<32x32xf32> to vector<31x32xf32>
    %94 = tpu.concatenate %92, %93 in 0 : vector<1x32xf32>, vector<31x32xf32> -> vector<32x32xf32>
    %c-1_i32_34 = arith.constant -1 : i32
    %95 = vector.broadcast %c-1_i32_34 : i32 to vector<32x1xi32>
    %96 = arith.addi %19, %95 : vector<32x1xi32>
    %c0_i32_35 = arith.constant 0 : i32
    %97 = vector.broadcast %c0_i32_35 : i32 to vector<32x1xi32>
    %98 = arith.cmpi sge, %96, %97 : vector<32x1xi32>
    %c-1_i32_36 = arith.constant -1 : i32
    %99 = vector.broadcast %c-1_i32_36 : i32 to vector<32x1xi32>
    %100 = arith.addi %19, %99 : vector<32x1xi32>
    %c16_i32_37 = arith.constant 16 : i32
    %101 = vector.broadcast %c16_i32_37 : i32 to vector<32x1xi32>
    %102 = arith.cmpi slt, %100, %101 : vector<32x1xi32>
    %103 = arith.andi %98, %102 : vector<32x1xi1>
    %cst_38 = arith.constant 0.000000e+00 : f32
    %104 = vector.shape_cast %103 : vector<32x1xi1> to vector<32x1xi1>
    %105 = vector.broadcast %104 : vector<32x1xi1> to vector<32x32xi1>
    %106 = vector.broadcast %cst_38 : f32 to vector<32x32xf32>
    %107 = arith.select %105, %94, %106 : vector<32x32xi1>, vector<32x32xf32>
    %c928 = arith.constant 928 : index
    %c0_39 = arith.constant 0 : index
    %108 = vector.load %arg6[%c928, %c0_39] : memref<1248x128xbf16, #tpu.memory_space<vmem>>, vector<32x32xbf16>
    %109 = arith.truncf %107 : vector<32x32xf32> to vector<32x32xbf16>
    %cst_40 = arith.constant dense<0.000000e+00> : vector<32x32xf32>
    %110 = tpu.matmul %109, %108, %cst_40 {dimension_numbers = #tpu.dot_dimension_numbers<[1], [0], [0], [1], [0, 0, 1, 1], [], []>} : vector<32x32xbf16>, vector<32x32xbf16>, vector<32x32xf32> -> vector<32x32xf32>
    %c960 = arith.constant 960 : index
    %c0_41 = arith.constant 0 : index
    %111 = vector.load %arg6[%c960, %c0_41] : memref<1248x128xbf16, #tpu.memory_space<vmem>>, vector<32x32xbf16>
    %112 = arith.truncf %91 : vector<32x32xf32> to vector<32x32xbf16>
    %cst_42 = arith.constant dense<0.000000e+00> : vector<32x32xf32>
    %113 = tpu.matmul %112, %111, %cst_42 {dimension_numbers = #tpu.dot_dimension_numbers<[1], [0], [0], [1], [0, 0, 1, 1], [], []>} : vector<32x32xbf16>, vector<32x32xbf16>, vector<32x32xf32> -> vector<32x32xf32>
    %114 = arith.addf %110, %113 : vector<32x32xf32>
    %cst_43 = arith.constant 0.000000e+00 : f32
    %115 = vector.broadcast %cst_43 : f32 to vector<1x32xf32>
    %116 = vector.extract_strided_slice %91 {offsets = [1, 0], sizes = [31, 32], strides = [1, 1]} : vector<32x32xf32> to vector<31x32xf32>
    %117 = tpu.concatenate %116, %115 in 0 : vector<31x32xf32>, vector<1x32xf32> -> vector<32x32xf32>
    %c1_i32_44 = arith.constant 1 : i32
    %118 = vector.broadcast %c1_i32_44 : i32 to vector<32x1xi32>
    %119 = arith.addi %19, %118 : vector<32x1xi32>
    %c0_i32_45 = arith.constant 0 : i32
    %120 = vector.broadcast %c0_i32_45 : i32 to vector<32x1xi32>
    %121 = arith.cmpi sge, %119, %120 : vector<32x1xi32>
    %c1_i32_46 = arith.constant 1 : i32
    %122 = vector.broadcast %c1_i32_46 : i32 to vector<32x1xi32>
    %123 = arith.addi %19, %122 : vector<32x1xi32>
    %c16_i32_47 = arith.constant 16 : i32
    %124 = vector.broadcast %c16_i32_47 : i32 to vector<32x1xi32>
    %125 = arith.cmpi slt, %123, %124 : vector<32x1xi32>
    %126 = arith.andi %121, %125 : vector<32x1xi1>
    %cst_48 = arith.constant 0.000000e+00 : f32
    %127 = vector.shape_cast %126 : vector<32x1xi1> to vector<32x1xi1>
    %128 = vector.broadcast %127 : vector<32x1xi1> to vector<32x32xi1>
    %129 = vector.broadcast %cst_48 : f32 to vector<32x32xf32>
    %130 = arith.select %128, %117, %129 : vector<32x32xi1>, vector<32x32xf32>
    %c992 = arith.constant 992 : index
    %c0_49 = arith.constant 0 : index
    %131 = vector.load %arg6[%c992, %c0_49] : memref<1248x128xbf16, #tpu.memory_space<vmem>>, vector<32x32xbf16>
    %132 = arith.truncf %130 : vector<32x32xf32> to vector<32x32xbf16>
    %cst_50 = arith.constant dense<0.000000e+00> : vector<32x32xf32>
    %133 = tpu.matmul %132, %131, %cst_50 {dimension_numbers = #tpu.dot_dimension_numbers<[1], [0], [0], [1], [0, 0, 1, 1], [], []>} : vector<32x32xbf16>, vector<32x32xbf16>, vector<32x32xf32> -> vector<32x32xf32>
    %134 = arith.addf %114, %133 : vector<32x32xf32>
    %c152 = arith.constant 152 : index
    %c0_51 = arith.constant 0 : index
    %135 = vector.load %arg7[%c152, %c0_51] : memref<360x128xf32, #tpu.memory_space<vmem>>, vector<1x32xf32>
    %136 = vector.broadcast %135 : vector<1x32xf32> to vector<32x32xf32>
    %137 = arith.addf %134, %136 : vector<32x32xf32>
    %cst_52 = arith.constant 0.000000e+00 : f32
    %138 = vector.broadcast %cst_52 : f32 to vector<32x32xf32>
    %139 = arith.maximumf %137, %138 : vector<32x32xf32>
    %c160 = arith.constant 160 : index
    %c0_53 = arith.constant 0 : index
    %140 = vector.load %arg7[%c160, %c0_53] : memref<360x128xf32, #tpu.memory_space<vmem>>, vector<1x32xf32>
    %c168 = arith.constant 168 : index
    %c0_54 = arith.constant 0 : index
    %141 = vector.load %arg7[%c168, %c0_54] : memref<360x128xf32, #tpu.memory_space<vmem>>, vector<1x32xf32>
    %cst_55 = arith.constant dense<0.000000e+00> : vector<32xf32>
    %142 = vector.multi_reduction <add>, %139, %cst_55 [1] : vector<32x32xf32> to vector<32xf32>
    %143 = vector.shape_cast %142 : vector<32xf32> to vector<32x1xf32>
    %cst_56 = arith.constant 3.200000e+01 : f32
    %144 = vector.broadcast %cst_56 : f32 to vector<32x1xf32>
    %145 = arith.divf %143, %144 : vector<32x1xf32>
    %146 = vector.broadcast %145 : vector<32x1xf32> to vector<32x32xf32>
    %147 = arith.subf %139, %146 : vector<32x32xf32>
    %148 = arith.mulf %147, %147 : vector<32x32xf32>
    %cst_57 = arith.constant dense<0.000000e+00> : vector<32xf32>
    %149 = vector.multi_reduction <add>, %148, %cst_57 [1] : vector<32x32xf32> to vector<32xf32>
    %150 = vector.shape_cast %149 : vector<32xf32> to vector<32x1xf32>
    %cst_58 = arith.constant 3.200000e+01 : f32
    %151 = vector.broadcast %cst_58 : f32 to vector<32x1xf32>
    %152 = arith.divf %150, %151 : vector<32x1xf32>
    %153 = vector.broadcast %145 : vector<32x1xf32> to vector<32x32xf32>
    %154 = arith.subf %139, %153 : vector<32x32xf32>
    %cst_59 = arith.constant 9.99999974E-6 : f32
    %155 = vector.broadcast %cst_59 : f32 to vector<32x1xf32>
    %156 = arith.addf %152, %155 : vector<32x1xf32>
    %157 = math.rsqrt %156 : vector<32x1xf32>
    %158 = vector.broadcast %157 : vector<32x1xf32> to vector<32x32xf32>
    %159 = arith.mulf %154, %158 : vector<32x32xf32>
    %160 = vector.broadcast %140 : vector<1x32xf32> to vector<32x32xf32>
    %161 = arith.mulf %159, %160 : vector<32x32xf32>
    %162 = vector.broadcast %141 : vector<1x32xf32> to vector<32x32xf32>
    %163 = arith.addf %161, %162 : vector<32x32xf32>
    %c176 = arith.constant 176 : index
    %c0_60 = arith.constant 0 : index
    %164 = vector.load %arg7[%c176, %c0_60] : memref<360x128xf32, #tpu.memory_space<vmem>>, vector<1x32xf32>
    %c184 = arith.constant 184 : index
    %c0_61 = arith.constant 0 : index
    %165 = vector.load %arg7[%c184, %c0_61] : memref<360x128xf32, #tpu.memory_space<vmem>>, vector<1x1xf32>
    %166 = arith.truncf %164 : vector<1x32xf32> to vector<1x32xbf16>
    %167 = arith.truncf %163 : vector<32x32xf32> to vector<32x32xbf16>
    %cst_62 = arith.constant dense<0.000000e+00> : vector<1x32xf32>
    %168 = tpu.matmul %166, %167, %cst_62 {dimension_numbers = #tpu.dot_dimension_numbers<[1], [1], [0], [0], [0, 0, 1, 0], [], []>} : vector<1x32xbf16>, vector<32x32xbf16>, vector<1x32xf32> -> vector<1x32xf32>
    %169 = vector.broadcast %165 : vector<1x1xf32> to vector<1x32xf32>
    %170 = arith.addf %168, %169 : vector<1x32xf32>
    %cst_63 = arith.constant 0.000000e+00 : f32
    %171 = vector.broadcast %cst_63 : f32 to vector<1x32xf32>
    %172 = vector.extract_strided_slice %0 {offsets = [0, 0], sizes = [31, 32], strides = [1, 1]} : vector<32x32xf32> to vector<31x32xf32>
    %173 = tpu.concatenate %171, %172 in 0 : vector<1x32xf32>, vector<31x32xf32> -> vector<32x32xf32>
    %c-1_i32_64 = arith.constant -1 : i32
    %174 = vector.broadcast %c-1_i32_64 : i32 to vector<32x1xi32>
    %175 = arith.addi %19, %174 : vector<32x1xi32>
    %c0_i32_65 = arith.constant 0 : i32
    %176 = vector.broadcast %c0_i32_65 : i32 to vector<32x1xi32>
    %177 = arith.cmpi sge, %175, %176 : vector<32x1xi32>
    %c-1_i32_66 = arith.constant -1 : i32
    %178 = vector.broadcast %c-1_i32_66 : i32 to vector<32x1xi32>
    %179 = arith.addi %19, %178 : vector<32x1xi32>
    %c16_i32_67 = arith.constant 16 : i32
    %180 = vector.broadcast %c16_i32_67 : i32 to vector<32x1xi32>
    %181 = arith.cmpi slt, %179, %180 : vector<32x1xi32>
    %182 = arith.andi %177, %181 : vector<32x1xi1>
    %cst_68 = arith.constant 0.000000e+00 : f32
    %183 = vector.shape_cast %182 : vector<32x1xi1> to vector<32x1xi1>
    %184 = vector.broadcast %183 : vector<32x1xi1> to vector<32x32xi1>
    %185 = vector.broadcast %cst_68 : f32 to vector<32x32xf32>
    %186 = arith.select %184, %173, %185 : vector<32x32xi1>, vector<32x32xf32>
    %c1024 = arith.constant 1024 : index
    %c0_69 = arith.constant 0 : index
    %187 = vector.load %arg6[%c1024, %c0_69] : memref<1248x128xbf16, #tpu.memory_space<vmem>>, vector<32x32xbf16>
    %188 = arith.truncf %186 : vector<32x32xf32> to vector<32x32xbf16>
    %cst_70 = arith.constant dense<0.000000e+00> : vector<32x32xf32>
    %189 = tpu.matmul %188, %187, %cst_70 {dimension_numbers = #tpu.dot_dimension_numbers<[1], [0], [0], [1], [0, 0, 1, 1], [], []>} : vector<32x32xbf16>, vector<32x32xbf16>, vector<32x32xf32> -> vector<32x32xf32>
    %c1056 = arith.constant 1056 : index
    %c0_71 = arith.constant 0 : index
    %190 = vector.load %arg6[%c1056, %c0_71] : memref<1248x128xbf16, #tpu.memory_space<vmem>>, vector<32x32xbf16>
    %191 = arith.truncf %0 : vector<32x32xf32> to vector<32x32xbf16>
    %cst_72 = arith.constant dense<0.000000e+00> : vector<32x32xf32>
    %192 = tpu.matmul %191, %190, %cst_72 {dimension_numbers = #tpu.dot_dimension_numbers<[1], [0], [0], [1], [0, 0, 1, 1], [], []>} : vector<32x32xbf16>, vector<32x32xbf16>, vector<32x32xf32> -> vector<32x32xf32>
    %193 = arith.addf %189, %192 : vector<32x32xf32>
    %cst_73 = arith.constant 0.000000e+00 : f32
    %194 = vector.broadcast %cst_73 : f32 to vector<1x32xf32>
    %195 = vector.extract_strided_slice %0 {offsets = [1, 0], sizes = [31, 32], strides = [1, 1]} : vector<32x32xf32> to vector<31x32xf32>
    %196 = tpu.concatenate %195, %194 in 0 : vector<31x32xf32>, vector<1x32xf32> -> vector<32x32xf32>
    %c1_i32_74 = arith.constant 1 : i32
    %197 = vector.broadcast %c1_i32_74 : i32 to vector<32x1xi32>
    %198 = arith.addi %19, %197 : vector<32x1xi32>
    %c0_i32_75 = arith.constant 0 : i32
    %199 = vector.broadcast %c0_i32_75 : i32 to vector<32x1xi32>
    %200 = arith.cmpi sge, %198, %199 : vector<32x1xi32>
    %c1_i32_76 = arith.constant 1 : i32
    %201 = vector.broadcast %c1_i32_76 : i32 to vector<32x1xi32>
    %202 = arith.addi %19, %201 : vector<32x1xi32>
    %c16_i32_77 = arith.constant 16 : i32
    %203 = vector.broadcast %c16_i32_77 : i32 to vector<32x1xi32>
    %204 = arith.cmpi slt, %202, %203 : vector<32x1xi32>
    %205 = arith.andi %200, %204 : vector<32x1xi1>
    %cst_78 = arith.constant 0.000000e+00 : f32
    %206 = vector.shape_cast %205 : vector<32x1xi1> to vector<32x1xi1>
    %207 = vector.broadcast %206 : vector<32x1xi1> to vector<32x32xi1>
    %208 = vector.broadcast %cst_78 : f32 to vector<32x32xf32>
    %209 = arith.select %207, %196, %208 : vector<32x32xi1>, vector<32x32xf32>
    %c1088 = arith.constant 1088 : index
    %c0_79 = arith.constant 0 : index
    %210 = vector.load %arg6[%c1088, %c0_79] : memref<1248x128xbf16, #tpu.memory_space<vmem>>, vector<32x32xbf16>
    %211 = arith.truncf %209 : vector<32x32xf32> to vector<32x32xbf16>
    %cst_80 = arith.constant dense<0.000000e+00> : vector<32x32xf32>
    %212 = tpu.matmul %211, %210, %cst_80 {dimension_numbers = #tpu.dot_dimension_numbers<[1], [0], [0], [1], [0, 0, 1, 1], [], []>} : vector<32x32xbf16>, vector<32x32xbf16>, vector<32x32xf32> -> vector<32x32xf32>
    %213 = arith.addf %193, %212 : vector<32x32xf32>
    %c192 = arith.constant 192 : index
    %c0_81 = arith.constant 0 : index
    %214 = vector.load %arg7[%c192, %c0_81] : memref<360x128xf32, #tpu.memory_space<vmem>>, vector<1x32xf32>
    %215 = vector.broadcast %214 : vector<1x32xf32> to vector<32x32xf32>
    %216 = arith.addf %213, %215 : vector<32x32xf32>
    %cst_82 = arith.constant 0.000000e+00 : f32
    %217 = vector.broadcast %cst_82 : f32 to vector<32x32xf32>
    %218 = arith.maximumf %216, %217 : vector<32x32xf32>
    %c200 = arith.constant 200 : index
    %c0_83 = arith.constant 0 : index
    %219 = vector.load %arg7[%c200, %c0_83] : memref<360x128xf32, #tpu.memory_space<vmem>>, vector<1x32xf32>
    %c208 = arith.constant 208 : index
    %c0_84 = arith.constant 0 : index
    %220 = vector.load %arg7[%c208, %c0_84] : memref<360x128xf32, #tpu.memory_space<vmem>>, vector<1x32xf32>
    %cst_85 = arith.constant dense<0.000000e+00> : vector<32xf32>
    %221 = vector.multi_reduction <add>, %218, %cst_85 [1] : vector<32x32xf32> to vector<32xf32>
    %222 = vector.shape_cast %221 : vector<32xf32> to vector<32x1xf32>
    %cst_86 = arith.constant 3.200000e+01 : f32
    %223 = vector.broadcast %cst_86 : f32 to vector<32x1xf32>
    %224 = arith.divf %222, %223 : vector<32x1xf32>
    %225 = vector.broadcast %224 : vector<32x1xf32> to vector<32x32xf32>
    %226 = arith.subf %218, %225 : vector<32x32xf32>
    %227 = arith.mulf %226, %226 : vector<32x32xf32>
    %cst_87 = arith.constant dense<0.000000e+00> : vector<32xf32>
    %228 = vector.multi_reduction <add>, %227, %cst_87 [1] : vector<32x32xf32> to vector<32xf32>
    %229 = vector.shape_cast %228 : vector<32xf32> to vector<32x1xf32>
    %cst_88 = arith.constant 3.200000e+01 : f32
    %230 = vector.broadcast %cst_88 : f32 to vector<32x1xf32>
    %231 = arith.divf %229, %230 : vector<32x1xf32>
    %232 = vector.broadcast %224 : vector<32x1xf32> to vector<32x32xf32>
    %233 = arith.subf %218, %232 : vector<32x32xf32>
    %cst_89 = arith.constant 9.99999974E-6 : f32
    %234 = vector.broadcast %cst_89 : f32 to vector<32x1xf32>
    %235 = arith.addf %231, %234 : vector<32x1xf32>
    %236 = math.rsqrt %235 : vector<32x1xf32>
    %237 = vector.broadcast %236 : vector<32x1xf32> to vector<32x32xf32>
    %238 = arith.mulf %233, %237 : vector<32x32xf32>
    %239 = vector.broadcast %219 : vector<1x32xf32> to vector<32x32xf32>
    %240 = arith.mulf %238, %239 : vector<32x32xf32>
    %241 = vector.broadcast %220 : vector<1x32xf32> to vector<32x32xf32>
    %242 = arith.addf %240, %241 : vector<32x32xf32>
    %cst_90 = arith.constant 0.000000e+00 : f32
    %243 = vector.broadcast %cst_90 : f32 to vector<1x32xf32>
    %244 = vector.extract_strided_slice %242 {offsets = [0, 0], sizes = [31, 32], strides = [1, 1]} : vector<32x32xf32> to vector<31x32xf32>
    %245 = tpu.concatenate %243, %244 in 0 : vector<1x32xf32>, vector<31x32xf32> -> vector<32x32xf32>
    %c-1_i32_91 = arith.constant -1 : i32
    %246 = vector.broadcast %c-1_i32_91 : i32 to vector<32x1xi32>
    %247 = arith.addi %19, %246 : vector<32x1xi32>
    %c0_i32_92 = arith.constant 0 : i32
    %248 = vector.broadcast %c0_i32_92 : i32 to vector<32x1xi32>
    %249 = arith.cmpi sge, %247, %248 : vector<32x1xi32>
    %c-1_i32_93 = arith.constant -1 : i32
    %250 = vector.broadcast %c-1_i32_93 : i32 to vector<32x1xi32>
    %251 = arith.addi %19, %250 : vector<32x1xi32>
    %c16_i32_94 = arith.constant 16 : i32
    %252 = vector.broadcast %c16_i32_94 : i32 to vector<32x1xi32>
    %253 = arith.cmpi slt, %251, %252 : vector<32x1xi32>
    %254 = arith.andi %249, %253 : vector<32x1xi1>
    %cst_95 = arith.constant 0.000000e+00 : f32
    %255 = vector.shape_cast %254 : vector<32x1xi1> to vector<32x1xi1>
    %256 = vector.broadcast %255 : vector<32x1xi1> to vector<32x32xi1>
    %257 = vector.broadcast %cst_95 : f32 to vector<32x32xf32>
    %258 = arith.select %256, %245, %257 : vector<32x32xi1>, vector<32x32xf32>
    %c1120 = arith.constant 1120 : index
    %c0_96 = arith.constant 0 : index
    %259 = vector.load %arg6[%c1120, %c0_96] : memref<1248x128xbf16, #tpu.memory_space<vmem>>, vector<32x32xbf16>
    %260 = arith.truncf %258 : vector<32x32xf32> to vector<32x32xbf16>
    %cst_97 = arith.constant dense<0.000000e+00> : vector<32x32xf32>
    %261 = tpu.matmul %260, %259, %cst_97 {dimension_numbers = #tpu.dot_dimension_numbers<[1], [0], [0], [1], [0, 0, 1, 1], [], []>} : vector<32x32xbf16>, vector<32x32xbf16>, vector<32x32xf32> -> vector<32x32xf32>
    %c1152 = arith.constant 1152 : index
    %c0_98 = arith.constant 0 : index
    %262 = vector.load %arg6[%c1152, %c0_98] : memref<1248x128xbf16, #tpu.memory_space<vmem>>, vector<32x32xbf16>
    %263 = arith.truncf %242 : vector<32x32xf32> to vector<32x32xbf16>
    %cst_99 = arith.constant dense<0.000000e+00> : vector<32x32xf32>
    %264 = tpu.matmul %263, %262, %cst_99 {dimension_numbers = #tpu.dot_dimension_numbers<[1], [0], [0], [1], [0, 0, 1, 1], [], []>} : vector<32x32xbf16>, vector<32x32xbf16>, vector<32x32xf32> -> vector<32x32xf32>
    %265 = arith.addf %261, %264 : vector<32x32xf32>
    %cst_100 = arith.constant 0.000000e+00 : f32
    %266 = vector.broadcast %cst_100 : f32 to vector<1x32xf32>
    %267 = vector.extract_strided_slice %242 {offsets = [1, 0], sizes = [31, 32], strides = [1, 1]} : vector<32x32xf32> to vector<31x32xf32>
    %268 = tpu.concatenate %267, %266 in 0 : vector<31x32xf32>, vector<1x32xf32> -> vector<32x32xf32>
    %c1_i32_101 = arith.constant 1 : i32
    %269 = vector.broadcast %c1_i32_101 : i32 to vector<32x1xi32>
    %270 = arith.addi %19, %269 : vector<32x1xi32>
    %c0_i32_102 = arith.constant 0 : i32
    %271 = vector.broadcast %c0_i32_102 : i32 to vector<32x1xi32>
    %272 = arith.cmpi sge, %270, %271 : vector<32x1xi32>
    %c1_i32_103 = arith.constant 1 : i32
    %273 = vector.broadcast %c1_i32_103 : i32 to vector<32x1xi32>
    %274 = arith.addi %19, %273 : vector<32x1xi32>
    %c16_i32_104 = arith.constant 16 : i32
    %275 = vector.broadcast %c16_i32_104 : i32 to vector<32x1xi32>
    %276 = arith.cmpi slt, %274, %275 : vector<32x1xi32>
    %277 = arith.andi %272, %276 : vector<32x1xi1>
    %cst_105 = arith.constant 0.000000e+00 : f32
    %278 = vector.shape_cast %277 : vector<32x1xi1> to vector<32x1xi1>
    %279 = vector.broadcast %278 : vector<32x1xi1> to vector<32x32xi1>
    %280 = vector.broadcast %cst_105 : f32 to vector<32x32xf32>
    %281 = arith.select %279, %268, %280 : vector<32x32xi1>, vector<32x32xf32>
    %c1184 = arith.constant 1184 : index
    %c0_106 = arith.constant 0 : index
    %282 = vector.load %arg6[%c1184, %c0_106] : memref<1248x128xbf16, #tpu.memory_space<vmem>>, vector<32x32xbf16>
    %283 = arith.truncf %281 : vector<32x32xf32> to vector<32x32xbf16>
    %cst_107 = arith.constant dense<0.000000e+00> : vector<32x32xf32>
    %284 = tpu.matmul %283, %282, %cst_107 {dimension_numbers = #tpu.dot_dimension_numbers<[1], [0], [0], [1], [0, 0, 1, 1], [], []>} : vector<32x32xbf16>, vector<32x32xbf16>, vector<32x32xf32> -> vector<32x32xf32>
    %285 = arith.addf %265, %284 : vector<32x32xf32>
    %c216 = arith.constant 216 : index
    %c0_108 = arith.constant 0 : index
    %286 = vector.load %arg7[%c216, %c0_108] : memref<360x128xf32, #tpu.memory_space<vmem>>, vector<1x32xf32>
    %287 = vector.broadcast %286 : vector<1x32xf32> to vector<32x32xf32>
    %288 = arith.addf %285, %287 : vector<32x32xf32>
    %cst_109 = arith.constant 0.000000e+00 : f32
    %289 = vector.broadcast %cst_109 : f32 to vector<32x32xf32>
    %290 = arith.maximumf %288, %289 : vector<32x32xf32>
    %c224 = arith.constant 224 : index
    %c0_110 = arith.constant 0 : index
    %291 = vector.load %arg7[%c224, %c0_110] : memref<360x128xf32, #tpu.memory_space<vmem>>, vector<1x32xf32>
    %c232 = arith.constant 232 : index
    %c0_111 = arith.constant 0 : index
    %292 = vector.load %arg7[%c232, %c0_111] : memref<360x128xf32, #tpu.memory_space<vmem>>, vector<1x32xf32>
    %cst_112 = arith.constant dense<0.000000e+00> : vector<32xf32>
    %293 = vector.multi_reduction <add>, %290, %cst_112 [1] : vector<32x32xf32> to vector<32xf32>
    %294 = vector.shape_cast %293 : vector<32xf32> to vector<32x1xf32>
    %cst_113 = arith.constant 3.200000e+01 : f32
    %295 = vector.broadcast %cst_113 : f32 to vector<32x1xf32>
    %296 = arith.divf %294, %295 : vector<32x1xf32>
    %297 = vector.broadcast %296 : vector<32x1xf32> to vector<32x32xf32>
    %298 = arith.subf %290, %297 : vector<32x32xf32>
    %299 = arith.mulf %298, %298 : vector<32x32xf32>
    %cst_114 = arith.constant dense<0.000000e+00> : vector<32xf32>
    %300 = vector.multi_reduction <add>, %299, %cst_114 [1] : vector<32x32xf32> to vector<32xf32>
    %301 = vector.shape_cast %300 : vector<32xf32> to vector<32x1xf32>
    %cst_115 = arith.constant 3.200000e+01 : f32
    %302 = vector.broadcast %cst_115 : f32 to vector<32x1xf32>
    %303 = arith.divf %301, %302 : vector<32x1xf32>
    %304 = vector.broadcast %296 : vector<32x1xf32> to vector<32x32xf32>
    %305 = arith.subf %290, %304 : vector<32x32xf32>
    %cst_116 = arith.constant 9.99999974E-6 : f32
    %306 = vector.broadcast %cst_116 : f32 to vector<32x1xf32>
    %307 = arith.addf %303, %306 : vector<32x1xf32>
    %308 = math.rsqrt %307 : vector<32x1xf32>
    %309 = vector.broadcast %308 : vector<32x1xf32> to vector<32x32xf32>
    %310 = arith.mulf %305, %309 : vector<32x32xf32>
    %311 = vector.broadcast %291 : vector<1x32xf32> to vector<32x32xf32>
    %312 = arith.mulf %310, %311 : vector<32x32xf32>
    %313 = vector.broadcast %292 : vector<1x32xf32> to vector<32x32xf32>
    %314 = arith.addf %312, %313 : vector<32x32xf32>
    %c240 = arith.constant 240 : index
    %c0_117 = arith.constant 0 : index
    %315 = vector.load %arg7[%c240, %c0_117] : memref<360x128xf32, #tpu.memory_space<vmem>>, vector<1x32xf32>
    %c248 = arith.constant 248 : index
    %c0_118 = arith.constant 0 : index
    %316 = vector.load %arg7[%c248, %c0_118] : memref<360x128xf32, #tpu.memory_space<vmem>>, vector<1x1xf32>
    %317 = arith.truncf %315 : vector<1x32xf32> to vector<1x32xbf16>
    %318 = arith.truncf %314 : vector<32x32xf32> to vector<32x32xbf16>
    %cst_119 = arith.constant dense<0.000000e+00> : vector<1x32xf32>
    %319 = tpu.matmul %317, %318, %cst_119 {dimension_numbers = #tpu.dot_dimension_numbers<[1], [1], [0], [0], [0, 0, 1, 0], [], []>} : vector<1x32xbf16>, vector<32x32xbf16>, vector<1x32xf32> -> vector<1x32xf32>
    %320 = vector.broadcast %316 : vector<1x1xf32> to vector<1x32xf32>
    %321 = arith.addf %319, %320 : vector<1x32xf32>
    %322 = tpu.concatenate %170, %321 in 0 : vector<1x32xf32>, vector<1x32xf32> -> vector<2x32xf32>
    %c0_120 = arith.constant 0 : index
    %c0_121 = arith.constant 0 : index
    %323 = vector.load %arg9[%c0_120, %c0_121] : memref<2x32xf32, #tpu.memory_space<vmem>>, vector<2x32xf32>
    tpu.vector_store %arg9[%c0_120, %c0_121], %322 {strides = array<i32>} : memref<2x32xf32, #tpu.memory_space<vmem>>, vector<2x32xf32>,
    %c0_122 = arith.constant 0 : index
    %c0_123 = arith.constant 0 : index
    %324 = vector.load %arg5[%c0_122, %c0_123] : memref<32x2xf32, #tpu.memory_space<vmem>>, vector<32x2xf32>
    %325 = tpu.iota {dimensions = array<i32: 1>} : vector<32x8xi32>
    %326 = vector.extract_strided_slice %324 {offsets = [0, 0], sizes = [32, 1], strides = [1, 1]} : vector<32x2xf32> to vector<32x1xf32>
    %c344 = arith.constant 344 : index
    %c0_124 = arith.constant 0 : index
    %327 = vector.load %arg7[%c344, %c0_124] : memref<360x128xf32, #tpu.memory_space<vmem>>, vector<1x7xf32>
    %328 = vector.broadcast %326 : vector<32x1xf32> to vector<32x7xf32>
    %329 = vector.broadcast %327 : vector<1x7xf32> to vector<32x7xf32>
    %330 = arith.cmpf ogt, %328, %329 : vector<32x7xf32>
    %331 = arith.extui %330 : vector<32x7xi1> to vector<32x7xi32>
    %cst_125 = arith.constant dense<0> : vector<32xi32>
    %332 = vector.multi_reduction <add>, %331, %cst_125 [1] : vector<32x7xi32> to vector<32xi32>
    %333 = vector.shape_cast %332 : vector<32xi32> to vector<32x1xi32>
    %334 = vector.broadcast %333 : vector<32x1xi32> to vector<32x8xi32>
    %335 = arith.cmpi eq, %325, %334 : vector<32x8xi32>
    %336 = arith.extui %335 : vector<32x8xi1> to vector<32x8xi32>
    %337 = arith.sitofp %336 : vector<32x8xi32> to vector<32x8xf32>
    %c328 = arith.constant 328 : index
    %c0_126 = arith.constant 0 : index
    %338 = vector.load %arg7[%c328, %c0_126] : memref<360x128xf32, #tpu.memory_space<vmem>>, vector<8x32xf32>
    %cst_127 = arith.constant dense<0.000000e+00> : vector<32x32xf32>
    %339 = tpu.matmul %337, %338, %cst_127 {dimension_numbers = #tpu.dot_dimension_numbers<[1], [0], [0], [1], [0, 0, 1, 1], [], []>} : vector<32x8xf32>, vector<8x32xf32>, vector<32x32xf32> -> vector<32x32xf32>
    %340 = arith.addf %0, %339 : vector<32x32xf32>
    %341 = vector.extract_strided_slice %324 {offsets = [0, 1], sizes = [32, 1], strides = [1, 1]} : vector<32x2xf32> to vector<32x1xf32>
    %c352 = arith.constant 352 : index
    %c0_128 = arith.constant 0 : index
    %342 = vector.load %arg7[%c352, %c0_128] : memref<360x128xf32, #tpu.memory_space<vmem>>, vector<1x7xf32>
    %343 = vector.broadcast %341 : vector<32x1xf32> to vector<32x7xf32>
    %344 = vector.broadcast %342 : vector<1x7xf32> to vector<32x7xf32>
    %345 = arith.cmpf ogt, %343, %344 : vector<32x7xf32>
    %346 = arith.extui %345 : vector<32x7xi1> to vector<32x7xi32>
    %cst_129 = arith.constant dense<0> : vector<32xi32>
    %347 = vector.multi_reduction <add>, %346, %cst_129 [1] : vector<32x7xi32> to vector<32xi32>
    %348 = vector.shape_cast %347 : vector<32xi32> to vector<32x1xi32>
    %349 = vector.broadcast %348 : vector<32x1xi32> to vector<32x8xi32>
    %350 = arith.cmpi eq, %325, %349 : vector<32x8xi32>
    %351 = arith.extui %350 : vector<32x8xi1> to vector<32x8xi32>
    %352 = arith.sitofp %351 : vector<32x8xi32> to vector<32x8xf32>
    %c336 = arith.constant 336 : index
    %c0_130 = arith.constant 0 : index
    %353 = vector.load %arg7[%c336, %c0_130] : memref<360x128xf32, #tpu.memory_space<vmem>>, vector<8x32xf32>
    %cst_131 = arith.constant dense<0.000000e+00> : vector<32x32xf32>
    %354 = tpu.matmul %352, %353, %cst_131 {dimension_numbers = #tpu.dot_dimension_numbers<[1], [0], [0], [1], [0, 0, 1, 1], [], []>} : vector<32x8xf32>, vector<8x32xf32>, vector<32x32xf32> -> vector<32x32xf32>
    %355 = arith.addf %340, %354 : vector<32x32xf32>
    %356 = tpu.iota {dimensions = array<i32: 1>} : vector<32x64xi32>
    %c0_132 = arith.constant 0 : index
    %c0_133 = arith.constant 0 : index
    %357 = vector.load %arg2[%c0_132, %c0_133] : memref<32x1xi32, #tpu.memory_space<vmem>>, vector<32x1xi32>
    %358 = vector.broadcast %357 : vector<32x1xi32> to vector<32x64xi32>
    %359 = arith.cmpi eq, %356, %358 : vector<32x64xi32>
    %360 = arith.extui %359 : vector<32x64xi1> to vector<32x64xi32>
    %361 = arith.sitofp %360 : vector<32x64xi32> to vector<32x64xf32>
    %c264 = arith.constant 264 : index
    %c0_134 = arith.constant 0 : index
    %362 = vector.load %arg7[%c264, %c0_134] : memref<360x128xf32, #tpu.memory_space<vmem>>, vector<64x32xf32>
    %cst_135 = arith.constant dense<0.000000e+00> : vector<32x32xf32>
    %363 = tpu.matmul %361, %362, %cst_135 {dimension_numbers = #tpu.dot_dimension_numbers<[1], [0], [0], [1], [0, 0, 1, 1], [], []>} : vector<32x64xf32>, vector<64x32xf32>, vector<32x32xf32> -> vector<32x32xf32>
    %364 = arith.addf %355, %363 : vector<32x32xf32>
    %c0_136 = arith.constant 0 : index
    %c0_137 = arith.constant 0 : index
    %365 = vector.load %arg6[%c0_136, %c0_137] : memref<1248x128xbf16, #tpu.memory_space<vmem>>, vector<32x96xbf16>
    %366 = arith.truncf %364 : vector<32x32xf32> to vector<32x32xbf16>
    %cst_138 = arith.constant dense<0.000000e+00> : vector<32x96xf32>
    %367 = tpu.matmul %366, %365, %cst_138 {dimension_numbers = #tpu.dot_dimension_numbers<[1], [0], [0], [1], [0, 0, 1, 1], [], []>} : vector<32x32xbf16>, vector<32x96xbf16>, vector<32x96xf32> -> vector<32x96xf32>
    %c0_139 = arith.constant 0 : index
    %c0_140 = arith.constant 0 : index
    %368 = vector.load %arg7[%c0_139, %c0_140] : memref<360x128xf32, #tpu.memory_space<vmem>>, vector<1x96xf32>
    %369 = vector.broadcast %368 : vector<1x96xf32> to vector<32x96xf32>
    %370 = arith.addf %367, %369 : vector<32x96xf32>
    %371 = vector.extract_strided_slice %370 {offsets = [0, 0], sizes = [16, 96], strides = [1, 1]} : vector<32x96xf32> to vector<16x96xf32>
    %372 = vector.extract_strided_slice %1 {offsets = [0, 0], sizes = [1, 16], strides = [1, 1]} : vector<2x16xf32> to vector<1x16xf32>
    %373 = vector.extract_strided_slice %371 {offsets = [0, 0], sizes = [16, 16], strides = [1, 1]} : vector<16x96xf32> to vector<16x16xf32>
    %374 = vector.extract_strided_slice %371 {offsets = [0, 32], sizes = [16, 16], strides = [1, 1]} : vector<16x96xf32> to vector<16x16xf32>
    %375 = vector.extract_strided_slice %371 {offsets = [0, 64], sizes = [16, 16], strides = [1, 1]} : vector<16x96xf32> to vector<16x16xf32>
    %376 = arith.truncf %373 : vector<16x16xf32> to vector<16x16xbf16>
    %377 = arith.truncf %374 : vector<16x16xf32> to vector<16x16xbf16>
    %cst_141 = arith.constant dense<0.000000e+00> : vector<16x16xf32>
    %378 = tpu.matmul %376, %377, %cst_141 {dimension_numbers = #tpu.dot_dimension_numbers<[1], [1], [0], [0], [0, 0, 1, 0], [], []>} : vector<16x16xbf16>, vector<16x16xbf16>, vector<16x16xf32> -> vector<16x16xf32>
    %cst_142 = arith.constant 2.500000e-01 : f32
    %379 = vector.broadcast %cst_142 : f32 to vector<16x16xf32>
    %380 = arith.mulf %378, %379 : vector<16x16xf32>
    %cst_143 = arith.constant 5.000000e-01 : f32
    %381 = vector.broadcast %cst_143 : f32 to vector<1x16xf32>
    %382 = arith.cmpf ogt, %372, %381 : vector<1x16xf32>
    %cst_144 = arith.constant -1.000000e+09 : f32
    %383 = vector.shape_cast %382 : vector<1x16xi1> to vector<1x16xi1>
    %384 = vector.broadcast %383 : vector<1x16xi1> to vector<16x16xi1>
    %385 = vector.broadcast %cst_144 : f32 to vector<16x16xf32>
    %386 = arith.select %384, %380, %385 : vector<16x16xi1>, vector<16x16xf32>
    %cst_145 = arith.constant dense<0xFF800000> : vector<16xf32>
    %387 = vector.multi_reduction <maximumf>, %386, %cst_145 [1] : vector<16x16xf32> to vector<16xf32>
    %cst_146 = arith.constant 0xFF800000 : f32
    %388 = vector.broadcast %cst_146 : f32 to vector<16xf32>
    %389 = arith.maximumf %388, %387 : vector<16xf32>
    %390 = vector.shape_cast %389 : vector<16xf32> to vector<16x1xf32>
    %391 = vector.broadcast %390 : vector<16x1xf32> to vector<16x16xf32>
    %392 = arith.subf %386, %391 : vector<16x16xf32>
    %393 = math.exp %392 : vector<16x16xf32>
    %cst_147 = arith.constant dense<0.000000e+00> : vector<16xf32>
    %394 = vector.multi_reduction <add>, %393, %cst_147 [1] : vector<16x16xf32> to vector<16xf32>
    %395 = vector.shape_cast %394 : vector<16xf32> to vector<16x1xf32>
    %396 = vector.broadcast %395 : vector<16x1xf32> to vector<16x16xf32>
    %397 = arith.divf %393, %396 : vector<16x16xf32>
    %398 = arith.truncf %397 : vector<16x16xf32> to vector<16x16xbf16>
    %399 = arith.truncf %375 : vector<16x16xf32> to vector<16x16xbf16>
    %cst_148 = arith.constant dense<0.000000e+00> : vector<16x16xf32>
    %400 = tpu.matmul %398, %399, %cst_148 {dimension_numbers = #tpu.dot_dimension_numbers<[1], [0], [0], [1], [0, 0, 1, 1], [], []>} : vector<16x16xbf16>, vector<16x16xbf16>, vector<16x16xf32> -> vector<16x16xf32>
    %401 = vector.extract_strided_slice %371 {offsets = [0, 16], sizes = [16, 16], strides = [1, 1]} : vector<16x96xf32> to vector<16x16xf32>
    %402 = vector.extract_strided_slice %371 {offsets = [0, 48], sizes = [16, 16], strides = [1, 1]} : vector<16x96xf32> to vector<16x16xf32>
    %403 = vector.extract_strided_slice %371 {offsets = [0, 80], sizes = [16, 16], strides = [1, 1]} : vector<16x96xf32> to vector<16x16xf32>
    %404 = arith.truncf %401 : vector<16x16xf32> to vector<16x16xbf16>
    %405 = arith.truncf %402 : vector<16x16xf32> to vector<16x16xbf16>
    %cst_149 = arith.constant dense<0.000000e+00> : vector<16x16xf32>
    %406 = tpu.matmul %404, %405, %cst_149 {dimension_numbers = #tpu.dot_dimension_numbers<[1], [1], [0], [0], [0, 0, 1, 0], [], []>} : vector<16x16xbf16>, vector<16x16xbf16>, vector<16x16xf32> -> vector<16x16xf32>
    %cst_150 = arith.constant 2.500000e-01 : f32
    %407 = vector.broadcast %cst_150 : f32 to vector<16x16xf32>
    %408 = arith.mulf %406, %407 : vector<16x16xf32>
    %cst_151 = arith.constant 5.000000e-01 : f32
    %409 = vector.broadcast %cst_151 : f32 to vector<1x16xf32>
    %410 = arith.cmpf ogt, %372, %409 : vector<1x16xf32>
    %cst_152 = arith.constant -1.000000e+09 : f32
    %411 = vector.shape_cast %410 : vector<1x16xi1> to vector<1x16xi1>
    %412 = vector.broadcast %411 : vector<1x16xi1> to vector<16x16xi1>
    %413 = vector.broadcast %cst_152 : f32 to vector<16x16xf32>
    %414 = arith.select %412, %408, %413 : vector<16x16xi1>, vector<16x16xf32>
    %cst_153 = arith.constant dense<0xFF800000> : vector<16xf32>
    %415 = vector.multi_reduction <maximumf>, %414, %cst_153 [1] : vector<16x16xf32> to vector<16xf32>
    %cst_154 = arith.constant 0xFF800000 : f32
    %416 = vector.broadcast %cst_154 : f32 to vector<16xf32>
    %417 = arith.maximumf %416, %415 : vector<16xf32>
    %418 = vector.shape_cast %417 : vector<16xf32> to vector<16x1xf32>
    %419 = vector.broadcast %418 : vector<16x1xf32> to vector<16x16xf32>
    %420 = arith.subf %414, %419 : vector<16x16xf32>
    %421 = math.exp %420 : vector<16x16xf32>
    %cst_155 = arith.constant dense<0.000000e+00> : vector<16xf32>
    %422 = vector.multi_reduction <add>, %421, %cst_155 [1] : vector<16x16xf32> to vector<16xf32>
    %423 = vector.shape_cast %422 : vector<16xf32> to vector<16x1xf32>
    %424 = vector.broadcast %423 : vector<16x1xf32> to vector<16x16xf32>
    %425 = arith.divf %421, %424 : vector<16x16xf32>
    %426 = arith.truncf %425 : vector<16x16xf32> to vector<16x16xbf16>
    %427 = arith.truncf %403 : vector<16x16xf32> to vector<16x16xbf16>
    %cst_156 = arith.constant dense<0.000000e+00> : vector<16x16xf32>
    %428 = tpu.matmul %426, %427, %cst_156 {dimension_numbers = #tpu.dot_dimension_numbers<[1], [0], [0], [1], [0, 0, 1, 1], [], []>} : vector<16x16xbf16>, vector<16x16xbf16>, vector<16x16xf32> -> vector<16x16xf32>
    %429 = tpu.concatenate %400, %428 in 1 : vector<16x16xf32>, vector<16x16xf32> -> vector<16x32xf32>
    %430 = vector.extract_strided_slice %370 {offsets = [16, 0], sizes = [16, 96], strides = [1, 1]} : vector<32x96xf32> to vector<16x96xf32>
    %431 = vector.extract_strided_slice %1 {offsets = [1, 0], sizes = [1, 16], strides = [1, 1]} : vector<2x16xf32> to vector<1x16xf32>
    %432 = vector.extract_strided_slice %430 {offsets = [0, 0], sizes = [16, 16], strides = [1, 1]} : vector<16x96xf32> to vector<16x16xf32>
    %433 = vector.extract_strided_slice %430 {offsets = [0, 32], sizes = [16, 16], strides = [1, 1]} : vector<16x96xf32> to vector<16x16xf32>
    %434 = vector.extract_strided_slice %430 {offsets = [0, 64], sizes = [16, 16], strides = [1, 1]} : vector<16x96xf32> to vector<16x16xf32>
    %435 = arith.truncf %432 : vector<16x16xf32> to vector<16x16xbf16>
    %436 = arith.truncf %433 : vector<16x16xf32> to vector<16x16xbf16>
    %cst_157 = arith.constant dense<0.000000e+00> : vector<16x16xf32>
    %437 = tpu.matmul %435, %436, %cst_157 {dimension_numbers = #tpu.dot_dimension_numbers<[1], [1], [0], [0], [0, 0, 1, 0], [], []>} : vector<16x16xbf16>, vector<16x16xbf16>, vector<16x16xf32> -> vector<16x16xf32>
    %cst_158 = arith.constant 2.500000e-01 : f32
    %438 = vector.broadcast %cst_158 : f32 to vector<16x16xf32>
    %439 = arith.mulf %437, %438 : vector<16x16xf32>
    %cst_159 = arith.constant 5.000000e-01 : f32
    %440 = vector.broadcast %cst_159 : f32 to vector<1x16xf32>
    %441 = arith.cmpf ogt, %431, %440 : vector<1x16xf32>
    %cst_160 = arith.constant -1.000000e+09 : f32
    %442 = vector.shape_cast %441 : vector<1x16xi1> to vector<1x16xi1>
    %443 = vector.broadcast %442 : vector<1x16xi1> to vector<16x16xi1>
    %444 = vector.broadcast %cst_160 : f32 to vector<16x16xf32>
    %445 = arith.select %443, %439, %444 : vector<16x16xi1>, vector<16x16xf32>
    %cst_161 = arith.constant dense<0xFF800000> : vector<16xf32>
    %446 = vector.multi_reduction <maximumf>, %445, %cst_161 [1] : vector<16x16xf32> to vector<16xf32>
    %cst_162 = arith.constant 0xFF800000 : f32
    %447 = vector.broadcast %cst_162 : f32 to vector<16xf32>
    %448 = arith.maximumf %447, %446 : vector<16xf32>
    %449 = vector.shape_cast %448 : vector<16xf32> to vector<16x1xf32>
    %450 = vector.broadcast %449 : vector<16x1xf32> to vector<16x16xf32>
    %451 = arith.subf %445, %450 : vector<16x16xf32>
    %452 = math.exp %451 : vector<16x16xf32>
    %cst_163 = arith.constant dense<0.000000e+00> : vector<16xf32>
    %453 = vector.multi_reduction <add>, %452, %cst_163 [1] : vector<16x16xf32> to vector<16xf32>
    %454 = vector.shape_cast %453 : vector<16xf32> to vector<16x1xf32>
    %455 = vector.broadcast %454 : vector<16x1xf32> to vector<16x16xf32>
    %456 = arith.divf %452, %455 : vector<16x16xf32>
    %457 = arith.truncf %456 : vector<16x16xf32> to vector<16x16xbf16>
    %458 = arith.truncf %434 : vector<16x16xf32> to vector<16x16xbf16>
    %cst_164 = arith.constant dense<0.000000e+00> : vector<16x16xf32>
    %459 = tpu.matmul %457, %458, %cst_164 {dimension_numbers = #tpu.dot_dimension_numbers<[1], [0], [0], [1], [0, 0, 1, 1], [], []>} : vector<16x16xbf16>, vector<16x16xbf16>, vector<16x16xf32> -> vector<16x16xf32>
    %460 = vector.extract_strided_slice %430 {offsets = [0, 16], sizes = [16, 16], strides = [1, 1]} : vector<16x96xf32> to vector<16x16xf32>
    %461 = vector.extract_strided_slice %430 {offsets = [0, 48], sizes = [16, 16], strides = [1, 1]} : vector<16x96xf32> to vector<16x16xf32>
    %462 = vector.extract_strided_slice %430 {offsets = [0, 80], sizes = [16, 16], strides = [1, 1]} : vector<16x96xf32> to vector<16x16xf32>
    %463 = arith.truncf %460 : vector<16x16xf32> to vector<16x16xbf16>
    %464 = arith.truncf %461 : vector<16x16xf32> to vector<16x16xbf16>
    %cst_165 = arith.constant dense<0.000000e+00> : vector<16x16xf32>
    %465 = tpu.matmul %463, %464, %cst_165 {dimension_numbers = #tpu.dot_dimension_numbers<[1], [1], [0], [0], [0, 0, 1, 0], [], []>} : vector<16x16xbf16>, vector<16x16xbf16>, vector<16x16xf32> -> vector<16x16xf32>
    %cst_166 = arith.constant 2.500000e-01 : f32
    %466 = vector.broadcast %cst_166 : f32 to vector<16x16xf32>
    %467 = arith.mulf %465, %466 : vector<16x16xf32>
    %cst_167 = arith.constant 5.000000e-01 : f32
    %468 = vector.broadcast %cst_167 : f32 to vector<1x16xf32>
    %469 = arith.cmpf ogt, %431, %468 : vector<1x16xf32>
    %cst_168 = arith.constant -1.000000e+09 : f32
    %470 = vector.shape_cast %469 : vector<1x16xi1> to vector<1x16xi1>
    %471 = vector.broadcast %470 : vector<1x16xi1> to vector<16x16xi1>
    %472 = vector.broadcast %cst_168 : f32 to vector<16x16xf32>
    %473 = arith.select %471, %467, %472 : vector<16x16xi1>, vector<16x16xf32>
    %cst_169 = arith.constant dense<0xFF800000> : vector<16xf32>
    %474 = vector.multi_reduction <maximumf>, %473, %cst_169 [1] : vector<16x16xf32> to vector<16xf32>
    %cst_170 = arith.constant 0xFF800000 : f32
    %475 = vector.broadcast %cst_170 : f32 to vector<16xf32>
    %476 = arith.maximumf %475, %474 : vector<16xf32>
    %477 = vector.shape_cast %476 : vector<16xf32> to vector<16x1xf32>
    %478 = vector.broadcast %477 : vector<16x1xf32> to vector<16x16xf32>
    %479 = arith.subf %473, %478 : vector<16x16xf32>
    %480 = math.exp %479 : vector<16x16xf32>
    %cst_171 = arith.constant dense<0.000000e+00> : vector<16xf32>
    %481 = vector.multi_reduction <add>, %480, %cst_171 [1] : vector<16x16xf32> to vector<16xf32>
    %482 = vector.shape_cast %481 : vector<16xf32> to vector<16x1xf32>
    %483 = vector.broadcast %482 : vector<16x1xf32> to vector<16x16xf32>
    %484 = arith.divf %480, %483 : vector<16x16xf32>
    %485 = arith.truncf %484 : vector<16x16xf32> to vector<16x16xbf16>
    %486 = arith.truncf %462 : vector<16x16xf32> to vector<16x16xbf16>
    %cst_172 = arith.constant dense<0.000000e+00> : vector<16x16xf32>
    %487 = tpu.matmul %485, %486, %cst_172 {dimension_numbers = #tpu.dot_dimension_numbers<[1], [0], [0], [1], [0, 0, 1, 1], [], []>} : vector<16x16xbf16>, vector<16x16xbf16>, vector<16x16xf32> -> vector<16x16xf32>
    %488 = tpu.concatenate %459, %487 in 1 : vector<16x16xf32>, vector<16x16xf32> -> vector<16x32xf32>
    %489 = tpu.concatenate %429, %488 in 0 : vector<16x32xf32>, vector<16x32xf32> -> vector<32x32xf32>
    %c32 = arith.constant 32 : index
    %c0_173 = arith.constant 0 : index
    %490 = vector.load %arg6[%c32, %c0_173] : memref<1248x128xbf16, #tpu.memory_space<vmem>>, vector<32x32xbf16>
    %491 = arith.truncf %489 : vector<32x32xf32> to vector<32x32xbf16>
    %cst_174 = arith.constant dense<0.000000e+00> : vector<32x32xf32>
    %492 = tpu.matmul %491, %490, %cst_174 {dimension_numbers = #tpu.dot_dimension_numbers<[1], [0], [0], [1], [0, 0, 1, 1], [], []>} : vector<32x32xbf16>, vector<32x32xbf16>, vector<32x32xf32> -> vector<32x32xf32>
    %c8 = arith.constant 8 : index
    %c0_175 = arith.constant 0 : index
    %493 = vector.load %arg7[%c8, %c0_175] : memref<360x128xf32, #tpu.memory_space<vmem>>, vector<1x32xf32>
    %494 = vector.broadcast %493 : vector<1x32xf32> to vector<32x32xf32>
    %495 = arith.addf %492, %494 : vector<32x32xf32>
    %496 = arith.addf %495, %364 : vector<32x32xf32>
    %c16 = arith.constant 16 : index
    %c0_176 = arith.constant 0 : index
    %497 = vector.load %arg7[%c16, %c0_176] : memref<360x128xf32, #tpu.memory_space<vmem>>, vector<1x32xf32>
    %c24 = arith.constant 24 : index
    %c0_177 = arith.constant 0 : index
    %498 = vector.load %arg7[%c24, %c0_177] : memref<360x128xf32, #tpu.memory_space<vmem>>, vector<1x32xf32>
    %cst_178 = arith.constant dense<0.000000e+00> : vector<32xf32>
    %499 = vector.multi_reduction <add>, %496, %cst_178 [1] : vector<32x32xf32> to vector<32xf32>
    %500 = vector.shape_cast %499 : vector<32xf32> to vector<32x1xf32>
    %cst_179 = arith.constant 3.200000e+01 : f32
    %501 = vector.broadcast %cst_179 : f32 to vector<32x1xf32>
    %502 = arith.divf %500, %501 : vector<32x1xf32>
    %503 = vector.broadcast %502 : vector<32x1xf32> to vector<32x32xf32>
    %504 = arith.subf %496, %503 : vector<32x32xf32>
    %505 = arith.mulf %504, %504 : vector<32x32xf32>
    %cst_180 = arith.constant dense<0.000000e+00> : vector<32xf32>
    %506 = vector.multi_reduction <add>, %505, %cst_180 [1] : vector<32x32xf32> to vector<32xf32>
    %507 = vector.shape_cast %506 : vector<32xf32> to vector<32x1xf32>
    %cst_181 = arith.constant 3.200000e+01 : f32
    %508 = vector.broadcast %cst_181 : f32 to vector<32x1xf32>
    %509 = arith.divf %507, %508 : vector<32x1xf32>
    %510 = vector.broadcast %502 : vector<32x1xf32> to vector<32x32xf32>
    %511 = arith.subf %496, %510 : vector<32x32xf32>
    %cst_182 = arith.constant 9.99999974E-6 : f32
    %512 = vector.broadcast %cst_182 : f32 to vector<32x1xf32>
    %513 = arith.addf %509, %512 : vector<32x1xf32>
    %514 = math.rsqrt %513 : vector<32x1xf32>
    %515 = vector.broadcast %514 : vector<32x1xf32> to vector<32x32xf32>
    %516 = arith.mulf %511, %515 : vector<32x32xf32>
    %517 = vector.broadcast %497 : vector<1x32xf32> to vector<32x32xf32>
    %518 = arith.mulf %516, %517 : vector<32x32xf32>
    %519 = vector.broadcast %498 : vector<1x32xf32> to vector<32x32xf32>
    %520 = arith.addf %518, %519 : vector<32x32xf32>
    %521 = vector.broadcast %2 : vector<32x1xf32> to vector<32x32xf32>
    %522 = arith.mulf %520, %521 : vector<32x32xf32>
    %cst_183 = arith.constant 0.000000e+00 : f32
    %523 = vector.broadcast %cst_183 : f32 to vector<4x32xf32>
    %524 = vector.extract_strided_slice %522 {offsets = [0, 0], sizes = [28, 32], strides = [1, 1]} : vector<32x32xf32> to vector<28x32xf32>
    %525 = tpu.concatenate %523, %524 in 0 : vector<4x32xf32>, vector<28x32xf32> -> vector<32x32xf32>
    %c-4_i32 = arith.constant -4 : i32
    %526 = vector.broadcast %c-4_i32 : i32 to vector<32x1xi32>
    %527 = arith.addi %19, %526 : vector<32x1xi32>
    %c0_i32_184 = arith.constant 0 : i32
    %528 = vector.broadcast %c0_i32_184 : i32 to vector<32x1xi32>
    %529 = arith.cmpi sge, %527, %528 : vector<32x1xi32>
    %c-4_i32_185 = arith.constant -4 : i32
    %530 = vector.broadcast %c-4_i32_185 : i32 to vector<32x1xi32>
    %531 = arith.addi %19, %530 : vector<32x1xi32>
    %c16_i32_186 = arith.constant 16 : i32
    %532 = vector.broadcast %c16_i32_186 : i32 to vector<32x1xi32>
    %533 = arith.cmpi slt, %531, %532 : vector<32x1xi32>
    %534 = arith.andi %529, %533 : vector<32x1xi1>
    %cst_187 = arith.constant 0.000000e+00 : f32
    %535 = vector.shape_cast %534 : vector<32x1xi1> to vector<32x1xi1>
    %536 = vector.broadcast %535 : vector<32x1xi1> to vector<32x32xi1>
    %537 = vector.broadcast %cst_187 : f32 to vector<32x32xf32>
    %538 = arith.select %536, %525, %537 : vector<32x32xi1>, vector<32x32xf32>
    %c64 = arith.constant 64 : index
    %c0_188 = arith.constant 0 : index
    %539 = vector.load %arg6[%c64, %c0_188] : memref<1248x128xbf16, #tpu.memory_space<vmem>>, vector<32x64xbf16>
    %540 = arith.truncf %538 : vector<32x32xf32> to vector<32x32xbf16>
    %cst_189 = arith.constant dense<0.000000e+00> : vector<32x64xf32>
    %541 = tpu.matmul %540, %539, %cst_189 {dimension_numbers = #tpu.dot_dimension_numbers<[1], [0], [0], [1], [0, 0, 1, 1], [], []>} : vector<32x32xbf16>, vector<32x64xbf16>, vector<32x64xf32> -> vector<32x64xf32>
    %cst_190 = arith.constant 0.000000e+00 : f32
    %542 = vector.broadcast %cst_190 : f32 to vector<3x32xf32>
    %543 = vector.extract_strided_slice %522 {offsets = [0, 0], sizes = [29, 32], strides = [1, 1]} : vector<32x32xf32> to vector<29x32xf32>
    %544 = tpu.concatenate %542, %543 in 0 : vector<3x32xf32>, vector<29x32xf32> -> vector<32x32xf32>
    %c-3_i32 = arith.constant -3 : i32
    %545 = vector.broadcast %c-3_i32 : i32 to vector<32x1xi32>
    %546 = arith.addi %19, %545 : vector<32x1xi32>
    %c0_i32_191 = arith.constant 0 : i32
    %547 = vector.broadcast %c0_i32_191 : i32 to vector<32x1xi32>
    %548 = arith.cmpi sge, %546, %547 : vector<32x1xi32>
    %c-3_i32_192 = arith.constant -3 : i32
    %549 = vector.broadcast %c-3_i32_192 : i32 to vector<32x1xi32>
    %550 = arith.addi %19, %549 : vector<32x1xi32>
    %c16_i32_193 = arith.constant 16 : i32
    %551 = vector.broadcast %c16_i32_193 : i32 to vector<32x1xi32>
    %552 = arith.cmpi slt, %550, %551 : vector<32x1xi32>
    %553 = arith.andi %548, %552 : vector<32x1xi1>
    %cst_194 = arith.constant 0.000000e+00 : f32
    %554 = vector.shape_cast %553 : vector<32x1xi1> to vector<32x1xi1>
    %555 = vector.broadcast %554 : vector<32x1xi1> to vector<32x32xi1>
    %556 = vector.broadcast %cst_194 : f32 to vector<32x32xf32>
    %557 = arith.select %555, %544, %556 : vector<32x32xi1>, vector<32x32xf32>
    %c96 = arith.constant 96 : index
    %c0_195 = arith.constant 0 : index
    %558 = vector.load %arg6[%c96, %c0_195] : memref<1248x128xbf16, #tpu.memory_space<vmem>>, vector<32x64xbf16>
    %559 = arith.truncf %557 : vector<32x32xf32> to vector<32x32xbf16>
    %cst_196 = arith.constant dense<0.000000e+00> : vector<32x64xf32>
    %560 = tpu.matmul %559, %558, %cst_196 {dimension_numbers = #tpu.dot_dimension_numbers<[1], [0], [0], [1], [0, 0, 1, 1], [], []>} : vector<32x32xbf16>, vector<32x64xbf16>, vector<32x64xf32> -> vector<32x64xf32>
    %561 = arith.addf %541, %560 : vector<32x64xf32>
    %cst_197 = arith.constant 0.000000e+00 : f32
    %562 = vector.broadcast %cst_197 : f32 to vector<2x32xf32>
    %563 = vector.extract_strided_slice %522 {offsets = [0, 0], sizes = [30, 32], strides = [1, 1]} : vector<32x32xf32> to vector<30x32xf32>
    %564 = tpu.concatenate %562, %563 in 0 : vector<2x32xf32>, vector<30x32xf32> -> vector<32x32xf32>
    %c-2_i32 = arith.constant -2 : i32
    %565 = vector.broadcast %c-2_i32 : i32 to vector<32x1xi32>
    %566 = arith.addi %19, %565 : vector<32x1xi32>
    %c0_i32_198 = arith.constant 0 : i32
    %567 = vector.broadcast %c0_i32_198 : i32 to vector<32x1xi32>
    %568 = arith.cmpi sge, %566, %567 : vector<32x1xi32>
    %c-2_i32_199 = arith.constant -2 : i32
    %569 = vector.broadcast %c-2_i32_199 : i32 to vector<32x1xi32>
    %570 = arith.addi %19, %569 : vector<32x1xi32>
    %c16_i32_200 = arith.constant 16 : i32
    %571 = vector.broadcast %c16_i32_200 : i32 to vector<32x1xi32>
    %572 = arith.cmpi slt, %570, %571 : vector<32x1xi32>
    %573 = arith.andi %568, %572 : vector<32x1xi1>
    %cst_201 = arith.constant 0.000000e+00 : f32
    %574 = vector.shape_cast %573 : vector<32x1xi1> to vector<32x1xi1>
    %575 = vector.broadcast %574 : vector<32x1xi1> to vector<32x32xi1>
    %576 = vector.broadcast %cst_201 : f32 to vector<32x32xf32>
    %577 = arith.select %575, %564, %576 : vector<32x32xi1>, vector<32x32xf32>
    %c128_202 = arith.constant 128 : index
    %c0_203 = arith.constant 0 : index
    %578 = vector.load %arg6[%c128_202, %c0_203] : memref<1248x128xbf16, #tpu.memory_space<vmem>>, vector<32x64xbf16>
    %579 = arith.truncf %577 : vector<32x32xf32> to vector<32x32xbf16>
    %cst_204 = arith.constant dense<0.000000e+00> : vector<32x64xf32>
    %580 = tpu.matmul %579, %578, %cst_204 {dimension_numbers = #tpu.dot_dimension_numbers<[1], [0], [0], [1], [0, 0, 1, 1], [], []>} : vector<32x32xbf16>, vector<32x64xbf16>, vector<32x64xf32> -> vector<32x64xf32>
    %581 = arith.addf %561, %580 : vector<32x64xf32>
    %cst_205 = arith.constant 0.000000e+00 : f32
    %582 = vector.broadcast %cst_205 : f32 to vector<1x32xf32>
    %583 = vector.extract_strided_slice %522 {offsets = [0, 0], sizes = [31, 32], strides = [1, 1]} : vector<32x32xf32> to vector<31x32xf32>
    %584 = tpu.concatenate %582, %583 in 0 : vector<1x32xf32>, vector<31x32xf32> -> vector<32x32xf32>
    %c-1_i32_206 = arith.constant -1 : i32
    %585 = vector.broadcast %c-1_i32_206 : i32 to vector<32x1xi32>
    %586 = arith.addi %19, %585 : vector<32x1xi32>
    %c0_i32_207 = arith.constant 0 : i32
    %587 = vector.broadcast %c0_i32_207 : i32 to vector<32x1xi32>
    %588 = arith.cmpi sge, %586, %587 : vector<32x1xi32>
    %c-1_i32_208 = arith.constant -1 : i32
    %589 = vector.broadcast %c-1_i32_208 : i32 to vector<32x1xi32>
    %590 = arith.addi %19, %589 : vector<32x1xi32>
    %c16_i32_209 = arith.constant 16 : i32
    %591 = vector.broadcast %c16_i32_209 : i32 to vector<32x1xi32>
    %592 = arith.cmpi slt, %590, %591 : vector<32x1xi32>
    %593 = arith.andi %588, %592 : vector<32x1xi1>
    %cst_210 = arith.constant 0.000000e+00 : f32
    %594 = vector.shape_cast %593 : vector<32x1xi1> to vector<32x1xi1>
    %595 = vector.broadcast %594 : vector<32x1xi1> to vector<32x32xi1>
    %596 = vector.broadcast %cst_210 : f32 to vector<32x32xf32>
    %597 = arith.select %595, %584, %596 : vector<32x32xi1>, vector<32x32xf32>
    %c160_211 = arith.constant 160 : index
    %c0_212 = arith.constant 0 : index
    %598 = vector.load %arg6[%c160_211, %c0_212] : memref<1248x128xbf16, #tpu.memory_space<vmem>>, vector<32x64xbf16>
    %599 = arith.truncf %597 : vector<32x32xf32> to vector<32x32xbf16>
    %cst_213 = arith.constant dense<0.000000e+00> : vector<32x64xf32>
    %600 = tpu.matmul %599, %598, %cst_213 {dimension_numbers = #tpu.dot_dimension_numbers<[1], [0], [0], [1], [0, 0, 1, 1], [], []>} : vector<32x32xbf16>, vector<32x64xbf16>, vector<32x64xf32> -> vector<32x64xf32>
    %601 = arith.addf %581, %600 : vector<32x64xf32>
    %c192_214 = arith.constant 192 : index
    %c0_215 = arith.constant 0 : index
    %602 = vector.load %arg6[%c192_214, %c0_215] : memref<1248x128xbf16, #tpu.memory_space<vmem>>, vector<32x64xbf16>
    %603 = arith.truncf %522 : vector<32x32xf32> to vector<32x32xbf16>
    %cst_216 = arith.constant dense<0.000000e+00> : vector<32x64xf32>
    %604 = tpu.matmul %603, %602, %cst_216 {dimension_numbers = #tpu.dot_dimension_numbers<[1], [0], [0], [1], [0, 0, 1, 1], [], []>} : vector<32x32xbf16>, vector<32x64xbf16>, vector<32x64xf32> -> vector<32x64xf32>
    %605 = arith.addf %601, %604 : vector<32x64xf32>
    %cst_217 = arith.constant 0.000000e+00 : f32
    %606 = vector.broadcast %cst_217 : f32 to vector<1x32xf32>
    %607 = vector.extract_strided_slice %522 {offsets = [1, 0], sizes = [31, 32], strides = [1, 1]} : vector<32x32xf32> to vector<31x32xf32>
    %608 = tpu.concatenate %607, %606 in 0 : vector<31x32xf32>, vector<1x32xf32> -> vector<32x32xf32>
    %c1_i32_218 = arith.constant 1 : i32
    %609 = vector.broadcast %c1_i32_218 : i32 to vector<32x1xi32>
    %610 = arith.addi %19, %609 : vector<32x1xi32>
    %c0_i32_219 = arith.constant 0 : i32
    %611 = vector.broadcast %c0_i32_219 : i32 to vector<32x1xi32>
    %612 = arith.cmpi sge, %610, %611 : vector<32x1xi32>
    %c1_i32_220 = arith.constant 1 : i32
    %613 = vector.broadcast %c1_i32_220 : i32 to vector<32x1xi32>
    %614 = arith.addi %19, %613 : vector<32x1xi32>
    %c16_i32_221 = arith.constant 16 : i32
    %615 = vector.broadcast %c16_i32_221 : i32 to vector<32x1xi32>
    %616 = arith.cmpi slt, %614, %615 : vector<32x1xi32>
    %617 = arith.andi %612, %616 : vector<32x1xi1>
    %cst_222 = arith.constant 0.000000e+00 : f32
    %618 = vector.shape_cast %617 : vector<32x1xi1> to vector<32x1xi1>
    %619 = vector.broadcast %618 : vector<32x1xi1> to vector<32x32xi1>
    %620 = vector.broadcast %cst_222 : f32 to vector<32x32xf32>
    %621 = arith.select %619, %608, %620 : vector<32x32xi1>, vector<32x32xf32>
    %c224_223 = arith.constant 224 : index
    %c0_224 = arith.constant 0 : index
    %622 = vector.load %arg6[%c224_223, %c0_224] : memref<1248x128xbf16, #tpu.memory_space<vmem>>, vector<32x64xbf16>
    %623 = arith.truncf %621 : vector<32x32xf32> to vector<32x32xbf16>
    %cst_225 = arith.constant dense<0.000000e+00> : vector<32x64xf32>
    %624 = tpu.matmul %623, %622, %cst_225 {dimension_numbers = #tpu.dot_dimension_numbers<[1], [0], [0], [1], [0, 0, 1, 1], [], []>} : vector<32x32xbf16>, vector<32x64xbf16>, vector<32x64xf32> -> vector<32x64xf32>
    %625 = arith.addf %605, %624 : vector<32x64xf32>
    %cst_226 = arith.constant 0.000000e+00 : f32
    %626 = vector.broadcast %cst_226 : f32 to vector<2x32xf32>
    %627 = vector.extract_strided_slice %522 {offsets = [2, 0], sizes = [30, 32], strides = [1, 1]} : vector<32x32xf32> to vector<30x32xf32>
    %628 = tpu.concatenate %627, %626 in 0 : vector<30x32xf32>, vector<2x32xf32> -> vector<32x32xf32>
    %c2_i32 = arith.constant 2 : i32
    %629 = vector.broadcast %c2_i32 : i32 to vector<32x1xi32>
    %630 = arith.addi %19, %629 : vector<32x1xi32>
    %c0_i32_227 = arith.constant 0 : i32
    %631 = vector.broadcast %c0_i32_227 : i32 to vector<32x1xi32>
    %632 = arith.cmpi sge, %630, %631 : vector<32x1xi32>
    %c2_i32_228 = arith.constant 2 : i32
    %633 = vector.broadcast %c2_i32_228 : i32 to vector<32x1xi32>
    %634 = arith.addi %19, %633 : vector<32x1xi32>
    %c16_i32_229 = arith.constant 16 : i32
    %635 = vector.broadcast %c16_i32_229 : i32 to vector<32x1xi32>
    %636 = arith.cmpi slt, %634, %635 : vector<32x1xi32>
    %637 = arith.andi %632, %636 : vector<32x1xi1>
    %cst_230 = arith.constant 0.000000e+00 : f32
    %638 = vector.shape_cast %637 : vector<32x1xi1> to vector<32x1xi1>
    %639 = vector.broadcast %638 : vector<32x1xi1> to vector<32x32xi1>
    %640 = vector.broadcast %cst_230 : f32 to vector<32x32xf32>
    %641 = arith.select %639, %628, %640 : vector<32x32xi1>, vector<32x32xf32>
    %c256 = arith.constant 256 : index
    %c0_231 = arith.constant 0 : index
    %642 = vector.load %arg6[%c256, %c0_231] : memref<1248x128xbf16, #tpu.memory_space<vmem>>, vector<32x64xbf16>
    %643 = arith.truncf %641 : vector<32x32xf32> to vector<32x32xbf16>
    %cst_232 = arith.constant dense<0.000000e+00> : vector<32x64xf32>
    %644 = tpu.matmul %643, %642, %cst_232 {dimension_numbers = #tpu.dot_dimension_numbers<[1], [0], [0], [1], [0, 0, 1, 1], [], []>} : vector<32x32xbf16>, vector<32x64xbf16>, vector<32x64xf32> -> vector<32x64xf32>
    %645 = arith.addf %625, %644 : vector<32x64xf32>
    %cst_233 = arith.constant 0.000000e+00 : f32
    %646 = vector.broadcast %cst_233 : f32 to vector<3x32xf32>
    %647 = vector.extract_strided_slice %522 {offsets = [3, 0], sizes = [29, 32], strides = [1, 1]} : vector<32x32xf32> to vector<29x32xf32>
    %648 = tpu.concatenate %647, %646 in 0 : vector<29x32xf32>, vector<3x32xf32> -> vector<32x32xf32>
    %c3_i32 = arith.constant 3 : i32
    %649 = vector.broadcast %c3_i32 : i32 to vector<32x1xi32>
    %650 = arith.addi %19, %649 : vector<32x1xi32>
    %c0_i32_234 = arith.constant 0 : i32
    %651 = vector.broadcast %c0_i32_234 : i32 to vector<32x1xi32>
    %652 = arith.cmpi sge, %650, %651 : vector<32x1xi32>
    %c3_i32_235 = arith.constant 3 : i32
    %653 = vector.broadcast %c3_i32_235 : i32 to vector<32x1xi32>
    %654 = arith.addi %19, %653 : vector<32x1xi32>
    %c16_i32_236 = arith.constant 16 : i32
    %655 = vector.broadcast %c16_i32_236 : i32 to vector<32x1xi32>
    %656 = arith.cmpi slt, %654, %655 : vector<32x1xi32>
    %657 = arith.andi %652, %656 : vector<32x1xi1>
    %cst_237 = arith.constant 0.000000e+00 : f32
    %658 = vector.shape_cast %657 : vector<32x1xi1> to vector<32x1xi1>
    %659 = vector.broadcast %658 : vector<32x1xi1> to vector<32x32xi1>
    %660 = vector.broadcast %cst_237 : f32 to vector<32x32xf32>
    %661 = arith.select %659, %648, %660 : vector<32x32xi1>, vector<32x32xf32>
    %c288 = arith.constant 288 : index
    %c0_238 = arith.constant 0 : index
    %662 = vector.load %arg6[%c288, %c0_238] : memref<1248x128xbf16, #tpu.memory_space<vmem>>, vector<32x64xbf16>
    %663 = arith.truncf %661 : vector<32x32xf32> to vector<32x32xbf16>
    %cst_239 = arith.constant dense<0.000000e+00> : vector<32x64xf32>
    %664 = tpu.matmul %663, %662, %cst_239 {dimension_numbers = #tpu.dot_dimension_numbers<[1], [0], [0], [1], [0, 0, 1, 1], [], []>} : vector<32x32xbf16>, vector<32x64xbf16>, vector<32x64xf32> -> vector<32x64xf32>
    %665 = arith.addf %645, %664 : vector<32x64xf32>
    %cst_240 = arith.constant 0.000000e+00 : f32
    %666 = vector.broadcast %cst_240 : f32 to vector<4x32xf32>
    %667 = vector.extract_strided_slice %522 {offsets = [4, 0], sizes = [28, 32], strides = [1, 1]} : vector<32x32xf32> to vector<28x32xf32>
    %668 = tpu.concatenate %667, %666 in 0 : vector<28x32xf32>, vector<4x32xf32> -> vector<32x32xf32>
    %c4_i32 = arith.constant 4 : i32
    %669 = vector.broadcast %c4_i32 : i32 to vector<32x1xi32>
    %670 = arith.addi %19, %669 : vector<32x1xi32>
    %c0_i32_241 = arith.constant 0 : i32
    %671 = vector.broadcast %c0_i32_241 : i32 to vector<32x1xi32>
    %672 = arith.cmpi sge, %670, %671 : vector<32x1xi32>
    %c4_i32_242 = arith.constant 4 : i32
    %673 = vector.broadcast %c4_i32_242 : i32 to vector<32x1xi32>
    %674 = arith.addi %19, %673 : vector<32x1xi32>
    %c16_i32_243 = arith.constant 16 : i32
    %675 = vector.broadcast %c16_i32_243 : i32 to vector<32x1xi32>
    %676 = arith.cmpi slt, %674, %675 : vector<32x1xi32>
    %677 = arith.andi %672, %676 : vector<32x1xi1>
    %cst_244 = arith.constant 0.000000e+00 : f32
    %678 = vector.shape_cast %677 : vector<32x1xi1> to vector<32x1xi1>
    %679 = vector.broadcast %678 : vector<32x1xi1> to vector<32x32xi1>
    %680 = vector.broadcast %cst_244 : f32 to vector<32x32xf32>
    %681 = arith.select %679, %668, %680 : vector<32x32xi1>, vector<32x32xf32>
    %c320 = arith.constant 320 : index
    %c0_245 = arith.constant 0 : index
    %682 = vector.load %arg6[%c320, %c0_245] : memref<1248x128xbf16, #tpu.memory_space<vmem>>, vector<32x64xbf16>
    %683 = arith.truncf %681 : vector<32x32xf32> to vector<32x32xbf16>
    %cst_246 = arith.constant dense<0.000000e+00> : vector<32x64xf32>
    %684 = tpu.matmul %683, %682, %cst_246 {dimension_numbers = #tpu.dot_dimension_numbers<[1], [0], [0], [1], [0, 0, 1, 1], [], []>} : vector<32x32xbf16>, vector<32x64xbf16>, vector<32x64xf32> -> vector<32x64xf32>
    %685 = arith.addf %665, %684 : vector<32x64xf32>
    %c32_247 = arith.constant 32 : index
    %c0_248 = arith.constant 0 : index
    %686 = vector.load %arg7[%c32_247, %c0_248] : memref<360x128xf32, #tpu.memory_space<vmem>>, vector<1x64xf32>
    %687 = vector.broadcast %686 : vector<1x64xf32> to vector<32x64xf32>
    %688 = arith.addf %685, %687 : vector<32x64xf32>
    %cst_249 = arith.constant 0.000000e+00 : f32
    %689 = vector.broadcast %cst_249 : f32 to vector<32x64xf32>
    %690 = arith.maximumf %688, %689 : vector<32x64xf32>
    %c352_250 = arith.constant 352 : index
    %c0_251 = arith.constant 0 : index
    %691 = vector.load %arg6[%c352_250, %c0_251] : memref<1248x128xbf16, #tpu.memory_space<vmem>>, vector<64x32xbf16>
    %692 = arith.truncf %690 : vector<32x64xf32> to vector<32x64xbf16>
    %cst_252 = arith.constant dense<0.000000e+00> : vector<32x32xf32>
    %693 = tpu.matmul %692, %691, %cst_252 {dimension_numbers = #tpu.dot_dimension_numbers<[1], [0], [0], [1], [0, 0, 1, 1], [], []>} : vector<32x64xbf16>, vector<64x32xbf16>, vector<32x32xf32> -> vector<32x32xf32>
    %c40 = arith.constant 40 : index
    %c0_253 = arith.constant 0 : index
    %694 = vector.load %arg7[%c40, %c0_253] : memref<360x128xf32, #tpu.memory_space<vmem>>, vector<1x32xf32>
    %695 = vector.broadcast %694 : vector<1x32xf32> to vector<32x32xf32>
    %696 = arith.addf %693, %695 : vector<32x32xf32>
    %697 = arith.addf %696, %522 : vector<32x32xf32>
    %c48 = arith.constant 48 : index
    %c0_254 = arith.constant 0 : index
    %698 = vector.load %arg7[%c48, %c0_254] : memref<360x128xf32, #tpu.memory_space<vmem>>, vector<1x32xf32>
    %c56 = arith.constant 56 : index
    %c0_255 = arith.constant 0 : index
    %699 = vector.load %arg7[%c56, %c0_255] : memref<360x128xf32, #tpu.memory_space<vmem>>, vector<1x32xf32>
    %cst_256 = arith.constant dense<0.000000e+00> : vector<32xf32>
    %700 = vector.multi_reduction <add>, %697, %cst_256 [1] : vector<32x32xf32> to vector<32xf32>
    %701 = vector.shape_cast %700 : vector<32xf32> to vector<32x1xf32>
    %cst_257 = arith.constant 3.200000e+01 : f32
    %702 = vector.broadcast %cst_257 : f32 to vector<32x1xf32>
    %703 = arith.divf %701, %702 : vector<32x1xf32>
    %704 = vector.broadcast %703 : vector<32x1xf32> to vector<32x32xf32>
    %705 = arith.subf %697, %704 : vector<32x32xf32>
    %706 = arith.mulf %705, %705 : vector<32x32xf32>
    %cst_258 = arith.constant dense<0.000000e+00> : vector<32xf32>
    %707 = vector.multi_reduction <add>, %706, %cst_258 [1] : vector<32x32xf32> to vector<32xf32>
    %708 = vector.shape_cast %707 : vector<32xf32> to vector<32x1xf32>
    %cst_259 = arith.constant 3.200000e+01 : f32
    %709 = vector.broadcast %cst_259 : f32 to vector<32x1xf32>
    %710 = arith.divf %708, %709 : vector<32x1xf32>
    %711 = vector.broadcast %703 : vector<32x1xf32> to vector<32x32xf32>
    %712 = arith.subf %697, %711 : vector<32x32xf32>
    %cst_260 = arith.constant 9.99999974E-6 : f32
    %713 = vector.broadcast %cst_260 : f32 to vector<32x1xf32>
    %714 = arith.addf %710, %713 : vector<32x1xf32>
    %715 = math.rsqrt %714 : vector<32x1xf32>
    %716 = vector.broadcast %715 : vector<32x1xf32> to vector<32x32xf32>
    %717 = arith.mulf %712, %716 : vector<32x32xf32>
    %718 = vector.broadcast %698 : vector<1x32xf32> to vector<32x32xf32>
    %719 = arith.mulf %717, %718 : vector<32x32xf32>
    %720 = vector.broadcast %699 : vector<1x32xf32> to vector<32x32xf32>
    %721 = arith.addf %719, %720 : vector<32x32xf32>
    %722 = vector.broadcast %2 : vector<32x1xf32> to vector<32x32xf32>
    %723 = arith.mulf %721, %722 : vector<32x32xf32>
    %c416 = arith.constant 416 : index
    %c0_261 = arith.constant 0 : index
    %724 = vector.load %arg6[%c416, %c0_261] : memref<1248x128xbf16, #tpu.memory_space<vmem>>, vector<32x96xbf16>
    %725 = arith.truncf %723 : vector<32x32xf32> to vector<32x32xbf16>
    %cst_262 = arith.constant dense<0.000000e+00> : vector<32x96xf32>
    %726 = tpu.matmul %725, %724, %cst_262 {dimension_numbers = #tpu.dot_dimension_numbers<[1], [0], [0], [1], [0, 0, 1, 1], [], []>} : vector<32x32xbf16>, vector<32x96xbf16>, vector<32x96xf32> -> vector<32x96xf32>
    %c64_263 = arith.constant 64 : index
    %c0_264 = arith.constant 0 : index
    %727 = vector.load %arg7[%c64_263, %c0_264] : memref<360x128xf32, #tpu.memory_space<vmem>>, vector<1x96xf32>
    %728 = vector.broadcast %727 : vector<1x96xf32> to vector<32x96xf32>
    %729 = arith.addf %726, %728 : vector<32x96xf32>
    %730 = vector.extract_strided_slice %729 {offsets = [0, 0], sizes = [16, 96], strides = [1, 1]} : vector<32x96xf32> to vector<16x96xf32>
    %731 = vector.extract_strided_slice %1 {offsets = [0, 0], sizes = [1, 16], strides = [1, 1]} : vector<2x16xf32> to vector<1x16xf32>
    %732 = vector.extract_strided_slice %730 {offsets = [0, 0], sizes = [16, 16], strides = [1, 1]} : vector<16x96xf32> to vector<16x16xf32>
    %733 = vector.extract_strided_slice %730 {offsets = [0, 32], sizes = [16, 16], strides = [1, 1]} : vector<16x96xf32> to vector<16x16xf32>
    %734 = vector.extract_strided_slice %730 {offsets = [0, 64], sizes = [16, 16], strides = [1, 1]} : vector<16x96xf32> to vector<16x16xf32>
    %735 = arith.truncf %732 : vector<16x16xf32> to vector<16x16xbf16>
    %736 = arith.truncf %733 : vector<16x16xf32> to vector<16x16xbf16>
    %cst_265 = arith.constant dense<0.000000e+00> : vector<16x16xf32>
    %737 = tpu.matmul %735, %736, %cst_265 {dimension_numbers = #tpu.dot_dimension_numbers<[1], [1], [0], [0], [0, 0, 1, 0], [], []>} : vector<16x16xbf16>, vector<16x16xbf16>, vector<16x16xf32> -> vector<16x16xf32>
    %cst_266 = arith.constant 2.500000e-01 : f32
    %738 = vector.broadcast %cst_266 : f32 to vector<16x16xf32>
    %739 = arith.mulf %737, %738 : vector<16x16xf32>
    %cst_267 = arith.constant 5.000000e-01 : f32
    %740 = vector.broadcast %cst_267 : f32 to vector<1x16xf32>
    %741 = arith.cmpf ogt, %731, %740 : vector<1x16xf32>
    %cst_268 = arith.constant -1.000000e+09 : f32
    %742 = vector.shape_cast %741 : vector<1x16xi1> to vector<1x16xi1>
    %743 = vector.broadcast %742 : vector<1x16xi1> to vector<16x16xi1>
    %744 = vector.broadcast %cst_268 : f32 to vector<16x16xf32>
    %745 = arith.select %743, %739, %744 : vector<16x16xi1>, vector<16x16xf32>
    %cst_269 = arith.constant dense<0xFF800000> : vector<16xf32>
    %746 = vector.multi_reduction <maximumf>, %745, %cst_269 [1] : vector<16x16xf32> to vector<16xf32>
    %cst_270 = arith.constant 0xFF800000 : f32
    %747 = vector.broadcast %cst_270 : f32 to vector<16xf32>
    %748 = arith.maximumf %747, %746 : vector<16xf32>
    %749 = vector.shape_cast %748 : vector<16xf32> to vector<16x1xf32>
    %750 = vector.broadcast %749 : vector<16x1xf32> to vector<16x16xf32>
    %751 = arith.subf %745, %750 : vector<16x16xf32>
    %752 = math.exp %751 : vector<16x16xf32>
    %cst_271 = arith.constant dense<0.000000e+00> : vector<16xf32>
    %753 = vector.multi_reduction <add>, %752, %cst_271 [1] : vector<16x16xf32> to vector<16xf32>
    %754 = vector.shape_cast %753 : vector<16xf32> to vector<16x1xf32>
    %755 = vector.broadcast %754 : vector<16x1xf32> to vector<16x16xf32>
    %756 = arith.divf %752, %755 : vector<16x16xf32>
    %757 = arith.truncf %756 : vector<16x16xf32> to vector<16x16xbf16>
    %758 = arith.truncf %734 : vector<16x16xf32> to vector<16x16xbf16>
    %cst_272 = arith.constant dense<0.000000e+00> : vector<16x16xf32>
    %759 = tpu.matmul %757, %758, %cst_272 {dimension_numbers = #tpu.dot_dimension_numbers<[1], [0], [0], [1], [0, 0, 1, 1], [], []>} : vector<16x16xbf16>, vector<16x16xbf16>, vector<16x16xf32> -> vector<16x16xf32>
    %760 = vector.extract_strided_slice %730 {offsets = [0, 16], sizes = [16, 16], strides = [1, 1]} : vector<16x96xf32> to vector<16x16xf32>
    %761 = vector.extract_strided_slice %730 {offsets = [0, 48], sizes = [16, 16], strides = [1, 1]} : vector<16x96xf32> to vector<16x16xf32>
    %762 = vector.extract_strided_slice %730 {offsets = [0, 80], sizes = [16, 16], strides = [1, 1]} : vector<16x96xf32> to vector<16x16xf32>
    %763 = arith.truncf %760 : vector<16x16xf32> to vector<16x16xbf16>
    %764 = arith.truncf %761 : vector<16x16xf32> to vector<16x16xbf16>
    %cst_273 = arith.constant dense<0.000000e+00> : vector<16x16xf32>
    %765 = tpu.matmul %763, %764, %cst_273 {dimension_numbers = #tpu.dot_dimension_numbers<[1], [1], [0], [0], [0, 0, 1, 0], [], []>} : vector<16x16xbf16>, vector<16x16xbf16>, vector<16x16xf32> -> vector<16x16xf32>
    %cst_274 = arith.constant 2.500000e-01 : f32
    %766 = vector.broadcast %cst_274 : f32 to vector<16x16xf32>
    %767 = arith.mulf %765, %766 : vector<16x16xf32>
    %cst_275 = arith.constant 5.000000e-01 : f32
    %768 = vector.broadcast %cst_275 : f32 to vector<1x16xf32>
    %769 = arith.cmpf ogt, %731, %768 : vector<1x16xf32>
    %cst_276 = arith.constant -1.000000e+09 : f32
    %770 = vector.shape_cast %769 : vector<1x16xi1> to vector<1x16xi1>
    %771 = vector.broadcast %770 : vector<1x16xi1> to vector<16x16xi1>
    %772 = vector.broadcast %cst_276 : f32 to vector<16x16xf32>
    %773 = arith.select %771, %767, %772 : vector<16x16xi1>, vector<16x16xf32>
    %cst_277 = arith.constant dense<0xFF800000> : vector<16xf32>
    %774 = vector.multi_reduction <maximumf>, %773, %cst_277 [1] : vector<16x16xf32> to vector<16xf32>
    %cst_278 = arith.constant 0xFF800000 : f32
    %775 = vector.broadcast %cst_278 : f32 to vector<16xf32>
    %776 = arith.maximumf %775, %774 : vector<16xf32>
    %777 = vector.shape_cast %776 : vector<16xf32> to vector<16x1xf32>
    %778 = vector.broadcast %777 : vector<16x1xf32> to vector<16x16xf32>
    %779 = arith.subf %773, %778 : vector<16x16xf32>
    %780 = math.exp %779 : vector<16x16xf32>
    %cst_279 = arith.constant dense<0.000000e+00> : vector<16xf32>
    %781 = vector.multi_reduction <add>, %780, %cst_279 [1] : vector<16x16xf32> to vector<16xf32>
    %782 = vector.shape_cast %781 : vector<16xf32> to vector<16x1xf32>
    %783 = vector.broadcast %782 : vector<16x1xf32> to vector<16x16xf32>
    %784 = arith.divf %780, %783 : vector<16x16xf32>
    %785 = arith.truncf %784 : vector<16x16xf32> to vector<16x16xbf16>
    %786 = arith.truncf %762 : vector<16x16xf32> to vector<16x16xbf16>
    %cst_280 = arith.constant dense<0.000000e+00> : vector<16x16xf32>
    %787 = tpu.matmul %785, %786, %cst_280 {dimension_numbers = #tpu.dot_dimension_numbers<[1], [0], [0], [1], [0, 0, 1, 1], [], []>} : vector<16x16xbf16>, vector<16x16xbf16>, vector<16x16xf32> -> vector<16x16xf32>
    %788 = tpu.concatenate %759, %787 in 1 : vector<16x16xf32>, vector<16x16xf32> -> vector<16x32xf32>
    %789 = vector.extract_strided_slice %729 {offsets = [16, 0], sizes = [16, 96], strides = [1, 1]} : vector<32x96xf32> to vector<16x96xf32>
    %790 = vector.extract_strided_slice %1 {offsets = [1, 0], sizes = [1, 16], strides = [1, 1]} : vector<2x16xf32> to vector<1x16xf32>
    %791 = vector.extract_strided_slice %789 {offsets = [0, 0], sizes = [16, 16], strides = [1, 1]} : vector<16x96xf32> to vector<16x16xf32>
    %792 = vector.extract_strided_slice %789 {offsets = [0, 32], sizes = [16, 16], strides = [1, 1]} : vector<16x96xf32> to vector<16x16xf32>
    %793 = vector.extract_strided_slice %789 {offsets = [0, 64], sizes = [16, 16], strides = [1, 1]} : vector<16x96xf32> to vector<16x16xf32>
    %794 = arith.truncf %791 : vector<16x16xf32> to vector<16x16xbf16>
    %795 = arith.truncf %792 : vector<16x16xf32> to vector<16x16xbf16>
    %cst_281 = arith.constant dense<0.000000e+00> : vector<16x16xf32>
    %796 = tpu.matmul %794, %795, %cst_281 {dimension_numbers = #tpu.dot_dimension_numbers<[1], [1], [0], [0], [0, 0, 1, 0], [], []>} : vector<16x16xbf16>, vector<16x16xbf16>, vector<16x16xf32> -> vector<16x16xf32>
    %cst_282 = arith.constant 2.500000e-01 : f32
    %797 = vector.broadcast %cst_282 : f32 to vector<16x16xf32>
    %798 = arith.mulf %796, %797 : vector<16x16xf32>
    %cst_283 = arith.constant 5.000000e-01 : f32
    %799 = vector.broadcast %cst_283 : f32 to vector<1x16xf32>
    %800 = arith.cmpf ogt, %790, %799 : vector<1x16xf32>
    %cst_284 = arith.constant -1.000000e+09 : f32
    %801 = vector.shape_cast %800 : vector<1x16xi1> to vector<1x16xi1>
    %802 = vector.broadcast %801 : vector<1x16xi1> to vector<16x16xi1>
    %803 = vector.broadcast %cst_284 : f32 to vector<16x16xf32>
    %804 = arith.select %802, %798, %803 : vector<16x16xi1>, vector<16x16xf32>
    %cst_285 = arith.constant dense<0xFF800000> : vector<16xf32>
    %805 = vector.multi_reduction <maximumf>, %804, %cst_285 [1] : vector<16x16xf32> to vector<16xf32>
    %cst_286 = arith.constant 0xFF800000 : f32
    %806 = vector.broadcast %cst_286 : f32 to vector<16xf32>
    %807 = arith.maximumf %806, %805 : vector<16xf32>
    %808 = vector.shape_cast %807 : vector<16xf32> to vector<16x1xf32>
    %809 = vector.broadcast %808 : vector<16x1xf32> to vector<16x16xf32>
    %810 = arith.subf %804, %809 : vector<16x16xf32>
    %811 = math.exp %810 : vector<16x16xf32>
    %cst_287 = arith.constant dense<0.000000e+00> : vector<16xf32>
    %812 = vector.multi_reduction <add>, %811, %cst_287 [1] : vector<16x16xf32> to vector<16xf32>
    %813 = vector.shape_cast %812 : vector<16xf32> to vector<16x1xf32>
    %814 = vector.broadcast %813 : vector<16x1xf32> to vector<16x16xf32>
    %815 = arith.divf %811, %814 : vector<16x16xf32>
    %816 = arith.truncf %815 : vector<16x16xf32> to vector<16x16xbf16>
    %817 = arith.truncf %793 : vector<16x16xf32> to vector<16x16xbf16>
    %cst_288 = arith.constant dense<0.000000e+00> : vector<16x16xf32>
    %818 = tpu.matmul %816, %817, %cst_288 {dimension_numbers = #tpu.dot_dimension_numbers<[1], [0], [0], [1], [0, 0, 1, 1], [], []>} : vector<16x16xbf16>, vector<16x16xbf16>, vector<16x16xf32> -> vector<16x16xf32>
    %819 = vector.extract_strided_slice %789 {offsets = [0, 16], sizes = [16, 16], strides = [1, 1]} : vector<16x96xf32> to vector<16x16xf32>
    %820 = vector.extract_strided_slice %789 {offsets = [0, 48], sizes = [16, 16], strides = [1, 1]} : vector<16x96xf32> to vector<16x16xf32>
    %821 = vector.extract_strided_slice %789 {offsets = [0, 80], sizes = [16, 16], strides = [1, 1]} : vector<16x96xf32> to vector<16x16xf32>
    %822 = arith.truncf %819 : vector<16x16xf32> to vector<16x16xbf16>
    %823 = arith.truncf %820 : vector<16x16xf32> to vector<16x16xbf16>
    %cst_289 = arith.constant dense<0.000000e+00> : vector<16x16xf32>
    %824 = tpu.matmul %822, %823, %cst_289 {dimension_numbers = #tpu.dot_dimension_numbers<[1], [1], [0], [0], [0, 0, 1, 0], [], []>} : vector<16x16xbf16>, vector<16x16xbf16>, vector<16x16xf32> -> vector<16x16xf32>
    %cst_290 = arith.constant 2.500000e-01 : f32
    %825 = vector.broadcast %cst_290 : f32 to vector<16x16xf32>
    %826 = arith.mulf %824, %825 : vector<16x16xf32>
    %cst_291 = arith.constant 5.000000e-01 : f32
    %827 = vector.broadcast %cst_291 : f32 to vector<1x16xf32>
    %828 = arith.cmpf ogt, %790, %827 : vector<1x16xf32>
    %cst_292 = arith.constant -1.000000e+09 : f32
    %829 = vector.shape_cast %828 : vector<1x16xi1> to vector<1x16xi1>
    %830 = vector.broadcast %829 : vector<1x16xi1> to vector<16x16xi1>
    %831 = vector.broadcast %cst_292 : f32 to vector<16x16xf32>
    %832 = arith.select %830, %826, %831 : vector<16x16xi1>, vector<16x16xf32>
    %cst_293 = arith.constant dense<0xFF800000> : vector<16xf32>
    %833 = vector.multi_reduction <maximumf>, %832, %cst_293 [1] : vector<16x16xf32> to vector<16xf32>
    %cst_294 = arith.constant 0xFF800000 : f32
    %834 = vector.broadcast %cst_294 : f32 to vector<16xf32>
    %835 = arith.maximumf %834, %833 : vector<16xf32>
    %836 = vector.shape_cast %835 : vector<16xf32> to vector<16x1xf32>
    %837 = vector.broadcast %836 : vector<16x1xf32> to vector<16x16xf32>
    %838 = arith.subf %832, %837 : vector<16x16xf32>
    %839 = math.exp %838 : vector<16x16xf32>
    %cst_295 = arith.constant dense<0.000000e+00> : vector<16xf32>
    %840 = vector.multi_reduction <add>, %839, %cst_295 [1] : vector<16x16xf32> to vector<16xf32>
    %841 = vector.shape_cast %840 : vector<16xf32> to vector<16x1xf32>
    %842 = vector.broadcast %841 : vector<16x1xf32> to vector<16x16xf32>
    %843 = arith.divf %839, %842 : vector<16x16xf32>
    %844 = arith.truncf %843 : vector<16x16xf32> to vector<16x16xbf16>
    %845 = arith.truncf %821 : vector<16x16xf32> to vector<16x16xbf16>
    %cst_296 = arith.constant dense<0.000000e+00> : vector<16x16xf32>
    %846 = tpu.matmul %844, %845, %cst_296 {dimension_numbers = #tpu.dot_dimension_numbers<[1], [0], [0], [1], [0, 0, 1, 1], [], []>} : vector<16x16xbf16>, vector<16x16xbf16>, vector<16x16xf32> -> vector<16x16xf32>
    %847 = tpu.concatenate %818, %846 in 1 : vector<16x16xf32>, vector<16x16xf32> -> vector<16x32xf32>
    %848 = tpu.concatenate %788, %847 in 0 : vector<16x32xf32>, vector<16x32xf32> -> vector<32x32xf32>
    %c448 = arith.constant 448 : index
    %c0_297 = arith.constant 0 : index
    %849 = vector.load %arg6[%c448, %c0_297] : memref<1248x128xbf16, #tpu.memory_space<vmem>>, vector<32x32xbf16>
    %850 = arith.truncf %848 : vector<32x32xf32> to vector<32x32xbf16>
    %cst_298 = arith.constant dense<0.000000e+00> : vector<32x32xf32>
    %851 = tpu.matmul %850, %849, %cst_298 {dimension_numbers = #tpu.dot_dimension_numbers<[1], [0], [0], [1], [0, 0, 1, 1], [], []>} : vector<32x32xbf16>, vector<32x32xbf16>, vector<32x32xf32> -> vector<32x32xf32>
    %c72 = arith.constant 72 : index
    %c0_299 = arith.constant 0 : index
    %852 = vector.load %arg7[%c72, %c0_299] : memref<360x128xf32, #tpu.memory_space<vmem>>, vector<1x32xf32>
    %853 = vector.broadcast %852 : vector<1x32xf32> to vector<32x32xf32>
    %854 = arith.addf %851, %853 : vector<32x32xf32>
    %855 = arith.addf %854, %723 : vector<32x32xf32>
    %c80 = arith.constant 80 : index
    %c0_300 = arith.constant 0 : index
    %856 = vector.load %arg7[%c80, %c0_300] : memref<360x128xf32, #tpu.memory_space<vmem>>, vector<1x32xf32>
    %c88 = arith.constant 88 : index
    %c0_301 = arith.constant 0 : index
    %857 = vector.load %arg7[%c88, %c0_301] : memref<360x128xf32, #tpu.memory_space<vmem>>, vector<1x32xf32>
    %cst_302 = arith.constant dense<0.000000e+00> : vector<32xf32>
    %858 = vector.multi_reduction <add>, %855, %cst_302 [1] : vector<32x32xf32> to vector<32xf32>
    %859 = vector.shape_cast %858 : vector<32xf32> to vector<32x1xf32>
    %cst_303 = arith.constant 3.200000e+01 : f32
    %860 = vector.broadcast %cst_303 : f32 to vector<32x1xf32>
    %861 = arith.divf %859, %860 : vector<32x1xf32>
    %862 = vector.broadcast %861 : vector<32x1xf32> to vector<32x32xf32>
    %863 = arith.subf %855, %862 : vector<32x32xf32>
    %864 = arith.mulf %863, %863 : vector<32x32xf32>
    %cst_304 = arith.constant dense<0.000000e+00> : vector<32xf32>
    %865 = vector.multi_reduction <add>, %864, %cst_304 [1] : vector<32x32xf32> to vector<32xf32>
    %866 = vector.shape_cast %865 : vector<32xf32> to vector<32x1xf32>
    %cst_305 = arith.constant 3.200000e+01 : f32
    %867 = vector.broadcast %cst_305 : f32 to vector<32x1xf32>
    %868 = arith.divf %866, %867 : vector<32x1xf32>
    %869 = vector.broadcast %861 : vector<32x1xf32> to vector<32x32xf32>
    %870 = arith.subf %855, %869 : vector<32x32xf32>
    %cst_306 = arith.constant 9.99999974E-6 : f32
    %871 = vector.broadcast %cst_306 : f32 to vector<32x1xf32>
    %872 = arith.addf %868, %871 : vector<32x1xf32>
    %873 = math.rsqrt %872 : vector<32x1xf32>
    %874 = vector.broadcast %873 : vector<32x1xf32> to vector<32x32xf32>
    %875 = arith.mulf %870, %874 : vector<32x32xf32>
    %876 = vector.broadcast %856 : vector<1x32xf32> to vector<32x32xf32>
    %877 = arith.mulf %875, %876 : vector<32x32xf32>
    %878 = vector.broadcast %857 : vector<1x32xf32> to vector<32x32xf32>
    %879 = arith.addf %877, %878 : vector<32x32xf32>
    %880 = vector.broadcast %2 : vector<32x1xf32> to vector<32x32xf32>
    %881 = arith.mulf %879, %880 : vector<32x32xf32>
    %cst_307 = arith.constant 0.000000e+00 : f32
    %882 = vector.broadcast %cst_307 : f32 to vector<4x32xf32>
    %883 = vector.extract_strided_slice %881 {offsets = [0, 0], sizes = [28, 32], strides = [1, 1]} : vector<32x32xf32> to vector<28x32xf32>
    %884 = tpu.concatenate %882, %883 in 0 : vector<4x32xf32>, vector<28x32xf32> -> vector<32x32xf32>
    %c-4_i32_308 = arith.constant -4 : i32
    %885 = vector.broadcast %c-4_i32_308 : i32 to vector<32x1xi32>
    %886 = arith.addi %19, %885 : vector<32x1xi32>
    %c0_i32_309 = arith.constant 0 : i32
    %887 = vector.broadcast %c0_i32_309 : i32 to vector<32x1xi32>
    %888 = arith.cmpi sge, %886, %887 : vector<32x1xi32>
    %c-4_i32_310 = arith.constant -4 : i32
    %889 = vector.broadcast %c-4_i32_310 : i32 to vector<32x1xi32>
    %890 = arith.addi %19, %889 : vector<32x1xi32>
    %c16_i32_311 = arith.constant 16 : i32
    %891 = vector.broadcast %c16_i32_311 : i32 to vector<32x1xi32>
    %892 = arith.cmpi slt, %890, %891 : vector<32x1xi32>
    %893 = arith.andi %888, %892 : vector<32x1xi1>
    %cst_312 = arith.constant 0.000000e+00 : f32
    %894 = vector.shape_cast %893 : vector<32x1xi1> to vector<32x1xi1>
    %895 = vector.broadcast %894 : vector<32x1xi1> to vector<32x32xi1>
    %896 = vector.broadcast %cst_312 : f32 to vector<32x32xf32>
    %897 = arith.select %895, %884, %896 : vector<32x32xi1>, vector<32x32xf32>
    %c480 = arith.constant 480 : index
    %c0_313 = arith.constant 0 : index
    %898 = vector.load %arg6[%c480, %c0_313] : memref<1248x128xbf16, #tpu.memory_space<vmem>>, vector<32x64xbf16>
    %899 = arith.truncf %897 : vector<32x32xf32> to vector<32x32xbf16>
    %cst_314 = arith.constant dense<0.000000e+00> : vector<32x64xf32>
    %900 = tpu.matmul %899, %898, %cst_314 {dimension_numbers = #tpu.dot_dimension_numbers<[1], [0], [0], [1], [0, 0, 1, 1], [], []>} : vector<32x32xbf16>, vector<32x64xbf16>, vector<32x64xf32> -> vector<32x64xf32>
    %cst_315 = arith.constant 0.000000e+00 : f32
    %901 = vector.broadcast %cst_315 : f32 to vector<3x32xf32>
    %902 = vector.extract_strided_slice %881 {offsets = [0, 0], sizes = [29, 32], strides = [1, 1]} : vector<32x32xf32> to vector<29x32xf32>
    %903 = tpu.concatenate %901, %902 in 0 : vector<3x32xf32>, vector<29x32xf32> -> vector<32x32xf32>
    %c-3_i32_316 = arith.constant -3 : i32
    %904 = vector.broadcast %c-3_i32_316 : i32 to vector<32x1xi32>
    %905 = arith.addi %19, %904 : vector<32x1xi32>
    %c0_i32_317 = arith.constant 0 : i32
    %906 = vector.broadcast %c0_i32_317 : i32 to vector<32x1xi32>
    %907 = arith.cmpi sge, %905, %906 : vector<32x1xi32>
    %c-3_i32_318 = arith.constant -3 : i32
    %908 = vector.broadcast %c-3_i32_318 : i32 to vector<32x1xi32>
    %909 = arith.addi %19, %908 : vector<32x1xi32>
    %c16_i32_319 = arith.constant 16 : i32
    %910 = vector.broadcast %c16_i32_319 : i32 to vector<32x1xi32>
    %911 = arith.cmpi slt, %909, %910 : vector<32x1xi32>
    %912 = arith.andi %907, %911 : vector<32x1xi1>
    %cst_320 = arith.constant 0.000000e+00 : f32
    %913 = vector.shape_cast %912 : vector<32x1xi1> to vector<32x1xi1>
    %914 = vector.broadcast %913 : vector<32x1xi1> to vector<32x32xi1>
    %915 = vector.broadcast %cst_320 : f32 to vector<32x32xf32>
    %916 = arith.select %914, %903, %915 : vector<32x32xi1>, vector<32x32xf32>
    %c512 = arith.constant 512 : index
    %c0_321 = arith.constant 0 : index
    %917 = vector.load %arg6[%c512, %c0_321] : memref<1248x128xbf16, #tpu.memory_space<vmem>>, vector<32x64xbf16>
    %918 = arith.truncf %916 : vector<32x32xf32> to vector<32x32xbf16>
    %cst_322 = arith.constant dense<0.000000e+00> : vector<32x64xf32>
    %919 = tpu.matmul %918, %917, %cst_322 {dimension_numbers = #tpu.dot_dimension_numbers<[1], [0], [0], [1], [0, 0, 1, 1], [], []>} : vector<32x32xbf16>, vector<32x64xbf16>, vector<32x64xf32> -> vector<32x64xf32>
    %920 = arith.addf %900, %919 : vector<32x64xf32>
    %cst_323 = arith.constant 0.000000e+00 : f32
    %921 = vector.broadcast %cst_323 : f32 to vector<2x32xf32>
    %922 = vector.extract_strided_slice %881 {offsets = [0, 0], sizes = [30, 32], strides = [1, 1]} : vector<32x32xf32> to vector<30x32xf32>
    %923 = tpu.concatenate %921, %922 in 0 : vector<2x32xf32>, vector<30x32xf32> -> vector<32x32xf32>
    %c-2_i32_324 = arith.constant -2 : i32
    %924 = vector.broadcast %c-2_i32_324 : i32 to vector<32x1xi32>
    %925 = arith.addi %19, %924 : vector<32x1xi32>
    %c0_i32_325 = arith.constant 0 : i32
    %926 = vector.broadcast %c0_i32_325 : i32 to vector<32x1xi32>
    %927 = arith.cmpi sge, %925, %926 : vector<32x1xi32>
    %c-2_i32_326 = arith.constant -2 : i32
    %928 = vector.broadcast %c-2_i32_326 : i32 to vector<32x1xi32>
    %929 = arith.addi %19, %928 : vector<32x1xi32>
    %c16_i32_327 = arith.constant 16 : i32
    %930 = vector.broadcast %c16_i32_327 : i32 to vector<32x1xi32>
    %931 = arith.cmpi slt, %929, %930 : vector<32x1xi32>
    %932 = arith.andi %927, %931 : vector<32x1xi1>
    %cst_328 = arith.constant 0.000000e+00 : f32
    %933 = vector.shape_cast %932 : vector<32x1xi1> to vector<32x1xi1>
    %934 = vector.broadcast %933 : vector<32x1xi1> to vector<32x32xi1>
    %935 = vector.broadcast %cst_328 : f32 to vector<32x32xf32>
    %936 = arith.select %934, %923, %935 : vector<32x32xi1>, vector<32x32xf32>
    %c544 = arith.constant 544 : index
    %c0_329 = arith.constant 0 : index
    %937 = vector.load %arg6[%c544, %c0_329] : memref<1248x128xbf16, #tpu.memory_space<vmem>>, vector<32x64xbf16>
    %938 = arith.truncf %936 : vector<32x32xf32> to vector<32x32xbf16>
    %cst_330 = arith.constant dense<0.000000e+00> : vector<32x64xf32>
    %939 = tpu.matmul %938, %937, %cst_330 {dimension_numbers = #tpu.dot_dimension_numbers<[1], [0], [0], [1], [0, 0, 1, 1], [], []>} : vector<32x32xbf16>, vector<32x64xbf16>, vector<32x64xf32> -> vector<32x64xf32>
    %940 = arith.addf %920, %939 : vector<32x64xf32>
    %cst_331 = arith.constant 0.000000e+00 : f32
    %941 = vector.broadcast %cst_331 : f32 to vector<1x32xf32>
    %942 = vector.extract_strided_slice %881 {offsets = [0, 0], sizes = [31, 32], strides = [1, 1]} : vector<32x32xf32> to vector<31x32xf32>
    %943 = tpu.concatenate %941, %942 in 0 : vector<1x32xf32>, vector<31x32xf32> -> vector<32x32xf32>
    %c-1_i32_332 = arith.constant -1 : i32
    %944 = vector.broadcast %c-1_i32_332 : i32 to vector<32x1xi32>
    %945 = arith.addi %19, %944 : vector<32x1xi32>
    %c0_i32_333 = arith.constant 0 : i32
    %946 = vector.broadcast %c0_i32_333 : i32 to vector<32x1xi32>
    %947 = arith.cmpi sge, %945, %946 : vector<32x1xi32>
    %c-1_i32_334 = arith.constant -1 : i32
    %948 = vector.broadcast %c-1_i32_334 : i32 to vector<32x1xi32>
    %949 = arith.addi %19, %948 : vector<32x1xi32>
    %c16_i32_335 = arith.constant 16 : i32
    %950 = vector.broadcast %c16_i32_335 : i32 to vector<32x1xi32>
    %951 = arith.cmpi slt, %949, %950 : vector<32x1xi32>
    %952 = arith.andi %947, %951 : vector<32x1xi1>
    %cst_336 = arith.constant 0.000000e+00 : f32
    %953 = vector.shape_cast %952 : vector<32x1xi1> to vector<32x1xi1>
    %954 = vector.broadcast %953 : vector<32x1xi1> to vector<32x32xi1>
    %955 = vector.broadcast %cst_336 : f32 to vector<32x32xf32>
    %956 = arith.select %954, %943, %955 : vector<32x32xi1>, vector<32x32xf32>
    %c576 = arith.constant 576 : index
    %c0_337 = arith.constant 0 : index
    %957 = vector.load %arg6[%c576, %c0_337] : memref<1248x128xbf16, #tpu.memory_space<vmem>>, vector<32x64xbf16>
    %958 = arith.truncf %956 : vector<32x32xf32> to vector<32x32xbf16>
    %cst_338 = arith.constant dense<0.000000e+00> : vector<32x64xf32>
    %959 = tpu.matmul %958, %957, %cst_338 {dimension_numbers = #tpu.dot_dimension_numbers<[1], [0], [0], [1], [0, 0, 1, 1], [], []>} : vector<32x32xbf16>, vector<32x64xbf16>, vector<32x64xf32> -> vector<32x64xf32>
    %960 = arith.addf %940, %959 : vector<32x64xf32>
    %c608 = arith.constant 608 : index
    %c0_339 = arith.constant 0 : index
    %961 = vector.load %arg6[%c608, %c0_339] : memref<1248x128xbf16, #tpu.memory_space<vmem>>, vector<32x64xbf16>
    %962 = arith.truncf %881 : vector<32x32xf32> to vector<32x32xbf16>
    %cst_340 = arith.constant dense<0.000000e+00> : vector<32x64xf32>
    %963 = tpu.matmul %962, %961, %cst_340 {dimension_numbers = #tpu.dot_dimension_numbers<[1], [0], [0], [1], [0, 0, 1, 1], [], []>} : vector<32x32xbf16>, vector<32x64xbf16>, vector<32x64xf32> -> vector<32x64xf32>
    %964 = arith.addf %960, %963 : vector<32x64xf32>
    %cst_341 = arith.constant 0.000000e+00 : f32
    %965 = vector.broadcast %cst_341 : f32 to vector<1x32xf32>
    %966 = vector.extract_strided_slice %881 {offsets = [1, 0], sizes = [31, 32], strides = [1, 1]} : vector<32x32xf32> to vector<31x32xf32>
    %967 = tpu.concatenate %966, %965 in 0 : vector<31x32xf32>, vector<1x32xf32> -> vector<32x32xf32>
    %c1_i32_342 = arith.constant 1 : i32
    %968 = vector.broadcast %c1_i32_342 : i32 to vector<32x1xi32>
    %969 = arith.addi %19, %968 : vector<32x1xi32>
    %c0_i32_343 = arith.constant 0 : i32
    %970 = vector.broadcast %c0_i32_343 : i32 to vector<32x1xi32>
    %971 = arith.cmpi sge, %969, %970 : vector<32x1xi32>
    %c1_i32_344 = arith.constant 1 : i32
    %972 = vector.broadcast %c1_i32_344 : i32 to vector<32x1xi32>
    %973 = arith.addi %19, %972 : vector<32x1xi32>
    %c16_i32_345 = arith.constant 16 : i32
    %974 = vector.broadcast %c16_i32_345 : i32 to vector<32x1xi32>
    %975 = arith.cmpi slt, %973, %974 : vector<32x1xi32>
    %976 = arith.andi %971, %975 : vector<32x1xi1>
    %cst_346 = arith.constant 0.000000e+00 : f32
    %977 = vector.shape_cast %976 : vector<32x1xi1> to vector<32x1xi1>
    %978 = vector.broadcast %977 : vector<32x1xi1> to vector<32x32xi1>
    %979 = vector.broadcast %cst_346 : f32 to vector<32x32xf32>
    %980 = arith.select %978, %967, %979 : vector<32x32xi1>, vector<32x32xf32>
    %c640 = arith.constant 640 : index
    %c0_347 = arith.constant 0 : index
    %981 = vector.load %arg6[%c640, %c0_347] : memref<1248x128xbf16, #tpu.memory_space<vmem>>, vector<32x64xbf16>
    %982 = arith.truncf %980 : vector<32x32xf32> to vector<32x32xbf16>
    %cst_348 = arith.constant dense<0.000000e+00> : vector<32x64xf32>
    %983 = tpu.matmul %982, %981, %cst_348 {dimension_numbers = #tpu.dot_dimension_numbers<[1], [0], [0], [1], [0, 0, 1, 1], [], []>} : vector<32x32xbf16>, vector<32x64xbf16>, vector<32x64xf32> -> vector<32x64xf32>
    %984 = arith.addf %964, %983 : vector<32x64xf32>
    %cst_349 = arith.constant 0.000000e+00 : f32
    %985 = vector.broadcast %cst_349 : f32 to vector<2x32xf32>
    %986 = vector.extract_strided_slice %881 {offsets = [2, 0], sizes = [30, 32], strides = [1, 1]} : vector<32x32xf32> to vector<30x32xf32>
    %987 = tpu.concatenate %986, %985 in 0 : vector<30x32xf32>, vector<2x32xf32> -> vector<32x32xf32>
    %c2_i32_350 = arith.constant 2 : i32
    %988 = vector.broadcast %c2_i32_350 : i32 to vector<32x1xi32>
    %989 = arith.addi %19, %988 : vector<32x1xi32>
    %c0_i32_351 = arith.constant 0 : i32
    %990 = vector.broadcast %c0_i32_351 : i32 to vector<32x1xi32>
    %991 = arith.cmpi sge, %989, %990 : vector<32x1xi32>
    %c2_i32_352 = arith.constant 2 : i32
    %992 = vector.broadcast %c2_i32_352 : i32 to vector<32x1xi32>
    %993 = arith.addi %19, %992 : vector<32x1xi32>
    %c16_i32_353 = arith.constant 16 : i32
    %994 = vector.broadcast %c16_i32_353 : i32 to vector<32x1xi32>
    %995 = arith.cmpi slt, %993, %994 : vector<32x1xi32>
    %996 = arith.andi %991, %995 : vector<32x1xi1>
    %cst_354 = arith.constant 0.000000e+00 : f32
    %997 = vector.shape_cast %996 : vector<32x1xi1> to vector<32x1xi1>
    %998 = vector.broadcast %997 : vector<32x1xi1> to vector<32x32xi1>
    %999 = vector.broadcast %cst_354 : f32 to vector<32x32xf32>
    %1000 = arith.select %998, %987, %999 : vector<32x32xi1>, vector<32x32xf32>
    %c672 = arith.constant 672 : index
    %c0_355 = arith.constant 0 : index
    %1001 = vector.load %arg6[%c672, %c0_355] : memref<1248x128xbf16, #tpu.memory_space<vmem>>, vector<32x64xbf16>
    %1002 = arith.truncf %1000 : vector<32x32xf32> to vector<32x32xbf16>
    %cst_356 = arith.constant dense<0.000000e+00> : vector<32x64xf32>
    %1003 = tpu.matmul %1002, %1001, %cst_356 {dimension_numbers = #tpu.dot_dimension_numbers<[1], [0], [0], [1], [0, 0, 1, 1], [], []>} : vector<32x32xbf16>, vector<32x64xbf16>, vector<32x64xf32> -> vector<32x64xf32>
    %1004 = arith.addf %984, %1003 : vector<32x64xf32>
    %cst_357 = arith.constant 0.000000e+00 : f32
    %1005 = vector.broadcast %cst_357 : f32 to vector<3x32xf32>
    %1006 = vector.extract_strided_slice %881 {offsets = [3, 0], sizes = [29, 32], strides = [1, 1]} : vector<32x32xf32> to vector<29x32xf32>
    %1007 = tpu.concatenate %1006, %1005 in 0 : vector<29x32xf32>, vector<3x32xf32> -> vector<32x32xf32>
    %c3_i32_358 = arith.constant 3 : i32
    %1008 = vector.broadcast %c3_i32_358 : i32 to vector<32x1xi32>
    %1009 = arith.addi %19, %1008 : vector<32x1xi32>
    %c0_i32_359 = arith.constant 0 : i32
    %1010 = vector.broadcast %c0_i32_359 : i32 to vector<32x1xi32>
    %1011 = arith.cmpi sge, %1009, %1010 : vector<32x1xi32>
    %c3_i32_360 = arith.constant 3 : i32
    %1012 = vector.broadcast %c3_i32_360 : i32 to vector<32x1xi32>
    %1013 = arith.addi %19, %1012 : vector<32x1xi32>
    %c16_i32_361 = arith.constant 16 : i32
    %1014 = vector.broadcast %c16_i32_361 : i32 to vector<32x1xi32>
    %1015 = arith.cmpi slt, %1013, %1014 : vector<32x1xi32>
    %1016 = arith.andi %1011, %1015 : vector<32x1xi1>
    %cst_362 = arith.constant 0.000000e+00 : f32
    %1017 = vector.shape_cast %1016 : vector<32x1xi1> to vector<32x1xi1>
    %1018 = vector.broadcast %1017 : vector<32x1xi1> to vector<32x32xi1>
    %1019 = vector.broadcast %cst_362 : f32 to vector<32x32xf32>
    %1020 = arith.select %1018, %1007, %1019 : vector<32x32xi1>, vector<32x32xf32>
    %c704 = arith.constant 704 : index
    %c0_363 = arith.constant 0 : index
    %1021 = vector.load %arg6[%c704, %c0_363] : memref<1248x128xbf16, #tpu.memory_space<vmem>>, vector<32x64xbf16>
    %1022 = arith.truncf %1020 : vector<32x32xf32> to vector<32x32xbf16>
    %cst_364 = arith.constant dense<0.000000e+00> : vector<32x64xf32>
    %1023 = tpu.matmul %1022, %1021, %cst_364 {dimension_numbers = #tpu.dot_dimension_numbers<[1], [0], [0], [1], [0, 0, 1, 1], [], []>} : vector<32x32xbf16>, vector<32x64xbf16>, vector<32x64xf32> -> vector<32x64xf32>
    %1024 = arith.addf %1004, %1023 : vector<32x64xf32>
    %cst_365 = arith.constant 0.000000e+00 : f32
    %1025 = vector.broadcast %cst_365 : f32 to vector<4x32xf32>
    %1026 = vector.extract_strided_slice %881 {offsets = [4, 0], sizes = [28, 32], strides = [1, 1]} : vector<32x32xf32> to vector<28x32xf32>
    %1027 = tpu.concatenate %1026, %1025 in 0 : vector<28x32xf32>, vector<4x32xf32> -> vector<32x32xf32>
    %c4_i32_366 = arith.constant 4 : i32
    %1028 = vector.broadcast %c4_i32_366 : i32 to vector<32x1xi32>
    %1029 = arith.addi %19, %1028 : vector<32x1xi32>
    %c0_i32_367 = arith.constant 0 : i32
    %1030 = vector.broadcast %c0_i32_367 : i32 to vector<32x1xi32>
    %1031 = arith.cmpi sge, %1029, %1030 : vector<32x1xi32>
    %c4_i32_368 = arith.constant 4 : i32
    %1032 = vector.broadcast %c4_i32_368 : i32 to vector<32x1xi32>
    %1033 = arith.addi %19, %1032 : vector<32x1xi32>
    %c16_i32_369 = arith.constant 16 : i32
    %1034 = vector.broadcast %c16_i32_369 : i32 to vector<32x1xi32>
    %1035 = arith.cmpi slt, %1033, %1034 : vector<32x1xi32>
    %1036 = arith.andi %1031, %1035 : vector<32x1xi1>
    %cst_370 = arith.constant 0.000000e+00 : f32
    %1037 = vector.shape_cast %1036 : vector<32x1xi1> to vector<32x1xi1>
    %1038 = vector.broadcast %1037 : vector<32x1xi1> to vector<32x32xi1>
    %1039 = vector.broadcast %cst_370 : f32 to vector<32x32xf32>
    %1040 = arith.select %1038, %1027, %1039 : vector<32x32xi1>, vector<32x32xf32>
    %c736 = arith.constant 736 : index
    %c0_371 = arith.constant 0 : index
    %1041 = vector.load %arg6[%c736, %c0_371] : memref<1248x128xbf16, #tpu.memory_space<vmem>>, vector<32x64xbf16>
    %1042 = arith.truncf %1040 : vector<32x32xf32> to vector<32x32xbf16>
    %cst_372 = arith.constant dense<0.000000e+00> : vector<32x64xf32>
    %1043 = tpu.matmul %1042, %1041, %cst_372 {dimension_numbers = #tpu.dot_dimension_numbers<[1], [0], [0], [1], [0, 0, 1, 1], [], []>} : vector<32x32xbf16>, vector<32x64xbf16>, vector<32x64xf32> -> vector<32x64xf32>
    %1044 = arith.addf %1024, %1043 : vector<32x64xf32>
    %c96_373 = arith.constant 96 : index
    %c0_374 = arith.constant 0 : index
    %1045 = vector.load %arg7[%c96_373, %c0_374] : memref<360x128xf32, #tpu.memory_space<vmem>>, vector<1x64xf32>
    %1046 = vector.broadcast %1045 : vector<1x64xf32> to vector<32x64xf32>
    %1047 = arith.addf %1044, %1046 : vector<32x64xf32>
    %cst_375 = arith.constant 0.000000e+00 : f32
    %1048 = vector.broadcast %cst_375 : f32 to vector<32x64xf32>
    %1049 = arith.maximumf %1047, %1048 : vector<32x64xf32>
    %c768 = arith.constant 768 : index
    %c0_376 = arith.constant 0 : index
    %1050 = vector.load %arg6[%c768, %c0_376] : memref<1248x128xbf16, #tpu.memory_space<vmem>>, vector<64x32xbf16>
    %1051 = arith.truncf %1049 : vector<32x64xf32> to vector<32x64xbf16>
    %cst_377 = arith.constant dense<0.000000e+00> : vector<32x32xf32>
    %1052 = tpu.matmul %1051, %1050, %cst_377 {dimension_numbers = #tpu.dot_dimension_numbers<[1], [0], [0], [1], [0, 0, 1, 1], [], []>} : vector<32x64xbf16>, vector<64x32xbf16>, vector<32x32xf32> -> vector<32x32xf32>
    %c104 = arith.constant 104 : index
    %c0_378 = arith.constant 0 : index
    %1053 = vector.load %arg7[%c104, %c0_378] : memref<360x128xf32, #tpu.memory_space<vmem>>, vector<1x32xf32>
    %1054 = vector.broadcast %1053 : vector<1x32xf32> to vector<32x32xf32>
    %1055 = arith.addf %1052, %1054 : vector<32x32xf32>
    %1056 = arith.addf %1055, %881 : vector<32x32xf32>
    %c112 = arith.constant 112 : index
    %c0_379 = arith.constant 0 : index
    %1057 = vector.load %arg7[%c112, %c0_379] : memref<360x128xf32, #tpu.memory_space<vmem>>, vector<1x32xf32>
    %c120 = arith.constant 120 : index
    %c0_380 = arith.constant 0 : index
    %1058 = vector.load %arg7[%c120, %c0_380] : memref<360x128xf32, #tpu.memory_space<vmem>>, vector<1x32xf32>
    %cst_381 = arith.constant dense<0.000000e+00> : vector<32xf32>
    %1059 = vector.multi_reduction <add>, %1056, %cst_381 [1] : vector<32x32xf32> to vector<32xf32>
    %1060 = vector.shape_cast %1059 : vector<32xf32> to vector<32x1xf32>
    %cst_382 = arith.constant 3.200000e+01 : f32
    %1061 = vector.broadcast %cst_382 : f32 to vector<32x1xf32>
    %1062 = arith.divf %1060, %1061 : vector<32x1xf32>
    %1063 = vector.broadcast %1062 : vector<32x1xf32> to vector<32x32xf32>
    %1064 = arith.subf %1056, %1063 : vector<32x32xf32>
    %1065 = arith.mulf %1064, %1064 : vector<32x32xf32>
    %cst_383 = arith.constant dense<0.000000e+00> : vector<32xf32>
    %1066 = vector.multi_reduction <add>, %1065, %cst_383 [1] : vector<32x32xf32> to vector<32xf32>
    %1067 = vector.shape_cast %1066 : vector<32xf32> to vector<32x1xf32>
    %cst_384 = arith.constant 3.200000e+01 : f32
    %1068 = vector.broadcast %cst_384 : f32 to vector<32x1xf32>
    %1069 = arith.divf %1067, %1068 : vector<32x1xf32>
    %1070 = vector.broadcast %1062 : vector<32x1xf32> to vector<32x32xf32>
    %1071 = arith.subf %1056, %1070 : vector<32x32xf32>
    %cst_385 = arith.constant 9.99999974E-6 : f32
    %1072 = vector.broadcast %cst_385 : f32 to vector<32x1xf32>
    %1073 = arith.addf %1069, %1072 : vector<32x1xf32>
    %1074 = math.rsqrt %1073 : vector<32x1xf32>
    %1075 = vector.broadcast %1074 : vector<32x1xf32> to vector<32x32xf32>
    %1076 = arith.mulf %1071, %1075 : vector<32x32xf32>
    %1077 = vector.broadcast %1057 : vector<1x32xf32> to vector<32x32xf32>
    %1078 = arith.mulf %1076, %1077 : vector<32x32xf32>
    %1079 = vector.broadcast %1058 : vector<1x32xf32> to vector<32x32xf32>
    %1080 = arith.addf %1078, %1079 : vector<32x32xf32>
    %1081 = vector.broadcast %2 : vector<32x1xf32> to vector<32x32xf32>
    %1082 = arith.mulf %1080, %1081 : vector<32x32xf32>
    %c1216 = arith.constant 1216 : index
    %c0_386 = arith.constant 0 : index
    %1083 = vector.load %arg6[%c1216, %c0_386] : memref<1248x128xbf16, #tpu.memory_space<vmem>>, vector<32x16xbf16>
    %1084 = arith.truncf %1082 : vector<32x32xf32> to vector<32x32xbf16>
    %cst_387 = arith.constant dense<0.000000e+00> : vector<32x16xf32>
    %1085 = tpu.matmul %1084, %1083, %cst_387 {dimension_numbers = #tpu.dot_dimension_numbers<[1], [0], [0], [1], [0, 0, 1, 1], [], []>} : vector<32x32xbf16>, vector<32x16xbf16>, vector<32x16xf32> -> vector<32x16xf32>
    %c256_388 = arith.constant 256 : index
    %c0_389 = arith.constant 0 : index
    %1086 = vector.load %arg7[%c256_388, %c0_389] : memref<360x128xf32, #tpu.memory_space<vmem>>, vector<1x16xf32>
    %1087 = vector.broadcast %1086 : vector<1x16xf32> to vector<32x16xf32>
    %1088 = arith.addf %1085, %1087 : vector<32x16xf32>
    %c0_390 = arith.constant 0 : index
    %c0_391 = arith.constant 0 : index
    %1089 = vector.load %arg8[%c0_390, %c0_391] : memref<32x16xf32, #tpu.memory_space<vmem>>, vector<32x16xf32>
    tpu.vector_store %arg8[%c0_390, %c0_391], %1088 {strides = array<i32>} : memref<32x16xf32, #tpu.memory_space<vmem>>, vector<32x16xf32>,
    return
  }
  func.func @transform_0(%arg0: i32) -> (i32, i32) {
    %c0_i32 = arith.constant 0 : i32
    %c0_i32_0 = arith.constant 0 : i32
    %c0_i32_1 = arith.constant 0 : i32
    return %c0_i32, %c0_i32_0 : i32, i32
  }
  func.func @transform_1(%arg0: i32) -> (i32, i32) {
    %c0_i32 = arith.constant 0 : i32
    %c0_i32_0 = arith.constant 0 : i32
    %c0_i32_1 = arith.constant 0 : i32
    return %c0_i32, %c0_i32_0 : i32, i32
  }
  func.func @transform_2(%arg0: i32) -> (i32, i32) {
    %c0_i32 = arith.constant 0 : i32
    %c0_i32_0 = arith.constant 0 : i32
    %c0_i32_1 = arith.constant 0 : i32
    return %c0_i32, %c0_i32_0 : i32, i32
  }
  func.func @transform_3(%arg0: i32) -> (i32, i32) {
    %c0_i32 = arith.constant 0 : i32
    %c0_i32_0 = arith.constant 0 : i32
    %c0_i32_1 = arith.constant 0 : i32
    return %c0_i32, %c0_i32_0 : i32, i32
  }
  func.func @transform_4(%arg0: i32) -> (i32, i32) {
    %c0_i32 = arith.constant 0 : i32
    %c0_i32_0 = arith.constant 0 : i32
    %c0_i32_1 = arith.constant 0 : i32
    return %c0_i32, %c0_i32_0 : i32, i32
  }
  func.func @transform_5(%arg0: i32) -> (i32, i32) {
    %c0_i32 = arith.constant 0 : i32
    %c0_i32_0 = arith.constant 0 : i32
    %c0_i32_1 = arith.constant 0 : i32
    return %c0_i32, %c0_i32_0 : i32, i32
  }
  func.func @transform_6(%arg0: i32) -> (i32, i32) {
    %c0_i32 = arith.constant 0 : i32
    %c0_i32_0 = arith.constant 0 : i32
    %c0_i32_1 = arith.constant 0 : i32
    return %c0_i32, %c0_i32_0 : i32, i32
  }
  func.func @transform_7(%arg0: i32) -> (i32, i32) {
    %c0_i32 = arith.constant 0 : i32
    %c0_i32_0 = arith.constant 0 : i32
    %c0_i32_1 = arith.constant 0 : i32
    return %c0_i32, %c0_i32_0 : i32, i32
  }
  func.func @transform_8(%arg0: i32) -> (i32, i32) {
    %c0_i32 = arith.constant 0 : i32
    %c0_i32_0 = arith.constant 0 : i32
    %c0_i32_1 = arith.constant 0 : i32
    return %c0_i32, %c0_i32_0 : i32, i32
  }
}

</mosaic_0001>

<bundles_post_ra>
// kernel: squeeze.2
= control target key start
LH: loop header
LB: loop body
LE: loop exit
PB: predicated region body
PF: predicated region fallthrough
CT: control target
= control target key end

     0   :  { %vm7_vm0 = vcmask 130048   ;;  %s39_s0 = inlined_call_operand.vmem [shape: f32[32], index: 0, kind: input, shape index: {}]   ;;  %s40_s1 = inlined_call_operand.vmem [shape: f32[2,16], index: 1, kind: output, shape index: {}]  }
   0x1   :  { %v4_v0 = vld [vmem:[%s39_s0] sm:$0x1]  ;;  %s22_s0 = smov 112  }
   0x2   :  { %5 = vst [vmem:[#allocation1] sm:$0x1] %v4_v0 }
   0x9   :  { %v9_v1 = vld [vmem:[#allocation1] sm:$0x1]  }
   0xa   :  { %v6_v2 = vld [vmem:[#allocation1] sm:$0x1]   ;;  %10 = vrot.lane.b32.xlu0 %v9_v1, %s22_s0 }
   0xb   :  { %8 = vst.msk [vmem:[#allocation0] sm:$0x1] %vm7_vm0, %v6_v2  }
  0x7c   :  { %v11_v3 = vpop.permute.xlu0 %10  }
  0x7d   :  { %14 = vst.msk [vmem:[#allocation0 + $0x1] sm:$0x1] %vm7_vm0, %v11_v3  }
  0x84   :  { %v17_v4 = vld [vmem:[#allocation0] sm:$0x3] }
  0x85   :  { %20 = vst [vmem:[%s40_s1] sm:$0x3] %v17_v4 }

// kernel: forward.2
= control target key start
LH: loop header
LB: loop body
LE: loop exit
PB: predicated region body
PF: predicated region fallthrough
CT: control target
= control target key end

     0   :  { %12 = vsyncpa [#allocation3], 0  ;;  %s2933_s24 = smov [#allocation2]   ;;  %s2934_s26 = smov 64   ;;  %s3610_s0 = inlined_call_operand.vmem [shape: f32[16,32], index: 0, kind: input, shape index: {}]   ;;  %s3611_s1 = inlined_call_operand.vmem [shape: f32[2,8], index: 1, kind: input, shape index: {}]   ;;  %s3612_s2 = inlined_call_operand.vmem [shape: f32[16,1], index: 2, kind: input, shape index: {}]   ;;  %s3613_s3 = inlined_call_operand.hbm [shape: bf16[1024,128], index: 3, kind: input, shape index: {}]   ;;  %s3614_s4 = inlined_call_operand.vmem [shape: f32[192,128], index: 4, kind: input, shape index: {}]   ;;  %s3615_s5 = inlined_call_operand.vmem [shape: f32[16,32], index: 5, kind: output, shape index: {0}]   ;;  %s3616_s6 = inlined_call_operand.vmem [shape: f32[1,16], index: 6, kind: output, shape index: {1}]  }
   0x1   :  { %s23_s23 = sshll.u32 %s3613_s3, 4  ;;  %s25_s25 = sshll.u32 %s2933_s24, 4  ;;  %s24_s23 = int_to_ptr.hbm [resolvable:$true] %s23_s23  ;;  %s26_s25 = int_to_ptr.vmem [resolvable:$true] %s25_s25 }
   0x2   :  { %s2935_s27 = smov 4  }
   0x3   :  { %31 = dma.hbm_to_vmem [thread:$0]  %s24_s23, 8192, %s26_s25, [#allocation3], %s2934_s26, %s2934_s26, %s2935_s27  }
   0x4   :  { %2931 = dma.done.wait [#allocation3], 8192  }
   0x5   :  { %2932 = vsyncadd [#allocation3], 4294959104  ;;  %v2742_v0 = vld [vmem:[#allocation2 + $0x8] sm:$0xff]  ;;  %v2741_v1 = vld [vmem:[#allocation2] sm:$0xff]  ;;  %vm90_vm0 = vcmask 261120   ;;  %s2936_s9 = smov 112  }
   0x6   :  { %v2986_v2 = vld [vmem:[%s3610_s0] sm:$0xff]  ;;  %v2991_v3 = vld [vmem:[%s3610_s0 + $0x8] sm:$0xff]  ;;  %100 = vmatpush.bf16.msra.mxu0 %v2742_v0  ;;  %s2937_s0 = smov 96   ;;  %s2938_s10 = smov 80   ;;  %vm112_vm1 = vcmask 130048   ;;  %v2939_v22 = vmov 0  }
   0x7   :  { %v75_v4 = vpack.c.bf16 %v2991_v3, %v2986_v2  ;;  %v2827_v5 = vld [vmem:[%s3614_s4] ss:$0 sm:$0xff]  ;;  %2820 = vset.pattern.permute.xlu1 %v2939_v22  ;;  %2821 = vset.pattern.permute.xlu0 %v2939_v22  ;;  %vm3617_vm4 = vcmask 64512   ;;  %vm169_vm6 = vcmask 1043456   ;;  %s2941_s13 = smov 16  }
   0x8   :  { %v41_v23 = vld [vmem:[%s3611_s1] sm:$0x3]  ;;  %s2940_s1 = smov 48  }
   0x9   :  { %vm133_vm2 = vcmp.gt.f32.partialorder %v41_v23, 0.5 }
   0xa   :  { %101 = vmatpush.bf16.msra.mxu0 %v2741_v1  ;;  %v134_v25 = vsel %vm133_vm2, 1, %v2939_v22 }
   0xb   :  { %v135_v26 = vperm.slane %v134_v25, 0  ;;  %v286_v39 = vperm.slane %v134_v25, 1 }
   0xd   :  { %2446 = vmatmul.msk.bf16.vlgmr.msra.gmra.mxu0 %vm90_vm0, %v75_v4  ;;  %vm3028_vm3 = vcmp.eq.s32.totalorder %v135_v26, 1  ;;  %vm3038_vm5 = vcmp.eq.s32.totalorder %v286_v39, 1 }
  0x8a   :  { %v103_v6 = vpop.f32.mrf.mxu0 }
  0x8b   :  { %v104_v7 = vadd.f32 %v2827_v5, %v103_v6 }
  0x8d   :  { %v2999_v8 = vpack.c.bf16 %v104_v7, %v104_v7 }
  0x8f   :  { %186 = vrot.lane.b32.xlu1 %v2999_v8, %s2936_s9  ;;  %110 = vrot.lane.b32.xlu0 %v2999_v8, %s2937_s0 }
  0x92   :  { %v105_v9 = vpop.f32.mrf.mxu0 }
  0x93   :  { %v106_v10 = vadd.f32 %v2827_v5, %v105_v9 }
  0x95   :  { %v3005_v11 = vpack.c.bf16 %v106_v10, %v106_v10 }
  0x97   :  { %335 = vrot.lane.b32.xlu2 %v3005_v11, %s2936_s9  ;;  %337 = vrot.lane.b32.xlu1 %v3005_v11, %s2938_s10 }
  0x98   :  { %188 = vrot.lane.b32.xlu0 %v2999_v8, %s2938_s10 }
  0x9f   :  { %264 = vrot.lane.b32.xlu2 %v3005_v11, %s2937_s0 }
  0xf1   :  { %v336_v12 = vpop.permute.xlu2 %335 }
  0xf9   :  { %v265_v13 = vpop.permute.xlu2 %264 }
  0xfa   :  { %v270_v14 = vsel %vm112_vm1, %v265_v13, 0 }
  0xfb   :  { %279 = vmatpush.bf16.xpose.msrb.mxu0 %v270_v14 }
 0x101   :  { %v187_v15 = vpop.permute.xlu1 %186  ;;  %v111_v16 = vpop.permute.xlu0 %110 }
 0x102   :  { %2451 = vmatmul.msk.bf16.vlgmr.msrb.gmra.mxu0 %vm112_vm1, %v3005_v11  ;;  %v117_v17 = vsel %vm112_vm1, %v111_v16, 0 }
 0x103   :  { %126 = vmatpush.bf16.xpose.msra.mxu1 %v117_v17 }
 0x109   :  { %v338_v18 = vpop.permute.xlu1 %337 }
 0x10a   :  { %v189_v19 = vpop.permute.xlu0 %188  ;;  %2447 = vmatmul.msk.bf16.vlgmr.msra.gmra.mxu1 %vm112_vm1, %v2999_v8  ;;  %v343_v20 = vsel %vm112_vm1, %v338_v18, 0 }
 0x10b   :  { %v194_v21 = vsel %vm112_vm1, %v189_v19, 0 }
 0x10c   :  { %203 = vmatpush.bf16.xpose.msra.mxu3 %v194_v21 }
 0x113   :  { %2449 = vmatmul.msk.bf16.vlgmr.msra.gmra.mxu3 %vm112_vm1, %v187_v15 }
 0x114   :  { %352 = vmatpush.bf16.xpose.msrb.mxu3 %v343_v20 }
 0x123   :  { %2453 = vmatmul.msk.bf16.vlgmr.msrb.gmra.mxu3 %vm112_vm1, %v336_v12 }
 0x17f   :  { %v281_v24 = vpop.f32.mrf.mxu0 }
 0x180   :  { %v285_v45 = vmul.f32 0.25, %v281_v24 }
 0x182   :  { %v288_v47 = vsel %vm3038_vm5, %v285_v45, -1e+09 }
 0x183   :  { %v289_v48 = vsel %vm3617_vm4, %v288_v47, -inf }
 0x187   :  { %v128_v27 = vpop.f32.mrf.mxu1  ;;  %v283_v28 = vpop.f32.mrf.mxu0 }
 0x188   :  { %v132_v30 = vmul.f32 0.25, %v128_v27 }
 0x18a   :  { %v137_v31 = vsel %vm3028_vm3, %v132_v30, -1e+09 }
 0x18b   :  { %v139_v32 = vsel %vm3617_vm4, %v137_v31, -inf }
 0x18c   :  { %140 = vmax.xlane.f32.xlu0 %v139_v32 }
 0x18f   :  { %v130_v33 = vpop.f32.mrf.mxu1 }
 0x196   :  { %v205_v34 = vpop.f32.mrf.mxu3 }
 0x197   :  { %v209_v35 = vmul.f32 0.25, %v205_v34 }
 0x199   :  { %v210_v36 = vsel %vm3028_vm3, %v209_v35, -1e+09 }
 0x19a   :  { %v211_v37 = vsel %vm3617_vm4, %v210_v36, -inf }
 0x19b   :  { %212 = vmax.xlane.f32.xlu1 %v211_v37 }
 0x19e   :  { %v207_v38 = vpop.f32.mrf.mxu3 }
 0x1a6   :  { %v354_v40 = vpop.f32.mrf.mxu3 }
 0x1a7   :  { %v358_v41 = vmul.f32 0.25, %v354_v40 }
 0x1a9   :  { %v359_v43 = vsel %vm3038_vm5, %v358_v41, -1e+09 }
 0x1aa   :  { %v360_v44 = vsel %vm3617_vm4, %v359_v43, -inf }
 0x1ab   :  { %361 = vmax.xlane.f32.xlu2 %v360_v44 }
 0x1ae   :  { %v356_v46 = vpop.f32.mrf.mxu3 }
 0x1b3   :  { %290 = vmax.xlane.f32.xlu2 %v289_v48 }
 0x1b4   :  { %164 = vrot.lane.b32.xlu1 %v2999_v8, %s2934_s26 }
 0x1ff   :  { %v141_v49 = vpop.xlane.xlu0 %140 }
 0x200   :  { %v142_v50 = vsub.f32 %v137_v31, %v141_v49 }
 0x202   :  { %v143_v51 = vmul.f32 1.442695, %v142_v50 }
 0x204   :  { %2849 = vpow2.f32 %v143_v51 }
 0x20a   :  { %v2850_v52 = vpop.eup %2849 }
 0x20b   :  { %v145_v53 = vsel %vm3617_vm4, %v2850_v52, 0.0 }
 0x20c   :  { %146 = vadd.xlane.f32.xlu2 %v145_v53 }
 0x20e   :  { %v213_v54 = vpop.xlane.xlu1 %212 }
 0x20f   :  { %v214_v55 = vsub.f32 %v210_v36, %v213_v54 }
 0x211   :  { %v215_v56 = vmul.f32 1.442695, %v214_v55 }
 0x213   :  { %2851 = vpow2.f32 %v215_v56 }
 0x219   :  { %v3051_v57 = vpop.eup %2851 }
 0x21a   :  { %v217_v58 = vsel %vm3617_vm4, %v3051_v57, 0.0 }
 0x21b   :  { %218 = vadd.xlane.f32.xlu0 %v217_v58 }
 0x21e   :  { %v362_v59 = vpop.xlane.xlu2 %361 }
 0x21f   :  { %v363_v60 = vsub.f32 %v359_v43, %v362_v59 }
 0x221   :  { %v364_v61 = vmul.f32 1.442695, %v363_v60 }
 0x223   :  { %2853 = vpow2.f32 %v364_v61 }
 0x224   :  { %236 = vrot.lane.b32.xlu2 %v2999_v8, %s2940_s1 }
 0x226   :  { %v165_v62 = vpop.permute.xlu1 %164  ;;  %v291_v63 = vpop.xlane.xlu2 %290 }
 0x227   :  { %v292_v0 = vsub.f32 %v288_v47, %v291_v63  ;;  %v171_v1 = vsel %vm169_vm6, %v165_v62, 0 }
 0x228   :  { %180 = vmatpush.bf16.msra.mxu2 %v171_v1 }
 0x229   :  { %v3058_v4 = vpop.eup %2853  ;;  %v293_v5 = vmul.f32 1.442695, %v292_v0 }
 0x22a   :  { %v366_v6 = vsel %vm3617_vm4, %v3058_v4, 0.0 }
 0x22b   :  { %2855 = vpow2.f32 %v293_v5  ;;  %367 = vadd.xlane.f32.xlu0 %v366_v6 }
 0x231   :  { %v3062_v7 = vpop.eup %2855 }
 0x232   :  { %v295_v8 = vsel %vm3617_vm4, %v3062_v7, 0.0 }
 0x233   :  { %296 = vadd.xlane.f32.xlu1 %v295_v8 }
 0x23f   :  { %385 = vrot.lane.b32.xlu0 %v3005_v11, %s2940_s1 }
 0x247   :  { %314 = vrot.lane.b32.xlu0 %v3005_v11, %s2934_s26 }
 0x27f   :  { %v147_v9 = vpop.xlane.xlu2 %146 }
 0x280   :  { %2857 = vrcp.f32 %v147_v9  ;;  %v159_v17 = vand.u32 2147483648, %v147_v9  ;;  %v157_v18 = vand.u32 2147483647, %v147_v9  ;;  %vm153_vm8 = vweird.f32 %v147_v9 }
 0x282   :  { %v160_v21 = vor.u32 1.1754944e-38, %v159_v17  ;;  %vm158_vm10 = vcmp.eq.f32.partialorder %v157_v18, 8.507059e+37  ;;  %v2743_v18 = vld [vmem:[#allocation2 + $0x10] sm:$0xff] }
 0x286   :  { %v2858_v10 = vpop.eup %2857 }
 0x287   :  { %v149_v12 = vmul.f32 %v2858_v10, %v147_v9  ;;  %v237_v13 = vpop.permute.xlu2 %236  ;;  %vm154_vm7 = vweird.f32 %v2858_v10 }
 0x288   :  { %v242_v14 = vsel %vm169_vm6, %v237_v13, 0  ;;  %vm155_vm9 = vmor %vm153_vm8, %vm154_vm7 }
 0x289   :  { %v150_v15 = vsub.f32 1.0, %v149_v12  ;;  %251 = vmatpush.bf16.msrb.mxu2 %v242_v14 }
 0x28b   :  { %v151_v16 = vmul.f32 %v2858_v10, %v150_v15 }
 0x28d   :  { %v152_v19 = vadd.f32 %v2858_v10, %v151_v16 }
 0x28e   :  { %v219_v20 = vpop.xlane.xlu0 %218 }
 0x28f   :  { %2859 = vrcp.f32 %v219_v20  ;;  %v156_v11 = vsel %vm155_vm9, %v2858_v10, %v152_v19  ;;  %v231_v30 = vand.u32 2147483648, %v219_v20  ;;  %v229_v31 = vand.u32 2147483647, %v219_v20  ;;  %v2744_v10 = vld [vmem:[#allocation2 + $0x18] sm:$0xff] }
 0x290   :  { %v161_v22 = vsel %vm158_vm10, %v160_v21, %v156_v11  ;;  %vm225_vm12 = vweird.f32 %v219_v20  ;;  %439 = vmatpush.bf16.msra.mxu0 %v2744_v10  ;;  %v2758_v10 = vld [vmem:[#allocation2 + $0x88] sm:$0xff] }
 0x291   :  { %v162_v23 = vmul.f32 %v2850_v52, %v161_v22  ;;  %v232_v33 = vor.u32 1.1754944e-38, %v231_v30  ;;  %vm230_vm14 = vcmp.eq.f32.partialorder %v229_v31, 8.507059e+37 }
 0x293   :  { %v163_v24 = vpack.c.bf16 %v162_v23, %v162_v23 }
 0x294   :  { %440 = vmatpush.bf16.msra.mxu0 %v2743_v18 }
 0x295   :  { %v2860_v25 = vpop.eup %2859  ;;  %2448 = vmatmul.msk.bf16.vlgmr.msra.gmra.mxu2 %vm3617_vm4, %v163_v24  ;;  %v2828_v24 = vld [vmem:[%s3614_s4 + $0x8] ss:$0 sm:$0xff] }
 0x296   :  { %v221_v26 = vmul.f32 %v2860_v25, %v219_v20  ;;  %vm226_vm11 = vweird.f32 %v2860_v25 }
 0x297   :  { %vm227_vm13 = vmor %vm225_vm12, %vm226_vm11 }
 0x298   :  { %v222_v27 = vsub.f32 1.0, %v221_v26 }
 0x29a   :  { %v223_v28 = vmul.f32 %v2860_v25, %v222_v27 }
 0x29c   :  { %v224_v32 = vadd.f32 %v2860_v25, %v223_v28 }
 0x29e   :  { %v368_v34 = vpop.xlane.xlu0 %367  ;;  %v228_v35 = vsel %vm227_vm13, %v2860_v25, %v224_v32 }
 0x29f   :  { %2861 = vrcp.f32 %v368_v34  ;;  %v233_v36 = vsel %vm230_vm14, %v232_v33, %v228_v35  ;;  %v380_v44 = vand.u32 2147483648, %v368_v34  ;;  %v378_v46 = vand.u32 2147483647, %v368_v34 }
 0x2a0   :  { %v234_v37 = vmul.f32 %v3051_v57, %v233_v36  ;;  %vm374_vm2 = vweird.f32 %v368_v34 }
 0x2a1   :  { %v381_v49 = vor.u32 1.1754944e-38, %v380_v44  ;;  %vm379_vm8 = vcmp.eq.f32.partialorder %v378_v46, 8.507059e+37 }
 0x2a2   :  { %v235_v38 = vpack.c.bf16 %v234_v37, %v234_v37 }
 0x2a5   :  { %v2862_v39 = vpop.eup %2861  ;;  %2450 = vmatmul.msk.bf16.vlgmr.msrb.gmra.mxu2 %vm3617_vm4, %v235_v38 }
 0x2a6   :  { %v370_v40 = vmul.f32 %v2862_v39, %v368_v34  ;;  %v297_v41 = vpop.xlane.xlu1 %296  ;;  %vm375_vm15 = vweird.f32 %v2862_v39  ;;  %v2942_v34 = vmov 32.0  }
 0x2a7   :  { %2863 = vrcp.f32 %v297_v41  ;;  %vm376_vm7 = vmor %vm374_vm2, %vm375_vm15  ;;  %v309_v55 = vand.u32 2147483648, %v297_v41  ;;  %v307_v58 = vand.u32 2147483647, %v297_v41  ;;  %vm303_vm10 = vweird.f32 %v297_v41 }
 0x2a8   :  { %v371_v43 = vsub.f32 1.0, %v370_v40  ;;  %2865 = vrcp.f32 %v2942_v34 }
 0x2a9   :  { %v310_v62 = vor.u32 1.1754944e-38, %v309_v55  ;;  %vm308_vm12 = vcmp.eq.f32.partialorder %v307_v58, 8.507059e+37  ;;  %v2748_v55 = vld [vmem:[#allocation2 + $0x38] sm:$0xff] }
 0x2aa   :  { %v372_v45 = vmul.f32 %v2862_v39, %v371_v43  ;;  %v2752_v58 = vld [vmem:[#allocation2 + $0x58] sm:$0xff] }
 0x2ab   :  { %735 = vmatpush.bf16.msrb.mxu0 %v2752_v58 }
 0x2ac   :  { %v373_v47 = vadd.f32 %v2862_v39, %v372_v45 }
 0x2ad   :  { %v2864_v48 = vpop.eup %2863 }
 0x2ae   :  { %v377_v50 = vsel %vm376_vm7, %v2862_v39, %v373_v47  ;;  %v299_v51 = vmul.f32 %v2864_v48, %v297_v41  ;;  %vm304_vm9 = vweird.f32 %v2864_v48  ;;  %v2866_v35 = vpop.eup %2865  ;;  %v43_v47 = vld [vmem:[%s3612_s2 + $0x8] sm:$0xff] }
 0x2af   :  { %v382_v52 = vsel %vm379_vm8, %v381_v49, %v377_v50  ;;  %vm305_vm11 = vmor %vm303_vm10, %vm304_vm9  ;;  %v458_v36 = vmul.f32 32.0, %v2866_v35  ;;  %vm462_vm13 = vweird.f32 %v2866_v35  ;;  %vm547_vm10 = vcmask 1042432  }
 0x2b0   :  { %v383_v53 = vmul.f32 %v3058_v4, %v382_v52  ;;  %v300_v54 = vsub.f32 1.0, %v299_v51  ;;  %v42_v51 = vld [vmem:[%s3612_s2] sm:$0xff] }
 0x2b1   :  { %v386_v56 = vpop.permute.xlu0 %385  ;;  %v459_v37 = vsub.f32 1.0, %v458_v36 }
 0x2b2   :  { %v301_v57 = vmul.f32 %v2864_v48, %v300_v54  ;;  %v391_v59 = vsel %vm169_vm6, %v386_v56, 0  ;;  %v384_v61 = vpack.c.bf16 %v383_v53, %v383_v53  ;;  %v2746_v56 = vld [vmem:[#allocation2 + $0x28] sm:$0xff] }
 0x2b3   :  { %400 = vmatpush.bf16.msra.mxu2 %v391_v59  ;;  %v460_v38 = vmul.f32 %v2866_v35, %v459_v37  ;;  %623 = vmatpush.bf16.msra.mxu3 %v2746_v56  ;;  %v2747_v59 = vld [vmem:[#allocation2 + $0x30] sm:$0xff] }
 0x2b4   :  { %v302_v60 = vadd.f32 %v2864_v48, %v301_v57  ;;  %v2750_v57 = vld [vmem:[#allocation2 + $0x48] sm:$0xff] }
 0x2b5   :  { %v461_v39 = vadd.f32 %v2866_v35, %v460_v38 }
 0x2b6   :  { %2454 = vmatmul.msk.bf16.vlgmr.msra.gmra.mxu2 %vm3617_vm4, %v384_v61  ;;  %v306_v63 = vsel %vm305_vm11, %v2864_v48, %v302_v60  ;;  %v2745_v60 = vld [vmem:[#allocation2 + $0x20] sm:$0xff]  ;;  %vm631_vm11 = vcmask 1041408  }
 0x2b7   :  { %v311_v0 = vsel %vm308_vm12, %v310_v62, %v306_v63  ;;  %v3091_v40 = vsel %vm462_vm13, %v2866_v35, %v461_v39  ;;  %678 = vmatpush.bf16.msrb.mxu2 %v2750_v57  ;;  %v2749_v62 = vld [vmem:[#allocation2 + $0x40] sm:$0xff]  ;;  %v2751_v63 = vld [vmem:[#allocation2 + $0x50] sm:$0xff]  ;;  %624 = vmatpush.bf16.msra.mxu3 %v2745_v60 }
 0x2b8   :  { %v312_v1 = vmul.f32 %v3062_v7, %v311_v0  ;;  %736 = vmatpush.bf16.msrb.mxu0 %v2751_v63 }
 0x2b9   :  { %v315_v4 = vpop.permute.xlu0 %314 }
 0x2ba   :  { %v320_v5 = vsel %vm169_vm6, %v315_v4, 0  ;;  %v313_v6 = vpack.c.bf16 %v312_v1, %v312_v1 }
 0x2bb   :  { %329 = vmatpush.bf16.msrb.mxu1 %v320_v5  ;;  %679 = vmatpush.bf16.msrb.mxu2 %v2749_v62 }
 0x2be   :  { %2452 = vmatmul.msk.bf16.vlgmr.msrb.gmra.mxu1 %vm3617_vm4, %v313_v6 }
 0x2bf   :  { %594 = vmatpush.bf16.msra.mxu1 %v2748_v55  ;;  %885 = vmatpush.bf16.msra.mxu2 %v2758_v10 }
 0x2c3   :  { %595 = vmatpush.bf16.msra.mxu1 %v2747_v59 }
 0x318   :  { %v182_v8 = vpop.f32.mrf.mxu2 }
 0x320   :  { %v184_v9 = vpop.f32.mrf.mxu2 }
 0x321   :  { %v2756_v9 = vld [vmem:[#allocation2 + $0x78] sm:$0xff] }
 0x322   :  { %828 = vmatpush.bf16.msrb.mxu3 %v2756_v9 }
 0x328   :  { %v253_v12 = vpop.f32.mrf.mxu2 }
 0x330   :  { %v255_v13 = vpop.f32.mrf.mxu2 }
 0x339   :  { %v402_v14 = vpop.f32.mrf.mxu2 }
 0x33a   :  { %v2815_v15 = vpack.i.bf16 %v402_v14, %v253_v12  ;;  %v2760_v12 = vld [vmem:[#allocation2 + $0x98] sm:$0xff]  ;;  %v2753_v14 = vld [vmem:[#allocation2 + $0x60] sm:$0xff] }
 0x33b   :  { %v331_v16 = vpop.f32.mrf.mxu1 }
 0x33c   :  { %2816 = vrot.lane.b32.xlu2 %v2815_v15, %s2941_s13  ;;  %v2755_v15 = vld [vmem:[#allocation2 + $0x70] sm:$0xff] }
 0x33d   :  { %829 = vmatpush.bf16.msrb.mxu3 %v2755_v15 }
 0x341   :  { %v404_v7 = vpop.f32.mrf.mxu2 }
 0x342   :  { %v2757_v7 = vld [vmem:[#allocation2 + $0x80] sm:$0xff] }
 0x343   :  { %v333_v17 = vpop.f32.mrf.mxu1  ;;  %886 = vmatpush.bf16.msra.mxu2 %v2757_v7 }
 0x344   :  { %v2759_v17 = vld [vmem:[#allocation2 + $0x90] sm:$0xff] }
 0x396   :  { %v2817_v19 = vpop.permute.xlu2 %2816 }
 0x397   :  { %v2819_v20 = vunpack.i.h.bf16 %v2817_v19  ;;  %v2818_v21 = vunpack.i.l.bf16 %v2817_v19 }
 0x399   :  { %v261_v11 = vsel %vm112_vm1, %v182_v8, %v2818_v21  ;;  %v410_v22 = vsel %vm112_vm1, %v331_v16, %v2819_v20  ;;  %v2754_v8 = vld [vmem:[#allocation2 + $0x68] sm:$0xff]  ;;  %v44_v16 = vlaneseq }
 0x39a   :  { %v415_v23 = vpack.c.bf16 %v410_v22, %v261_v11  ;;  %771 = vmatpush.bf16.msrb.mxu1 %v2754_v8 }
 0x39b   :  { %v45_v11 = vshrl.u32 %v44_v16, 7 }
 0x39c   :  { %2463 = vmatmul.msk.bf16.vlgmr.msra.gmra.mxu0 %vm90_vm0, %v415_v23 }
 0x39d   :  { %942 = vmatpush.bf16.msra.mxu0 %v2760_v12 }
 0x39e   :  { %772 = vmatpush.bf16.msrb.mxu1 %v2753_v14 }
 0x3a1   :  { %943 = vmatpush.bf16.msra.mxu0 %v2759_v17 }
 0x419   :  { %v442_v25 = vpop.f32.mrf.mxu0 }
 0x41a   :  { %v443_v26 = vadd.f32 %v2828_v24, %v442_v25  ;;  %v2829_v25 = vld [vmem:[%s3614_s4 + $0x10] ss:$0 sm:$0xff] }
 0x41c   :  { %v447_v27 = vadd.f32 %v443_v26, %v2986_v2 }
 0x41e   :  { %v451_v28 = vsel %vm90_vm0, %v447_v27, 0.0 }
 0x41f   :  { %452 = vadd.xlane.f32.xlu0 %v451_v28  ;;  %v3117_v28 = vand.u32 7, %v45_v11 }
 0x421   :  { %v444_v30 = vpop.f32.mrf.mxu0  ;;  %v3125_v35 = vadd.s32 4294967293, %v3117_v28  ;;  %v3128_v36 = vadd.s32 4294967292, %v3117_v28 }
 0x422   :  { %v445_v31 = vadd.f32 %v2828_v24, %v444_v30 }
 0x423   :  { %vm3625_vm12 = vcmp.ge.s32.totalorder %v3125_v35, 0  ;;  %vm3624_vm13 = vcmp.ge.s32.totalorder %v3128_v36, 0 }
 0x424   :  { %v448_v32 = vadd.f32 %v445_v31, %v2991_v3 }
 0x426   :  { %v454_v33 = vsel %vm90_vm0, %v448_v32, 0.0 }
 0x427   :  { %455 = vadd.xlane.f32.xlu2 %v454_v33 }
 0x433   :  { %515 = vperm.xlu0 %2821, %v43_v47  }
 0x492   :  { %v453_v2 = vpop.xlane.xlu0 %452 }
 0x493   :  { %v464_v41 = vmul.f32 %v3091_v40, %v453_v2  ;;  %v3132_v2 = vadd.s32 4294967294, %v3117_v28 }
 0x495   :  { %v3094_v43 = vsub.f32 %v447_v27, %v464_v41  ;;  %v46_v27 = vadd.s32 8, %v45_v11  ;;  %v2761_v11 = vld [vmem:[#allocation2 + $0xa0] sm:$0xff] }
 0x497   :  { %v468_v3 = vmul.f32 %v3094_v43, %v3094_v43  ;;  %v3122_v34 = vand.u32 7, %v46_v27 }
 0x499   :  { %v470_v44 = vsel %vm90_vm0, %v468_v3, 0.0  ;;  %v3140_v3 = vadd.s32 4294967295, %v3117_v28  ;;  %v3150_v47 = vadd.s32 4294967292, %v3122_v34 }
 0x49a   :  { %v456_v45 = vpop.xlane.xlu2 %455  ;;  %471 = vadd.xlane.f32.xlu1 %v470_v44 }
 0x49b   :  { %v465_v46 = vmul.f32 %v3091_v40, %v456_v45 }
 0x49d   :  { %v3103_v48 = vsub.f32 %v448_v32, %v465_v46  ;;  %v2830_v32 = vld [vmem:[%s3614_s4 + $0x18] ss:$0 sm:$0xff] }
 0x49f   :  { %v469_v49 = vmul.f32 %v3103_v48, %v3103_v48 }
 0x4a1   :  { %v473_v50 = vsel %vm90_vm0, %v469_v49, 0.0  ;;  %v3156_v49 = vadd.s32 4294967295, %v3122_v34 }
 0x4a2   :  { %474 = vadd.xlane.f32.xlu1 %v473_v50 }
 0x4a3   :  { %vm3618_vm4 = vcmp.ge.s32.totalorder %v3156_v49, 0 }
 0x4a5   :  { %v3147_v46 = vpop.permute.xlu0 %515 }
 0x4bb   :  { %510 = vperm.xlu1 %2820, %v42_v51  }
 0x50d   :  { %v472_v52 = vpop.xlane.xlu1 %471 }
 0x50e   :  { %v476_v53 = vmul.f32 %v472_v52, %v3091_v40 }
 0x510   :  { %v478_v54 = vadd.f32 1e-05, %v476_v53 }
 0x512   :  { %2867 = vrsqrt.f32 %v478_v54  ;;  %vm486_vm15 = vweird.f32 %v478_v54 }
 0x515   :  { %v475_v61 = vpop.xlane.xlu1 %474 }
 0x516   :  { %v477_v0 = vmul.f32 %v475_v61, %v3091_v40 }
 0x518   :  { %v2868_v1 = vpop.eup %2867  ;;  %v479_v4 = vadd.f32 1e-05, %v477_v0 }
 0x519   :  { %v481_v5 = vmul.f32 %v2868_v1, %v478_v54  ;;  %vm487_vm14 = vweird.f32 %v2868_v1 }
 0x51a   :  { %2869 = vrsqrt.f32 %v479_v4  ;;  %vm488_vm2 = vmor %vm486_vm15, %vm487_vm14  ;;  %vm496_vm8 = vweird.f32 %v479_v4  ;;  %vm3626_vm14 = vcmask 1040384  }
 0x51b   :  { %v482_v6 = vmul.f32 %v2868_v1, %v481_v5 }
 0x51d   :  { %v483_v13 = vmul.f32 0.5, %v482_v6 }
 0x51f   :  { %v484_v18 = vsub.f32 1.5, %v483_v13 }
 0x520   :  { %v2870_v19 = vpop.eup %2869 }
 0x521   :  { %v485_v20 = vmul.f32 %v2868_v1, %v484_v18  ;;  %v491_v21 = vmul.f32 %v2870_v19, %v479_v4  ;;  %vm497_vm7 = vweird.f32 %v2870_v19 }
 0x522   :  { %vm498_vm9 = vmor %vm496_vm8, %vm497_vm7  ;;  %vm3622_vm7 = vcmp.ge.s32.totalorder %v3140_v3, 0  ;;  %vm3620_vm8 = vcmp.ge.s32.totalorder %v3150_v47, 0 }
 0x523   :  { %v489_v22 = vsel %vm488_vm2, %v2868_v1, %v485_v20  ;;  %v492_v23 = vmul.f32 %v2870_v19, %v491_v21  ;;  %vm3623_vm2 = vcmp.ge.s32.totalorder %v3132_v2, 0  ;;  %v3209_v20 = vadd.s32 1, %v3117_v28 }
 0x524   :  { %v500_v24 = vmul.f32 %v489_v22, %v3094_v43  ;;  %v3137_v43 = vadd.s32 4294967293, %v3122_v34  ;;  %v3212_v21 = vadd.s32 1, %v3122_v34  ;;  %v3215_v22 = vadd.s32 2, %v3117_v28 }
 0x525   :  { %v493_v26 = vmul.f32 0.5, %v492_v23  ;;  %v3218_v23 = vadd.s32 2, %v3122_v34 }
 0x526   :  { %v503_v31 = vmul.f32 %v2829_v25, %v500_v24  ;;  %vm3621_vm15 = vcmp.ge.s32.totalorder %v3137_v43, 0 }
 0x527   :  { %v494_v30 = vsub.f32 1.5, %v493_v26  ;;  %v3225_v26 = vadd.s32 3, %v3122_v34 }
 0x528   :  { %v506_v39 = vadd.f32 %v2830_v32, %v503_v31 }
 0x529   :  { %v495_v33 = vmul.f32 %v2870_v19, %v494_v30 }
 0x52b   :  { %v499_v37 = vsel %vm498_vm9, %v2870_v19, %v495_v33  ;;  %v2762_v19 = vld [vmem:[#allocation2 + $0xa8] sm:$0xff] }
 0x52c   :  { %v501_v38 = vmul.f32 %v499_v37, %v3103_v48  ;;  %v3153_v48 = vadd.s32 4294967294, %v3122_v34 }
 0x52d   :  { %v3134_v41 = vpop.permute.xlu1 %510 }
 0x52e   :  { %v3143_v44 = vmul.f32 %v3134_v41, %v506_v39  ;;  %v504_v45 = vmul.f32 %v2829_v25, %v501_v38  ;;  %vm3619_vm9 = vcmp.ge.s32.totalorder %v3153_v48, 0  ;;  %v3222_v25 = vadd.s32 3, %v3117_v28 }
 0x530   :  { %v507_v50 = vadd.f32 %v2830_v32, %v504_v45  ;;  %v548_v51 = vrot.slane %v3143_v44, 5  ;;  %v522_v52 = vrot.slane %v3143_v44, 4  ;;  %v632_v53 = vrot.slane %v3143_v44, 6 }
 0x531   :  { %v689_v54 = vrot.slane %v3143_v44, 7  ;;  %v782_v31 = vrot.slane %v3143_v44, 1  ;;  %v839_v32 = vrot.slane %v3143_v44, 2  ;;  %v896_v33 = vrot.slane %v3143_v44, 3 }
 0x532   :  { %v3166_v55 = vmul.f32 %v3147_v46, %v507_v50  ;;  %v553_v56 = vsel %vm547_vm10, 0.0, %v548_v51  ;;  %v527_v57 = vsel %vm169_vm6, 0.0, %v522_v52  ;;  %v637_v58 = vsel %vm631_vm11, 0.0, %v632_v53 }
 0x533   :  { %v694_v59 = vsel %vm3626_vm14, 0.0, %v689_v54  ;;  %v566_v0 = vsel %vm3625_vm12, %v553_v56, 0.0  ;;  %v540_v1 = vsel %vm3624_vm13, %v527_v57, 0.0  ;;  %v650_v4 = vsel %vm3623_vm2, %v637_v58, 0.0 }
 0x534   :  { %v549_v60 = vrot.slane %v3166_v55, 5  ;;  %v523_v61 = vrot.slane %v3166_v55, 4  ;;  %v633_v62 = vrot.slane %v3166_v55, 6  ;;  %v690_v63 = vrot.slane %v3166_v55, 7 }
 0x535   :  { %v707_v5 = vsel %vm3622_vm7, %v694_v59, 0.0  ;;  %v783_v24 = vrot.slane %v3166_v55, 1  ;;  %v840_v27 = vrot.slane %v3166_v55, 2  ;;  %v897_v30 = vrot.slane %v3166_v55, 3 }
 0x536   :  { %v550_v6 = vsel %vm547_vm10, %v548_v51, %v549_v60  ;;  %v3191_v8 = vsel %vm169_vm6, %v522_v52, %v523_v61  ;;  %v634_v9 = vsel %vm631_vm11, %v632_v53, %v633_v62  ;;  %v691_v10 = vsel %vm3626_vm14, %v689_v54, %v690_v63 }
 0x537   :  { %v567_v12 = vsel %vm3621_vm15, %v550_v6, 0.0  ;;  %v541_v13 = vsel %vm3620_vm8, %v3191_v8, 0.0  ;;  %v651_v14 = vsel %vm3619_vm9, %v634_v9, 0.0  ;;  %v708_v15 = vsel %vm3618_vm4, %v691_v10, 0.0  ;;  %v2766_v9 = vld [vmem:[#allocation2 + $0xc8] sm:$0xff] }
 0x538   :  { %v572_v16 = vpack.c.bf16 %v567_v12, %v566_v0  ;;  %v546_v7 = vpack.c.bf16 %v541_v13, %v540_v1  ;;  %v656_v17 = vpack.c.bf16 %v651_v14, %v650_v4  ;;  %v713_v18 = vpack.c.bf16 %v708_v15, %v707_v5 }
 0x539   :  { %vm781_vm4 = vcmask 1046528   ;;  %vm838_vm9 = vcmask 1045504   ;;  %vm3635_vm8 = vcmp.lt.s32.totalorder %v3209_v20, 8  ;;  %vm3634_vm15 = vcmp.lt.s32.totalorder %v3212_v21, 8 }
 0x53a   :  { %2472 = vmatmul.msk.bf16.vlgmr.msra.gmra.mxu1 %vm90_vm0, %v572_v16  ;;  %2481 = vmatmul.msk.bf16.vlgmr.msra.gmra.mxu3 %vm90_vm0, %v546_v7  ;;  %vm895_vm7 = vcmask 1044480   ;;  %vm3633_vm2 = vcmp.lt.s32.totalorder %v3215_v22, 8  ;;  %vm3632_vm13 = vcmp.lt.s32.totalorder %v3218_v23, 8  ;;  %v784_v37 = vsel %vm781_vm4, %v782_v31, %v783_v24 }
 0x53b   :  { %2490 = vmatmul.msk.bf16.vlgmr.msrb.gmra.mxu2 %vm90_vm0, %v656_v17  ;;  %2499 = vmatmul.msk.bf16.vlgmr.msrb.gmra.mxu0 %vm90_vm0, %v713_v18  ;;  %v787_v38 = vsel %vm781_vm4, %v783_v24, 0.0  ;;  %vm3628_vm12 = vcmp.lt.s32.totalorder %v3222_v25, 8  ;;  %vm3627_vm14 = vcmp.lt.s32.totalorder %v3225_v26, 8  ;;  %v841_v39 = vsel %vm838_vm9, %v839_v32, %v840_v27  ;;  %v2764_v17 = vld [vmem:[#allocation2 + $0xb8] sm:$0xff]  ;;  %v2763_v18 = vld [vmem:[#allocation2 + $0xb0] sm:$0xff] }
 0x53c   :  { %994 = vmatpush.bf16.msra.mxu1 %v2762_v19  ;;  %v844_v45 = vsel %vm838_vm9, %v840_v27, 0.0  ;;  %v898_v50 = vsel %vm895_vm7, %v896_v33, %v897_v30  ;;  %v901_v51 = vsel %vm895_vm7, %v897_v30, 0.0  ;;  %v800_v52 = vsel %vm3635_vm8, %v784_v37, 0.0  ;;  %1053 = vmatpush.bf16.msra.mxu3 %v2766_v9 }
 0x53d   :  { %v801_v53 = vsel %vm3634_vm15, %v787_v38, 0.0  ;;  %v857_v54 = vsel %vm3633_vm2, %v841_v39, 0.0  ;;  %v858_v56 = vsel %vm3632_vm13, %v844_v45, 0.0  ;;  %v914_v57 = vsel %vm3628_vm12, %v898_v50, 0.0 }
 0x53e   :  { %v915_v58 = vsel %vm3627_vm14, %v901_v51, 0.0  ;;  %v749_v59 = vpack.c.bf16 %v3166_v55, %v3143_v44  ;;  %v806_v60 = vpack.c.bf16 %v801_v53, %v800_v52  ;;  %v863_v62 = vpack.c.bf16 %v858_v56, %v857_v54 }
 0x53f   :  { %v920_v63 = vpack.c.bf16 %v915_v58, %v914_v57  ;;  %v3263_v0 = vadd.s32 4, %v3117_v28  ;;  %v3266_v1 = vadd.s32 4, %v3122_v34  ;;  %v953_v4 = vsel %vm169_vm6, %v523_v61, 0.0  ;;  %v2765_v61 = vld [vmem:[#allocation2 + $0xc0] sm:$0xff] }
 0x540   :  { %995 = vmatpush.bf16.msra.mxu1 %v2761_v11  ;;  %1054 = vmatpush.bf16.msra.mxu3 %v2765_v61 }
 0x541   :  { %vm3631_vm14 = vcmp.lt.s32.totalorder %v3263_v0, 8  ;;  %vm3629_vm12 = vcmp.lt.s32.totalorder %v3266_v1, 8 }
 0x542   :  { %v966_v5 = vsel %vm3631_vm14, %v3191_v8, 0.0  ;;  %v967_v6 = vsel %vm3629_vm12, %v953_v4, 0.0  ;;  %vm3630_vm12 = vcmask 523264  }
 0x543   :  { %v972_v28 = vpack.c.bf16 %v967_v6, %v966_v5 }
 0x544   :  { %1055 = vmatpush.bf16.msra.mxu3 %v2764_v17 }
 0x548   :  { %1056 = vmatpush.bf16.msra.mxu3 %v2763_v18 }
 0x54a   :  { %2508 = vmatmul.msk.bf16.vlgmr.msrb.gmra.mxu1 %vm90_vm0, %v749_v59  ;;  %2517 = vmatmul.msk.bf16.vlgmr.msrb.gmra.mxu3 %vm90_vm0, %v806_v60  ;;  %v2831_v60 = vld [vmem:[%s3614_s4 + $0x20] ss:$0 sm:$0xff] }
 0x54b   :  { %2526 = vmatmul.msk.bf16.vlgmr.msra.gmra.mxu2 %vm90_vm0, %v863_v62  ;;  %2535 = vmatmul.msk.bf16.vlgmr.msra.gmra.mxu0 %vm90_vm0, %v920_v63 }
 0x55a   :  { %2544 = vmatmul.msk.bf16.vlgmr.msra.gmra.mxu1 %vm90_vm0, %v972_v28 }
 0x5b7   :  { %v597_v34 = vpop.f32.mrf.mxu1 }
 0x5b8   :  { %v738_v13 = vpop.f32.mrf.mxu0 }
 0x5bd   :  { %v626_v10 = vpop.f32.mrf.mxu3 }
 0x5be   :  { %v681_v12 = vpop.f32.mrf.mxu2  ;;  %v627_v16 = vadd.f32 %v626_v10, %v597_v34 }
 0x5bf   :  { %v599_v14 = vpop.f32.mrf.mxu1 }
 0x5c0   :  { %v740_v19 = vpop.f32.mrf.mxu0  ;;  %v686_v11 = vadd.f32 %v681_v12, %v627_v16  ;;  %v2832_v12 = vld [vmem:[%s3614_s4 + $0x28] ss:$0 sm:$0xff] }
 0x5c2   :  { %v743_v31 = vadd.f32 %v738_v13, %v686_v11 }
 0x5c5   :  { %v628_v15 = vpop.f32.mrf.mxu3 }
 0x5c6   :  { %v683_v7 = vpop.f32.mrf.mxu2  ;;  %v629_v24 = vadd.f32 %v628_v15, %v599_v14 }
 0x5c7   :  { %v774_v8 = vpop.f32.mrf.mxu1 }
 0x5c8   :  { %v687_v30 = vadd.f32 %v683_v7, %v629_v24  ;;  %v779_v37 = vadd.f32 %v774_v8, %v743_v31  ;;  %v945_v45 = vpop.f32.mrf.mxu0 }
 0x5ca   :  { %v744_v39 = vadd.f32 %v740_v19, %v687_v30 }
 0x5cd   :  { %v831_v27 = vpop.f32.mrf.mxu3 }
 0x5ce   :  { %v888_v32 = vpop.f32.mrf.mxu2  ;;  %v836_v38 = vadd.f32 %v831_v27, %v779_v37 }
 0x5cf   :  { %v776_v33 = vpop.f32.mrf.mxu1 }
 0x5d0   :  { %v780_v50 = vadd.f32 %v776_v33, %v744_v39  ;;  %v893_v52 = vadd.f32 %v888_v32, %v836_v38  ;;  %v947_v62 = vpop.f32.mrf.mxu0  ;;  %v2768_v39 = vld [vmem:[#allocation2 + $0xd8] sm:$0xff] }
 0x5d1   :  { %1147 = vmatpush.bf16.msrb.mxu2 %v2768_v39 }
 0x5d2   :  { %v950_v58 = vadd.f32 %v945_v45, %v893_v52  ;;  %v2767_v45 = vld [vmem:[#allocation2 + $0xd0] sm:$0xff] }
 0x5d5   :  { %v833_v51 = vpop.f32.mrf.mxu3  ;;  %1148 = vmatpush.bf16.msrb.mxu2 %v2767_v45 }
 0x5d6   :  { %v837_v53 = vadd.f32 %v833_v51, %v780_v50  ;;  %v890_v56 = vpop.f32.mrf.mxu2 }
 0x5d7   :  { %v997_v54 = vpop.f32.mrf.mxu1 }
 0x5d8   :  { %v894_v57 = vadd.f32 %v890_v56, %v837_v53  ;;  %v1002_v59 = vadd.f32 %v997_v54, %v950_v58 }
 0x5da   :  { %v951_v63 = vadd.f32 %v947_v62, %v894_v57  ;;  %v1006_v5 = vadd.f32 %v2831_v60, %v1002_v59 }
 0x5dc   :  { %v1008_v34 = vmax.f32 %v1006_v5, 0.0 }
 0x5df   :  { %v999_v4 = vpop.f32.mrf.mxu1 }
 0x5e0   :  { %v1003_v6 = vadd.f32 %v999_v4, %v951_v63 }
 0x5e2   :  { %v1007_v28 = vadd.f32 %v2831_v60, %v1003_v6  ;;  %v2833_v6 = vld [vmem:[%s3614_s4 + $0x30] ss:$0 sm:$0xff] }
 0x5e4   :  { %v1009_v9 = vmax.f32 %v1007_v28, 0.0 }
 0x5e6   :  { %v1018_v10 = vpack.c.bf16 %v1009_v9, %v1008_v34 }
 0x5e8   :  { %2561 = vmatmul.msk.bf16.vlgmr.msra.gmra.mxu3 %vm3630_vm12, %v1018_v10  ;;  %v2834_v10 = vld [vmem:[%s3614_s4 + $0x38] ss:$0 sm:$0xff] }
 0x66b   :  { %v1058_v61 = vpop.f32.mrf.mxu3 }
 0x66c   :  { %v1059_v13 = vadd.f32 %v2832_v12, %v1058_v61 }
 0x66e   :  { %v1063_v14 = vadd.f32 %v1059_v13, %v3143_v44 }
 0x670   :  { %v1067_v15 = vsel %vm90_vm0, %v1063_v14, 0.0 }
 0x671   :  { %1068 = vadd.xlane.f32.xlu2 %v1067_v15 }
 0x673   :  { %v1060_v16 = vpop.f32.mrf.mxu3 }
 0x674   :  { %v1061_v7 = vadd.f32 %v2832_v12, %v1060_v16 }
 0x676   :  { %v1064_v17 = vadd.f32 %v1061_v7, %v3166_v55 }
 0x678   :  { %v1070_v8 = vsel %vm90_vm0, %v1064_v17, 0.0 }
 0x679   :  { %1071 = vadd.xlane.f32.xlu2 %v1070_v8 }
 0x6e4   :  { %v1069_v18 = vpop.xlane.xlu2 %1068 }
 0x6e5   :  { %v1073_v19 = vmul.f32 %v1069_v18, %v3091_v40  ;;  %v2835_v18 = vld [vmem:[%s3614_s4 + $0x40] ss:$0 sm:$0xff] }
 0x6e7   :  { %v1075_v11 = vsub.f32 %v1063_v14, %v1073_v19 }
 0x6e9   :  { %v1077_v24 = vmul.f32 %v1075_v11, %v1075_v11 }
 0x6eb   :  { %v1079_v27 = vsel %vm90_vm0, %v1077_v24, 0.0 }
 0x6ec   :  { %1080 = vadd.xlane.f32.xlu2 %v1079_v27  ;;  %v1072_v30 = vpop.xlane.xlu2 %1071 }
 0x6ed   :  { %v1074_v44 = vmul.f32 %v1072_v30, %v3091_v40 }
 0x6ef   :  { %v1076_v31 = vsub.f32 %v1064_v17, %v1074_v44 }
 0x6f1   :  { %v1078_v32 = vmul.f32 %v1076_v31, %v1076_v31 }
 0x6f3   :  { %v1082_v33 = vsel %vm90_vm0, %v1078_v32, 0.0 }
 0x6f4   :  { %1083 = vadd.xlane.f32.xlu1 %v1082_v33 }
 0x75f   :  { %v1081_v55 = vpop.xlane.xlu2 %1080 }
 0x760   :  { %v1085_v37 = vmul.f32 %v1081_v55, %v3091_v40 }
 0x762   :  { %v1087_v38 = vadd.f32 1e-05, %v1085_v37 }
 0x764   :  { %2871 = vrsqrt.f32 %v1087_v38  ;;  %vm1095_vm14 = vweird.f32 %v1087_v38 }
 0x767   :  { %v1084_v50 = vpop.xlane.xlu1 %1083 }
 0x768   :  { %v1086_v51 = vmul.f32 %v1084_v50, %v3091_v40 }
 0x76a   :  { %v2872_v52 = vpop.eup %2871  ;;  %v1088_v53 = vadd.f32 1e-05, %v1086_v51 }
 0x76b   :  { %v1090_v54 = vmul.f32 %v2872_v52, %v1087_v38  ;;  %vm1096_vm12 = vweird.f32 %v2872_v52 }
 0x76c   :  { %2873 = vrsqrt.f32 %v1088_v53  ;;  %vm1097_vm13 = vmor %vm1095_vm14, %vm1096_vm12  ;;  %vm1105_vm15 = vweird.f32 %v1088_v53  ;;  %vm3640_vm12 = vcmask 64512  }
 0x76d   :  { %v1091_v56 = vmul.f32 %v2872_v52, %v1090_v54  ;;  %vm3642_vm14 = vmmov %vm3640_vm12 }
 0x76f   :  { %v1092_v57 = vmul.f32 0.5, %v1091_v56 }
 0x771   :  { %v1093_v58 = vsub.f32 1.5, %v1092_v57 }
 0x772   :  { %v2874_v59 = vpop.eup %2873 }
 0x773   :  { %v1094_v60 = vmul.f32 %v2872_v52, %v1093_v58  ;;  %v1100_v62 = vmul.f32 %v2874_v59, %v1088_v53  ;;  %vm1106_vm2 = vweird.f32 %v2874_v59 }
 0x774   :  { %vm1107_vm8 = vmor %vm1105_vm15, %vm1106_vm2 }
 0x775   :  { %v1098_v63 = vsel %vm1097_vm13, %v2872_v52, %v1094_v60  ;;  %v1101_v4 = vmul.f32 %v2874_v59, %v1100_v62  ;;  %vm3641_vm13 = vmmov %vm3640_vm12 }
 0x776   :  { %v1109_v28 = vmul.f32 %v1098_v63, %v1075_v11 }
 0x777   :  { %v1102_v5 = vmul.f32 0.5, %v1101_v4 }
 0x778   :  { %v1112_v12 = vmul.f32 %v2833_v6, %v1109_v28 }
 0x779   :  { %v1103_v34 = vsub.f32 1.5, %v1102_v5 }
 0x77a   :  { %v1115_v14 = vadd.f32 %v2834_v10, %v1112_v12 }
 0x77b   :  { %v1104_v9 = vmul.f32 %v2874_v59, %v1103_v34 }
 0x77c   :  { %v3303_v7 = vmul.f32 %v1115_v14, %v3134_v41 }
 0x77d   :  { %v1108_v61 = vsel %vm1107_vm8, %v2874_v59, %v1104_v9 }
 0x77e   :  { %v1110_v13 = vmul.f32 %v1108_v61, %v1076_v31 }
 0x780   :  { %v1113_v15 = vmul.f32 %v2833_v6, %v1110_v13 }
 0x782   :  { %v1116_v16 = vadd.f32 %v2834_v10, %v1113_v15 }
 0x784   :  { %v3306_v17 = vmul.f32 %v1116_v16, %v3147_v46 }
 0x786   :  { %v1123_v8 = vpack.c.bf16 %v3306_v17, %v3303_v7 }
 0x788   :  { %2570 = vmatmul.msk.bf16.vlgmr.msrb.gmra.mxu2 %vm90_vm0, %v1123_v8 }
 0x80b   :  { %v1150_v19 = vpop.f32.mrf.mxu2 }
 0x80c   :  { %v1151_v11 = vadd.f32 %v2835_v18, %v1150_v19 }
 0x80e   :  { %v3314_v24 = vpack.c.bf16 %v1151_v11, %v1151_v11 }
 0x810   :  { %1226 = vrot.lane.b32.xlu0 %v3314_v24, %s2936_s9  ;;  %1228 = vrot.lane.b32.xlu2 %v3314_v24, %s2938_s10 }
 0x813   :  { %v1152_v27 = vpop.f32.mrf.mxu2 }
 0x814   :  { %v1153_v30 = vadd.f32 %v2835_v18, %v1152_v27 }
 0x816   :  { %v3320_v44 = vpack.c.bf16 %v1153_v30, %v1153_v30 }
 0x818   :  { %1375 = vrot.lane.b32.xlu0 %v3320_v44, %s2938_s10  ;;  %1373 = vrot.lane.b32.xlu2 %v3320_v44, %s2936_s9 }
 0x820   :  { %1157 = vrot.lane.b32.xlu0 %v3314_v24, %s2937_s0  ;;  %1304 = vrot.lane.b32.xlu2 %v3320_v44, %s2937_s0 }
 0x86a   :  { %v1229_v31 = vpop.permute.xlu2 %1228 }
 0x86b   :  { %v1234_v32 = vsel %vm112_vm1, %v1229_v31, 0 }
 0x86c   :  { %1243 = vmatpush.bf16.xpose.msrb.mxu3 %v1234_v32 }
 0x872   :  { %v1374_v55 = vpop.permute.xlu2 %1373 }
 0x87a   :  { %v1305_v39 = vpop.permute.xlu2 %1304 }
 0x87b   :  { %v1310_v51 = vsel %vm112_vm1, %v1305_v39, 0 }
 0x882   :  { %v1227_v33 = vpop.permute.xlu0 %1226 }
 0x883   :  { %2573 = vmatmul.msk.bf16.vlgmr.msrb.gmra.mxu3 %vm112_vm1, %v1227_v33 }
 0x88a   :  { %v1376_v37 = vpop.permute.xlu0 %1375 }
 0x88b   :  { %v1381_v38 = vsel %vm112_vm1, %v1376_v37, 0 }
 0x88c   :  { %1390 = vmatpush.bf16.xpose.msra.mxu3 %v1381_v38 }
 0x892   :  { %v1158_v45 = vpop.permute.xlu0 %1157 }
 0x893   :  { %v1163_v50 = vsel %vm112_vm1, %v1158_v45, 0  ;;  %2577 = vmatmul.msk.bf16.vlgmr.msra.gmra.mxu3 %vm112_vm1, %v1374_v55 }
 0x894   :  { %1172 = vmatpush.bf16.xpose.msrb.mxu0 %v1163_v50 }
 0x89b   :  { %2571 = vmatmul.msk.bf16.vlgmr.msrb.gmra.mxu0 %vm112_vm1, %v3314_v24 }
 0x89c   :  { %1319 = vmatpush.bf16.xpose.msra.mxu0 %v1310_v51 }
 0x8ab   :  { %2575 = vmatmul.msk.bf16.vlgmr.msra.gmra.mxu0 %vm112_vm1, %v3320_v44 }
 0x906   :  { %v1245_v52 = vpop.f32.mrf.mxu3 }
 0x907   :  { %v1249_v53 = vmul.f32 0.25, %v1245_v52 }
 0x909   :  { %v1250_v54 = vsel %vm3028_vm3, %v1249_v53, -1e+09 }
 0x90a   :  { %v1251_v56 = vsel %vm3640_vm12, %v1250_v54, -inf }
 0x90b   :  { %1252 = vmax.xlane.f32.xlu0 %v1251_v56 }
 0x90e   :  { %v1247_v57 = vpop.f32.mrf.mxu3 }
 0x916   :  { %v1392_v58 = vpop.f32.mrf.mxu3 }
 0x917   :  { %v1396_v10 = vmul.f32 0.25, %v1392_v58 }
 0x918   :  { %v1174_v59 = vpop.f32.mrf.mxu0 }
 0x919   :  { %v1178_v60 = vmul.f32 0.25, %v1174_v59  ;;  %v1397_v29 = vsel %vm3038_vm5, %v1396_v10, -1e+09 }
 0x91b   :  { %v1179_v62 = vsel %vm3028_vm3, %v1178_v60, -1e+09  ;;  %vm3643_vm3 = vmmov %vm3640_vm12 }
 0x91c   :  { %v1180_v63 = vsel %vm3641_vm13, %v1179_v62, -inf  ;;  %v1398_v61 = vsel %vm3643_vm3, %v1397_v29, -inf  ;;  %vm3644_vm15 = vmmov %vm3643_vm3 }
 0x91d   :  { %1181 = vmax.xlane.f32.xlu2 %v1180_v63  ;;  %vm3645_vm2 = vmmov %vm3643_vm3 }
 0x91e   :  { %v1394_v4 = vpop.f32.mrf.mxu3  ;;  %vm3647_vm8 = vmmov %vm3645_vm2 }
 0x91f   :  { %1423 = vrot.lane.b32.xlu0 %v3320_v44, %s2940_s1 }
 0x920   :  { %v1176_v5 = vpop.f32.mrf.mxu0 }
 0x928   :  { %v1321_v6 = vpop.f32.mrf.mxu0 }
 0x929   :  { %v1325_v28 = vmul.f32 0.25, %v1321_v6 }
 0x92b   :  { %v1326_v34 = vsel %vm3038_vm5, %v1325_v28, -1e+09  ;;  %vm3646_vm5 = vmmov %vm3645_vm2 }
 0x92c   :  { %v1327_v9 = vsel %vm3642_vm14, %v1326_v34, -inf }
 0x92d   :  { %1328 = vmax.xlane.f32.xlu1 %v1327_v9 }
 0x930   :  { %v1323_v12 = vpop.f32.mrf.mxu0 }
 0x935   :  { %1399 = vmax.xlane.f32.xlu1 %v1398_v61 }
 0x97e   :  { %v1253_v13 = vpop.xlane.xlu0 %1252 }
 0x97f   :  { %v1254_v14 = vsub.f32 %v1250_v54, %v1253_v13 }
 0x981   :  { %v1255_v15 = vmul.f32 1.442695, %v1254_v14 }
 0x983   :  { %2875 = vpow2.f32 %v1255_v15 }
 0x989   :  { %v2876_v16 = vpop.eup %2875 }
 0x98a   :  { %v1257_v8 = vsel %vm3644_vm15, %v2876_v16, 0.0 }
 0x98b   :  { %1258 = vadd.xlane.f32.xlu1 %v1257_v8 }
 0x990   :  { %v1182_v18 = vpop.xlane.xlu2 %1181 }
 0x991   :  { %v1183_v19 = vsub.f32 %v1179_v62, %v1182_v18  ;;  %v1424_v14 = vpop.permute.xlu0 %1423 }
 0x993   :  { %v1184_v11 = vmul.f32 1.442695, %v1183_v19 }
 0x995   :  { %2877 = vpow2.f32 %v1184_v11 }
 0x99b   :  { %v3355_v27 = vpop.eup %2877 }
 0x99c   :  { %v1186_v42 = vsel %vm3645_vm2, %v3355_v27, 0.0 }
 0x99d   :  { %1187 = vadd.xlane.f32.xlu2 %v1186_v42 }
 0x9a0   :  { %v1329_v30 = vpop.xlane.xlu1 %1328 }
 0x9a1   :  { %v1330_v31 = vsub.f32 %v1326_v34, %v1329_v30 }
 0x9a3   :  { %v1331_v32 = vmul.f32 1.442695, %v1330_v31  ;;  %v1429_v31 = vsel %vm169_vm6, %v1424_v14, 0 }
 0x9a5   :  { %2879 = vpow2.f32 %v1331_v32 }
 0x9a8   :  { %v1400_v33 = vpop.xlane.xlu1 %1399 }
 0x9a9   :  { %v1401_v55 = vsub.f32 %v1397_v29, %v1400_v33 }
 0x9ab   :  { %v3359_v37 = vpop.eup %2879  ;;  %v1402_v38 = vmul.f32 1.442695, %v1401_v55 }
 0x9ac   :  { %v1333_v39 = vsel %vm3646_vm5, %v3359_v37, 0.0 }
 0x9ad   :  { %2881 = vpow2.f32 %v1402_v38  ;;  %1334 = vadd.xlane.f32.xlu2 %v1333_v39 }
 0x9b3   :  { %v3363_v45 = vpop.eup %2881 }
 0x9b4   :  { %v1404_v50 = vsel %vm3647_vm8, %v3363_v45, 0.0 }
 0x9b5   :  { %1405 = vadd.xlane.f32.xlu1 %v1404_v50 }
 0x9c5   :  { %1352 = vrot.lane.b32.xlu2 %v3320_v44, %s2934_s26 }
 0x9ce   :  { %1276 = vrot.lane.b32.xlu1 %v3314_v24, %s2940_s1 }
 0x9d6   :  { %1205 = vrot.lane.b32.xlu1 %v3314_v24, %s2934_s26 }
 0x9fe   :  { %v1259_v51 = vpop.xlane.xlu1 %1258 }
 0x9ff   :  { %2883 = vrcp.f32 %v1259_v51  ;;  %v1271_v5 = vand.u32 2147483648, %v1259_v51  ;;  %vm1265_vm13 = vweird.f32 %v1259_v51  ;;  %v1269_v24 = vand.u32 2147483647, %v1259_v51 }
 0xa01   :  { %v1272_v9 = vor.u32 1.1754944e-38, %v1271_v5  ;;  %vm1270_vm3 = vcmp.eq.f32.partialorder %v1269_v24, 8.507059e+37 }
 0xa05   :  { %v2884_v53 = vpop.eup %2883 }
 0xa06   :  { %v1261_v54 = vmul.f32 %v2884_v53, %v1259_v51  ;;  %vm1266_vm12 = vweird.f32 %v2884_v53 }
 0xa07   :  { %vm1267_vm14 = vmor %vm1265_vm13, %vm1266_vm12  ;;  %vm3648_vm13 = vcmask 64512  }
 0xa08   :  { %v1262_v56 = vsub.f32 1.0, %v1261_v54 }
 0xa0a   :  { %v1263_v59 = vmul.f32 %v2884_v53, %v1262_v56 }
 0xa0c   :  { %v1264_v62 = vadd.f32 %v2884_v53, %v1263_v59 }
 0xa0e   :  { %v1268_v6 = vsel %vm1267_vm14, %v2884_v53, %v1264_v62 }
 0xa0f   :  { %v1273_v10 = vsel %vm1270_vm3, %v1272_v9, %v1268_v6 }
 0xa10   :  { %v1188_v52 = vpop.xlane.xlu2 %1187  ;;  %v1274_v15 = vmul.f32 %v2876_v16, %v1273_v10 }
 0xa11   :  { %2885 = vrcp.f32 %v1188_v52  ;;  %v1200_v13 = vand.u32 2147483648, %v1188_v52  ;;  %vm1194_vm2 = vweird.f32 %v1188_v52  ;;  %v1198_v8 = vand.u32 2147483647, %v1188_v52 }
 0xa12   :  { %v1275_v33 = vpack.c.bf16 %v1274_v15, %v1274_v15 }
 0xa13   :  { %v1201_v32 = vor.u32 1.1754944e-38, %v1200_v13  ;;  %vm1199_vm8 = vcmp.eq.f32.partialorder %v1198_v8, 8.507059e+37 }
 0xa17   :  { %v2886_v58 = vpop.eup %2885 }
 0xa18   :  { %v1190_v60 = vmul.f32 %v2886_v58, %v1188_v52  ;;  %vm1195_vm15 = vweird.f32 %v2886_v58 }
 0xa19   :  { %vm1196_vm5 = vmor %vm1194_vm2, %vm1195_vm15 }
 0xa1a   :  { %v1191_v44 = vsub.f32 1.0, %v1190_v60 }
 0xa1c   :  { %v1192_v28 = vmul.f32 %v2886_v58, %v1191_v44 }
 0xa1e   :  { %v1193_v12 = vadd.f32 %v2886_v58, %v1192_v28 }
 0xa20   :  { %v3373_v63 = vpop.xlane.xlu2 %1334  ;;  %v1197_v19 = vsel %vm1196_vm5, %v2886_v58, %v1193_v12  ;;  %vm3649_vm5 = vmmov %vm3648_vm13  ;;  %v2770_v12 = vld [vmem:[#allocation2 + $0xe8] sm:$0xff] }
 0xa21   :  { %v1202_v55 = vsel %vm1199_vm8, %v1201_v32, %v1197_v19  ;;  %vm1341_vm8 = vweird.f32 %v3373_v63  ;;  %1477 = vmatpush.bf16.msrb.mxu0 %v2770_v12  ;;  %v2769_v19 = vld [vmem:[#allocation2 + $0xe0] sm:$0xff] }
 0xa22   :  { %v1203_v50 = vmul.f32 %v3355_v27, %v1202_v55  ;;  %v1347_v27 = vand.u32 2147483648, %v3373_v63 }
 0xa24   :  { %v1204_v62 = vpack.c.bf16 %v1203_v50, %v1203_v50  ;;  %v1348_v6 = vor.u32 1.1754944e-38, %v1347_v27 }
 0xa25   :  { %1478 = vmatpush.bf16.msrb.mxu0 %v2769_v19  ;;  %v2784_v19 = vld [vmem:[#allocation2 + $0x158] sm:$0xff] }
 0xa28   :  { %v1406_v57 = vpop.xlane.xlu1 %1405  ;;  %v1353_v52 = vpop.permute.xlu2 %1352 }
 0xa29   :  { %2887 = vrcp.f32 %v1406_v57  ;;  %v1418_v39 = vand.u32 2147483648, %v1406_v57  ;;  %vm1412_vm14 = vweird.f32 %v1406_v57  ;;  %v1416_v51 = vand.u32 2147483647, %v1406_v57 }
 0xa2a   :  { %2889 = vrcp.f32 %v3373_v63  ;;  %v1358_v60 = vsel %vm169_vm6, %v1353_v52, 0 }
 0xa2b   :  { %v1419_v59 = vor.u32 1.1754944e-38, %v1418_v39  ;;  %vm1417_vm15 = vcmp.eq.f32.partialorder %v1416_v51, 8.507059e+37 }
 0xa2f   :  { %v2888_v4 = vpop.eup %2887 }
 0xa30   :  { %v1408_v34 = vmul.f32 %v2888_v4, %v1406_v57  ;;  %v2890_v61 = vpop.eup %2889  ;;  %vm1413_vm12 = vweird.f32 %v2888_v4  ;;  %v1345_v57 = vand.u32 2147483647, %v3373_v63 }
 0xa31   :  { %v1337_v11 = vmul.f32 %v2890_v61, %v3373_v63  ;;  %vm1414_vm3 = vmor %vm1412_vm14, %vm1413_vm12  ;;  %vm1342_vm2 = vweird.f32 %v2890_v61 }
 0xa32   :  { %v1409_v29 = vsub.f32 1.0, %v1408_v34  ;;  %vm1343_vm12 = vmor %vm1341_vm8, %vm1342_vm2 }
 0xa33   :  { %v1338_v38 = vsub.f32 1.0, %v1337_v11  ;;  %vm3650_vm14 = vmmov %vm3649_vm5 }
 0xa34   :  { %v1410_v42 = vmul.f32 %v2888_v4, %v1409_v29 }
 0xa35   :  { %v1339_v54 = vmul.f32 %v2890_v61, %v1338_v38 }
 0xa36   :  { %v1411_v16 = vadd.f32 %v2888_v4, %v1410_v42 }
 0xa37   :  { %v1340_v5 = vadd.f32 %v2890_v61, %v1339_v54 }
 0xa38   :  { %v1415_v56 = vsel %vm1414_vm3, %v2888_v4, %v1411_v16  ;;  %vm3651_vm3 = vmmov %vm3649_vm5 }
 0xa39   :  { %v1420_v44 = vsel %vm1417_vm15, %v1419_v59, %v1415_v56  ;;  %v1344_v24 = vsel %vm1343_vm12, %v2890_v61, %v1340_v5 }
 0xa3a   :  { %v1421_v4 = vmul.f32 %v3363_v45, %v1420_v44 }
 0xa3c   :  { %v1422_v28 = vpack.c.bf16 %v1421_v4, %v1421_v4 }
 0xa40   :  { %v1277_v18 = vpop.permute.xlu1 %1276 }
 0xa41   :  { %v1282_v30 = vsel %vm169_vm6, %v1277_v18, 0 }
 0xa42   :  { %1291 = vmatpush.bf16.msra.mxu2 %v1282_v30 }
 0xa45   :  { %2574 = vmatmul.msk.bf16.vlgmr.msra.gmra.mxu2 %vm3648_vm13, %v1275_v33  ;;  %vm1346_vm13 = vcmp.eq.f32.partialorder %v1345_v57, 8.507059e+37  ;;  %v2836_v33 = vld [vmem:[%s3614_s4 + $0x48] ss:$0 sm:$0xff] }
 0xa46   :  { %1438 = vmatpush.bf16.msrb.mxu2 %v1429_v31  ;;  %v1349_v34 = vsel %vm1346_vm13, %v1348_v6, %v1344_v24  ;;  %v2774_v24 = vld [vmem:[#allocation2 + $0x108] sm:$0xff]  ;;  %v2772_v6 = vld [vmem:[#allocation2 + $0xf8] sm:$0xff]  ;;  %vm3652_vm13 = vcmask 1040384  }
 0xa47   :  { %v1350_v9 = vmul.f32 %v3359_v37, %v1349_v34  ;;  %v2778_v34 = vld [vmem:[#allocation2 + $0x128] sm:$0xff]  ;;  %1619 = vmatpush.bf16.msrb.mxu3 %v2772_v6 }
 0xa48   :  { %v1206_v53 = vpop.permute.xlu1 %1205  ;;  %1705 = vmatpush.bf16.msra.mxu0 %v2778_v34 }
 0xa49   :  { %v1211_v58 = vsel %vm169_vm6, %v1206_v53, 0  ;;  %v1351_v10 = vpack.c.bf16 %v1350_v9, %v1350_v9  ;;  %v2773_v9 = vld [vmem:[#allocation2 + $0x100] sm:$0xff] }
 0xa4a   :  { %1220 = vmatpush.bf16.msrb.mxu1 %v1211_v58 }
 0xa4d   :  { %2572 = vmatmul.msk.bf16.vlgmr.msrb.gmra.mxu1 %vm3649_vm5, %v1204_v62 }
 0xa4e   :  { %1367 = vmatpush.bf16.msra.mxu1 %v1358_v60 }
 0xa52   :  { %1590 = vmatpush.bf16.msrb.mxu1 %v2774_v24 }
 0xa55   :  { %2578 = vmatmul.msk.bf16.vlgmr.msrb.gmra.mxu2 %vm3650_vm14, %v1422_v28  ;;  %v2776_v28 = vld [vmem:[#allocation2 + $0x118] sm:$0xff]  ;;  %vm3653_vm14 = vcmp.ge.s32.totalorder %v3125_v35, 0 }
 0xa56   :  { %1661 = vmatpush.bf16.msra.mxu2 %v2776_v28  ;;  %1591 = vmatpush.bf16.msrb.mxu1 %v2773_v9 }
 0xa5d   :  { %2576 = vmatmul.msk.bf16.vlgmr.msra.gmra.mxu1 %vm3651_vm3, %v1351_v10  ;;  %v2771_v10 = vld [vmem:[#allocation2 + $0xf0] sm:$0xff]  ;;  %vm3654_vm3 = vcmp.ge.s32.totalorder %v3128_v36, 0 }
 0xa5e   :  { %1620 = vmatpush.bf16.msrb.mxu3 %v2771_v10 }
 0xac8   :  { %v1293_v29 = vpop.f32.mrf.mxu2 }
 0xaca   :  { %v1222_v13 = vpop.f32.mrf.mxu1 }
 0xad0   :  { %v1295_v63 = vpop.f32.mrf.mxu2 }
 0xad2   :  { %v1224_v14 = vpop.f32.mrf.mxu1 }
 0xad8   :  { %v1440_v45 = vpop.f32.mrf.mxu2 }
 0xad9   :  { %v2822_v15 = vpack.i.bf16 %v1440_v45, %v1293_v29  ;;  %v2775_v29 = vld [vmem:[#allocation2 + $0x110] sm:$0xff] }
 0xada   :  { %v1369_v61 = vpop.f32.mrf.mxu1  ;;  %1662 = vmatpush.bf16.msra.mxu2 %v2775_v29 }
 0xadb   :  { %2823 = vrot.lane.b32.xlu0 %v2822_v15, %s2941_s13 }
 0xade   :  { %1829 = vmatpush.bf16.msrb.mxu2 %v2784_v19 }
 0xae0   :  { %v1442_v8 = vpop.f32.mrf.mxu2 }
 0xae1   :  { %v2780_v8 = vld [vmem:[#allocation2 + $0x138] sm:$0xff] }
 0xae2   :  { %v1371_v18 = vpop.f32.mrf.mxu1  ;;  %1741 = vmatpush.bf16.msra.mxu1 %v2780_v8 }
 0xae3   :  { %v2782_v18 = vld [vmem:[#allocation2 + $0x148] sm:$0xff] }
 0xae4   :  { %1785 = vmatpush.bf16.msra.mxu3 %v2782_v18 }
 0xb4d   :  { %v2824_v11 = vpop.permute.xlu0 %2823 }
 0xb4e   :  { %v2826_v37 = vunpack.i.h.bf16 %v2824_v11  ;;  %v2825_v42 = vunpack.i.l.bf16 %v2824_v11  ;;  %v2786_v11 = vld [vmem:[#allocation2 + $0x168] sm:$0xff] }
 0xb50   :  { %v1301_v30 = vsel %vm112_vm1, %v1222_v13, %v2825_v42  ;;  %v1448_v31 = vsel %vm112_vm1, %v1369_v61, %v2826_v37  ;;  %v2777_v13 = vld [vmem:[#allocation2 + $0x120] sm:$0xff]  ;;  %v2779_v42 = vld [vmem:[#allocation2 + $0x130] sm:$0xff] }
 0xb51   :  { %v1453_v32 = vpack.c.bf16 %v1448_v31, %v1301_v30  ;;  %1706 = vmatpush.bf16.msra.mxu0 %v2777_v13  ;;  %v2781_v30 = vld [vmem:[#allocation2 + $0x140] sm:$0xff]  ;;  %v2783_v31 = vld [vmem:[#allocation2 + $0x150] sm:$0xff]  ;;  %1742 = vmatpush.bf16.msra.mxu1 %v2779_v42 }
 0xb52   :  { %1786 = vmatpush.bf16.msra.mxu3 %v2781_v30  ;;  %1830 = vmatpush.bf16.msrb.mxu2 %v2783_v31 }
 0xb53   :  { %2587 = vmatmul.msk.bf16.vlgmr.msrb.gmra.mxu0 %vm90_vm0, %v1453_v32  ;;  %v2785_v32 = vld [vmem:[#allocation2 + $0x160] sm:$0xff] }
 0xb55   :  { %1873 = vmatpush.bf16.msrb.mxu0 %v2786_v11 }
 0xb59   :  { %1874 = vmatpush.bf16.msrb.mxu0 %v2785_v32 }
 0xbd0   :  { %v1480_v55 = vpop.f32.mrf.mxu0 }
 0xbd1   :  { %v1481_v38 = vadd.f32 %v2836_v33, %v1480_v55 }
 0xbd3   :  { %v1485_v16 = vadd.f32 %v1481_v38, %v3303_v7 }
 0xbd5   :  { %v1489_v39 = vsel %vm90_vm0, %v1485_v16, 0.0 }
 0xbd6   :  { %1490 = vadd.xlane.f32.xlu1 %v1489_v39  ;;  %v2837_v39 = vld [vmem:[%s3614_s4 + $0x50] ss:$0 sm:$0xff] }
 0xbd8   :  { %v1482_v50 = vpop.f32.mrf.mxu0 }
 0xbd9   :  { %v1483_v51 = vadd.f32 %v2836_v33, %v1482_v50 }
 0xbdb   :  { %v1486_v52 = vadd.f32 %v1483_v51, %v3306_v17 }
 0xbdd   :  { %v1492_v53 = vsel %vm90_vm0, %v1486_v52, 0.0 }
 0xbde   :  { %1493 = vadd.xlane.f32.xlu0 %v1492_v53 }
 0xc49   :  { %v1491_v54 = vpop.xlane.xlu1 %1490 }
 0xc4a   :  { %v1495_v56 = vmul.f32 %v1491_v54, %v3091_v40 }
 0xc4c   :  { %v3403_v58 = vsub.f32 %v1485_v16, %v1495_v56 }
 0xc4e   :  { %v1499_v59 = vmul.f32 %v3403_v58, %v3403_v58 }
 0xc50   :  { %v1501_v7 = vsel %vm90_vm0, %v1499_v59, 0.0 }
 0xc51   :  { %v1494_v60 = vpop.xlane.xlu0 %1493  ;;  %1502 = vadd.xlane.f32.xlu2 %v1501_v7 }
 0xc52   :  { %v1496_v62 = vmul.f32 %v1494_v60, %v3091_v40 }
 0xc54   :  { %v3409_v44 = vsub.f32 %v1486_v52, %v1496_v62  ;;  %v2838_v52 = vld [vmem:[%s3614_s4 + $0x58] ss:$0 sm:$0xff] }
 0xc56   :  { %v1500_v17 = vmul.f32 %v3409_v44, %v3409_v44 }
 0xc58   :  { %v1504_v5 = vsel %vm90_vm0, %v1500_v17, 0.0 }
 0xc59   :  { %1505 = vadd.xlane.f32.xlu1 %v1504_v5 }
 0xcc4   :  { %v1503_v27 = vpop.xlane.xlu2 %1502 }
 0xcc5   :  { %v1507_v57 = vmul.f32 %v1503_v27, %v3091_v40 }
 0xcc7   :  { %v1509_v4 = vadd.f32 1e-05, %v1507_v57 }
 0xcc9   :  { %2891 = vrsqrt.f32 %v1509_v4  ;;  %vm1517_vm15 = vweird.f32 %v1509_v4 }
 0xccc   :  { %v1506_v12 = vpop.xlane.xlu1 %1505 }
 0xccd   :  { %v1508_v63 = vmul.f32 %v1506_v12, %v3091_v40 }
 0xccf   :  { %v2892_v14 = vpop.eup %2891  ;;  %v1510_v45 = vadd.f32 1e-05, %v1508_v63 }
 0xcd0   :  { %v1512_v15 = vmul.f32 %v2892_v14, %v1509_v4  ;;  %vm1518_vm1 = vweird.f32 %v2892_v14 }
 0xcd1   :  { %2893 = vrsqrt.f32 %v1510_v45  ;;  %vm1519_vm2 = vmor %vm1517_vm15, %vm1518_vm1  ;;  %vm1527_vm8 = vweird.f32 %v1510_v45  ;;  %vm3655_vm1 = vcmp.ge.s32.totalorder %v3132_v2, 0  ;;  %vm3656_vm15 = vcmp.ge.s32.totalorder %v3140_v3, 0 }
 0xcd2   :  { %v1513_v61 = vmul.f32 %v2892_v14, %v1512_v15 }
 0xcd4   :  { %v1514_v37 = vmul.f32 0.5, %v1513_v61 }
 0xcd6   :  { %v1515_v33 = vsub.f32 1.5, %v1514_v37 }
 0xcd7   :  { %v2894_v55 = vpop.eup %2893 }
 0xcd8   :  { %v1516_v38 = vmul.f32 %v2892_v14, %v1515_v33  ;;  %v1522_v16 = vmul.f32 %v2894_v55, %v1510_v45  ;;  %vm1528_vm5 = vweird.f32 %v2894_v55  ;;  %v2788_v33 = vld [vmem:[#allocation2 + $0x178] sm:$0xff] }
 0xcd9   :  { %vm1529_vm12 = vmor %vm1527_vm8, %vm1528_vm5  ;;  %vm3658_vm5 = vcmp.ge.s32.totalorder %v3137_v43, 0  ;;  %vm3659_vm8 = vcmp.ge.s32.totalorder %v3150_v47, 0  ;;  %v2787_v43 = vld [vmem:[#allocation2 + $0x170] sm:$0xff] }
 0xcda   :  { %v1520_v50 = vsel %vm1519_vm2, %v2892_v14, %v1516_v38  ;;  %v1523_v51 = vmul.f32 %v2894_v55, %v1522_v16  ;;  %vm3657_vm2 = vmmov %vm3652_vm13 }
 0xcdb   :  { %v1531_v53 = vmul.f32 %v1520_v50, %v3403_v58 }
 0xcdc   :  { %v1524_v54 = vmul.f32 0.5, %v1523_v51 }
 0xcdd   :  { %v1534_v56 = vmul.f32 %v2837_v39, %v1531_v53 }
 0xcde   :  { %v1525_v59 = vsub.f32 1.5, %v1524_v54 }
 0xcdf   :  { %v1537_v7 = vadd.f32 %v2838_v52, %v1534_v56 }
 0xce0   :  { %v1526_v60 = vmul.f32 %v2894_v55, %v1525_v59 }
 0xce1   :  { %v3424_v62 = vmul.f32 %v1537_v7, %v3134_v41 }
 0xce2   :  { %v1530_v17 = vsel %vm1529_vm12, %v2894_v55, %v1526_v60  ;;  %vm3660_vm12 = vcmp.ge.s32.totalorder %v3153_v48, 0 }
 0xce3   :  { %v1532_v5 = vmul.f32 %v1530_v17, %v3409_v44  ;;  %v1556_v27 = vrot.slane %v3424_v62, 5  ;;  %v1543_v4 = vrot.slane %v3424_v62, 4  ;;  %v1627_v58 = vrot.slane %v3424_v62, 6 }
 0xce4   :  { %v1671_v24 = vrot.slane %v3424_v62, 7  ;;  %v1751_v38 = vrot.slane %v3424_v62, 1  ;;  %v1795_v16 = vrot.slane %v3424_v62, 2 }
 0xce5   :  { %v1535_v57 = vmul.f32 %v2837_v39, %v1532_v5  ;;  %v1561_v28 = vsel %vm547_vm10, 0.0, %v1556_v27  ;;  %v1548_v9 = vsel %vm169_vm6, 0.0, %v1543_v4  ;;  %v1632_v10 = vsel %vm631_vm11, 0.0, %v1627_v58 }
 0xce6   :  { %v1676_v44 = vsel %vm3652_vm13, 0.0, %v1671_v24  ;;  %v1562_v14 = vsel %vm3653_vm14, %v1561_v28, 0.0  ;;  %v1549_v45 = vsel %vm3654_vm3, %v1548_v9, 0.0  ;;  %v1633_v15 = vsel %vm3655_vm1, %v1632_v10, 0.0  ;;  %v2792_v28 = vld [vmem:[#allocation2 + $0x198] sm:$0xff] }
 0xce7   :  { %v1538_v6 = vadd.f32 %v2838_v52, %v1535_v57  ;;  %v1677_v61 = vsel %vm3656_vm15, %v1676_v44, 0.0  ;;  %vm3661_vm13 = vcmp.ge.s32.totalorder %v3156_v49, 0  ;;  %v1839_v39 = vrot.slane %v3424_v62, 3  ;;  %v2791_v44 = vld [vmem:[#allocation2 + $0x190] sm:$0xff] }
 0xce8   :  { %vm3664_vm14 = vcmp.lt.s32.totalorder %v3215_v22, 8  ;;  %vm3665_vm3 = vcmp.lt.s32.totalorder %v3218_v23, 8  ;;  %vm3666_vm1 = vcmp.lt.s32.totalorder %v3222_v25, 8  ;;  %vm3669_vm15 = vcmp.lt.s32.totalorder %v3266_v1, 8  ;;  %v2789_v1 = vld [vmem:[#allocation2 + $0x180] sm:$0xff] }
 0xce9   :  { %v3433_v34 = vmul.f32 %v1538_v6, %v3147_v46 }
 0xceb   :  { %v1557_v12 = vrot.slane %v3433_v34, 5  ;;  %v1544_v29 = vrot.slane %v3433_v34, 4  ;;  %v1628_v13 = vrot.slane %v3433_v34, 6  ;;  %v1672_v63 = vrot.slane %v3433_v34, 7 }
 0xcec   :  { %v1752_v47 = vrot.slane %v3433_v34, 1  ;;  %v1796_v48 = vrot.slane %v3433_v34, 2  ;;  %v1840_v55 = vrot.slane %v3433_v34, 3  ;;  %v1719_v57 = vpack.c.bf16 %v3433_v34, %v3424_v62 }
 0xced   :  { %v1558_v8 = vsel %vm547_vm10, %v1556_v27, %v1557_v12  ;;  %v1545_v18 = vsel %vm169_vm6, %v1543_v4, %v1544_v29  ;;  %v1629_v19 = vsel %vm631_vm11, %v1627_v58, %v1628_v13  ;;  %v1673_v11 = vsel %vm3657_vm2, %v1671_v24, %v1672_v63 }
 0xcee   :  { %v1563_v35 = vsel %vm3658_vm5, %v1558_v8, 0.0  ;;  %v1550_v36 = vsel %vm3659_vm8, %v1545_v18, 0.0  ;;  %v1634_v2 = vsel %vm3660_vm12, %v1629_v19, 0.0  ;;  %v1678_v37 = vsel %vm3661_vm13, %v1673_v11, 0.0 }
 0xcef   :  { %v1568_v42 = vpack.c.bf16 %v1563_v35, %v1562_v14  ;;  %v1555_v30 = vpack.c.bf16 %v1550_v36, %v1549_v45  ;;  %v1639_v31 = vpack.c.bf16 %v1634_v2, %v1633_v15  ;;  %v1683_v32 = vpack.c.bf16 %v1678_v37, %v1677_v61 }
 0xcf0   :  { %v1753_v50 = vsel %vm781_vm4, %v1751_v38, %v1752_v47  ;;  %v1756_v51 = vsel %vm781_vm4, %v1752_v47, 0.0  ;;  %v1797_v52 = vsel %vm838_vm9, %v1795_v16, %v1796_v48  ;;  %v1800_v53 = vsel %vm838_vm9, %v1796_v48, 0.0 }
 0xcf1   :  { %2596 = vmatmul.msk.bf16.vlgmr.msrb.gmra.mxu1 %vm90_vm0, %v1568_v42  ;;  %2605 = vmatmul.msk.bf16.vlgmr.msrb.gmra.mxu3 %vm90_vm0, %v1555_v30  ;;  %v1841_v54 = vsel %vm895_vm7, %v1839_v39, %v1840_v55  ;;  %v1844_v56 = vsel %vm895_vm7, %v1840_v55, 0.0  ;;  %vm3662_vm10 = vcmp.lt.s32.totalorder %v3209_v20, 8  ;;  %vm3663_vm11 = vcmp.lt.s32.totalorder %v3212_v21, 8  ;;  %v2839_v39 = vld [vmem:[%s3614_s4 + $0x60] ss:$0 sm:$0xff] }
 0xcf2   :  { %2614 = vmatmul.msk.bf16.vlgmr.msra.gmra.mxu2 %vm90_vm0, %v1639_v31  ;;  %2623 = vmatmul.msk.bf16.vlgmr.msra.gmra.mxu0 %vm90_vm0, %v1683_v32  ;;  %v1757_v59 = vsel %vm3662_vm10, %v1753_v50, 0.0  ;;  %v1758_v7 = vsel %vm3663_vm11, %v1756_v51, 0.0  ;;  %v1801_v60 = vsel %vm3664_vm14, %v1797_v52, 0.0  ;;  %v1802_v17 = vsel %vm3665_vm3, %v1800_v53, 0.0 }
 0xcf3   :  { %1913 = vmatpush.bf16.msrb.mxu1 %v2788_v33  ;;  %v1845_v5 = vsel %vm3666_vm1, %v1841_v54, 0.0  ;;  %vm3667_vm9 = vcmp.lt.s32.totalorder %v3225_v26, 8  ;;  %v1763_v4 = vpack.c.bf16 %v1758_v7, %v1757_v59  ;;  %v1807_v58 = vpack.c.bf16 %v1802_v17, %v1801_v60  ;;  %1971 = vmatpush.bf16.msrb.mxu3 %v2792_v28  ;;  %v2840_v17 = vld [vmem:[%s3614_s4 + $0x68] ss:$0 sm:$0xff] }
 0xcf4   :  { %v1846_v27 = vsel %vm3667_vm9, %v1844_v56, 0.0  ;;  %v1884_v22 = vsel %vm169_vm6, %v1544_v29, 0.0  ;;  %vm3668_vm7 = vcmp.lt.s32.totalorder %v3263_v0, 8  ;;  %v2790_v0 = vld [vmem:[#allocation2 + $0x188] sm:$0xff]  ;;  %vm3670_vm6 = vcmask 523264  }
 0xcf5   :  { %v1851_v24 = vpack.c.bf16 %v1846_v27, %v1845_v5  ;;  %v1885_v23 = vsel %vm3668_vm7, %v1545_v18, 0.0  ;;  %v1886_v25 = vsel %vm3669_vm15, %v1884_v22, 0.0  ;;  %vm3671_vm11 = vcmask 1040384  }
 0xcf6   :  { %v1891_v26 = vpack.c.bf16 %v1886_v25, %v1885_v23  ;;  %vm3672_vm14 = vmmov %vm3671_vm11  ;;  %vm3673_vm3 = vcmp.ge.s32.totalorder %v3140_v3, 0  ;;  %vm3674_vm1 = vcmp.ge.s32.totalorder %v3156_v49, 0  ;;  %vm3675_vm9 = vcmp.lt.s32.totalorder %v3209_v20, 8  ;;  %v2846_v49 = vld [vmem:[%s3614_s4 + $0x98] ss:$0 sm:$0xff] }
 0xcf7   :  { %1914 = vmatpush.bf16.msrb.mxu1 %v2787_v43  ;;  %1972 = vmatpush.bf16.msrb.mxu3 %v2791_v44  ;;  %vm3676_vm7 = vcmp.lt.s32.totalorder %v3212_v21, 8 }
 0xcfb   :  { %1973 = vmatpush.bf16.msrb.mxu3 %v2790_v0  ;;  %v2794_v0 = vld [vmem:[#allocation2 + $0x1a8] sm:$0xff] }
 0xcfc   :  { %2109 = vmatpush.bf16.msra.mxu0 %v2794_v0 }
 0xcff   :  { %1974 = vmatpush.bf16.msrb.mxu3 %v2789_v1  ;;  %v2798_v1 = vld [vmem:[#allocation2 + $0x1c8] sm:$0xff] }
 0xd01   :  { %2632 = vmatmul.msk.bf16.vlgmr.msra.gmra.mxu1 %vm90_vm0, %v1719_v57  ;;  %2641 = vmatmul.msk.bf16.vlgmr.msra.gmra.mxu3 %vm90_vm0, %v1763_v4 }
 0xd02   :  { %2650 = vmatmul.msk.bf16.vlgmr.msrb.gmra.mxu2 %vm90_vm0, %v1807_v58  ;;  %2659 = vmatmul.msk.bf16.vlgmr.msrb.gmra.mxu0 %vm90_vm0, %v1851_v24 }
 0xd03   :  { %2151 = vmatpush.bf16.msra.mxu1 %v2798_v1 }
 0xd11   :  { %2668 = vmatmul.msk.bf16.vlgmr.msrb.gmra.mxu1 %vm90_vm0, %v1891_v26 }
 0xd6e   :  { %v1593_v6 = vpop.f32.mrf.mxu1 }
 0xd6f   :  { %v1708_v12 = vpop.f32.mrf.mxu0 }
 0xd74   :  { %v1622_v9 = vpop.f32.mrf.mxu3 }
 0xd75   :  { %v1664_v10 = vpop.f32.mrf.mxu2  ;;  %v1623_v29 = vadd.f32 %v1622_v9, %v1593_v6 }
 0xd76   :  { %v1595_v13 = vpop.f32.mrf.mxu1 }
 0xd77   :  { %v1710_v15 = vpop.f32.mrf.mxu0  ;;  %v1669_v61 = vadd.f32 %v1664_v10, %v1623_v29 }
 0xd79   :  { %v1713_v11 = vadd.f32 %v1708_v12, %v1669_v61  ;;  %v2795_v61 = vld [vmem:[#allocation2 + $0x1b0] sm:$0xff] }
 0xd7c   :  { %v1624_v63 = vpop.f32.mrf.mxu3 }
 0xd7d   :  { %v1666_v14 = vpop.f32.mrf.mxu2  ;;  %v1625_v8 = vadd.f32 %v1624_v63, %v1595_v13 }
 0xd7e   :  { %v1744_v45 = vpop.f32.mrf.mxu1 }
 0xd7f   :  { %v1670_v19 = vadd.f32 %v1666_v14, %v1625_v8  ;;  %v1749_v2 = vadd.f32 %v1744_v45, %v1713_v11  ;;  %v1876_v30 = vpop.f32.mrf.mxu0  ;;  %v2796_v14 = vld [vmem:[#allocation2 + $0x1b8] sm:$0xff]  ;;  %v2793_v8 = vld [vmem:[#allocation2 + $0x1a0] sm:$0xff] }
 0xd80   :  { %2080 = vmatpush.bf16.msra.mxu2 %v2796_v14  ;;  %2110 = vmatpush.bf16.msra.mxu0 %v2793_v8 }
 0xd81   :  { %v1714_v42 = vadd.f32 %v1710_v15, %v1670_v19 }
 0xd84   :  { %v1788_v18 = vpop.f32.mrf.mxu3  ;;  %2081 = vmatpush.bf16.msra.mxu2 %v2795_v61 }
 0xd85   :  { %v1832_v35 = vpop.f32.mrf.mxu2  ;;  %v1793_v37 = vadd.f32 %v1788_v18, %v1749_v2  ;;  %v2797_v18 = vld [vmem:[#allocation2 + $0x1c0] sm:$0xff] }
 0xd86   :  { %v1746_v36 = vpop.f32.mrf.mxu1  ;;  %2152 = vmatpush.bf16.msra.mxu1 %v2797_v18 }
 0xd87   :  { %v1750_v31 = vadd.f32 %v1746_v36, %v1714_v42  ;;  %v1837_v33 = vadd.f32 %v1832_v35, %v1793_v37  ;;  %v1878_v50 = vpop.f32.mrf.mxu0 }
 0xd89   :  { %v1881_v38 = vadd.f32 %v1876_v30, %v1837_v33 }
 0xd8c   :  { %v1790_v32 = vpop.f32.mrf.mxu3 }
 0xd8d   :  { %v1794_v43 = vadd.f32 %v1790_v32, %v1750_v31  ;;  %v1834_v48 = vpop.f32.mrf.mxu2  ;;  %v2841_v32 = vld [vmem:[%s3614_s4 + $0x70] ss:$0 sm:$0xff] }
 0xd8e   :  { %v1916_v47 = vpop.f32.mrf.mxu1 }
 0xd8f   :  { %v1838_v55 = vadd.f32 %v1834_v48, %v1794_v43  ;;  %v1921_v16 = vadd.f32 %v1916_v47, %v1881_v38  ;;  %v2842_v47 = vld [vmem:[%s3614_s4 + $0x78] ss:$0 sm:$0xff] }
 0xd91   :  { %v1882_v51 = vadd.f32 %v1878_v50, %v1838_v55  ;;  %v1925_v53 = vadd.f32 %v2839_v39, %v1921_v16 }
 0xd93   :  { %v1927_v59 = vmax.f32 %v1925_v53, 0.0 }
 0xd96   :  { %v1918_v52 = vpop.f32.mrf.mxu1 }
 0xd97   :  { %v1922_v54 = vadd.f32 %v1918_v52, %v1882_v51 }
 0xd99   :  { %v1926_v56 = vadd.f32 %v2839_v39, %v1922_v54 }
 0xd9b   :  { %v1928_v7 = vmax.f32 %v1926_v56, 0.0 }
 0xd9d   :  { %v1937_v60 = vpack.c.bf16 %v1928_v7, %v1927_v59 }
 0xd9f   :  { %2685 = vmatmul.msk.bf16.vlgmr.msrb.gmra.mxu3 %vm3670_vm6, %v1937_v60 }
 0xe22   :  { %v1976_v5 = vpop.f32.mrf.mxu3 }
 0xe23   :  { %v1977_v27 = vadd.f32 %v2840_v17, %v1976_v5 }
 0xe25   :  { %v1981_v57 = vadd.f32 %v1977_v27, %v3424_v62 }
 0xe27   :  { %v1985_v4 = vsel %vm90_vm0, %v1981_v57, 0.0 }
 0xe28   :  { %1986 = vadd.xlane.f32.xlu0 %v1985_v4 }
 0xe2a   :  { %v1978_v58 = vpop.f32.mrf.mxu3 }
 0xe2b   :  { %v1979_v24 = vadd.f32 %v2840_v17, %v1978_v58 }
 0xe2d   :  { %v1982_v22 = vadd.f32 %v1979_v24, %v3433_v34 }
 0xe2f   :  { %v1988_v23 = vsel %vm90_vm0, %v1982_v22, 0.0 }
 0xe30   :  { %1989 = vadd.xlane.f32.xlu1 %v1988_v23 }
 0xe9b   :  { %v1987_v25 = vpop.xlane.xlu0 %1986 }
 0xe9c   :  { %v1991_v26 = vmul.f32 %v1987_v25, %v3091_v40 }
 0xe9e   :  { %v1993_v6 = vsub.f32 %v1981_v57, %v1991_v26 }
 0xea0   :  { %v1995_v28 = vmul.f32 %v1993_v6, %v1993_v6 }
 0xea2   :  { %v1997_v9 = vsel %vm90_vm0, %v1995_v28, 0.0 }
 0xea3   :  { %v1990_v10 = vpop.xlane.xlu1 %1989  ;;  %1998 = vadd.xlane.f32.xlu0 %v1997_v9 }
 0xea4   :  { %v1992_v62 = vmul.f32 %v1990_v10, %v3091_v40 }
 0xea6   :  { %v1994_v44 = vsub.f32 %v1982_v22, %v1992_v62  ;;  %v2843_v62 = vld [vmem:[%s3614_s4 + $0x80] ss:$0 sm:$0xff] }
 0xea8   :  { %v1996_v12 = vmul.f32 %v1994_v44, %v1994_v44 }
 0xeaa   :  { %v2000_v13 = vsel %vm90_vm0, %v1996_v12, 0.0 }
 0xeab   :  { %2001 = vadd.xlane.f32.xlu1 %v2000_v13 }
 0xf16   :  { %v1999_v34 = vpop.xlane.xlu0 %1998 }
 0xf17   :  { %v2003_v63 = vmul.f32 %v1999_v34, %v3091_v40 }
 0xf19   :  { %v2005_v29 = vadd.f32 1e-05, %v2003_v63 }
 0xf1b   :  { %2895 = vrsqrt.f32 %v2005_v29  ;;  %vm2013_vm5 = vweird.f32 %v2005_v29 }
 0xf1e   :  { %v2002_v45 = vpop.xlane.xlu1 %2001 }
 0xf1f   :  { %v2004_v15 = vmul.f32 %v2002_v45, %v3091_v40 }
 0xf21   :  { %v2896_v19 = vpop.eup %2895  ;;  %v2006_v11 = vadd.f32 1e-05, %v2004_v15 }
 0xf22   :  { %v2008_v35 = vmul.f32 %v2896_v19, %v2005_v29  ;;  %vm2014_vm2 = vweird.f32 %v2896_v19 }
 0xf23   :  { %2897 = vrsqrt.f32 %v2006_v11  ;;  %vm2015_vm8 = vmor %vm2013_vm5, %vm2014_vm2  ;;  %vm2023_vm13 = vweird.f32 %v2006_v11 }
 0xf24   :  { %v2009_v36 = vmul.f32 %v2896_v19, %v2008_v35 }
 0xf26   :  { %v2010_v2 = vmul.f32 0.5, %v2009_v36 }
 0xf28   :  { %v2011_v37 = vsub.f32 1.5, %v2010_v2 }
 0xf29   :  { %v2898_v42 = vpop.eup %2897 }
 0xf2a   :  { %v2012_v30 = vmul.f32 %v2896_v19, %v2011_v37  ;;  %v2018_v31 = vmul.f32 %v2898_v42, %v2006_v11  ;;  %vm2024_vm12 = vweird.f32 %v2898_v42 }
 0xf2b   :  { %vm2025_vm10 = vmor %vm2023_vm13, %vm2024_vm12 }
 0xf2c   :  { %v2016_v33 = vsel %vm2015_vm8, %v2896_v19, %v2012_v30  ;;  %v2019_v43 = vmul.f32 %v2898_v42, %v2018_v31  ;;  %vm3677_vm13 = vmmov %vm3671_vm11 }
 0xf2d   :  { %v2027_v48 = vmul.f32 %v2016_v33, %v1993_v6 }
 0xf2e   :  { %v2020_v55 = vmul.f32 0.5, %v2019_v43  ;;  %v2802_v43 = vld [vmem:[#allocation2 + $0x1e8] sm:$0xff] }
 0xf2f   :  { %v2030_v38 = vmul.f32 %v2841_v32, %v2027_v48  ;;  %v2804_v48 = vld [vmem:[#allocation2 + $0x1f8] sm:$0xff]  ;;  %2260 = vmatpush.bf16.msra.mxu3 %v2802_v43 }
 0xf30   :  { %v2021_v16 = vsub.f32 1.5, %v2020_v55  ;;  %v2801_v55 = vld [vmem:[#allocation2 + $0x1e0] sm:$0xff]  ;;  %2331 = vmatpush.bf16.msrb.mxu0 %v2804_v48  ;;  %v2400_v43 = vld [vmem:[%s3614_s4 + $0xb8] sm:$0x1] }
 0xf31   :  { %v2033_v39 = vadd.f32 %v2842_v47, %v2030_v38  ;;  %v2799_v38 = vld [vmem:[#allocation2 + $0x1d0] sm:$0xff] }
 0xf32   :  { %v2022_v50 = vmul.f32 %v2898_v42, %v2021_v16 }
 0xf33   :  { %v2035_v51 = vmul.f32 %v2033_v39, %v3134_v41  ;;  %v2803_v39 = vld [vmem:[#allocation2 + $0x1f0] sm:$0xff]  ;;  %2261 = vmatpush.bf16.msra.mxu3 %v2801_v55 }
 0xf34   :  { %v2026_v52 = vsel %vm2025_vm10, %v2898_v42, %v2022_v50  ;;  %2332 = vmatpush.bf16.msrb.mxu0 %v2803_v39  ;;  %vm3678_vm10 = vmmov %vm3671_vm11 }
 0xf35   :  { %2037 = vst.msk [vmem:[%s3615_s5] sm:$0xff] %vm90_vm0, %v2035_v51  ;;  %v2028_v53 = vmul.f32 %v2026_v52, %v1994_v44  ;;  %v2041_v59 = vrot.slane %v2035_v51, 7  ;;  %v2117_v60 = vrot.slane %v2035_v51, 1 }
 0xf37   :  { %v2031_v54 = vmul.f32 %v2841_v32, %v2028_v53  ;;  %v2046_v5 = vsel %vm3671_vm11, 0.0, %v2041_v59  ;;  %vm3679_vm11 = vmmov %vm3673_vm3 }
 0xf39   :  { %v2034_v56 = vadd.f32 %v2842_v47, %v2031_v54  ;;  %v2800_v47 = vld [vmem:[#allocation2 + $0x1d8] sm:$0xff] }
 0xf3a   :  { %2289 = vmatpush.bf16.msrb.mxu2 %v2800_v47 }
 0xf3b   :  { %v2036_v7 = vmul.f32 %v2034_v56, %v3147_v46  ;;  %v2047_v46 = vsel %vm3673_vm3, %v2046_v5, 0.0  ;;  %vm3681_vm3 = vmmov %vm3675_vm9 }
 0xf3d   :  { %2038 = vst.msk [vmem:[%s3615_s5 + $0x8] sm:$0xff] %vm90_vm0, %v2036_v7  ;;  %v2058_v41 = vpack.c.bf16 %v2036_v7, %v2035_v51  ;;  %v2042_v17 = vrot.slane %v2036_v7, 7  ;;  %v2118_v27 = vrot.slane %v2036_v7, 1 }
 0xf3e   :  { %2290 = vmatpush.bf16.msrb.mxu2 %v2799_v38 }
 0xf3f   :  { %2694 = vmatmul.msk.bf16.vlgmr.msra.gmra.mxu2 %vm90_vm0, %v2058_v41  ;;  %v2043_v57 = vsel %vm3672_vm14, %v2041_v59, %v2042_v17  ;;  %v2119_v4 = vsel %vm781_vm4, %v2117_v60, %v2118_v27  ;;  %v2122_v58 = vsel %vm781_vm4, %v2118_v27, 0.0  ;;  %v2844_v17 = vld [vmem:[%s3614_s4 + $0x88] ss:$0 sm:$0xff]  ;;  %vm3680_vm14 = vmmov %vm3674_vm1 }
 0xf40   :  { %v2048_v24 = vsel %vm3674_vm1, %v2043_v57, 0.0  ;;  %v2123_v22 = vsel %vm3675_vm9, %v2119_v4, 0.0  ;;  %v2124_v23 = vsel %vm3676_vm7, %v2122_v58, 0.0  ;;  %v2845_v58 = vld [vmem:[%s3614_s4 + $0x90] ss:$0 sm:$0xff]  ;;  %vm3682_vm1 = vmmov %vm3676_vm7 }
 0xf41   :  { %v2053_v25 = vpack.c.bf16 %v2048_v24, %v2047_v46  ;;  %v2129_v26 = vpack.c.bf16 %v2124_v23, %v2123_v22 }
 0xf43   :  { %2703 = vmatmul.msk.bf16.vlgmr.msra.gmra.mxu0 %vm90_vm0, %v2053_v25  ;;  %2712 = vmatmul.msk.bf16.vlgmr.msra.gmra.mxu1 %vm90_vm0, %v2129_v26 }
 0xfc0   :  { %v2112_v6 = vpop.f32.mrf.mxu0  ;;  %v2154_v28 = vpop.f32.mrf.mxu1 }
 0xfc2   :  { %v2083_v9 = vpop.f32.mrf.mxu2 }
 0xfc3   :  { %v2113_v10 = vadd.f32 %v2112_v6, %v2083_v9 }
 0xfc5   :  { %v2159_v44 = vadd.f32 %v2154_v28, %v2113_v10 }
 0xfc7   :  { %v2163_v12 = vadd.f32 %v2843_v62, %v2159_v44 }
 0xfc8   :  { %v2114_v34 = vpop.f32.mrf.mxu0  ;;  %v2156_v0 = vpop.f32.mrf.mxu1 }
 0xfc9   :  { %v2165_v13 = vmax.f32 %v2163_v12, 0.0 }
 0xfca   :  { %v2085_v63 = vpop.f32.mrf.mxu2 }
 0xfcb   :  { %v2115_v29 = vadd.f32 %v2114_v34, %v2085_v63  ;;  %v2169_v14 = vsel %vm90_vm0, %v2165_v13, 0.0 }
 0xfcc   :  { %2170 = vadd.xlane.f32.xlu2 %v2169_v14 }
 0xfcd   :  { %v2160_v45 = vadd.f32 %v2156_v0, %v2115_v29 }
 0xfcf   :  { %v2164_v1 = vadd.f32 %v2843_v62, %v2160_v45 }
 0xfd1   :  { %v2166_v15 = vmax.f32 %v2164_v1, 0.0 }
 0xfd3   :  { %v2172_v61 = vsel %vm90_vm0, %v2166_v15, 0.0 }
 0xfd4   :  { %2173 = vadd.xlane.f32.xlu0 %v2172_v61 }
0x103f   :  { %v2171_v8 = vpop.xlane.xlu2 %2170 }
0x1040   :  { %v2175_v18 = vmul.f32 %v2171_v8, %v3091_v40 }
0x1042   :  { %v2177_v19 = vsub.f32 %v2165_v13, %v2175_v18 }
0x1044   :  { %v2179_v11 = vmul.f32 %v2177_v19, %v2177_v19 }
0x1046   :  { %v2181_v35 = vsel %vm90_vm0, %v2179_v11, 0.0 }
0x1047   :  { %v2174_v36 = vpop.xlane.xlu0 %2173  ;;  %2182 = vadd.xlane.f32.xlu1 %v2181_v35 }
0x1048   :  { %v2176_v2 = vmul.f32 %v2174_v36, %v3091_v40 }
0x104a   :  { %v2178_v37 = vsub.f32 %v2166_v15, %v2176_v2 }
0x104c   :  { %v2180_v42 = vmul.f32 %v2178_v37, %v2178_v37 }
0x104e   :  { %v2184_v30 = vsel %vm90_vm0, %v2180_v42, 0.0 }
0x104f   :  { %2185 = vadd.xlane.f32.xlu2 %v2184_v30 }
0x10ba   :  { %v2183_v31 = vpop.xlane.xlu1 %2182 }
0x10bb   :  { %v2187_v32 = vmul.f32 %v2183_v31, %v3091_v40 }
0x10bd   :  { %v2189_v33 = vadd.f32 1e-05, %v2187_v32 }
0x10bf   :  { %2899 = vrsqrt.f32 %v2189_v33  ;;  %vm2197_vm6 = vweird.f32 %v2189_v33 }
0x10c2   :  { %v2186_v16 = vpop.xlane.xlu2 %2185 }
0x10c3   :  { %v2188_v50 = vmul.f32 %v2186_v16, %v3091_v40 }
0x10c5   :  { %v2900_v51 = vpop.eup %2899  ;;  %v2190_v52 = vadd.f32 1e-05, %v2188_v50 }
0x10c6   :  { %v2192_v53 = vmul.f32 %v2900_v51, %v2189_v33  ;;  %vm2198_vm15 = vweird.f32 %v2900_v51 }
0x10c7   :  { %2901 = vrsqrt.f32 %v2190_v52  ;;  %vm2199_vm2 = vmor %vm2197_vm6, %vm2198_vm15  ;;  %vm2207_vm8 = vweird.f32 %v2190_v52 }
0x10c8   :  { %v2193_v54 = vmul.f32 %v2900_v51, %v2192_v53 }
0x10ca   :  { %v2194_v56 = vmul.f32 0.5, %v2193_v54 }
0x10cc   :  { %v2195_v59 = vsub.f32 1.5, %v2194_v56 }
0x10cd   :  { %v2902_v7 = vpop.eup %2901 }
0x10ce   :  { %v2196_v60 = vmul.f32 %v2900_v51, %v2195_v59  ;;  %v2202_v41 = vmul.f32 %v2902_v7, %v2190_v52  ;;  %vm2208_vm5 = vweird.f32 %v2902_v7 }
0x10cf   :  { %vm2209_vm12 = vmor %vm2207_vm8, %vm2208_vm5  ;;  %vm2427_vm5 = vcmask 122880  }
0x10d0   :  { %v2200_v5 = vsel %vm2199_vm2, %v2900_v51, %v2196_v60  ;;  %v2203_v27 = vmul.f32 %v2902_v7, %v2202_v41 }
0x10d1   :  { %v2211_v57 = vmul.f32 %v2200_v5, %v2177_v19 }
0x10d2   :  { %v2204_v4 = vmul.f32 0.5, %v2203_v27 }
0x10d3   :  { %v2214_v46 = vmul.f32 %v2844_v17, %v2211_v57 }
0x10d4   :  { %v2205_v24 = vsub.f32 1.5, %v2204_v4 }
0x10d5   :  { %v2217_v23 = vadd.f32 %v2845_v58, %v2214_v46 }
0x10d6   :  { %v2206_v22 = vmul.f32 %v2902_v7, %v2205_v24 }
0x10d7   :  { %v2221_v28 = vrot.slane %v2217_v23, 7  ;;  %v2297_v10 = vrot.slane %v2217_v23, 1 }
0x10d8   :  { %v2210_v25 = vsel %vm2209_vm12, %v2902_v7, %v2206_v22 }
0x10d9   :  { %v2212_v26 = vmul.f32 %v2210_v25, %v2178_v37  ;;  %v2226_v12 = vsel %vm3677_vm13, 0.0, %v2221_v28 }
0x10da   :  { %v2227_v14 = vsel %vm3679_vm11, %v2226_v12, 0.0 }
0x10db   :  { %v2215_v6 = vmul.f32 %v2844_v17, %v2212_v26 }
0x10dd   :  { %v2218_v9 = vadd.f32 %v2845_v58, %v2215_v6 }
0x10df   :  { %v2222_v62 = vrot.slane %v2218_v9, 7  ;;  %v2238_v44 = vpack.c.bf16 %v2218_v9, %v2217_v23  ;;  %v2298_v13 = vrot.slane %v2218_v9, 1 }
0x10e1   :  { %2721 = vmatmul.msk.bf16.vlgmr.msra.gmra.mxu3 %vm90_vm0, %v2238_v44  ;;  %v2223_v34 = vsel %vm3678_vm10, %v2221_v28, %v2222_v62  ;;  %v2299_v63 = vsel %vm781_vm4, %v2297_v10, %v2298_v13  ;;  %v2302_v29 = vsel %vm781_vm4, %v2298_v13, 0.0  ;;  %v2848_v44 = vld [vmem:[%s3614_s4 + $0xa8] ss:$0 sm:$0xff] }
0x10e2   :  { %v2228_v0 = vsel %vm3680_vm14, %v2223_v34, 0.0  ;;  %v2303_v45 = vsel %vm3681_vm3, %v2299_v63, 0.0  ;;  %v2304_v1 = vsel %vm3682_vm1, %v2302_v29, 0.0 }
0x10e3   :  { %v2233_v15 = vpack.c.bf16 %v2228_v0, %v2227_v14  ;;  %v2309_v61 = vpack.c.bf16 %v2304_v1, %v2303_v45  ;;  %v2399_v14 = vld [vmem:[%s3614_s4 + $0xb0] sm:$0x1] }
0x10e4   :  { %v2401_v0 = vpack.c.bf16 %v2399_v14, %v2399_v14 }
0x10e5   :  { %2730 = vmatmul.msk.bf16.vlgmr.msrb.gmra.mxu2 %vm90_vm0, %v2233_v15  ;;  %2739 = vmatmul.msk.bf16.vlgmr.msrb.gmra.mxu0 %vm90_vm0, %v2309_v61 }
0x1162   :  { %v2334_v18 = vpop.f32.mrf.mxu0 }
0x1164   :  { %v2263_v8 = vpop.f32.mrf.mxu3 }
0x1168   :  { %v2292_v19 = vpop.f32.mrf.mxu2 }
0x1169   :  { %v2293_v3 = vadd.f32 %v2292_v19, %v2263_v8 }
0x116a   :  { %v2336_v42 = vpop.f32.mrf.mxu0 }
0x116b   :  { %v2339_v11 = vadd.f32 %v2334_v18, %v2293_v3 }
0x116c   :  { %v2265_v36 = vpop.f32.mrf.mxu3 }
0x116d   :  { %v2343_v20 = vadd.f32 %v2846_v49, %v2339_v11 }
0x116f   :  { %v2345_v35 = vmax.f32 %v2343_v20, 0.0 }
0x1170   :  { %v2294_v21 = vpop.f32.mrf.mxu2 }
0x1171   :  { %v2295_v2 = vadd.f32 %v2294_v21, %v2265_v36  ;;  %v2349_v37 = vsel %vm90_vm0, %v2345_v35, 0.0 }
0x1172   :  { %2350 = vadd.xlane.f32.xlu0 %v2349_v37 }
0x1173   :  { %v2340_v30 = vadd.f32 %v2336_v42, %v2295_v2 }
0x1175   :  { %v2344_v31 = vadd.f32 %v2846_v49, %v2340_v30 }
0x1177   :  { %v2346_v32 = vmax.f32 %v2344_v31, 0.0 }
0x1179   :  { %v2352_v33 = vsel %vm90_vm0, %v2346_v32, 0.0 }
0x117a   :  { %2353 = vadd.xlane.f32.xlu1 %v2352_v33 }
0x1193   :  { %2405 = vperm.xlu1 %2820, %v2400_v43  }
0x11e5   :  { %v2351_v47 = vpop.xlane.xlu0 %2350 }
0x11e6   :  { %v2355_v48 = vmul.f32 %v2351_v47, %v3091_v40 }
0x11e8   :  { %v2357_v55 = vsub.f32 %v2345_v35, %v2355_v48 }
0x11ea   :  { %v2359_v38 = vmul.f32 %v2357_v55, %v2357_v55 }
0x11ec   :  { %v2361_v16 = vsel %vm90_vm0, %v2359_v38, 0.0 }
0x11ed   :  { %v2354_v39 = vpop.xlane.xlu1 %2353  ;;  %2362 = vadd.xlane.f32.xlu2 %v2361_v16 }
0x11ee   :  { %v2356_v50 = vmul.f32 %v2354_v39, %v3091_v40 }
0x11f0   :  { %v2358_v51 = vsub.f32 %v2346_v32, %v2356_v50 }
0x11f2   :  { %v2360_v52 = vmul.f32 %v2358_v51, %v2358_v51 }
0x11f4   :  { %v2364_v53 = vsel %vm90_vm0, %v2360_v52, 0.0 }
0x11f5   :  { %2365 = vadd.xlane.f32.xlu0 %v2364_v53 }
0x1205   :  { %v2406_v45 = vpop.permute.xlu1 %2405 }
0x1260   :  { %v2363_v54 = vpop.xlane.xlu2 %2362 }
0x1261   :  { %v2367_v56 = vmul.f32 %v2363_v54, %v3091_v40 }
0x1263   :  { %v2369_v59 = vadd.f32 1e-05, %v2367_v56 }
0x1265   :  { %2903 = vrsqrt.f32 %v2369_v59  ;;  %vm2377_vm9 = vweird.f32 %v2369_v59 }
0x1268   :  { %v2366_v7 = vpop.xlane.xlu0 %2365 }
0x1269   :  { %v2368_v60 = vmul.f32 %v2366_v7, %v3091_v40  ;;  %v2847_v40 = vld [vmem:[%s3614_s4 + $0xa0] ss:$0 sm:$0xff] }
0x126b   :  { %v2904_v41 = vpop.eup %2903  ;;  %v2370_v17 = vadd.f32 1e-05, %v2368_v60 }
0x126c   :  { %v2372_v5 = vmul.f32 %v2904_v41, %v2369_v59  ;;  %vm2378_vm4 = vweird.f32 %v2904_v41 }
0x126d   :  { %2905 = vrsqrt.f32 %v2370_v17  ;;  %vm2379_vm7 = vmor %vm2377_vm9, %vm2378_vm4  ;;  %vm2387_vm6 = vweird.f32 %v2370_v17 }
0x126e   :  { %v2373_v27 = vmul.f32 %v2904_v41, %v2372_v5 }
0x1270   :  { %v2374_v57 = vmul.f32 0.5, %v2373_v27 }
0x1272   :  { %v2375_v4 = vsub.f32 1.5, %v2374_v57 }
0x1273   :  { %v2906_v58 = vpop.eup %2905 }
0x1274   :  { %v2376_v46 = vmul.f32 %v2904_v41, %v2375_v4  ;;  %v2382_v24 = vmul.f32 %v2906_v58, %v2370_v17  ;;  %vm2388_vm15 = vweird.f32 %v2906_v58 }
0x1275   :  { %vm2389_vm2 = vmor %vm2387_vm6, %vm2388_vm15 }
0x1276   :  { %v2383_v22 = vmul.f32 %v2906_v58, %v2382_v24  ;;  %v2380_v23 = vsel %vm2379_vm7, %v2904_v41, %v2376_v46 }
0x1277   :  { %v2391_v6 = vmul.f32 %v2380_v23, %v2357_v55 }
0x1278   :  { %v2384_v25 = vmul.f32 0.5, %v2383_v22 }
0x1279   :  { %v2394_v62 = vmul.f32 %v2847_v40, %v2391_v6 }
0x127a   :  { %v2385_v26 = vsub.f32 1.5, %v2384_v25 }
0x127b   :  { %v2397_v13 = vadd.f32 %v2848_v44, %v2394_v62 }
0x127c   :  { %v2386_v28 = vmul.f32 %v2906_v58, %v2385_v26 }
0x127e   :  { %v2390_v9 = vsel %vm2389_vm2, %v2906_v58, %v2386_v28 }
0x127f   :  { %v2392_v10 = vmul.f32 %v2390_v9, %v2358_v51 }
0x1281   :  { %v2395_v12 = vmul.f32 %v2847_v40, %v2392_v10 }
0x1283   :  { %v2398_v34 = vadd.f32 %v2848_v44, %v2395_v12 }
0x1285   :  { %v2402_v63 = vpack.c.bf16 %v2398_v34, %v2397_v13 }
0x1287   :  { %v2412_v29 = vsel %vm90_vm0, %v2402_v63, 0 }
0x1288   :  { %2421 = vmatpush.bf16.xpose.msrb.mxu1 %v2412_v29 }
0x128f   :  { %2740 = vmatmul.msk.bf16.vlgmr.msrb.gmra.mxu1 %vm90_vm0, %v2401_v0 }
0x130c   :  { %v2423_v1 = vpop.f32.mrf.mxu1 }
0x130d   :  { %v2424_v15 = vadd.f32 %v2423_v1, %v2406_v45 }
0x130f   :  { %2428 = vst.msk [vmem:[%s3616_s6] sm:$0x1] %vm2427_vm5, %v2424_v15 }
0x1314   :  { %v2425_v61 = vpop.f32.mrf.mxu1 }
0x1315   :  { %2437 = vsyncpa [#allocation3], 1 }

// kernel: forward.3
= control target key start
LH: loop header
LB: loop body
LE: loop exit
PB: predicated region body
PF: predicated region fallthrough
CT: control target
= control target key end

     0   :  { %14 = vsyncpa [#allocation3], 0  ;;  %s6855_s0 = inlined_call_operand.vmem [shape: f32[32,32], index: 0, kind: input, shape index: {}]   ;;  %s6856_s1 = inlined_call_operand.vmem [shape: s32[32,1], index: 1, kind: input, shape index: {}]   ;;  %s6857_s2 = inlined_call_operand.vmem [shape: f32[2,16], index: 2, kind: input, shape index: {}]   ;;  %s6858_s3 = inlined_call_operand.vmem [shape: f32[32,1], index: 3, kind: input, shape index: {}]   ;;  %s6859_s4 = inlined_call_operand.vmem [shape: f32[32,2], index: 4, kind: input, shape index: {}]   ;;  %s6860_s5 = inlined_call_operand.hbm [shape: bf16[1248,128], index: 5, kind: input, shape index: {}]   ;;  %s6861_s6 = inlined_call_operand.vmem [shape: f32[360,128], index: 6, kind: input, shape index: {}]   ;;  %s6862_s7 = inlined_call_operand.hbm [shape: f32[32,16], index: 7, kind: output, shape index: {0}]   ;;  %s6863_s8 = inlined_call_operand.vmem [shape: f32[2,32], index: 8, kind: output, shape index: {1}]  }
   0x1   :  { %15 = vsyncpa [#allocation4], 0  ;;  %s30_s29 = sshll.u32 %s6860_s5, 4  ;;  %s5322_s30 = smov [#allocation2]   ;;  %s31_s29 = int_to_ptr.hbm [resolvable:$true] %s30_s29 }
   0x2   :  { %s32_s9 = sshll.u32 %s5322_s30, 4  ;;  %s5323_s10 = smov 64   ;;  %s33_s9 = int_to_ptr.vmem [resolvable:$true] %s32_s9 }
   0x3   :  { %s5324_s11 = smov 4  }
   0x4   :  { %38 = dma.hbm_to_vmem [thread:$0]  %s31_s29, 9984, %s33_s9, [#allocation3], %s5323_s10, %s5323_s10, %s5324_s11  }
   0x5   :  { %5318 = dma.done.wait [#allocation3], 9984  }
   0x6   :  { %5319 = vsyncadd [#allocation3], 4294957312  ;;  %v55_v0 = vlaneseq  ;;  %v4981_v8 = vld [vmem:[#allocation2 + $0x1b8] sm:$0xff]  ;;  %v4979_v9 = vld [vmem:[#allocation2 + $0x1a8] sm:$0xff]  ;;  %vm112_vm0 = vcmask 1040384   ;;  %vm6883_vm1 = vcmask 1046528  }
   0x7   :  { %v4983_v10 = vld [vmem:[#allocation2 + $0x1c8] sm:$0xff]  ;;  %v4980_v11 = vld [vmem:[#allocation2 + $0x1b0] sm:$0xff]  ;;  %v4978_v12 = vld [vmem:[#allocation2 + $0x1a0] sm:$0xff]  ;;  %190 = vmatpush.bf16.msra.mxu0 %v4981_v8  ;;  %227 = vmatpush.bf16.msra.mxu1 %v4979_v9  ;;  %vm177_vm4 = vcmask 261120   ;;  %s5330_s27 = smov 80   ;;  %s5331_s28 = smov 112  }
   0x8   :  { %v56_v1 = vshrl.u32 %v55_v0, 7  ;;  %v4982_v13 = vld [vmem:[#allocation2 + $0x1c0] sm:$0xff]  ;;  %v47_v16 = vld [vmem:[%s6855_s0 + $0x8] sm:$0xff]  ;;  %v48_v17 = vld [vmem:[%s6855_s0 + $0x10] sm:$0xff]  ;;  %311 = vmatpush.bf16.msra.mxu2 %v4983_v10  ;;  %s5333_s30 = smov 16   ;;  %s5334_s24 = smov [#allocation5]  }
   0x9   :  { %v46_v15 = vld [vmem:[%s6855_s0] sm:$0xff]  ;;  %v114_v21 = vrot.slane %v47_v16, 7  ;;  %v242_v23 = vrot.slane %v47_v16, 1  ;;  %v244_v24 = vrot.slane %v48_v17, 1  ;;  %v49_v28 = vld [vmem:[%s6855_s0 + $0x18] sm:$0xff]  ;;  %v116_v37 = vrot.slane %v48_v17, 7 }
   0xa   :  { %v5388_v2 = vand.u32 15, %v56_v1  ;;  %v57_v3 = vadd.s32 8, %v56_v1  ;;  %v58_v4 = vadd.s32 16, %v56_v1  ;;  %v59_v5 = vadd.s32 24, %v56_v1  ;;  %v5105_v52 = vld [vmem:[%s6861_s6 + $0x80] ss:$0 sm:$0xff] }
   0xb   :  { %v113_v20 = vrot.slane %v46_v15, 7  ;;  %v241_v22 = vrot.slane %v46_v15, 1  ;;  %v5413_v25 = vpack.c.bf16 %v47_v16, %v46_v15  ;;  %191 = vmatpush.bf16.msra.mxu0 %v4980_v11  ;;  %228 = vmatpush.bf16.msra.mxu1 %v4978_v12  ;;  %v245_v31 = vsel %vm6883_vm1, %v242_v23, %v244_v24  ;;  %s4531_s25 = sshll.u32 %s5334_s24, 4  ;;  %s4533_s29 = sshll.u32 %s6862_s7, 4  ;;  %s4532_s25 = int_to_ptr.vmem [resolvable:$true] %s4531_s25  ;;  %s4534_s29 = int_to_ptr.hbm [resolvable:$true] %s4533_s29 }
   0xc   :  { %v5391_v6 = vadd.s32 4294967295, %v5388_v2  ;;  %v5393_v7 = vand.u32 15, %v57_v3  ;;  %v5407_v18 = vand.u32 15, %v58_v4  ;;  %v5409_v19 = vand.u32 15, %v59_v5  ;;  %312 = vmatpush.bf16.msra.mxu2 %v4982_v13  ;;  %s5336_s9 = smov 8  }
   0xd   :  { %v115_v26 = vsel %vm112_vm0, %v113_v20, %v114_v21  ;;  %v124_v27 = vsel %vm112_vm0, 0.0, %v113_v20  ;;  %v243_v30 = vsel %vm6883_vm1, %v241_v22, %v242_v23  ;;  %v246_v38 = vrot.slane %v49_v28, 1 }
   0xe   :  { %v5396_v14 = vadd.s32 1, %v5393_v7  ;;  %vm6867_vm2 = vcmp.ge.s32.totalorder %v5391_v6, 0  ;;  %v5425_v32 = vadd.s32 4294967295, %v5407_v18  ;;  %v5432_v35 = vadd.s32 1, %v5409_v19  ;;  %4558 = vmatmul.msk.bf16.vlgmr.msra.gmra.mxu0 %vm177_vm4, %v5413_v25 }
   0xf   :  { %v149_v29 = vsel %vm6867_vm2, %v124_v27, 0.0  ;;  %v118_v39 = vrot.slane %v49_v28, 7  ;;  %v252_v40 = vsel %vm6883_vm1, %v246_v38, 0.0  ;;  %v117_v41 = vsel %vm112_vm0, %v114_v21, %v116_v37 }
  0x10   :  { %vm6866_vm3 = vcmp.lt.s32.totalorder %v5396_v14, 16  ;;  %v5427_v33 = vpack.c.bf16 %v115_v26, %v149_v29  ;;  %vm6872_vm5 = vcmp.ge.s32.totalorder %v5425_v32, 0  ;;  %vm6865_vm6 = vcmp.lt.s32.totalorder %v5432_v35, 16 }
  0x11   :  { %v278_v34 = vsel %vm6866_vm3, %v245_v31, 0.0  ;;  %v119_v42 = vsel %vm112_vm0, %v116_v37, %v118_v39  ;;  %v151_v43 = vsel %vm6872_vm5, %v117_v41, 0.0  ;;  %v247_v44 = vsel %vm6883_vm1, %v244_v24, %v246_v38 }
  0x12   :  { %v5434_v36 = vpack.c.bf16 %v278_v34, %v243_v30  ;;  %4568 = vmatmul.msk.bf16.vlgmr.msra.gmra.mxu1 %vm177_vm4, %v5427_v33  ;;  %v280_v45 = vsel %vm6865_vm6, %v252_v40, 0.0  ;;  %v5452_v46 = vpack.c.bf16 %v49_v28, %v48_v17  ;;  %v5454_v47 = vpack.c.bf16 %v119_v42, %v151_v43 }
  0x13   :  { %v5456_v48 = vpack.c.bf16 %v280_v45, %v247_v44  ;;  %v5325_v26 = vmov 32.0  }
  0x14   :  { %4578 = vmatmul.msk.bf16.vlgmr.msra.gmra.mxu2 %vm177_vm4, %v5434_v36  ;;  %5136 = vrcp.f32 %v5325_v26 }
  0x1a   :  { %v5137_v27 = vpop.eup %5136 }
  0x1b   :  { %v353_v28 = vmul.f32 32.0, %v5137_v27  ;;  %vm357_vm7 = vweird.f32 %v5137_v27 }
  0x1d   :  { %v354_v29 = vsub.f32 1.0, %v353_v28 }
  0x1e   :  { %4559 = vmatmul.msk.bf16.gmra.mxu0 %vm177_vm4, %v5452_v46 }
  0x1f   :  { %v355_v30 = vmul.f32 %v5137_v27, %v354_v29 }
  0x21   :  { %v356_v31 = vadd.f32 %v5137_v27, %v355_v30 }
  0x22   :  { %4569 = vmatmul.msk.bf16.gmra.mxu1 %vm177_vm4, %v5454_v47 }
  0x23   :  { %v5471_v34 = vsel %vm357_vm7, %v5137_v27, %v356_v31  ;;  %v5499_v27 = vld [vmem:[%s6861_s6 + $0x88] ss:$0 sm:$0xff] }
  0x24   :  { %4579 = vmatmul.msk.bf16.gmra.mxu2 %vm177_vm4, %v5456_v48 }
  0x8b   :  { %v193_v49 = vpop.f32.mrf.mxu0 }
  0x8f   :  { %v230_v50 = vpop.f32.mrf.mxu1 }
  0x90   :  { %v231_v51 = vadd.f32 %v230_v50, %v193_v49 }
  0x93   :  { %v195_v55 = vpop.f32.mrf.mxu0 }
  0x97   :  { %v314_v53 = vpop.f32.mrf.mxu2  ;;  %v232_v56 = vpop.f32.mrf.mxu1 }
  0x98   :  { %v324_v54 = vadd.f32 %v314_v53, %v231_v51  ;;  %v233_v59 = vadd.f32 %v232_v56, %v195_v55 }
  0x9a   :  { %v330_v57 = vadd.f32 %v5105_v52, %v324_v54 }
  0x9b   :  { %v198_v63 = vpop.f32.mrf.mxu0 }
  0x9c   :  { %v334_v58 = vmax.f32 %v330_v57, 0.0 }
  0x9e   :  { %v340_v60 = vsel %vm177_vm4, %v334_v58, 0.0 }
  0x9f   :  { %v316_v61 = vpop.f32.mrf.mxu2  ;;  %341 = vadd.xlane.f32.xlu0 %v340_v60  ;;  %v235_v1 = vpop.f32.mrf.mxu1  ;;  %v4987_v60 = vld [vmem:[#allocation2 + $0x1e8] sm:$0xff] }
  0xa0   :  { %v325_v62 = vadd.f32 %v316_v61, %v233_v59  ;;  %v236_v4 = vadd.f32 %v235_v1, %v198_v63  ;;  %501 = vmatpush.bf16.msra.mxu3 %v4987_v60  ;;  %v4985_v63 = vld [vmem:[#allocation2 + $0x1d8] sm:$0xff]  ;;  %v4986_v1 = vld [vmem:[#allocation2 + $0x1e0] sm:$0xff] }
  0xa1   :  { %538 = vmatpush.bf16.msrb.mxu0 %v4985_v63 }
  0xa2   :  { %v331_v3 = vadd.f32 %v5105_v52, %v325_v62 }
  0xa3   :  { %v200_v12 = vpop.f32.mrf.mxu0 }
  0xa4   :  { %v335_v5 = vmax.f32 %v331_v3, 0.0  ;;  %502 = vmatpush.bf16.msra.mxu3 %v4986_v1 }
  0xa6   :  { %v343_v8 = vsel %vm177_vm4, %v335_v5, 0.0 }
  0xa7   :  { %v319_v9 = vpop.f32.mrf.mxu2  ;;  %344 = vadd.xlane.f32.xlu0 %v343_v8  ;;  %v237_v13 = vpop.f32.mrf.mxu1 }
  0xa8   :  { %v326_v10 = vadd.f32 %v319_v9, %v236_v4  ;;  %v238_v16 = vadd.f32 %v237_v13, %v200_v12  ;;  %v4984_v4 = vld [vmem:[#allocation2 + $0x1d0] sm:$0xff]  ;;  %v4989_v9 = vld [vmem:[#allocation2 + $0x1f8] sm:$0xff] }
  0xa9   :  { %539 = vmatpush.bf16.msrb.mxu0 %v4984_v4  ;;  %597 = vmatpush.bf16.msrb.mxu1 %v4989_v9 }
  0xaa   :  { %v332_v11 = vadd.f32 %v5105_v52, %v326_v10 }
  0xac   :  { %v336_v15 = vmax.f32 %v332_v11, 0.0 }
  0xae   :  { %v346_v17 = vsel %vm177_vm4, %v336_v15, 0.0 }
  0xaf   :  { %v321_v20 = vpop.f32.mrf.mxu2  ;;  %347 = vadd.xlane.f32.xlu1 %v346_v17 }
  0xb0   :  { %v327_v21 = vadd.f32 %v321_v20, %v238_v16 }
  0xb2   :  { %v333_v22 = vadd.f32 %v5105_v52, %v327_v21 }
  0xb4   :  { %v337_v23 = vmax.f32 %v333_v22, 0.0 }
  0xb6   :  { %v349_v24 = vsel %vm177_vm4, %v337_v23, 0.0 }
  0xb7   :  { %350 = vadd.xlane.f32.xlu1 %v349_v24 }
 0x112   :  { %v342_v37 = vpop.xlane.xlu0 %341 }
 0x113   :  { %v359_v38 = vmul.f32 %v5471_v34, %v342_v37  ;;  %v5107_v37 = vld [vmem:[%s6861_s6 + $0x90] ss:$0 sm:$0xff] }
 0x115   :  { %v363_v39 = vsub.f32 %v334_v58, %v359_v38 }
 0x117   :  { %v367_v40 = vmul.f32 %v363_v39, %v363_v39 }
 0x119   :  { %v371_v41 = vsel %vm177_vm4, %v367_v40, 0.0 }
 0x11a   :  { %372 = vadd.xlane.f32.xlu2 %v371_v41  ;;  %v345_v42 = vpop.xlane.xlu0 %344 }
 0x11b   :  { %v360_v43 = vmul.f32 %v5471_v34, %v345_v42 }
 0x11d   :  { %v5476_v44 = vsub.f32 %v335_v5, %v360_v43 }
 0x11f   :  { %v368_v45 = vmul.f32 %v5476_v44, %v5476_v44 }
 0x121   :  { %v374_v49 = vsel %vm177_vm4, %v368_v45, 0.0 }
 0x122   :  { %v348_v50 = vpop.xlane.xlu1 %347  ;;  %375 = vadd.xlane.f32.xlu2 %v374_v49 }
 0x123   :  { %v361_v51 = vmul.f32 %v5471_v34, %v348_v50 }
 0x125   :  { %v5482_v52 = vsub.f32 %v336_v15, %v361_v51  ;;  %v4988_v15 = vld [vmem:[#allocation2 + $0x1f0] sm:$0xff] }
 0x126   :  { %598 = vmatpush.bf16.msrb.mxu1 %v4988_v15 }
 0x127   :  { %v369_v53 = vmul.f32 %v5482_v52, %v5482_v52 }
 0x129   :  { %v377_v54 = vsel %vm177_vm4, %v369_v53, 0.0 }
 0x12a   :  { %v351_v55 = vpop.xlane.xlu1 %350  ;;  %378 = vadd.xlane.f32.xlu0 %v377_v54 }
 0x12b   :  { %v362_v56 = vmul.f32 %v5471_v34, %v351_v55 }
 0x12d   :  { %v5488_v57 = vsub.f32 %v337_v23, %v362_v56 }
 0x12f   :  { %v370_v58 = vmul.f32 %v5488_v57, %v5488_v57 }
 0x131   :  { %v380_v59 = vsel %vm177_vm4, %v370_v58, 0.0 }
 0x132   :  { %381 = vadd.xlane.f32.xlu1 %v380_v59 }
 0x18d   :  { %v373_v61 = vpop.xlane.xlu2 %372 }
 0x18e   :  { %v383_v62 = vmul.f32 %v373_v61, %v5471_v34 }
 0x190   :  { %v387_v3 = vadd.f32 1e-05, %v383_v62 }
 0x192   :  { %5138 = vrsqrt.f32 %v387_v3  ;;  %vm397_vm9 = vweird.f32 %v387_v3 }
 0x195   :  { %v376_v5 = vpop.xlane.xlu2 %375 }
 0x196   :  { %v384_v8 = vmul.f32 %v376_v5, %v5471_v34 }
 0x198   :  { %v5139_v10 = vpop.eup %5138  ;;  %v388_v11 = vadd.f32 1e-05, %v384_v8 }
 0x199   :  { %v392_v12 = vmul.f32 %v5139_v10, %v387_v3  ;;  %vm398_vm8 = vweird.f32 %v5139_v10 }
 0x19a   :  { %5140 = vrsqrt.f32 %v388_v11  ;;  %vm399_vm10 = vmor %vm397_vm9, %vm398_vm8  ;;  %vm407_vm12 = vweird.f32 %v388_v11 }
 0x19b   :  { %v393_v13 = vmul.f32 %v5139_v10, %v392_v12 }
 0x19d   :  { %v394_v16 = vmul.f32 0.5, %v393_v13  ;;  %v379_v17 = vpop.xlane.xlu0 %378 }
 0x19e   :  { %v385_v20 = vmul.f32 %v379_v17, %v5471_v34 }
 0x19f   :  { %v395_v21 = vsub.f32 1.5, %v394_v16 }
 0x1a0   :  { %v5141_v22 = vpop.eup %5140  ;;  %v389_v23 = vadd.f32 1e-05, %v385_v20 }
 0x1a1   :  { %v396_v24 = vmul.f32 %v5139_v10, %v395_v21  ;;  %v402_v26 = vmul.f32 %v5141_v22, %v388_v11  ;;  %vm408_vm11 = vweird.f32 %v5141_v22 }
 0x1a2   :  { %5142 = vrsqrt.f32 %v389_v23  ;;  %vm409_vm13 = vmor %vm407_vm12, %vm408_vm11  ;;  %vm417_vm15 = vweird.f32 %v389_v23 }
 0x1a3   :  { %v400_v28 = vsel %vm399_vm10, %v5139_v10, %v396_v24  ;;  %v403_v29 = vmul.f32 %v5141_v22, %v402_v26 }
 0x1a4   :  { %v431_v30 = vmul.f32 %v400_v28, %v363_v39 }
 0x1a5   :  { %v404_v31 = vmul.f32 0.5, %v403_v29  ;;  %v382_v38 = vpop.xlane.xlu1 %381 }
 0x1a6   :  { %v386_v40 = vmul.f32 %v382_v38, %v5471_v34  ;;  %v436_v41 = vmul.f32 %v5499_v27, %v431_v30 }
 0x1a7   :  { %v405_v42 = vsub.f32 1.5, %v404_v31 }
 0x1a8   :  { %v5143_v43 = vpop.eup %5142  ;;  %v390_v45 = vadd.f32 1e-05, %v386_v40  ;;  %v441_v51 = vadd.f32 %v5107_v37, %v436_v41 }
 0x1a9   :  { %v406_v49 = vmul.f32 %v5141_v22, %v405_v42  ;;  %v412_v50 = vmul.f32 %v5143_v43, %v389_v23  ;;  %vm418_vm14 = vweird.f32 %v5143_v43 }
 0x1aa   :  { %5144 = vrsqrt.f32 %v390_v45  ;;  %v449_v56 = vrot.slane %v441_v51, 7  ;;  %vm419_vm7 = vmor %vm417_vm15, %vm418_vm14  ;;  %vm427_vm9 = vweird.f32 %v390_v45 }
 0x1ab   :  { %v410_v39 = vsel %vm409_vm13, %v5141_v22, %v406_v49  ;;  %v413_v53 = vmul.f32 %v5143_v43, %v412_v50  ;;  %v551_v22 = vrot.slane %v441_v51, 1 }
 0x1ac   :  { %v432_v54 = vmul.f32 %v410_v39, %v5476_v44  ;;  %v460_v1 = vsel %vm112_vm0, 0.0, %v449_v56 }
 0x1ad   :  { %v414_v55 = vmul.f32 0.5, %v413_v53  ;;  %v461_v10 = vsel %vm6867_vm2, %v460_v1, 0.0 }
 0x1ae   :  { %v437_v58 = vmul.f32 %v5499_v27, %v432_v54 }
 0x1af   :  { %v415_v59 = vsub.f32 1.5, %v414_v55  ;;  %v5108_v55 = vld [vmem:[%s6861_s6 + $0x98] ss:$0 sm:$0xff] }
 0x1b0   :  { %v5145_v60 = vpop.eup %5144  ;;  %v442_v61 = vadd.f32 %v5107_v37, %v437_v58 }
 0x1b1   :  { %v416_v62 = vmul.f32 %v5143_v43, %v415_v59  ;;  %v422_v63 = vmul.f32 %v5145_v60, %v390_v45  ;;  %vm428_vm8 = vweird.f32 %v5145_v60 }
 0x1b2   :  { %v475_v3 = vpack.c.bf16 %v442_v61, %v441_v51  ;;  %v450_v4 = vrot.slane %v442_v61, 7  ;;  %v552_v20 = vrot.slane %v442_v61, 1  ;;  %vm429_vm10 = vmor %vm427_vm9, %vm428_vm8 }
 0x1b3   :  { %v420_v5 = vsel %vm419_vm7, %v5143_v43, %v416_v62  ;;  %v423_v8 = vmul.f32 %v5145_v60, %v422_v63 }
 0x1b4   :  { %v433_v44 = vmul.f32 %v420_v5, %v5482_v52  ;;  %4588 = vmatmul.msk.bf16.vlgmr.msra.gmra.mxu3 %vm177_vm4, %v475_v3  ;;  %v451_v9 = vsel %vm112_vm0, %v449_v56, %v450_v4  ;;  %v553_v26 = vsel %vm6883_vm1, %v551_v22, %v552_v20 }
 0x1b5   :  { %v424_v11 = vmul.f32 0.5, %v423_v8  ;;  %v469_v12 = vpack.c.bf16 %v451_v9, %v461_v10 }
 0x1b6   :  { %v438_v13 = vmul.f32 %v5499_v27, %v433_v44 }
 0x1b7   :  { %v425_v15 = vsub.f32 1.5, %v424_v11  ;;  %4598 = vmatmul.msk.bf16.vlgmr.msrb.gmra.mxu0 %vm177_vm4, %v469_v12 }
 0x1b8   :  { %v443_v16 = vadd.f32 %v5107_v37, %v438_v13 }
 0x1b9   :  { %v426_v17 = vmul.f32 %v5145_v60, %v425_v15 }
 0x1ba   :  { %v554_v52 = vrot.slane %v443_v16, 1  ;;  %v452_v29 = vrot.slane %v443_v16, 7 }
 0x1bb   :  { %v430_v21 = vsel %vm429_vm10, %v5145_v60, %v426_v17 }
 0x1bc   :  { %v434_v23 = vmul.f32 %v430_v21, %v5488_v57  ;;  %v555_v24 = vsel %vm6883_vm1, %v552_v20, %v554_v52  ;;  %v453_v40 = vsel %vm112_vm0, %v450_v4, %v452_v29 }
 0x1bd   :  { %v564_v28 = vsel %vm6866_vm3, %v555_v24, 0.0  ;;  %v463_v43 = vsel %vm6872_vm5, %v453_v40, 0.0 }
 0x1be   :  { %v571_v30 = vpack.c.bf16 %v564_v28, %v553_v26  ;;  %v439_v31 = vmul.f32 %v5499_v27, %v434_v23 }
 0x1c0   :  { %4608 = vmatmul.msk.bf16.vlgmr.msrb.gmra.mxu1 %vm177_vm4, %v571_v30  ;;  %v444_v38 = vadd.f32 %v5107_v37, %v439_v31 }
 0x1c2   :  { %v476_v41 = vpack.c.bf16 %v444_v38, %v443_v16  ;;  %v454_v42 = vrot.slane %v444_v38, 7  ;;  %v556_v45 = vrot.slane %v444_v38, 1 }
 0x1c4   :  { %4589 = vmatmul.msk.bf16.gmra.mxu3 %vm177_vm4, %v476_v41  ;;  %v455_v57 = vsel %vm112_vm0, %v452_v29, %v454_v42  ;;  %v562_v27 = vsel %vm6883_vm1, %v556_v45, 0.0  ;;  %v557_v50 = vsel %vm6883_vm1, %v554_v52, %v556_v45 }
 0x1c5   :  { %v470_v49 = vpack.c.bf16 %v455_v57, %v463_v43  ;;  %v566_v37 = vsel %vm6865_vm6, %v562_v27, 0.0 }
 0x1c6   :  { %v572_v51 = vpack.c.bf16 %v566_v37, %v557_v50 }
 0x1c7   :  { %4599 = vmatmul.msk.bf16.gmra.mxu0 %vm177_vm4, %v470_v49 }
 0x1d0   :  { %4609 = vmatmul.msk.bf16.gmra.mxu1 %vm177_vm4, %v572_v51 }
 0x234   :  { %v541_v39 = vpop.f32.mrf.mxu0 }
 0x237   :  { %v504_v53 = vpop.f32.mrf.mxu3 }
 0x238   :  { %v542_v54 = vadd.f32 %v541_v39, %v504_v53 }
 0x23c   :  { %v543_v59 = vpop.f32.mrf.mxu0 }
 0x23d   :  { %v600_v56 = vpop.f32.mrf.mxu1 }
 0x23e   :  { %v610_v58 = vadd.f32 %v600_v56, %v542_v54 }
 0x23f   :  { %v506_v60 = vpop.f32.mrf.mxu3 }
 0x240   :  { %v616_v61 = vadd.f32 %v5108_v55, %v610_v58  ;;  %v544_v44 = vadd.f32 %v543_v59, %v506_v60 }
 0x242   :  { %v620_v62 = vmax.f32 %v616_v61, 0.0 }
 0x244   :  { %v626_v63 = vsel %vm177_vm4, %v620_v62, 0.0  ;;  %v546_v4 = vpop.f32.mrf.mxu0 }
 0x245   :  { %627 = vadd.xlane.f32.xlu1 %v626_v63  ;;  %v602_v1 = vpop.f32.mrf.mxu1 }
 0x246   :  { %v611_v10 = vadd.f32 %v602_v1, %v544_v44 }
 0x247   :  { %v509_v3 = vpop.f32.mrf.mxu3 }
 0x248   :  { %v547_v5 = vadd.f32 %v546_v4, %v509_v3  ;;  %v617_v16 = vadd.f32 %v5108_v55, %v611_v10 }
 0x24a   :  { %v621_v23 = vmax.f32 %v617_v16, 0.0 }
 0x24c   :  { %v548_v15 = vpop.f32.mrf.mxu0  ;;  %v629_v28 = vsel %vm177_vm4, %v621_v23, 0.0 }
 0x24d   :  { %v605_v8 = vpop.f32.mrf.mxu1 }
 0x24e   :  { %v612_v9 = vadd.f32 %v605_v8, %v547_v5 }
 0x24f   :  { %v511_v12 = vpop.f32.mrf.mxu3 }
 0x250   :  { %v618_v11 = vadd.f32 %v5108_v55, %v612_v9  ;;  %v549_v17 = vadd.f32 %v548_v15, %v511_v12 }
 0x252   :  { %v622_v13 = vmax.f32 %v618_v11, 0.0 }
 0x254   :  { %v632_v20 = vsel %vm177_vm4, %v622_v13, 0.0 }
 0x255   :  { %v607_v52 = vpop.f32.mrf.mxu1  ;;  %633 = vadd.xlane.f32.xlu2 %v632_v20 }
 0x256   :  { %v613_v21 = vadd.f32 %v607_v52, %v549_v17 }
 0x258   :  { %v619_v22 = vadd.f32 %v5108_v55, %v613_v21 }
 0x25a   :  { %v623_v24 = vmax.f32 %v619_v22, 0.0 }
 0x25c   :  { %v635_v26 = vsel %vm177_vm4, %v623_v24, 0.0 }
 0x25d   :  { %636 = vadd.xlane.f32.xlu0 %v635_v26  ;;  %630 = vadd.xlane.f32.xlu2 %v629_v28 }
 0x2b8   :  { %v628_v29 = vpop.xlane.xlu1 %627 }
 0x2b9   :  { %v638_v30 = vmul.f32 %v628_v29, %v5471_v34 }
 0x2bb   :  { %v5542_v31 = vsub.f32 %v620_v62, %v638_v30 }
 0x2bd   :  { %v646_v38 = vmul.f32 %v5542_v31, %v5542_v31 }
 0x2bf   :  { %v650_v40 = vsel %vm177_vm4, %v646_v38, 0.0  ;;  %v4993_v38 = vld [vmem:[#allocation2 + $0x218] sm:$0xff] }
 0x2c0   :  { %651 = vadd.xlane.f32.xlu2 %v650_v40  ;;  %782 = vmatpush.bf16.msrb.mxu3 %v4993_v38 }
 0x2c8   :  { %v634_v41 = vpop.xlane.xlu2 %633 }
 0x2c9   :  { %v640_v42 = vmul.f32 %v634_v41, %v5471_v34 }
 0x2cb   :  { %v5548_v57 = vsub.f32 %v622_v13, %v640_v42  ;;  %v4995_v42 = vld [vmem:[#allocation2 + $0x228] sm:$0xff] }
 0x2cc   :  { %848 = vmatpush.bf16.msra.mxu0 %v4995_v42 }
 0x2cd   :  { %v648_v43 = vmul.f32 %v5548_v57, %v5548_v57 }
 0x2cf   :  { %v656_v45 = vsel %vm177_vm4, %v648_v43, 0.0 }
 0x2d0   :  { %v637_v49 = vpop.xlane.xlu0 %636  ;;  %657 = vadd.xlane.f32.xlu0 %v656_v45  ;;  %v631_v27 = vpop.xlane.xlu2 %630  ;;  %v4992_v45 = vld [vmem:[#allocation2 + $0x210] sm:$0xff] }
 0x2d1   :  { %v641_v50 = vmul.f32 %v637_v49, %v5471_v34  ;;  %v639_v37 = vmul.f32 %v631_v27, %v5471_v34  ;;  %783 = vmatpush.bf16.msrb.mxu3 %v4992_v45 }
 0x2d3   :  { %v5555_v51 = vsub.f32 %v623_v24, %v641_v50  ;;  %v5557_v39 = vsub.f32 %v621_v23, %v639_v37  ;;  %v4994_v50 = vld [vmem:[#allocation2 + $0x220] sm:$0xff] }
 0x2d4   :  { %849 = vmatpush.bf16.msra.mxu0 %v4994_v50  ;;  %4619 = vmatmul.msk.bf16.vlgmr.msrb.gmra.mxu3 %vm177_vm4, %v5413_v25 }
 0x2d5   :  { %v649_v53 = vmul.f32 %v5555_v51, %v5555_v51  ;;  %v647_v54 = vmul.f32 %v5557_v39, %v5557_v39 }
 0x2d7   :  { %v659_v55 = vsel %vm177_vm4, %v649_v53, 0.0  ;;  %v653_v56 = vsel %vm177_vm4, %v647_v54, 0.0  ;;  %4639 = vmatmul.msk.bf16.vlgmr.msra.gmra.mxu0 %vm177_vm4, %v5434_v36  ;;  %v4990_v36 = vld [vmem:[#allocation2 + $0x200] sm:$0xff] }
 0x2d8   :  { %660 = vadd.xlane.f32.xlu1 %v659_v55  ;;  %654 = vadd.xlane.f32.xlu0 %v653_v56 }
 0x2e4   :  { %4620 = vmatmul.msk.bf16.gmra.mxu3 %vm177_vm4, %v5452_v46 }
 0x2e7   :  { %4640 = vmatmul.msk.bf16.gmra.mxu0 %vm177_vm4, %v5456_v48  ;;  %v5111_v48 = vld [vmem:[%s6861_s6 + $0xc0] ss:$0 sm:$0xff] }
 0x333   :  { %v652_v58 = vpop.xlane.xlu2 %651 }
 0x334   :  { %v662_v59 = vmul.f32 %v652_v58, %v5471_v34  ;;  %v5109_v58 = vld [vmem:[%s6861_s6 + $0xa0] ss:$0 sm:$0xff] }
 0x336   :  { %v666_v60 = vadd.f32 1e-05, %v662_v59 }
 0x338   :  { %5146 = vrsqrt.f32 %v666_v60  ;;  %vm676_vm7 = vweird.f32 %v666_v60 }
 0x33e   :  { %v5567_v1 = vpop.eup %5146 }
 0x33f   :  { %v671_v44 = vmul.f32 %v5567_v1, %v666_v60  ;;  %vm677_vm14 = vweird.f32 %v5567_v1 }
 0x340   :  { %vm5582_vm9 = vmor %vm676_vm7, %vm677_vm14 }
 0x341   :  { %v672_v13 = vmul.f32 %v5567_v1, %v671_v44 }
 0x343   :  { %v658_v61 = vpop.xlane.xlu0 %657  ;;  %v673_v17 = vmul.f32 0.5, %v672_v13 }
 0x344   :  { %v664_v62 = vmul.f32 %v658_v61, %v5471_v34 }
 0x345   :  { %v674_v26 = vsub.f32 1.5, %v673_v17 }
 0x346   :  { %v668_v63 = vadd.f32 1e-05, %v664_v62 }
 0x347   :  { %v675_v49 = vmul.f32 %v5567_v1, %v674_v26 }
 0x348   :  { %5148 = vrsqrt.f32 %v668_v63  ;;  %vm696_vm12 = vweird.f32 %v668_v63 }
 0x349   :  { %v679_v59 = vsel %vm5582_vm9, %v5567_v1, %v675_v49 }
 0x34b   :  { %v661_v3 = vpop.xlane.xlu1 %660  ;;  %v655_v4 = vpop.xlane.xlu0 %654 }
 0x34c   :  { %v665_v5 = vmul.f32 %v661_v3, %v5471_v34  ;;  %v663_v8 = vmul.f32 %v655_v4, %v5471_v34  ;;  %v5110_v4 = vld [vmem:[%s6861_s6 + $0xa8] ss:$0 sm:$0xff] }
 0x34e   :  { %v5149_v9 = vpop.eup %5148  ;;  %v669_v10 = vadd.f32 1e-05, %v665_v5  ;;  %v667_v11 = vadd.f32 1e-05, %v663_v8  ;;  %v710_v5 = vmul.f32 %v679_v59, %v5542_v31  ;;  %v724_v31 = vld [vmem:[%s6861_s6 + $0xb0] sm:$0x1] }
 0x34f   :  { %v691_v12 = vmul.f32 %v5149_v9, %v668_v63  ;;  %vm697_vm11 = vweird.f32 %v5149_v9 }
 0x350   :  { %5150 = vrsqrt.f32 %v669_v10  ;;  %vm5573_vm13 = vmor %vm696_vm12, %vm697_vm11  ;;  %vm706_vm10 = vweird.f32 %v669_v10  ;;  %vm686_vm12 = vweird.f32 %v667_v11 }
 0x351   :  { %v692_v15 = vmul.f32 %v5149_v9, %v691_v12  ;;  %5152 = vrsqrt.f32 %v667_v11  ;;  %v4991_v12 = vld [vmem:[#allocation2 + $0x208] sm:$0xff] }
 0x353   :  { %v693_v16 = vmul.f32 0.5, %v692_v15  ;;  %v726_v15 = vpack.c.bf16 %v724_v31, %v724_v31 }
 0x354   :  { %v851_v46 = vpop.f32.mrf.mxu0 }
 0x355   :  { %v694_v20 = vsub.f32 1.5, %v693_v16 }
 0x356   :  { %v5151_v52 = vpop.eup %5150 }
 0x357   :  { %v5153_v21 = vpop.eup %5152  ;;  %v695_v22 = vmul.f32 %v5149_v9, %v694_v20  ;;  %v701_v23 = vmul.f32 %v5151_v52, %v669_v10  ;;  %vm707_vm15 = vweird.f32 %v5151_v52  ;;  %v785_v20 = vpop.f32.mrf.mxu3 }
 0x358   :  { %v681_v24 = vmul.f32 %v5153_v21, %v667_v11  ;;  %vm687_vm8 = vweird.f32 %v5153_v21  ;;  %vm708_vm11 = vmor %vm706_vm10, %vm707_vm15 }
 0x359   :  { %v702_v28 = vmul.f32 %v5151_v52, %v701_v23  ;;  %v699_v40 = vsel %vm5573_vm13, %v5149_v9, %v695_v22  ;;  %vm688_vm13 = vmor %vm686_vm12, %vm687_vm8  ;;  %v715_v9 = vmul.f32 %v5109_v58, %v710_v5 }
 0x35a   :  { %v682_v30 = vmul.f32 %v5153_v21, %v681_v24  ;;  %v712_v53 = vmul.f32 %v699_v40, %v5548_v57 }
 0x35b   :  { %v703_v41 = vmul.f32 0.5, %v702_v28  ;;  %v720_v25 = vadd.f32 %v5110_v4, %v715_v9 }
 0x35c   :  { %v683_v43 = vmul.f32 0.5, %v682_v30  ;;  %v717_v62 = vmul.f32 %v5109_v58, %v712_v53  ;;  %v853_v26 = vpop.f32.mrf.mxu0 }
 0x35d   :  { %v704_v27 = vsub.f32 1.5, %v703_v41 }
 0x35e   :  { %v684_v37 = vsub.f32 1.5, %v683_v43  ;;  %v722_v1 = vadd.f32 %v5110_v4, %v717_v62 }
 0x35f   :  { %v705_v55 = vmul.f32 %v5151_v52, %v704_v27  ;;  %v787_v23 = vpop.f32.mrf.mxu3 }
 0x360   :  { %v685_v56 = vmul.f32 %v5153_v21, %v684_v37 }
 0x361   :  { %v709_v60 = vsel %vm708_vm11, %v5151_v52, %v705_v55 }
 0x362   :  { %v689_v57 = vsel %vm688_vm13, %v5153_v21, %v685_v56  ;;  %v713_v61 = vmul.f32 %v709_v60, %v5555_v51 }
 0x363   :  { %v711_v63 = vmul.f32 %v689_v57, %v5557_v39 }
 0x364   :  { %v718_v3 = vmul.f32 %v5109_v58, %v713_v61  ;;  %v856_v42 = vpop.f32.mrf.mxu0 }
 0x365   :  { %v716_v44 = vmul.f32 %v5109_v58, %v711_v63 }
 0x366   :  { %v723_v8 = vadd.f32 %v5110_v4, %v718_v3 }
 0x367   :  { %v721_v10 = vadd.f32 %v5110_v4, %v716_v44  ;;  %v790_v40 = vpop.f32.mrf.mxu3 }
 0x368   :  { %v728_v51 = vpack.c.bf16 %v723_v8, %v722_v1 }
 0x369   :  { %v727_v11 = vpack.c.bf16 %v721_v10, %v720_v25 }
 0x36a   :  { %v741_v39 = vsel %vm177_vm4, %v728_v51, 0 }
 0x36b   :  { %749 = vmatpush.bf16.xpose.msrb.mxu2 %v741_v39  ;;  %v738_v13 = vsel %vm177_vm4, %v727_v11, 0 }
 0x36c   :  { %v858_v58 = vpop.f32.mrf.mxu0 }
 0x36f   :  { %v792_v53 = vpop.f32.mrf.mxu3 }
 0x373   :  { %750 = vmatpush.bf16.xpose.msrb.mxu2 %v738_v13 }
 0x37a   :  { %4610 = vmatmul.msk.bf16.vlgmr.msrb.gmra.mxu2 %vm177_vm4, %v726_v15 }
 0x37b   :  { %813 = vmatpush.bf16.msra.mxu2 %v4991_v12 }
 0x37f   :  { %814 = vmatpush.bf16.msra.mxu2 %v4990_v36 }
 0x38a   :  { %4629 = vmatmul.msk.bf16.vlgmr.msra.gmra.mxu2 %vm177_vm4, %v5427_v33 }
 0x39a   :  { %4630 = vmatmul.msk.bf16.gmra.mxu2 %vm177_vm4, %v5454_v47 }
 0x3fd   :  { %v5616_v16 = vpop.f32.mrf.mxu2 }
 0x3fe   :  { %6888 = vst [vmem:[#allocation8_spill] sm:$0xff] %v5616_v16 }
 0x405   :  { %v754_v17 = vpop.f32.mrf.mxu2 }
 0x40d   :  { %v816_v52 = vpop.f32.mrf.mxu2 }
 0x40e   :  { %v817_v21 = vadd.f32 %v816_v52, %v785_v20  ;;  %v4999_v20 = vld [vmem:[#allocation2 + $0x248] sm:$0xff] }
 0x40f   :  { %1031 = vmatpush.bf16.msra.mxu1 %v4999_v20 }
 0x410   :  { %v861_v22 = vadd.f32 %v851_v46, %v817_v21  ;;  %v4997_v21 = vld [vmem:[#allocation2 + $0x238] sm:$0xff] }
 0x411   :  { %1068 = vmatpush.bf16.msra.mxu3 %v4997_v21 }
 0x412   :  { %v867_v24 = vadd.f32 %v5111_v48, %v861_v22  ;;  %v4998_v22 = vld [vmem:[#allocation2 + $0x240] sm:$0xff] }
 0x413   :  { %1032 = vmatpush.bf16.msra.mxu1 %v4998_v22 }
 0x414   :  { %v871_v28 = vmax.f32 %v867_v24, 0.0 }
 0x415   :  { %v818_v33 = vpop.f32.mrf.mxu2 }
 0x416   :  { %v819_v29 = vadd.f32 %v818_v33, %v787_v23  ;;  %v877_v47 = vsel %vm177_vm4, %v871_v28, 0.0  ;;  %v4996_v23 = vld [vmem:[#allocation2 + $0x230] sm:$0xff] }
 0x417   :  { %878 = vadd.xlane.f32.xlu1 %v877_v47  ;;  %1069 = vmatpush.bf16.msra.mxu3 %v4996_v23 }
 0x418   :  { %v862_v30 = vadd.f32 %v853_v26, %v819_v29  ;;  %v5001_v29 = vld [vmem:[#allocation2 + $0x258] sm:$0xff] }
 0x419   :  { %1127 = vmatpush.bf16.msrb.mxu2 %v5001_v29 }
 0x41a   :  { %v868_v38 = vadd.f32 %v5111_v48, %v862_v30 }
 0x41c   :  { %v872_v41 = vmax.f32 %v868_v38, 0.0  ;;  %v5000_v38 = vld [vmem:[#allocation2 + $0x250] sm:$0xff] }
 0x41d   :  { %v821_v43 = vpop.f32.mrf.mxu2  ;;  %1128 = vmatpush.bf16.msrb.mxu2 %v5000_v38 }
 0x41e   :  { %v822_v45 = vadd.f32 %v821_v43, %v790_v40  ;;  %v880_v49 = vsel %vm177_vm4, %v872_v41, 0.0 }
 0x41f   :  { %881 = vadd.xlane.f32.xlu2 %v880_v49 }
 0x420   :  { %v863_v27 = vadd.f32 %v856_v42, %v822_v45 }
 0x422   :  { %v869_v50 = vadd.f32 %v5111_v48, %v863_v27 }
 0x424   :  { %v873_v37 = vmax.f32 %v869_v50, 0.0 }
 0x425   :  { %v823_v54 = vpop.f32.mrf.mxu2 }
 0x426   :  { %v824_v55 = vadd.f32 %v823_v54, %v792_v53  ;;  %v883_v56 = vsel %vm177_vm4, %v873_v37, 0.0 }
 0x427   :  { %884 = vadd.xlane.f32.xlu0 %v883_v56  ;;  %v5656_v56 = vld [vmem:[%s6861_s6 + $0xd0] ss:$0 sm:$0xff] }
 0x428   :  { %v864_v59 = vadd.f32 %v858_v58, %v824_v55 }
 0x42a   :  { %v870_v60 = vadd.f32 %v5111_v48, %v864_v59 }
 0x42c   :  { %v874_v57 = vmax.f32 %v870_v60, 0.0 }
 0x42e   :  { %v886_v61 = vsel %vm177_vm4, %v874_v57, 0.0 }
 0x42f   :  { %887 = vadd.xlane.f32.xlu1 %v886_v61 }
 0x48a   :  { %v879_v62 = vpop.xlane.xlu1 %878 }
 0x48b   :  { %v889_v63 = vmul.f32 %v879_v62, %v5471_v34 }
 0x48d   :  { %v893_v3 = vsub.f32 %v871_v28, %v889_v63 }
 0x48f   :  { %v897_v4 = vmul.f32 %v893_v3, %v893_v3 }
 0x491   :  { %v901_v5 = vsel %vm177_vm4, %v897_v4, 0.0 }
 0x492   :  { %v882_v1 = vpop.xlane.xlu2 %881  ;;  %902 = vadd.xlane.f32.xlu2 %v901_v5 }
 0x493   :  { %v890_v8 = vmul.f32 %v882_v1, %v5471_v34 }
 0x495   :  { %v5628_v44 = vsub.f32 %v872_v41, %v890_v8 }
 0x497   :  { %v898_v51 = vmul.f32 %v5628_v44, %v5628_v44 }
 0x499   :  { %v904_v9 = vsel %vm177_vm4, %v898_v51, 0.0 }
 0x49a   :  { %v885_v39 = vpop.xlane.xlu0 %884  ;;  %905 = vadd.xlane.f32.xlu0 %v904_v9 }
 0x49b   :  { %v891_v10 = vmul.f32 %v885_v39, %v5471_v34 }
 0x49d   :  { %v5634_v25 = vsub.f32 %v873_v37, %v891_v10  ;;  %v5651_v37 = vld [vmem:[%s6861_s6 + $0xc8] ss:$0 sm:$0xff] }
 0x49f   :  { %v899_v11 = vmul.f32 %v5634_v25, %v5634_v25 }
 0x4a1   :  { %v907_v12 = vsel %vm177_vm4, %v899_v11, 0.0 }
 0x4a2   :  { %908 = vadd.xlane.f32.xlu1 %v907_v12  ;;  %v888_v13 = vpop.xlane.xlu1 %887 }
 0x4a3   :  { %v892_v31 = vmul.f32 %v888_v13, %v5471_v34 }
 0x4a5   :  { %v5640_v36 = vsub.f32 %v874_v57, %v892_v31  ;;  %v5667_v31 = vld [vmem:[%s6859_s4] sm:$0xff] }
 0x4a7   :  { %v900_v15 = vmul.f32 %v5640_v36, %v5640_v36 }
 0x4a9   :  { %v910_v17 = vsel %vm177_vm4, %v900_v15, 0.0  ;;  %v5672_v15 = vld [vmem:[%s6859_s4 + $0x8] sm:$0xff] }
 0x4aa   :  { %911 = vadd.xlane.f32.xlu2 %v910_v17 }
 0x505   :  { %v903_v46 = vpop.xlane.xlu2 %902 }
 0x506   :  { %v913_v52 = vmul.f32 %v903_v46, %v5471_v34  ;;  %v5326_v46 = vmov 1  }
 0x507   :  { %5081 = vset.pattern.permute.xlu2 %v5326_v46  ;;  %5082 = vset.pattern.permute.xlu0 %v5326_v46 }
 0x508   :  { %v917_v48 = vadd.f32 1e-05, %v913_v52  ;;  %1442 = vperm.xlu2 %5081, %v5667_v31   ;;  %1446 = vperm.xlu0 %5082, %v5672_v15  }
 0x50a   :  { %5154 = vrsqrt.f32 %v917_v48  ;;  %vm927_vm15 = vweird.f32 %v917_v48 }
 0x50d   :  { %v906_v24 = vpop.xlane.xlu0 %905 }
 0x50e   :  { %v914_v26 = vmul.f32 %v906_v24, %v5471_v34 }
 0x510   :  { %v5155_v28 = vpop.eup %5154  ;;  %v918_v33 = vadd.f32 1e-05, %v914_v26 }
 0x511   :  { %v922_v47 = vmul.f32 %v5155_v28, %v917_v48  ;;  %vm928_vm14 = vweird.f32 %v5155_v28 }
 0x512   :  { %5156 = vrsqrt.f32 %v918_v33  ;;  %vm929_vm7 = vmor %vm927_vm15, %vm928_vm14  ;;  %vm937_vm9 = vweird.f32 %v918_v33 }
 0x513   :  { %v923_v30 = vmul.f32 %v5155_v28, %v922_v47 }
 0x515   :  { %v924_v40 = vmul.f32 0.5, %v923_v30  ;;  %v909_v41 = vpop.xlane.xlu1 %908 }
 0x516   :  { %v915_v42 = vmul.f32 %v909_v41, %v5471_v34 }
 0x517   :  { %v925_v43 = vsub.f32 1.5, %v924_v40 }
 0x518   :  { %v5157_v45 = vpop.eup %5156  ;;  %v919_v49 = vadd.f32 1e-05, %v915_v42 }
 0x519   :  { %v926_v27 = vmul.f32 %v5155_v28, %v925_v43  ;;  %v932_v50 = vmul.f32 %v5157_v45, %v918_v33  ;;  %vm938_vm8 = vweird.f32 %v5157_v45 }
 0x51a   :  { %5158 = vrsqrt.f32 %v919_v49  ;;  %vm939_vm10 = vmor %vm937_vm9, %vm938_vm8  ;;  %vm947_vm12 = vweird.f32 %v919_v49  ;;  %vm1328_vm9 = vcmask 56320  }
 0x51b   :  { %v930_v53 = vsel %vm929_vm7, %v5155_v28, %v926_v27  ;;  %v933_v54 = vmul.f32 %v5157_v45, %v932_v50 }
 0x51c   :  { %v961_v55 = vmul.f32 %v930_v53, %v893_v3 }
 0x51d   :  { %v934_v58 = vmul.f32 0.5, %v933_v54  ;;  %v912_v59 = vpop.xlane.xlu2 %911 }
 0x51e   :  { %v966_v60 = vmul.f32 %v5651_v37, %v961_v55  ;;  %v916_v57 = vmul.f32 %v912_v59, %v5471_v34 }
 0x51f   :  { %v935_v61 = vsub.f32 1.5, %v934_v58 }
 0x520   :  { %v5159_v62 = vpop.eup %5158  ;;  %v920_v63 = vadd.f32 1e-05, %v916_v57  ;;  %v971_v4 = vadd.f32 %v5656_v56, %v966_v60 }
 0x521   :  { %v936_v5 = vmul.f32 %v5157_v45, %v935_v61  ;;  %v942_v3 = vmul.f32 %v5159_v62, %v919_v49  ;;  %vm948_vm11 = vweird.f32 %v5159_v62 }
 0x522   :  { %5160 = vrsqrt.f32 %v920_v63  ;;  %v979_v39 = vrot.slane %v971_v4, 7  ;;  %vm949_vm13 = vmor %vm947_vm12, %vm948_vm11  ;;  %vm957_vm15 = vweird.f32 %v920_v63  ;;  %v1081_v42 = vrot.slane %v971_v4, 1 }
 0x523   :  { %v940_v1 = vsel %vm939_vm10, %v5157_v45, %v936_v5  ;;  %v943_v8 = vmul.f32 %v5159_v62, %v942_v3  ;;  %v1295_v5 = vld [vmem:[%s6859_s4 + $0x18] sm:$0xff]  ;;  %v5327_v3 = vmov 0  }
 0x524   :  { %v962_v51 = vmul.f32 %v940_v1, %v5628_v44  ;;  %v990_v20 = vsel %vm112_vm0, 0.0, %v979_v39  ;;  %5080 = vset.pattern.permute.xlu1 %v5327_v3 }
 0x525   :  { %v944_v9 = vmul.f32 0.5, %v943_v8  ;;  %v991_v26 = vsel %vm6867_vm2, %v990_v20, 0.0  ;;  %1316 = vperm.xlu1 %5080, %v1295_v5  }
 0x526   :  { %v967_v10 = vmul.f32 %v5651_v37, %v962_v51 }
 0x527   :  { %v945_v11 = vsub.f32 1.5, %v944_v9  ;;  %v5114_v9 = vld [vmem:[%s6861_s6 + $0xd8] ss:$0 sm:$0xff] }
 0x528   :  { %v5161_v12 = vpop.eup %5160  ;;  %v972_v13 = vadd.f32 %v5656_v56, %v967_v10 }
 0x529   :  { %v946_v44 = vmul.f32 %v5159_v62, %v945_v11  ;;  %v952_v17 = vmul.f32 %v5161_v12, %v920_v63  ;;  %vm958_vm14 = vweird.f32 %v5161_v12 }
 0x52a   :  { %v1005_v52 = vpack.c.bf16 %v972_v13, %v971_v4  ;;  %v980_v21 = vrot.slane %v972_v13, 7  ;;  %vm959_vm7 = vmor %vm957_vm15, %vm958_vm14 }
 0x52b   :  { %v950_v48 = vsel %vm949_vm13, %v5159_v62, %v946_v44  ;;  %v953_v22 = vmul.f32 %v5161_v12, %v952_v17 }
 0x52c   :  { %v963_v23 = vmul.f32 %v950_v48, %v5634_v25  ;;  %4649 = vmatmul.msk.bf16.vlgmr.msra.gmra.mxu1 %vm177_vm4, %v1005_v52  ;;  %v981_v24 = vsel %vm112_vm0, %v979_v39, %v980_v21  ;;  %v1082_v25 = vrot.slane %v972_v13, 1 }
 0x52d   :  { %v954_v28 = vmul.f32 0.5, %v953_v22  ;;  %v999_v33 = vpack.c.bf16 %v981_v24, %v991_v26 }
 0x52e   :  { %v968_v29 = vmul.f32 %v5651_v37, %v963_v23  ;;  %v1083_v49 = vsel %vm6883_vm1, %v1081_v42, %v1082_v25 }
 0x52f   :  { %v955_v47 = vsub.f32 1.5, %v954_v28  ;;  %4659 = vmatmul.msk.bf16.vlgmr.msra.gmra.mxu3 %vm177_vm4, %v999_v33 }
 0x530   :  { %v973_v30 = vadd.f32 %v5656_v56, %v968_v29 }
 0x531   :  { %v956_v38 = vmul.f32 %v5161_v12, %v955_v47 }
 0x532   :  { %v1084_v40 = vrot.slane %v973_v30, 1  ;;  %v982_v50 = vrot.slane %v973_v30, 7 }
 0x533   :  { %v960_v41 = vsel %vm959_vm7, %v5161_v12, %v956_v38 }
 0x534   :  { %v964_v43 = vmul.f32 %v960_v41, %v5640_v36  ;;  %v1085_v45 = vsel %vm6883_vm1, %v1082_v25, %v1084_v40  ;;  %v983_v58 = vsel %vm112_vm0, %v980_v21, %v982_v50 }
 0x535   :  { %v1094_v27 = vsel %vm6866_vm3, %v1085_v45, 0.0  ;;  %v993_v57 = vsel %vm6872_vm5, %v983_v58, 0.0 }
 0x536   :  { %v1101_v53 = vpack.c.bf16 %v1094_v27, %v1083_v49  ;;  %v969_v54 = vmul.f32 %v5651_v37, %v964_v43  ;;  %v1294_v27 = vld [vmem:[%s6859_s4 + $0x10] sm:$0xff] }
 0x538   :  { %4669 = vmatmul.msk.bf16.vlgmr.msrb.gmra.mxu2 %vm177_vm4, %v1101_v53  ;;  %v974_v55 = vadd.f32 %v5656_v56, %v969_v54 }
 0x53a   :  { %v1006_v59 = vpack.c.bf16 %v974_v55, %v973_v30  ;;  %v984_v60 = vrot.slane %v974_v55, 7  ;;  %v1086_v61 = vrot.slane %v974_v55, 1 }
 0x53c   :  { %4650 = vmatmul.msk.bf16.gmra.mxu1 %vm177_vm4, %v1006_v59  ;;  %v985_v36 = vsel %vm112_vm0, %v982_v50, %v984_v60  ;;  %v1092_v37 = vsel %vm6883_vm1, %v1086_v61, 0.0  ;;  %v1087_v63 = vsel %vm6883_vm1, %v1084_v40, %v1086_v61  ;;  %v5725_v50 = vld [vmem:[%s6861_s6 + $0x158] ss:$0 sm:$0xff] }
 0x53d   :  { %v1000_v62 = vpack.c.bf16 %v985_v36, %v993_v57  ;;  %v1096_v56 = vsel %vm6865_vm6, %v1092_v37, 0.0  ;;  %v5733_v36 = vld [vmem:[%s6861_s6 + $0x160] ss:$0 sm:$0xff] }
 0x53e   :  { %v1102_v4 = vpack.c.bf16 %v1096_v56, %v1087_v63 }
 0x53f   :  { %4660 = vmatmul.msk.bf16.gmra.mxu3 %vm177_vm4, %v1000_v62 }
 0x548   :  { %4670 = vmatmul.msk.bf16.gmra.mxu2 %vm177_vm4, %v1102_v4 }
 0x57a   :  { %v1447_v57 = vpop.permute.xlu0 %1446 }
 0x57b   :  { %vm1459_vm11 = vcmp.gt.f32.partialorder %v1447_v57, %v5733_v36 }
 0x597   :  { %v1317_v53 = vpop.permute.xlu1 %1316 }
 0x598   :  { %vm1323_vm8 = vcmp.gt.f32.partialorder %v1317_v53, %v5725_v50 }
 0x599   :  { %v1327_v54 = vsel %vm1323_vm8, 1, %v5327_v3  ;;  %vm1394_vm8 = vcmask 64512  }
 0x59a   :  { %v1368_v55 = vsel %vm1328_vm9, %v1327_v54, 0 }
 0x59b   :  { %v1370_v58 = vshrl.u32 %v1368_v55, 16  ;;  %v1369_v60 = vand.u32 65535, %v1368_v55 }
 0x59d   :  { %v1372_v59 = vcvt.s32.f32 %v1370_v58 }
 0x5a9   :  { %v1034_v8 = vpop.f32.mrf.mxu1 }
 0x5b1   :  { %v1036_v12 = vpop.f32.mrf.mxu1 }
 0x5b2   :  { %v1071_v1 = vpop.f32.mrf.mxu3 }
 0x5b3   :  { %v1072_v51 = vadd.f32 %v1071_v1, %v1034_v8 }
 0x5b9   :  { %v1039_v22 = vpop.f32.mrf.mxu1 }
 0x5ba   :  { %v1073_v39 = vpop.f32.mrf.mxu3 }
 0x5bb   :  { %v1130_v10 = vpop.f32.mrf.mxu2  ;;  %v1074_v17 = vadd.f32 %v1073_v39, %v1036_v12  ;;  %v1463_v39 = vsel %vm1459_vm11, 1, %v5327_v3 }
 0x5bc   :  { %v1140_v11 = vadd.f32 %v1130_v10, %v1072_v51  ;;  %v1479_v12 = vsel %vm1328_vm9, %v1463_v39, 0 }
 0x5be   :  { %v1146_v13 = vadd.f32 %v5114_v9, %v1140_v11 }
 0x5c0   :  { %v1150_v44 = vmax.f32 %v1146_v13, 0.0 }
 0x5c1   :  { %v1041_v38 = vpop.f32.mrf.mxu1 }
 0x5c2   :  { %v1156_v20 = vsel %vm177_vm4, %v1150_v44, 0.0  ;;  %v1076_v21 = vpop.f32.mrf.mxu3 }
 0x5c3   :  { %1157 = vadd.xlane.f32.xlu2 %v1156_v20  ;;  %v1132_v46 = vpop.f32.mrf.mxu2  ;;  %v1077_v24 = vadd.f32 %v1076_v21, %v1039_v22  ;;  %v1481_v20 = vshrl.u32 %v1479_v12, 16 }
 0x5c4   :  { %v1141_v52 = vadd.f32 %v1132_v46, %v1074_v17 }
 0x5c5   :  { %v1483_v21 = vcvt.s32.f32 %v1481_v20 }
 0x5c6   :  { %v1147_v48 = vadd.f32 %v5114_v9, %v1141_v52 }
 0x5c8   :  { %v1151_v23 = vmax.f32 %v1147_v48, 0.0 }
 0x5ca   :  { %v1159_v26 = vsel %vm177_vm4, %v1151_v23, 0.0  ;;  %v1078_v47 = vpop.f32.mrf.mxu3 }
 0x5cb   :  { %1160 = vadd.xlane.f32.xlu0 %v1159_v26  ;;  %v1135_v28 = vpop.f32.mrf.mxu2  ;;  %v1079_v25 = vadd.f32 %v1078_v47, %v1041_v38 }
 0x5cc   :  { %v1142_v33 = vadd.f32 %v1135_v28, %v1077_v24 }
 0x5ce   :  { %v1148_v29 = vadd.f32 %v5114_v9, %v1142_v33 }
 0x5d0   :  { %v1152_v30 = vmax.f32 %v1148_v29, 0.0 }
 0x5d2   :  { %v1162_v40 = vsel %vm177_vm4, %v1152_v30, 0.0 }
 0x5d3   :  { %v1137_v41 = vpop.f32.mrf.mxu2  ;;  %1163 = vadd.xlane.f32.xlu0 %v1162_v40 }
 0x5d4   :  { %v1143_v42 = vadd.f32 %v1137_v41, %v1079_v25 }
 0x5d6   :  { %v1149_v43 = vadd.f32 %v5114_v9, %v1143_v42 }
 0x5d8   :  { %v1153_v45 = vmax.f32 %v1149_v43, 0.0 }
 0x5da   :  { %v1165_v49 = vsel %vm177_vm4, %v1153_v45, 0.0 }
 0x5db   :  { %1454 = vperm.xlu2 %5081, %v1295_v5   ;;  %1166 = vadd.xlane.f32.xlu1 %v1165_v49 }
 0x5e3   :  { %5084 = vset.pattern.permute.xlu2 %v5327_v3 }
 0x5e7   :  { %1450 = vperm.xlu0 %5082, %v1294_v27  }
 0x5ef   :  { %5083 = vset.pattern.permute.xlu0 %v5327_v3 }
 0x5f0   :  { %1301 = vperm.xlu0 %5083, %v5667_v31   ;;  %v1371_v31 = vcvt.s32.f32 %v1369_v60 }
 0x5f4   :  { %1306 = vperm.xlu1 %5080, %v5672_v15   ;;  %v1443_v15 = vpop.permute.xlu2 %1442 }
 0x5f5   :  { %vm1458_vm10 = vcmp.gt.f32.partialorder %v1443_v15, %v5733_v36 }
 0x5f6   :  { %v1462_v63 = vsel %vm1458_vm10, 1, %v5327_v3 }
 0x5f7   :  { %v1466_v4 = vsel %vm1328_vm9, %v1462_v63, 0 }
 0x5f8   :  { %1311 = vperm.xlu0 %5083, %v1294_v27   ;;  %v1467_v51 = vand.u32 65535, %v1466_v4  ;;  %v1468_v24 = vshrl.u32 %v1466_v4, 16 }
 0x5fa   :  { %v1469_v11 = vcvt.s32.f32 %v1467_v51  ;;  %v1470_v33 = vcvt.s32.f32 %v1468_v24 }
 0x61e   :  { %1375 = vadd.xlane.f32.xlu1 %v1372_v59  ;;  %v1480_v59 = vand.u32 65535, %v1479_v12 }
 0x620   :  { %v1482_v15 = vcvt.s32.f32 %v1480_v59 }
 0x622   :  { %1373 = vadd.xlane.f32.xlu0 %v1371_v31 }
 0x636   :  { %v1158_v61 = vpop.xlane.xlu2 %1157 }
 0x637   :  { %v1168_v62 = vmul.f32 %v1158_v61, %v5471_v34 }
 0x639   :  { %v5737_v37 = vsub.f32 %v1150_v44, %v1168_v62 }
 0x63b   :  { %v1176_v56 = vmul.f32 %v5737_v37, %v5737_v37 }
 0x63d   :  { %v1180_v5 = vsel %vm177_vm4, %v1176_v56, 0.0 }
 0x63e   :  { %v1161_v1 = vpop.xlane.xlu0 %1160  ;;  %1181 = vadd.xlane.f32.xlu1 %v1180_v5  ;;  %v1455_v55 = vpop.permute.xlu2 %1454 }
 0x63f   :  { %v1169_v8 = vmul.f32 %v1161_v1, %v5471_v34  ;;  %vm1461_vm15 = vcmp.gt.f32.partialorder %v1455_v55, %v5733_v36 }
 0x640   :  { %v1465_v62 = vsel %vm1461_vm15, 1, %v5327_v3 }
 0x641   :  { %v5746_v9 = vsub.f32 %v1151_v23, %v1169_v8  ;;  %v1505_v5 = vsel %vm1328_vm9, %v1465_v62, 0 }
 0x642   :  { %v1507_v8 = vshrl.u32 %v1505_v5, 16 }
 0x643   :  { %v1177_v10 = vmul.f32 %v5746_v9, %v5746_v9 }
 0x645   :  { %v1183_v13 = vsel %vm177_vm4, %v1177_v10, 0.0 }
 0x646   :  { %1184 = vadd.xlane.f32.xlu2 %v1183_v13  ;;  %v1164_v44 = vpop.xlane.xlu0 %1163  ;;  %1471 = vadd.xlane.f32.xlu1 %v1469_v11  ;;  %v1576_v11 = vld [vmem:[%s6856_s1] sm:$0xff] }
 0x647   :  { %v1170_v17 = vmul.f32 %v1164_v44, %v5471_v34 }
 0x649   :  { %v5754_v46 = vsub.f32 %v1152_v30, %v1170_v17 }
 0x64b   :  { %v1178_v52 = vmul.f32 %v5754_v46, %v5754_v46 }
 0x64d   :  { %v1186_v48 = vsel %vm177_vm4, %v1178_v52, 0.0  ;;  %v1577_v52 = vld [vmem:[%s6856_s1 + $0x8] sm:$0xff] }
 0x64e   :  { %1187 = vadd.xlane.f32.xlu2 %v1186_v48  ;;  %1486 = vadd.xlane.f32.xlu1 %v1483_v21  ;;  %v1167_v22 = vpop.xlane.xlu1 %1166 }
 0x64f   :  { %v1171_v23 = vmul.f32 %v1167_v22, %v5471_v34  ;;  %v5790_v22 = vand.u32 127, %v55_v0  ;;  %v1506_v0 = vand.u32 65535, %v1505_v5 }
 0x651   :  { %v5760_v26 = vsub.f32 %v1153_v45, %v1171_v23 }
 0x653   :  { %v1179_v28 = vmul.f32 %v5760_v26, %v5760_v26 }
 0x655   :  { %v1189_v29 = vsel %vm177_vm4, %v1179_v28, 0.0  ;;  %v5328_v28 = vmov 0.0  }
 0x656   :  { %1473 = vadd.xlane.f32.xlu2 %v1470_v33  ;;  %1190 = vadd.xlane.f32.xlu0 %v1189_v29  ;;  %v1578_v29 = vld [vmem:[%s6856_s1 + $0x10] sm:$0xff] }
 0x659   :  { %v1451_v47 = vpop.permute.xlu0 %1450 }
 0x65a   :  { %vm1460_vm13 = vcmp.gt.f32.partialorder %v1451_v47, %v5733_v36  ;;  %v1509_v36 = vcvt.s32.f32 %v1507_v8  ;;  %v1579_v47 = vld [vmem:[%s6856_s1 + $0x18] sm:$0xff] }
 0x65b   :  { %v1464_v53 = vsel %vm1460_vm13, 1, %v5327_v3 }
 0x65c   :  { %v1492_v31 = vsel %vm1328_vm9, %v1464_v53, 0 }
 0x65d   :  { %v1493_v61 = vand.u32 65535, %v1492_v31  ;;  %v1494_v4 = vshrl.u32 %v1492_v31, 16 }
 0x65f   :  { %v1495_v56 = vcvt.s32.f32 %v1493_v61  ;;  %v1496_v1 = vcvt.s32.f32 %v1494_v4 }
 0x662   :  { %v1302_v30 = vpop.permute.xlu0 %1301 }
 0x663   :  { %vm1320_vm12 = vcmp.gt.f32.partialorder %v1302_v30, %v5725_v50  ;;  %v1508_v30 = vcvt.s32.f32 %v1506_v0 }
 0x664   :  { %v1324_v38 = vsel %vm1320_vm12, 1, %v5327_v3 }
 0x665   :  { %v1329_v25 = vsel %vm1328_vm9, %v1324_v38, 0  ;;  %v1530_v38 = vld [vmem:[%s6861_s6 + $0x150] sm:$0xff] }
 0x666   :  { %v1307_v40 = vpop.permute.xlu1 %1306  ;;  %v1330_v41 = vand.u32 65535, %v1329_v25  ;;  %v1331_v42 = vshrl.u32 %v1329_v25, 16 }
 0x667   :  { %vm1321_vm14 = vcmp.gt.f32.partialorder %v1307_v40, %v5725_v50 }
 0x668   :  { %v1325_v43 = vsel %vm1321_vm14, 1, %v5327_v3  ;;  %v1332_v45 = vcvt.s32.f32 %v1330_v41  ;;  %v1333_v49 = vcvt.s32.f32 %v1331_v42 }
 0x669   :  { %v1342_v27 = vsel %vm1328_vm9, %v1325_v43, 0 }
 0x66a   :  { %1334 = vadd.xlane.f32.xlu2 %v1332_v45  ;;  %1336 = vadd.xlane.f32.xlu0 %v1333_v49  ;;  %v1343_v54 = vand.u32 65535, %v1342_v27  ;;  %v1344_v60 = vshrl.u32 %v1342_v27, 16  ;;  %v1312_v63 = vpop.permute.xlu0 %1311 }
 0x66b   :  { %vm1322_vm7 = vcmp.gt.f32.partialorder %v1312_v63, %v5725_v50  ;;  %v1393_v50 = vld [vmem:[%s6861_s6 + $0x148] sm:$0xff] }
 0x66c   :  { %v1345_v58 = vcvt.s32.f32 %v1343_v54  ;;  %v1346_v57 = vcvt.s32.f32 %v1344_v60  ;;  %v1326_v51 = vsel %vm1322_vm7, 1, %v5327_v3  ;;  %5056 = vmatpush.msrb.mxu3 %v1393_v50  ;;  %1422 = vmatpush.msrb.mxu1 %v1393_v50 }
 0x66d   :  { %v1355_v39 = vsel %vm1328_vm9, %v1326_v51, 0 }
 0x66e   :  { %1347 = vadd.xlane.f32.xlu1 %v1345_v58  ;;  %v1357_v10 = vshrl.u32 %v1355_v39, 16  ;;  %v1356_v13 = vand.u32 65535, %v1355_v39  ;;  %1558 = vmatpush.msra.mxu3 %v1530_v38  ;;  %v5836_v38 = vld [vmem:[%s6861_s6 + $0x138] sm:$0xff] }
 0x670   :  { %v1359_v12 = vcvt.s32.f32 %v1357_v10  ;;  %v1358_v44 = vcvt.s32.f32 %v1356_v13 }
 0x672   :  { %1484 = vadd.xlane.f32.xlu0 %v1482_v15  ;;  %1349 = vadd.xlane.f32.xlu2 %v1346_v57 }
 0x676   :  { %1497 = vadd.xlane.f32.xlu1 %v1495_v56 }
 0x67a   :  { %1499 = vadd.xlane.f32.xlu2 %v1496_v1 }
 0x67e   :  { %1512 = vadd.xlane.f32.xlu1 %v1509_v36 }
 0x686   :  { %1581 = vperm.xlu0 %5083, %v1576_v11   ;;  %1362 = vadd.xlane.f32.xlu1 %v1359_v12 }
 0x68e   :  { %1360 = vadd.xlane.f32.xlu1 %v1358_v44 }
 0x691   :  { %v1376_v17 = vpop.xlane.xlu1 %1375 }
 0x692   :  { %v1378_v20 = vcvt.f32.s32 %v1376_v17  ;;  %1584 = vperm.xlu2 %5084, %v1577_v52  }
 0x694   :  { %v1379_v21 = vshll.u32 %v1378_v20, 16 }
 0x695   :  { %v1374_v48 = vpop.xlane.xlu0 %1373 }
 0x696   :  { %v1377_v23 = vcvt.f32.s32 %v1374_v48 }
 0x698   :  { %v1380_v24 = vadd.s32 %v1379_v21, %v1377_v23 }
 0x69a   :  { %vm1384_vm9 = vcmp.eq.s32.totalorder %v5790_v22, %v1380_v24  ;;  %1590 = vperm.xlu2 %5084, %v1579_v47  }
 0x69b   :  { %v4675_v33 = vsel %vm1384_vm9, 1.0, %v5328_v28 }
 0x69c   :  { %4679 = vmatmul.msk.f32.vlgmr.msrb.gmra.mxu3 %vm1394_vm8, %v4675_v33 }
 0x6a7   :  { %1587 = vperm.xlu1 %5080, %v1578_v29   ;;  %v5824_v29 = vld [vmem:[%s6861_s6 + $0x140] sm:$0xff] }
 0x6a8   :  { %5057 = vmatpush.msra.mxu2 %v5824_v29 }
 0x6aa   :  { %5058 = vmatpush.msra.mxu2 %v5836_v38 }
 0x6b0   :  { %1510 = vadd.xlane.f32.xlu0 %v1508_v30 }
 0x6b1   :  { %v1182_v25 = vpop.xlane.xlu1 %1181 }
 0x6b2   :  { %v1192_v41 = vmul.f32 %v1182_v25, %v5471_v34 }
 0x6b4   :  { %v1196_v45 = vadd.f32 1e-05, %v1192_v41 }
 0x6b9   :  { %v1185_v40 = vpop.xlane.xlu2 %1184  ;;  %v1472_v59 = vpop.xlane.xlu1 %1471 }
 0x6ba   :  { %v1193_v42 = vmul.f32 %v1185_v40, %v5471_v34  ;;  %v1475_v56 = vcvt.f32.s32 %v1472_v59  ;;  %v5863_v59 = vld [vmem:[%s6861_s6 + $0x128] sm:$0xff] }
 0x6bc   :  { %v1197_v43 = vadd.f32 1e-05, %v1193_v42 }
 0x6be   :  { %5162 = vrsqrt.f32 %v1197_v43  ;;  %vm1216_vm7 = vweird.f32 %v1197_v43 }
 0x6bf   :  { %5164 = vrsqrt.f32 %v1196_v45 }
 0x6c1   :  { %v1188_v49 = vpop.xlane.xlu2 %1187  ;;  %v1487_v24 = vpop.xlane.xlu1 %1486 }
 0x6c2   :  { %v1194_v27 = vmul.f32 %v1188_v49, %v5471_v34 }
 0x6c4   :  { %v1198_v53 = vadd.f32 1e-05, %v1194_v27  ;;  %v5807_v54 = vpop.eup %5162 }
 0x6c5   :  { %v5809_v55 = vpop.eup %5164  ;;  %v1211_v58 = vmul.f32 %v5807_v54, %v1197_v43  ;;  %vm1217_vm13 = vweird.f32 %v5807_v54 }
 0x6c6   :  { %5166 = vrsqrt.f32 %v1198_v53  ;;  %v1201_v61 = vmul.f32 %v5809_v55, %v1196_v45  ;;  %vm1226_vm12 = vweird.f32 %v1198_v53  ;;  %vm1207_vm15 = vweird.f32 %v5809_v55  ;;  %vm5829_vm9 = vmor %vm1216_vm7, %vm1217_vm13 }
 0x6c7   :  { %v1212_v63 = vmul.f32 %v5807_v54, %v1211_v58 }
 0x6c8   :  { %v1202_v51 = vmul.f32 %v5809_v55, %v1201_v61  ;;  %v1489_v61 = vcvt.f32.s32 %v1487_v24 }
 0x6c9   :  { %v1474_v60 = vpop.xlane.xlu2 %1473  ;;  %v1191_v31 = vpop.xlane.xlu0 %1190  ;;  %v1213_v39 = vmul.f32 0.5, %v1212_v63 }
 0x6ca   :  { %v1476_v15 = vcvt.f32.s32 %v1474_v60  ;;  %v1195_v57 = vmul.f32 %v1191_v31, %v5471_v34  ;;  %v1203_v12 = vmul.f32 0.5, %v1202_v51  ;;  %v1490_v51 = vshll.u32 %v1489_v61, 16 }
 0x6cb   :  { %v1214_v44 = vsub.f32 1.5, %v1213_v39 }
 0x6cc   :  { %v5167_v62 = vpop.eup %5166  ;;  %v1477_v4 = vshll.u32 %v1476_v15, 16  ;;  %v1199_v5 = vadd.f32 1e-05, %v1195_v57  ;;  %v1204_v52 = vsub.f32 1.5, %v1203_v12 }
 0x6cd   :  { %v1221_v1 = vmul.f32 %v5167_v62, %v1198_v53  ;;  %vm1227_vm11 = vweird.f32 %v5167_v62  ;;  %v1215_v48 = vmul.f32 %v5807_v54, %v1214_v44 }
 0x6ce   :  { %v1478_v8 = vadd.s32 %v1477_v4, %v1475_v56  ;;  %5168 = vrsqrt.f32 %v1199_v5  ;;  %vm1228_vm14 = vmor %vm1226_vm12, %vm1227_vm11  ;;  %v1205_v47 = vmul.f32 %v5809_v55, %v1204_v52  ;;  %vm1206_vm11 = vweird.f32 %v1196_v45  ;;  %v5850_v45 = vld [vmem:[%s6861_s6 + $0x130] sm:$0xff]  ;;  %v5118_v56 = vld [vmem:[%s6861_s6 + $0xe8] ss:$0 sm:$0xff] }
 0x6cf   :  { %v1222_v36 = vmul.f32 %v5167_v62, %v1221_v1  ;;  %v1219_v25 = vsel %vm5829_vm9, %v5807_v54, %v1215_v48  ;;  %vm5843_vm12 = vmor %vm1206_vm11, %vm1207_vm15  ;;  %vm1236_vm13 = vweird.f32 %v1199_v5  ;;  %5059 = vmatpush.msra.mxu2 %v5850_v45 }
 0x6d0   :  { %vm1518_vm10 = vcmp.eq.s32.totalorder %v5790_v22, %v1478_v8  ;;  %v1209_v53 = vsel %vm5843_vm12, %v5809_v55, %v1205_v47  ;;  %v1241_v58 = vmul.f32 %v1219_v25, %v5746_v9  ;;  %v1607_v55 = vld [vmem:[%s6861_s6 + $0x120] sm:$0xff]  ;;  %vm6864_vm12 = vcmask 523264  }
 0x6d1   :  { %v1223_v10 = vmul.f32 0.5, %v1222_v36  ;;  %v4680_v11 = vsel %vm1518_vm10, 1.0, %v5328_v28  ;;  %5060 = vmatpush.msra.mxu2 %v5863_v59  ;;  %v1240_v4 = vmul.f32 %v1209_v53, %v5737_v37  ;;  %v1605_v37 = vld [vmem:[%s6861_s6 + $0x110] sm:$0xff] }
 0x6d2   :  { %4684 = vmatmul.msk.f32.vlgmr.msra.gmra.mxu3 %vm1394_vm8, %v4680_v11 }
 0x6d3   :  { %v1224_v50 = vsub.f32 1.5, %v1223_v10  ;;  %5061 = vmatpush.msra.mxu2 %v1607_v55 }
 0x6d4   :  { %v5169_v13 = vpop.eup %5168 }
 0x6d5   :  { %v1225_v17 = vmul.f32 %v5167_v62, %v1224_v50  ;;  %v1231_v20 = vmul.f32 %v5169_v13, %v1199_v5  ;;  %vm1237_vm10 = vweird.f32 %v5169_v13  ;;  %v1606_v5 = vld [vmem:[%s6861_s6 + $0x118] sm:$0xff] }
 0x6d6   :  { %5062 = vmatpush.msra.mxu2 %v1606_v5 }
 0x6d7   :  { %v1232_v21 = vmul.f32 %v5169_v13, %v1231_v20  ;;  %v1229_v23 = vsel %vm1228_vm14, %v5167_v62, %v1225_v17  ;;  %vm1238_vm14 = vmor %vm1236_vm13, %vm1237_vm10  ;;  %v1604_v17 = vld [vmem:[%s6861_s6 + $0x108] sm:$0xff] }
 0x6d8   :  { %v1242_v40 = vmul.f32 %v1229_v23, %v5754_v46  ;;  %v5117_v46 = vld [vmem:[%s6861_s6 + $0xe0] ss:$0 sm:$0xff]  ;;  %5063 = vmatpush.msra.mxu2 %v1605_v37 }
 0x6d9   :  { %v1233_v33 = vmul.f32 0.5, %v1232_v21 }
 0x6da   :  { %v1247_v57 = vmul.f32 %v5117_v46, %v1242_v40  ;;  %5064 = vmatpush.msra.mxu2 %v1604_v17 }
 0x6db   :  { %v1234_v30 = vsub.f32 1.5, %v1233_v33 }
 0x6dc   :  { %v1252_v1 = vadd.f32 %v5118_v56, %v1247_v57 }
 0x6dd   :  { %v1235_v42 = vmul.f32 %v5169_v13, %v1234_v30  ;;  %v1335_v43 = vpop.xlane.xlu2 %1334  ;;  %v1337_v49 = vpop.xlane.xlu0 %1336 }
 0x6de   :  { %v1339_v27 = vcvt.f32.s32 %v1337_v49  ;;  %v1338_v31 = vcvt.f32.s32 %v1335_v43 }
 0x6df   :  { %v1239_v54 = vsel %vm1238_vm14, %v5169_v13, %v1235_v42  ;;  %v1245_v13 = vmul.f32 %v5117_v46, %v1240_v4 }
 0x6e0   :  { %v1243_v60 = vmul.f32 %v1239_v54, %v5760_v26  ;;  %v1340_v15 = vshll.u32 %v1339_v27, 16  ;;  %v1246_v26 = vmul.f32 %v5117_v46, %v1241_v58  ;;  %v1254_v27 = vld [vmem:[%s6861_s6 + $0xf0] sm:$0x1] }
 0x6e1   :  { %v1348_v62 = vpop.xlane.xlu1 %1347  ;;  %v1250_v33 = vadd.f32 %v5118_v56, %v1245_v13  ;;  %v1256_v53 = vpack.c.bf16 %v1254_v27, %v1254_v27 }
 0x6e2   :  { %v1341_v63 = vadd.s32 %v1340_v15, %v1338_v31  ;;  %v1248_v9 = vmul.f32 %v5117_v46, %v1243_v60  ;;  %v1251_v44 = vadd.f32 %v5118_v56, %v1246_v26  ;;  %v1351_v20 = vcvt.f32.s32 %v1348_v62 }
 0x6e4   :  { %vm1381_vm15 = vcmp.eq.s32.totalorder %v5790_v22, %v1341_v63  ;;  %v1253_v8 = vadd.f32 %v5118_v56, %v1248_v9  ;;  %v1257_v0 = vpack.c.bf16 %v1251_v44, %v1250_v33 }
 0x6e5   :  { %v1485_v36 = vpop.xlane.xlu0 %1484  ;;  %v1350_v39 = vpop.xlane.xlu2 %1349  ;;  %v4672_v10 = vsel %vm1381_vm15, 1.0, %v5328_v28 }
 0x6e6   :  { %v1488_v11 = vcvt.f32.s32 %v1485_v36  ;;  %v1352_v12 = vcvt.f32.s32 %v1350_v39  ;;  %4676 = vmatmul.msk.f32.vlgmr.msrb.gmra.mxu1 %vm1394_vm8, %v4672_v10  ;;  %v1258_v50 = vpack.c.bf16 %v1253_v8, %v1252_v1  ;;  %v1268_v43 = vsel %vm177_vm4, %v1257_v0, 0  ;;  %v5003_v36 = vld [vmem:[#allocation2 + $0x8] sm:$0xff]  ;;  %v5002_v39 = vld [vmem:[#allocation2] sm:$0xff] }
 0x6e7   :  { %1690 = vmatpush.bf16.msrb.mxu2 %v5003_v36 }
 0x6e8   :  { %v1491_v52 = vadd.s32 %v1490_v51, %v1488_v11  ;;  %v1353_v21 = vshll.u32 %v1352_v12, 16  ;;  %v1271_v48 = vsel %vm177_vm4, %v1258_v50, 0 }
 0x6e9   :  { %1279 = vmatpush.bf16.xpose.msrb.mxu0 %v1271_v48  ;;  %v1498_v23 = vpop.xlane.xlu1 %1497 }
 0x6ea   :  { %v1354_v24 = vadd.s32 %v1353_v21, %v1351_v20  ;;  %vm1519_vm7 = vcmp.eq.s32.totalorder %v5790_v22, %v1491_v52  ;;  %v1501_v41 = vcvt.f32.s32 %v1498_v23  ;;  %v5267_v20 = vld [vmem:[%s6855_s0 + $0x8] sm:$0xff] }
 0x6eb   :  { %v4681_v47 = vsel %vm1519_vm7, 1.0, %v5328_v28  ;;  %1691 = vmatpush.bf16.msrb.mxu2 %v5002_v39 }
 0x6ec   :  { %4685 = vmatmul.msk.f32.gmra.mxu3 %vm1394_vm8, %v4681_v47  ;;  %vm1382_vm9 = vcmp.eq.s32.totalorder %v5790_v22, %v1354_v24 }
 0x6ed   :  { %v1500_v30 = vpop.xlane.xlu2 %1499  ;;  %v4673_v25 = vsel %vm1382_vm9, 1.0, %v5328_v28 }
 0x6ee   :  { %v1502_v40 = vcvt.f32.s32 %v1500_v30  ;;  %4677 = vmatmul.msk.f32.gmra.mxu1 %vm1394_vm8, %v4673_v25  ;;  %v5268_v25 = vld [vmem:[%s6855_s0 + $0x10] sm:$0xff] }
 0x6f0   :  { %v1503_v42 = vshll.u32 %v1502_v40, 16 }
 0x6f1   :  { %1280 = vmatpush.bf16.xpose.msrb.mxu0 %v1268_v43  ;;  %v1513_v49 = vpop.xlane.xlu1 %1512 }
 0x6f2   :  { %v1504_v46 = vadd.s32 %v1503_v42, %v1501_v41  ;;  %v1515_v4 = vcvt.f32.s32 %v1513_v49  ;;  %v5269_v41 = vld [vmem:[%s6855_s0 + $0x18] sm:$0xff] }
 0x6f4   :  { %vm1520_vm10 = vcmp.eq.s32.totalorder %v5790_v22, %v1504_v46 }
 0x6f5   :  { %v4682_v54 = vsel %vm1520_vm10, 1.0, %v5328_v28  ;;  %v1585_v58 = vpop.permute.xlu2 %1584 }
 0x6f6   :  { %4686 = vmatmul.msk.f32.gmra.mxu3 %vm1394_vm8, %v4682_v54  ;;  %vm1593_vm15 = vcmp.eq.s32.totalorder %v5790_v22, %v1585_v58 }
 0x6f7   :  { %v4689_v63 = vsel %vm1593_vm15, 1.0, %v5328_v28 }
 0x6f8   :  { %4671 = vmatmul.msk.bf16.vlgmr.msrb.gmra.mxu0 %vm177_vm4, %v1256_v53  ;;  %v1582_v15 = vpop.permute.xlu0 %1581 }
 0x6f9   :  { %1633 = vmatpush.msra.mxu0 %v5824_v29  ;;  %v1363_v60 = vpop.xlane.xlu1 %1362  ;;  %vm1592_vm13 = vcmp.eq.s32.totalorder %v5790_v22, %v1582_v15 }
 0x6fa   :  { %v1365_v29 = vcvt.f32.s32 %v1363_v60  ;;  %v4688_v62 = vsel %vm1592_vm13, 1.0, %v5328_v28 }
 0x6fb   :  { %1634 = vmatpush.msra.mxu0 %v5836_v38 }
 0x6fc   :  { %v1366_v38 = vshll.u32 %v1365_v29, 16 }
 0x6fd   :  { %1635 = vmatpush.msra.mxu0 %v5850_v45  ;;  %v1591_v31 = vpop.permute.xlu2 %1590 }
 0x6fe   :  { %vm1595_vm11 = vcmp.eq.s32.totalorder %v5790_v22, %v1591_v31  ;;  %v5119_v31 = vld [vmem:[%s6861_s6] ss:$0 sm:$0xff] }
 0x6ff   :  { %1636 = vmatpush.msra.mxu0 %v5863_v59  ;;  %v4691_v45 = vsel %vm1595_vm11, 1.0, %v5328_v28 }
 0x700   :  { %4695 = vmatmul.msk.f32.vlgmr.msra.gmra.mxu2 %vm6864_vm12, %v4691_v45 }
 0x701   :  { %1637 = vmatpush.msra.mxu0 %v1607_v55  ;;  %v1361_v57 = vpop.xlane.xlu1 %1360 }
 0x702   :  { %v1364_v61 = vcvt.f32.s32 %v1361_v57 }
 0x703   :  { %1638 = vmatpush.msra.mxu0 %v1606_v5  ;;  %v1516_v5 = vshll.u32 %v1515_v4, 16 }
 0x704   :  { %v1367_v59 = vadd.s32 %v1366_v38, %v1364_v61 }
 0x705   :  { %1639 = vmatpush.msra.mxu0 %v1605_v37 }
 0x706   :  { %vm1383_vm14 = vcmp.eq.s32.totalorder %v5790_v22, %v1367_v59 }
 0x707   :  { %1640 = vmatpush.msra.mxu0 %v1604_v17  ;;  %v4674_v55 = vsel %vm1383_vm14, 1.0, %v5328_v28 }
 0x708   :  { %4678 = vmatmul.msk.f32.gmra.mxu1 %vm1394_vm8, %v4674_v55  ;;  %4692 = vmatmul.msk.f32.vlgmr.msra.gmra.mxu0 %vm6864_vm12, %v4688_v62 }
 0x710   :  { %4693 = vmatmul.msk.f32.gmra.mxu0 %vm6864_vm12, %v4689_v63 }
 0x719   :  { %v1588_v9 = vpop.permute.xlu1 %1587 }
 0x71a   :  { %vm1594_vm7 = vcmp.eq.s32.totalorder %v5790_v22, %v1588_v9 }
 0x71b   :  { %v4690_v56 = vsel %vm1594_vm7, 1.0, %v5328_v28 }
 0x71c   :  { %4694 = vmatmul.msk.f32.gmra.mxu0 %vm6864_vm12, %v4690_v56 }
 0x71f   :  { %v1433_v37 = vpop.f32.mrf.mxu3 }
 0x720   :  { %v1439_v42 = vadd.f32 %v5269_v41, %v1433_v37  ;;  %v50_v37 = vld [vmem:[%s6857_s2] sm:$0x3]  ;;  %s5332_s2 = smov 48  }
 0x721   :  { %vm1730_vm10 = vcmp.gt.f32.partialorder %v50_v37, 0.5 }
 0x723   :  { %v1511_v26 = vpop.xlane.xlu0 %1510 }
 0x724   :  { %v1514_v1 = vcvt.f32.s32 %v1511_v26 }
 0x726   :  { %v1517_v8 = vadd.s32 %v1516_v5, %v1514_v1 }
 0x728   :  { %vm1521_vm9 = vcmp.eq.s32.totalorder %v5790_v22, %v1517_v8  ;;  %v5266_v22 = vld [vmem:[%s6855_s0] sm:$0xff]  ;;  %s5329_s0 = smov 96  }
 0x729   :  { %v4683_v51 = vsel %vm1521_vm9, 1.0, %v5328_v28 }
 0x72a   :  { %4687 = vmatmul.msk.f32.gmra.mxu3 %vm1394_vm8, %v4683_v51  ;;  %vm1707_vm8 = vcmask 130048  }
 0x755   :  { %v1560_v50 = vpop.f32.mrf.mxu3 }
 0x763   :  { %v1424_v11 = vpop.f32.mrf.mxu1 }
 0x764   :  { %v1436_v17 = vadd.f32 %v5266_v22, %v1424_v11  ;;  %v1731_v11 = vsel %vm1730_vm10, 1, %v5327_v3 }
 0x766   :  { %v1572_v48 = vadd.f32 %v1560_v50, %v1436_v17 }
 0x76b   :  { %v1427_v44 = vpop.f32.mrf.mxu1 }
 0x76c   :  { %v1437_v52 = vadd.f32 %v5267_v20, %v1427_v44 }
 0x76f   :  { %v1563_v28 = vpop.f32.mrf.mxu3 }
 0x770   :  { %v1573_v21 = vadd.f32 %v1563_v28, %v1437_v52 }
 0x775   :  { %v5923_v10 = vpop.f32.mrf.mxu0 }
 0x776   :  { %6893 = vst [vmem:[#allocation9_spill] sm:$0xff] %v5923_v10 }
 0x779   :  { %v1566_v0 = vpop.f32.mrf.mxu3 }
 0x77d   :  { %v1284_v12 = vpop.f32.mrf.mxu0 }
 0x77e   :  { %v1732_v12 = vperm.slane %v1731_v11, 0 }
 0x780   :  { %vm5984_vm11 = vcmp.eq.s32.totalorder %v1732_v12, 1 }
 0x783   :  { %v1651_v53 = vpop.f32.mrf.mxu2 }
 0x785   :  { %v1642_v13 = vpop.f32.mrf.mxu0  ;;  %v1430_v30 = vpop.f32.mrf.mxu1 }
 0x786   :  { %v5931_v24 = vadd.f32 %v1642_v13, %v1572_v48  ;;  %v1438_v40 = vadd.f32 %v5268_v25, %v1430_v30 }
 0x788   :  { %v1574_v27 = vadd.f32 %v1566_v0, %v1438_v40  ;;  %v1938_v0 = vperm.slane %v1731_v11, 1 }
 0x78a   :  { %vm5997_vm13 = vcmp.eq.s32.totalorder %v1938_v0, 1 }
 0x78d   :  { %v1645_v23 = vpop.f32.mrf.mxu0 }
 0x78e   :  { %v5933_v33 = vadd.f32 %v1645_v23, %v1573_v21 }
 0x790   :  { %v1662_v47 = vpack.c.bf16 %v5933_v33, %v5931_v24 }
 0x792   :  { %4704 = vmatmul.msk.bf16.vlgmr.msrb.gmra.mxu2 %vm177_vm4, %v1662_v47 }
 0x799   :  { %v1648_v43 = vpop.f32.mrf.mxu0 }
 0x79a   :  { %v5944_v54 = vadd.f32 %v1648_v43, %v1574_v27 }
 0x7ad   :  { %v1569_v49 = vpop.f32.mrf.mxu3 }
 0x7ae   :  { %v1575_v46 = vadd.f32 %v1569_v49, %v1439_v42 }
 0x7b0   :  { %v5946_v58 = vadd.f32 %v1651_v53, %v1575_v46 }
 0x7b2   :  { %v1663_v60 = vpack.c.bf16 %v5946_v58, %v5944_v54 }
 0x7b4   :  { %4705 = vmatmul.msk.bf16.gmra.mxu2 %vm177_vm4, %v1663_v60 }
 0x815   :  { %v1693_v29 = vpop.f32.mrf.mxu2 }
 0x816   :  { %v1694_v57 = vadd.f32 %v5119_v31, %v1693_v29 }
 0x81d   :  { %v1695_v15 = vpop.f32.mrf.mxu2 }
 0x81e   :  { %v1696_v38 = vadd.f32 %v5119_v31, %v1695_v15 }
 0x820   :  { %v5954_v61 = vpack.c.bf16 %v1696_v38, %v1694_v57 }
 0x822   :  { %1705 = vrot.lane.b32.xlu0 %v5954_v61, %s5329_s0  ;;  %1807 = vrot.lane.b32.xlu2 %v5954_v61, %s5330_s27 }
 0x82a   :  { %1805 = vrot.lane.b32.xlu2 %v5954_v61, %s5331_s28 }
 0x837   :  { %v1698_v45 = vpop.f32.mrf.mxu2 }
 0x838   :  { %v1699_v62 = vadd.f32 %v5119_v31, %v1698_v45 }
 0x83f   :  { %v1700_v59 = vpop.f32.mrf.mxu2 }
 0x840   :  { %v1701_v55 = vadd.f32 %v5119_v31, %v1700_v59 }
 0x842   :  { %v5962_v63 = vpack.c.bf16 %v1701_v55, %v1699_v62 }
 0x844   :  { %2011 = vrot.lane.b32.xlu1 %v5962_v63, %s5331_s28  ;;  %2013 = vrot.lane.b32.xlu2 %v5962_v63, %s5330_s27 }
 0x84c   :  { %1914 = vrot.lane.b32.xlu2 %v5962_v63, %s5329_s0 }
 0x87c   :  { %v1808_v9 = vpop.permute.xlu2 %1807 }
 0x87d   :  { %v1813_v56 = vsel %vm1707_vm8, %v1808_v9, 0 }
 0x87e   :  { %1822 = vmatpush.bf16.xpose.msrb.mxu0 %v1813_v56 }
 0x884   :  { %v1806_v4 = vpop.permute.xlu2 %1805 }
 0x885   :  { %4708 = vmatmul.msk.bf16.vlgmr.msrb.gmra.mxu0 %vm1707_vm8, %v1806_v4 }
 0x894   :  { %v1706_v26 = vpop.permute.xlu0 %1705 }
 0x895   :  { %v1712_v5 = vsel %vm1707_vm8, %v1706_v26, 0 }
 0x896   :  { %1721 = vmatpush.bf16.xpose.msra.mxu1 %v1712_v5 }
 0x89d   :  { %4706 = vmatmul.msk.bf16.vlgmr.msra.gmra.mxu1 %vm1707_vm8, %v5954_v61 }
 0x89e   :  { %v2014_v1 = vpop.permute.xlu2 %2013 }
 0x89f   :  { %v2019_v8 = vsel %vm1707_vm8, %v2014_v1, 0 }
 0x8a0   :  { %2028 = vmatpush.bf16.xpose.msra.mxu0 %v2019_v8 }
 0x8a6   :  { %v1915_v51 = vpop.permute.xlu2 %1914 }
 0x8a7   :  { %v1920_v36 = vsel %vm1707_vm8, %v1915_v51, 0 }
 0x8a8   :  { %1929 = vmatpush.bf16.xpose.msra.mxu2 %v1920_v36 }
 0x8af   :  { %4710 = vmatmul.msk.bf16.vlgmr.msra.gmra.mxu2 %vm1707_vm8, %v5962_v63 }
 0x8b6   :  { %v2012_v39 = vpop.permute.xlu1 %2011 }
 0x8b7   :  { %4712 = vmatmul.msk.bf16.vlgmr.msra.gmra.mxu0 %vm1707_vm8, %v2012_v39 }
 0x902   :  { %v1824_v50 = vpop.f32.mrf.mxu0 }
 0x903   :  { %v1829_v44 = vmul.f32 0.25, %v1824_v50 }
 0x905   :  { %v1831_v22 = vsel %vm5984_vm11, %v1829_v44, -1e+09 }
 0x906   :  { %v1833_v17 = vsel %vm1707_vm8, %v1831_v22, -inf }
 0x907   :  { %1834 = vmax.xlane.f32.xlu1 %v1833_v17 }
 0x90a   :  { %v1826_v28 = vpop.f32.mrf.mxu0 }
 0x90b   :  { %v1830_v20 = vmul.f32 0.25, %v1826_v28 }
 0x90d   :  { %v1832_v52 = vsel %vm5984_vm11, %v1830_v20, -1e+09 }
 0x90e   :  { %v1836_v3 = vsel %vm1707_vm8, %v1832_v52, -inf }
 0x90f   :  { %1837 = vmax.xlane.f32.xlu2 %v1836_v3 }
 0x91a   :  { %v1723_v21 = vpop.f32.mrf.mxu1 }
 0x91b   :  { %v1728_v48 = vmul.f32 0.25, %v1723_v21 }
 0x91d   :  { %v1734_v23 = vsel %vm5984_vm11, %v1728_v48, -1e+09 }
 0x91e   :  { %v1736_v47 = vsel %vm1707_vm8, %v1734_v23, -inf }
 0x91f   :  { %1737 = vmax.xlane.f32.xlu2 %v1736_v47 }
 0x922   :  { %v1725_v57 = vpop.f32.mrf.mxu1 }
 0x923   :  { %v1729_v62 = vmul.f32 0.25, %v1725_v57 }
 0x925   :  { %v1735_v55 = vsel %vm5984_vm11, %v1729_v62, -1e+09 }
 0x926   :  { %v1739_v9 = vsel %vm1707_vm8, %v1735_v55, -inf }
 0x932   :  { %v1931_v30 = vpop.f32.mrf.mxu2 }
 0x933   :  { %v1936_v40 = vmul.f32 0.25, %v1931_v30 }
 0x934   :  { %v2030_v41 = vpop.f32.mrf.mxu0 }
 0x935   :  { %v2035_v42 = vmul.f32 0.25, %v2030_v41  ;;  %v6003_v43 = vsel %vm5997_vm13, %v1936_v40, -1e+09 }
 0x936   :  { %v1942_v49 = vsel %vm1707_vm8, %v6003_v43, -inf }
 0x937   :  { %1943 = vmax.xlane.f32.xlu2 %v1942_v49  ;;  %v2037_v27 = vsel %vm5997_vm13, %v2035_v42, -1e+09 }
 0x938   :  { %v2039_v46 = vsel %vm1707_vm8, %v2037_v27, -inf }
 0x939   :  { %2040 = vmax.xlane.f32.xlu0 %v2039_v46 }
 0x93a   :  { %v1933_v53 = vpop.f32.mrf.mxu2 }
 0x93b   :  { %v1937_v60 = vmul.f32 0.25, %v1933_v53 }
 0x93c   :  { %v2032_v29 = vpop.f32.mrf.mxu0 }
 0x93d   :  { %v2036_v31 = vmul.f32 0.25, %v2032_v29  ;;  %v6012_v15 = vsel %vm5997_vm13, %v1937_v60, -1e+09 }
 0x93e   :  { %v1945_v59 = vsel %vm1707_vm8, %v6012_v15, -inf }
 0x93f   :  { %v2038_v38 = vsel %vm5997_vm13, %v2036_v31, -1e+09 }
 0x940   :  { %v2042_v45 = vsel %vm1707_vm8, %v2038_v38, -inf }
 0x941   :  { %2043 = vmax.xlane.f32.xlu1 %v2042_v45  ;;  %1946 = vmax.xlane.f32.xlu0 %v1945_v59 }
 0x949   :  { %1740 = vmax.xlane.f32.xlu1 %v1739_v9 }
 0x97a   :  { %v1835_v56 = vpop.xlane.xlu1 %1834 }
 0x97b   :  { %v1839_v4 = vsub.f32 %v1831_v22, %v1835_v56 }
 0x97d   :  { %v1841_v26 = vmul.f32 1.442695, %v1839_v4 }
 0x97f   :  { %5170 = vpow2.f32 %v1841_v26 }
 0x982   :  { %v1838_v5 = vpop.xlane.xlu2 %1837 }
 0x983   :  { %v1840_v1 = vsub.f32 %v1832_v52, %v1838_v5 }
 0x985   :  { %v6022_v8 = vpop.eup %5170  ;;  %v1843_v51 = vmul.f32 1.442695, %v1840_v1 }
 0x986   :  { %v1845_v36 = vsel %vm1707_vm8, %v6022_v8, 0.0 }
 0x987   :  { %5172 = vpow2.f32 %v1843_v51  ;;  %1846 = vadd.xlane.f32.xlu1 %v1845_v36 }
 0x98d   :  { %v6026_v39 = vpop.eup %5172 }
 0x98e   :  { %v1848_v37 = vsel %vm1707_vm8, %v6026_v39, 0.0 }
 0x98f   :  { %1849 = vadd.xlane.f32.xlu2 %v1848_v37 }
 0x992   :  { %v1738_v11 = vpop.xlane.xlu2 %1737 }
 0x993   :  { %v1742_v12 = vsub.f32 %v1734_v23, %v1738_v11 }
 0x995   :  { %v1744_v50 = vmul.f32 1.442695, %v1742_v12 }
 0x997   :  { %5174 = vpow2.f32 %v1744_v50 }
 0x99d   :  { %v6030_v44 = vpop.eup %5174 }
 0x99e   :  { %v1748_v22 = vsel %vm1707_vm8, %v6030_v44, 0.0 }
 0x99f   :  { %1749 = vadd.xlane.f32.xlu0 %v1748_v22 }
 0x9a7   :  { %1882 = vrot.lane.b32.xlu2 %v5954_v61, %s5332_s2 }
 0x9aa   :  { %v1944_v40 = vpop.xlane.xlu2 %1943 }
 0x9ab   :  { %v1948_v42 = vsub.f32 %v6003_v43, %v1944_v40 }
 0x9ac   :  { %v2041_v17 = vpop.xlane.xlu0 %2040 }
 0x9ad   :  { %v2045_v28 = vsub.f32 %v2037_v27, %v2041_v17  ;;  %v1950_v49 = vmul.f32 1.442695, %v1948_v42 }
 0x9af   :  { %v2047_v20 = vmul.f32 1.442695, %v2045_v28  ;;  %1785 = vrot.lane.b32.xlu2 %v5954_v61, %s5323_s10 }
 0x9b1   :  { %5176 = vpow2.f32 %v2047_v20 }
 0x9b4   :  { %v2044_v52 = vpop.xlane.xlu1 %2043  ;;  %v1947_v27 = vpop.xlane.xlu0 %1946 }
 0x9b5   :  { %v2046_v47 = vsub.f32 %v2038_v38, %v2044_v52  ;;  %v1949_v53 = vsub.f32 %v6012_v15, %v1947_v27 }
 0x9b7   :  { %v6038_v3 = vpop.eup %5176  ;;  %v2049_v30 = vmul.f32 1.442695, %v2046_v47  ;;  %v1952_v43 = vmul.f32 1.442695, %v1949_v53 }
 0x9b8   :  { %v2051_v21 = vsel %vm1707_vm8, %v6038_v3, 0.0 }
 0x9b9   :  { %2052 = vadd.xlane.f32.xlu0 %v2051_v21 }
 0x9bc   :  { %v1741_v48 = vpop.xlane.xlu1 %1740 }
 0x9bd   :  { %v1743_v23 = vsub.f32 %v1735_v55, %v1741_v48 }
 0x9bf   :  { %v1746_v0 = vmul.f32 1.442695, %v1743_v23 }
 0x9c1   :  { %5178 = vpow2.f32 %v1746_v0 }
 0x9c2   :  { %5180 = vpow2.f32 %v2049_v30 }
 0x9c3   :  { %5182 = vpow2.f32 %v1950_v49 }
 0x9c4   :  { %5184 = vpow2.f32 %v1952_v43 }
 0x9c7   :  { %v6042_v41 = vpop.eup %5178 }
 0x9c8   :  { %v1751_v61 = vsel %vm1707_vm8, %v6042_v41, 0.0  ;;  %v6047_v46 = vpop.eup %5180 }
 0x9c9   :  { %1752 = vadd.xlane.f32.xlu1 %v1751_v61  ;;  %v2054_v60 = vsel %vm1707_vm8, %v6047_v46, 0.0  ;;  %v6054_v29 = vpop.eup %5182 }
 0x9ca   :  { %v1954_v31 = vsel %vm1707_vm8, %v6054_v29, 0.0  ;;  %v6058_v57 = vpop.eup %5184 }
 0x9cb   :  { %v1957_v38 = vsel %vm1707_vm8, %v6058_v57, 0.0 }
 0x9cd   :  { %2088 = vrot.lane.b32.xlu0 %v5962_v63, %s5332_s2 }
 0x9d1   :  { %2055 = vadd.xlane.f32.xlu1 %v2054_v60 }
 0x9d9   :  { %1955 = vadd.xlane.f32.xlu1 %v1954_v31 }
 0x9e1   :  { %1958 = vadd.xlane.f32.xlu1 %v1957_v38 }
 0x9fa   :  { %v1847_v45 = vpop.xlane.xlu1 %1846  ;;  %1991 = vrot.lane.b32.xlu1 %v5962_v63, %s5323_s10 }
 0x9fb   :  { %5186 = vrcp.f32 %v1847_v45  ;;  %v1862_v1 = vand.u32 2147483648, %v1847_v45  ;;  %vm1856_vm15 = vweird.f32 %v1847_v45  ;;  %v1860_v51 = vand.u32 2147483647, %v1847_v45 }
 0x9fd   :  { %v1863_v50 = vor.u32 1.1754944e-38, %v1862_v1  ;;  %vm1861_vm10 = vcmp.eq.f32.partialorder %v1860_v51, 8.507059e+37 }
 0xa01   :  { %v5187_v15 = vpop.eup %5186 }
 0xa02   :  { %v1852_v59 = vmul.f32 %v5187_v15, %v1847_v45  ;;  %v1850_v62 = vpop.xlane.xlu2 %1849  ;;  %vm1857_vm14 = vweird.f32 %v5187_v15 }
 0xa03   :  { %5188 = vrcp.f32 %v1850_v62  ;;  %vm1858_vm7 = vmor %vm1856_vm15, %vm1857_vm14  ;;  %v1877_v37 = vand.u32 2147483648, %v1850_v62  ;;  %v1875_v12 = vand.u32 2147483647, %v1850_v62  ;;  %vm1871_vm12 = vweird.f32 %v1850_v62 }
 0xa04   :  { %v1853_v55 = vsub.f32 1.0, %v1852_v59 }
 0xa05   :  { %v1878_v28 = vor.u32 1.1754944e-38, %v1877_v37  ;;  %vm1876_vm3 = vcmp.eq.f32.partialorder %v1875_v12, 8.507059e+37 }
 0xa06   :  { %v1854_v9 = vmul.f32 %v5187_v15, %v1853_v55 }
 0xa08   :  { %v1855_v4 = vadd.f32 %v5187_v15, %v1854_v9 }
 0xa09   :  { %v5189_v56 = vpop.eup %5188 }
 0xa0a   :  { %v1867_v26 = vmul.f32 %v5189_v56, %v1850_v62  ;;  %v1883_v5 = vpop.permute.xlu2 %1882  ;;  %v1859_v63 = vsel %vm1858_vm7, %v5187_v15, %v1855_v4  ;;  %vm1872_vm9 = vweird.f32 %v5189_v56 }
 0xa0b   :  { %1895 = vmatpush.bf16.msrb.mxu1 %v1883_v5  ;;  %v1864_v17 = vsel %vm1861_vm10, %v1863_v50, %v1859_v63  ;;  %vm1873_vm6 = vmor %vm1871_vm12, %vm1872_vm9 }
 0xa0c   :  { %v1868_v36 = vsub.f32 1.0, %v1867_v26  ;;  %v1865_v48 = vmul.f32 %v6022_v8, %v1864_v17 }
 0xa0e   :  { %v1869_v11 = vmul.f32 %v5189_v56, %v1868_v36 }
 0xa10   :  { %v1870_v22 = vadd.f32 %v5189_v56, %v1869_v11 }
 0xa12   :  { %v1874_v20 = vsel %vm1873_vm6, %v5189_v56, %v1870_v22  ;;  %v1786_v52 = vpop.permute.xlu2 %1785  ;;  %v1750_v0 = vpop.xlane.xlu0 %1749 }
 0xa13   :  { %v1879_v21 = vsel %vm1876_vm3, %v1878_v28, %v1874_v20  ;;  %1798 = vmatpush.bf16.msrb.mxu3 %v1786_v52  ;;  %5190 = vrcp.f32 %v1750_v0  ;;  %v1765_v15 = vand.u32 2147483648, %v1750_v0  ;;  %vm1759_vm6 = vweird.f32 %v1750_v0 }
 0xa14   :  { %v1880_v23 = vmul.f32 %v6026_v39, %v1879_v21  ;;  %v1763_v59 = vand.u32 2147483647, %v1750_v0 }
 0xa15   :  { %v1766_v5 = vor.u32 1.1754944e-38, %v1765_v15 }
 0xa16   :  { %v1881_v47 = vpack.c.bf16 %v1880_v23, %v1865_v48  ;;  %vm1764_vm15 = vcmp.eq.f32.partialorder %v1763_v59, 8.507059e+37 }
 0xa18   :  { %4709 = vmatmul.msk.bf16.vlgmr.msrb.gmra.mxu1 %vm1707_vm8, %v1881_v47 }
 0xa19   :  { %v5191_v40 = vpop.eup %5190 }
 0xa1a   :  { %v1755_v42 = vmul.f32 %v5191_v40, %v1750_v0  ;;  %vm1760_vm3 = vweird.f32 %v5191_v40 }
 0xa1b   :  { %vm1761_vm12 = vmor %vm1759_vm6, %vm1760_vm3 }
 0xa1c   :  { %v1756_v49 = vsub.f32 1.0, %v1755_v42 }
 0xa1e   :  { %v1757_v8 = vmul.f32 %v5191_v40, %v1756_v49 }
 0xa20   :  { %v1758_v31 = vadd.f32 %v5191_v40, %v1757_v8 }
 0xa22   :  { %v1762_v56 = vsel %vm1761_vm12, %v5191_v40, %v1758_v31 }
 0xa23   :  { %v1767_v36 = vsel %vm1764_vm15, %v1766_v5, %v1762_v56 }
 0xa24   :  { %v1768_v28 = vmul.f32 %v6030_v44, %v1767_v36 }
 0xa2c   :  { %v2053_v30 = vpop.xlane.xlu0 %2052 }
 0xa2d   :  { %5192 = vrcp.f32 %v2053_v30  ;;  %vm2062_vm6 = vweird.f32 %v2053_v30  ;;  %v2068_v22 = vand.u32 2147483648, %v2053_v30  ;;  %v2066_v52 = vand.u32 2147483647, %v2053_v30 }
 0xa2f   :  { %v2069_v49 = vor.u32 1.1754944e-38, %v2068_v22  ;;  %vm2067_vm15 = vcmp.eq.f32.partialorder %v2066_v52, 8.507059e+37 }
 0xa33   :  { %v6067_v61 = vpop.eup %5192 }
 0xa34   :  { %v2058_v53 = vmul.f32 %v6067_v61, %v2053_v30  ;;  %vm2063_vm9 = vweird.f32 %v6067_v61 }
 0xa35   :  { %vm6074_vm12 = vmor %vm2062_vm6, %vm2063_vm9 }
 0xa36   :  { %v2059_v43 = vsub.f32 1.0, %v2058_v53 }
 0xa38   :  { %v2060_v55 = vmul.f32 %v6067_v61, %v2059_v43 }
 0xa3a   :  { %v2061_v37 = vadd.f32 %v6067_v61, %v2060_v55 }
 0xa3c   :  { %v1753_v27 = vpop.xlane.xlu1 %1752  ;;  %v2065_v23 = vsel %vm6074_vm12, %v6067_v61, %v2061_v37 }
 0xa3d   :  { %5194 = vrcp.f32 %v1753_v27  ;;  %v1780_v9 = vand.u32 2147483648, %v1753_v27  ;;  %v1778_v26 = vand.u32 2147483647, %v1753_v27  ;;  %vm1774_vm7 = vweird.f32 %v1753_v27 }
 0xa3e   :  { %v2070_v30 = vsel %vm2067_vm15, %v2069_v49, %v2065_v23 }
 0xa3f   :  { %v2089_v60 = vpop.permute.xlu0 %2088  ;;  %v1781_v63 = vor.u32 1.1754944e-38, %v1780_v9  ;;  %vm1779_vm3 = vcmp.eq.f32.partialorder %v1778_v26, 8.507059e+37  ;;  %v2071_v61 = vmul.f32 %v6038_v3, %v2070_v30 }
 0xa40   :  { %2101 = vmatpush.bf16.msra.mxu1 %v2089_v60 }
 0xa43   :  { %v5195_v39 = vpop.eup %5194 }
 0xa44   :  { %v1770_v38 = vmul.f32 %v5195_v39, %v1753_v27  ;;  %v2056_v45 = vpop.xlane.xlu1 %2055  ;;  %vm1775_vm14 = vweird.f32 %v5195_v39 }
 0xa45   :  { %5196 = vrcp.f32 %v2056_v45  ;;  %vm1776_vm10 = vmor %vm1774_vm7, %vm1775_vm14  ;;  %v2083_v47 = vand.u32 2147483648, %v2056_v45  ;;  %v2081_v40 = vand.u32 2147483647, %v2056_v45  ;;  %vm2077_vm7 = vweird.f32 %v2056_v45 }
 0xa46   :  { %v1771_v62 = vsub.f32 1.0, %v1770_v38 }
 0xa48   :  { %v1772_v4 = vmul.f32 %v5195_v39, %v1771_v62 }
 0xa4a   :  { %v1773_v1 = vadd.f32 %v5195_v39, %v1772_v4 }
 0xa4b   :  { %v5197_v51 = vpop.eup %5196 }
 0xa4c   :  { %v1777_v11 = vsel %vm1776_vm10, %v5195_v39, %v1773_v1  ;;  %v2073_v12 = vmul.f32 %v5197_v51, %v2056_v45  ;;  %v1956_v50 = vpop.xlane.xlu1 %1955  ;;  %vm2078_vm14 = vweird.f32 %v5197_v51  ;;  %vm2082_vm10 = vcmp.eq.f32.partialorder %v2081_v40, 8.507059e+37 }
 0xa4d   :  { %v1782_v17 = vsel %vm1779_vm3, %v1781_v63, %v1777_v11  ;;  %5198 = vrcp.f32 %v1956_v50  ;;  %vm2079_vm9 = vmor %vm2077_vm7, %vm2078_vm14  ;;  %v1971_v3 = vand.u32 2147483648, %v1956_v50  ;;  %vm1965_vm15 = vweird.f32 %v1956_v50 }
 0xa4e   :  { %v1783_v21 = vmul.f32 %v6042_v41, %v1782_v17  ;;  %v2074_v48 = vsub.f32 1.0, %v2073_v12  ;;  %v2084_v41 = vor.u32 1.1754944e-38, %v2083_v47 }
 0xa4f   :  { %v1972_v36 = vor.u32 1.1754944e-38, %v1971_v3 }
 0xa50   :  { %v2075_v0 = vmul.f32 %v5197_v51, %v2074_v48  ;;  %v1784_v42 = vpack.c.bf16 %v1783_v21, %v1768_v28  ;;  %v5005_v21 = vld [vmem:[#allocation2 + $0x18] sm:$0xff] }
 0xa51   :  { %2150 = vmatpush.bf16.msrb.mxu2 %v5005_v21 }
 0xa52   :  { %v2076_v44 = vadd.f32 %v5197_v51, %v2075_v0  ;;  %4707 = vmatmul.msk.bf16.vlgmr.msrb.gmra.mxu3 %vm1707_vm8, %v1784_v42 }
 0xa53   :  { %v5199_v27 = vpop.eup %5198 }
 0xa54   :  { %v2080_v53 = vsel %vm2079_vm9, %v5197_v51, %v2076_v44  ;;  %v1959_v60 = vpop.xlane.xlu1 %1958  ;;  %v1961_v43 = vmul.f32 %v5199_v27, %v1956_v50  ;;  %vm1966_vm6 = vweird.f32 %v5199_v27 }
 0xa55   :  { %v2085_v8 = vsel %vm2082_vm10, %v2084_v41, %v2080_v53  ;;  %5200 = vrcp.f32 %v1959_v60  ;;  %v1986_v9 = vand.u32 2147483648, %v1959_v60  ;;  %vm1980_vm12 = vweird.f32 %v1959_v60  ;;  %vm1967_vm7 = vmor %vm1965_vm15, %vm1966_vm6 }
 0xa56   :  { %v2086_v39 = vmul.f32 %v6047_v46, %v2085_v8  ;;  %v1962_v38 = vsub.f32 1.0, %v1961_v43  ;;  %v1984_v26 = vand.u32 2147483647, %v1959_v60  ;;  %v1969_v46 = vand.u32 2147483647, %v1956_v50 }
 0xa57   :  { %v1987_v1 = vor.u32 1.1754944e-38, %v1986_v9 }
 0xa58   :  { %v2087_v31 = vpack.c.bf16 %v2086_v39, %v2071_v61  ;;  %v1963_v59 = vmul.f32 %v5199_v27, %v1962_v38  ;;  %vm1985_vm9 = vcmp.eq.f32.partialorder %v1984_v26, 8.507059e+37  ;;  %vm1970_vm10 = vcmp.eq.f32.partialorder %v1969_v46, 8.507059e+37 }
 0xa5a   :  { %4713 = vmatmul.msk.bf16.vlgmr.msra.gmra.mxu1 %vm1707_vm8, %v2087_v31  ;;  %v1964_v56 = vadd.f32 %v5199_v27, %v1963_v59  ;;  %v5120_v31 = vld [vmem:[%s6861_s6 + $0x8] ss:$0 sm:$0xff] }
 0xa5b   :  { %v5201_v45 = vpop.eup %5200 }
 0xa5c   :  { %v1976_v15 = vmul.f32 %v5201_v45, %v1959_v60  ;;  %vm1981_vm3 = vweird.f32 %v5201_v45  ;;  %v1968_v51 = vsel %vm1967_vm7, %v5199_v27, %v1964_v56 }
 0xa5d   :  { %vm1982_vm14 = vmor %vm1980_vm12, %vm1981_vm3  ;;  %v1973_v63 = vsel %vm1970_vm10, %v1972_v36, %v1968_v51  ;;  %v51_v36 = vld [vmem:[%s6858_s3] sm:$0xff]  ;;  %vm2295_vm10 = vcmask 1043456  }
 0xa5e   :  { %v1977_v62 = vsub.f32 1.0, %v1976_v15  ;;  %v1974_v12 = vmul.f32 %v6054_v29, %v1973_v63 }
 0xa60   :  { %v1978_v55 = vmul.f32 %v5201_v45, %v1977_v62 }
 0xa62   :  { %v1979_v4 = vadd.f32 %v5201_v45, %v1978_v55 }
 0xa64   :  { %v1983_v5 = vsel %vm1982_vm14, %v5201_v45, %v1979_v4  ;;  %v52_v4 = vld [vmem:[%s6858_s3 + $0x8] sm:$0xff] }
 0xa65   :  { %v1988_v37 = vsel %vm1985_vm9, %v1987_v1, %v1983_v5  ;;  %vm2342_vm9 = vcmask 1042432  }
 0xa66   :  { %v1989_v11 = vmul.f32 %v6058_v57, %v1988_v37  ;;  %v5004_v57 = vld [vmem:[#allocation2 + $0x10] sm:$0xff] }
 0xa67   :  { %2151 = vmatpush.bf16.msrb.mxu2 %v5004_v57 }
 0xa68   :  { %v1990_v17 = vpack.c.bf16 %v1989_v11, %v1974_v12 }
 0xa6c   :  { %v1992_v22 = vpop.permute.xlu1 %1991 }
 0xa6d   :  { %2004 = vmatpush.bf16.msra.mxu3 %v1992_v22 }
 0xa70   :  { %4711 = vmatmul.msk.bf16.vlgmr.msra.gmra.mxu3 %vm1707_vm8, %v1990_v17 }
 0xa95   :  { %v1897_v28 = vpop.f32.mrf.mxu1 }
 0xa9d   :  { %v1899_v50 = vpop.f32.mrf.mxu1 }
 0xa9e   :  { %v5085_v20 = vpack.i.bf16 %v1899_v50, %v1897_v28 }
 0xaa0   :  { %5086 = vrot.lane.b32.xlu0 %v5085_v20, %s5333_s30 }
 0xad5   :  { %v1800_v29 = vpop.f32.mrf.mxu3 }
 0xad7   :  { %v2103_v52 = vpop.f32.mrf.mxu1 }
 0xadd   :  { %v1802_v42 = vpop.f32.mrf.mxu3 }
 0xadf   :  { %v2105_v48 = vpop.f32.mrf.mxu1 }
 0xae0   :  { %v5090_v23 = vpack.i.bf16 %v2105_v48, %v2103_v52 }
 0xae2   :  { %5091 = vrot.lane.b32.xlu2 %v5090_v23, %s5333_s30 }
 0xaf3   :  { %v2006_v30 = vpop.f32.mrf.mxu3 }
 0xafb   :  { %v2008_v8 = vpop.f32.mrf.mxu3 }
 0xb12   :  { %v5087_v47 = vpop.permute.xlu0 %5086 }
 0xb13   :  { %v5089_v0 = vunpack.i.h.bf16 %v5087_v47  ;;  %v5088_v40 = vunpack.i.l.bf16 %v5087_v47 }
 0xb15   :  { %v1910_v49 = vsel %vm1707_vm8, %v1800_v29, %v5088_v40  ;;  %v1911_v44 = vsel %vm1707_vm8, %v1802_v42, %v5089_v0  ;;  %v54_v42 = vld [vmem:[%s6858_s3 + $0x18] sm:$0xff] }
 0xb16   :  { %v2122_v27 = vpack.c.bf16 %v1911_v44, %v1910_v49  ;;  %v53_v49 = vld [vmem:[%s6858_s3 + $0x10] sm:$0xff] }
 0xb18   :  { %4722 = vmatmul.msk.bf16.vlgmr.msrb.gmra.mxu2 %vm177_vm4, %v2122_v27 }
 0xb3c   :  { %v5092_v41 = vpop.permute.xlu2 %5091 }
 0xb3d   :  { %v5094_v53 = vunpack.i.h.bf16 %v5092_v41  ;;  %v5093_v60 = vunpack.i.l.bf16 %v5092_v41 }
 0xb3f   :  { %v2117_v61 = vsel %vm1707_vm8, %v2008_v8, %v5094_v53  ;;  %v2116_v39 = vsel %vm1707_vm8, %v2006_v30, %v5093_v60  ;;  %v5009_v53 = vld [vmem:[#allocation2 + $0x38] sm:$0xff]  ;;  %v5007_v60 = vld [vmem:[#allocation2 + $0x28] sm:$0xff] }
 0xb40   :  { %v2123_v43 = vpack.c.bf16 %v2117_v61, %v2116_v39  ;;  %v5011_v8 = vld [vmem:[#allocation2 + $0x48] sm:$0xff]  ;;  %v5013_v61 = vld [vmem:[#allocation2 + $0x58] sm:$0xff]  ;;  %2413 = vmatpush.bf16.msrb.mxu3 %v5009_v53  ;;  %2450 = vmatpush.bf16.msrb.mxu0 %v5007_v60  ;;  %v5008_v39 = vld [vmem:[#allocation2 + $0x30] sm:$0xff] }
 0xb41   :  { %2534 = vmatpush.bf16.msrb.mxu1 %v5011_v8  ;;  %2597 = vmatpush.bf16.msra.mxu2 %v5013_v61 }
 0xb42   :  { %4723 = vmatmul.msk.bf16.gmra.mxu2 %vm177_vm4, %v2123_v43  ;;  %v5006_v43 = vld [vmem:[#allocation2 + $0x20] sm:$0xff] }
 0xb44   :  { %2414 = vmatpush.bf16.msrb.mxu3 %v5008_v39  ;;  %2451 = vmatpush.bf16.msrb.mxu0 %v5006_v43 }
 0xb9b   :  { %v2153_v38 = vpop.f32.mrf.mxu2 }
 0xb9c   :  { %v2154_v45 = vadd.f32 %v5120_v31, %v2153_v38  ;;  %v5012_v38 = vld [vmem:[#allocation2 + $0x50] sm:$0xff] }
 0xb9d   :  { %2598 = vmatpush.bf16.msra.mxu2 %v5012_v38 }
 0xb9e   :  { %v2163_v15 = vadd.f32 %v2154_v45, %v5931_v24 }
 0xba0   :  { %v2169_v59 = vsel %vm177_vm4, %v2163_v15, 0.0 }
 0xba1   :  { %2170 = vadd.xlane.f32.xlu0 %v2169_v59 }
 0xba3   :  { %v2155_v62 = vpop.f32.mrf.mxu2 }
 0xba4   :  { %v2156_v55 = vadd.f32 %v5120_v31, %v2155_v62 }
 0xba6   :  { %v2164_v9 = vadd.f32 %v2156_v55, %v5933_v33 }
 0xba8   :  { %v2172_v56 = vsel %vm177_vm4, %v2164_v9, 0.0 }
 0xba9   :  { %2173 = vadd.xlane.f32.xlu2 %v2172_v56 }
 0xbc1   :  { %2274 = vperm.xlu2 %5084, %v52_v4  }
 0xbc5   :  { %v2158_v26 = vpop.f32.mrf.mxu2 }
 0xbc6   :  { %v2159_v3 = vadd.f32 %v5120_v31, %v2158_v26 }
 0xbc8   :  { %v2165_v46 = vadd.f32 %v2159_v3, %v5944_v54 }
 0xbca   :  { %v2175_v24 = vsel %vm177_vm4, %v2165_v46, 0.0 }
 0xbcb   :  { %2176 = vadd.xlane.f32.xlu1 %v2175_v24  ;;  %v6151_v24 = vld [vmem:[%s6861_s6 + $0x10] ss:$0 sm:$0xff] }
 0xbcd   :  { %v2160_v5 = vpop.f32.mrf.mxu2 }
 0xbce   :  { %v2161_v1 = vadd.f32 %v5120_v31, %v2160_v5  ;;  %v5010_v31 = vld [vmem:[#allocation2 + $0x40] sm:$0xff] }
 0xbcf   :  { %2535 = vmatpush.bf16.msrb.mxu1 %v5010_v31 }
 0xbd0   :  { %v2166_v51 = vadd.f32 %v2161_v1, %v5946_v58 }
 0xbd2   :  { %v2178_v33 = vsel %vm177_vm4, %v2166_v51, 0.0 }
 0xbd3   :  { %2179 = vadd.xlane.f32.xlu0 %v2178_v33 }
 0xbe4   :  { %2269 = vperm.xlu1 %5080, %v51_v36  }
 0xc14   :  { %v2171_v37 = vpop.xlane.xlu0 %2170 }
 0xc15   :  { %v2181_v63 = vmul.f32 %v2171_v37, %v5471_v34 }
 0xc17   :  { %v6115_v11 = vsub.f32 %v2163_v15, %v2181_v63 }
 0xc19   :  { %v2189_v54 = vmul.f32 %v6115_v11, %v6115_v11 }
 0xc1b   :  { %v2193_v12 = vsel %vm177_vm4, %v2189_v54, 0.0 }
 0xc1c   :  { %2194 = vadd.xlane.f32.xlu2 %v2193_v12  ;;  %v2174_v58 = vpop.xlane.xlu2 %2173 }
 0xc1d   :  { %v2182_v22 = vmul.f32 %v2174_v58, %v5471_v34 }
 0xc1f   :  { %v6121_v17 = vsub.f32 %v2164_v9, %v2182_v22 }
 0xc21   :  { %v2190_v28 = vmul.f32 %v6121_v17, %v6121_v17 }
 0xc23   :  { %v2196_v50 = vsel %vm177_vm4, %v2190_v28, 0.0 }
 0xc24   :  { %2197 = vadd.xlane.f32.xlu0 %v2196_v50  ;;  %v6144_v44 = vpop.permute.xlu2 %2274 }
 0xc3e   :  { %v2177_v20 = vpop.xlane.xlu1 %2176 }
 0xc3f   :  { %v2183_v52 = vmul.f32 %v2177_v20, %v5471_v34 }
 0xc41   :  { %v6127_v21 = vsub.f32 %v2165_v46, %v2183_v52  ;;  %v6172_v52 = vadd.s32 4294967292, %v5388_v2 }
 0xc43   :  { %v2191_v48 = vmul.f32 %v6127_v21, %v6127_v21 }
 0xc45   :  { %v2199_v23 = vsel %vm177_vm4, %v2191_v48, 0.0  ;;  %v6175_v48 = vadd.s32 4294967294, %v5388_v2 }
 0xc46   :  { %v2180_v57 = vpop.xlane.xlu0 %2179  ;;  %2200 = vadd.xlane.f32.xlu2 %v2199_v23 }
 0xc47   :  { %v2184_v29 = vmul.f32 %v2180_v57, %v5471_v34 }
 0xc49   :  { %v6133_v47 = vsub.f32 %v2166_v51, %v2184_v29  ;;  %v6156_v51 = vld [vmem:[%s6861_s6 + $0x18] ss:$0 sm:$0xff] }
 0xc4b   :  { %v2192_v0 = vmul.f32 %v6133_v47, %v6133_v47 }
 0xc4d   :  { %v2202_v40 = vsel %vm177_vm4, %v2192_v0, 0.0 }
 0xc4e   :  { %2203 = vadd.xlane.f32.xlu0 %v2202_v40 }
 0xc56   :  { %v6161_v12 = vpop.permute.xlu1 %2269 }
 0xc5e   :  { %2284 = vperm.xlu2 %5084, %v54_v42  }
 0xc62   :  { %2279 = vperm.xlu0 %5083, %v53_v49  }
 0xc8f   :  { %v2195_v27 = vpop.xlane.xlu2 %2194 }
 0xc90   :  { %v2205_v30 = vmul.f32 %v2195_v27, %v5471_v34 }
 0xc92   :  { %v2209_v41 = vadd.f32 1e-05, %v2205_v30 }
 0xc94   :  { %5202 = vrsqrt.f32 %v2209_v41  ;;  %vm2219_vm6 = vweird.f32 %v2209_v41 }
 0xc97   :  { %v2198_v45 = vpop.xlane.xlu0 %2197 }
 0xc98   :  { %v2206_v15 = vmul.f32 %v2198_v45, %v5471_v34 }
 0xc9a   :  { %v5203_v59 = vpop.eup %5202  ;;  %v2210_v62 = vadd.f32 1e-05, %v2206_v15 }
 0xc9b   :  { %v2214_v55 = vmul.f32 %v5203_v59, %v2209_v41  ;;  %vm2220_vm3 = vweird.f32 %v5203_v59 }
 0xc9c   :  { %5204 = vrsqrt.f32 %v2210_v62  ;;  %vm2221_vm12 = vmor %vm2219_vm6, %vm2220_vm3  ;;  %vm2229_vm15 = vweird.f32 %v2210_v62  ;;  %vm2463_vm3 = vcmask 1041408  }
 0xc9d   :  { %v2215_v9 = vmul.f32 %v5203_v59, %v2214_v55 }
 0xc9f   :  { %v2216_v56 = vmul.f32 0.5, %v2215_v9 }
 0xca1   :  { %v2217_v4 = vsub.f32 1.5, %v2216_v56 }
 0xca2   :  { %v5205_v26 = vpop.eup %5204 }
 0xca3   :  { %v2218_v3 = vmul.f32 %v5203_v59, %v2217_v4  ;;  %v2224_v46 = vmul.f32 %v5205_v26, %v2210_v62  ;;  %vm2230_vm14 = vweird.f32 %v5205_v26 }
 0xca4   :  { %vm2231_vm7 = vmor %vm2229_vm15, %vm2230_vm14  ;;  %vm6868_vm14 = vcmp.ge.s32.totalorder %v6175_v48, 0 }
 0xca5   :  { %v2222_v5 = vsel %vm2221_vm12, %v5203_v59, %v2218_v3  ;;  %v2225_v1 = vmul.f32 %v5205_v26, %v2224_v46  ;;  %vm6869_vm12 = vcmp.ge.s32.totalorder %v6172_v52, 0 }
 0xca6   :  { %v2253_v33 = vmul.f32 %v2222_v5, %v6115_v11  ;;  %v6168_v11 = vadd.s32 4294967293, %v5388_v2 }
 0xca7   :  { %v2226_v36 = vmul.f32 0.5, %v2225_v1 }
 0xca8   :  { %v2258_v37 = vmul.f32 %v6151_v24, %v2253_v33  ;;  %vm6870_vm6 = vcmp.ge.s32.totalorder %v6168_v11, 0 }
 0xca9   :  { %v2227_v63 = vsub.f32 1.5, %v2226_v36  ;;  %v5015_v36 = vld [vmem:[#allocation2 + $0x68] sm:$0xff] }
 0xcaa   :  { %v2263_v54 = vadd.f32 %v6156_v51, %v2258_v37  ;;  %v5017_v37 = vld [vmem:[#allocation2 + $0x78] sm:$0xff]  ;;  %2644 = vmatpush.bf16.msra.mxu3 %v5015_v36 }
 0xcab   :  { %v2228_v58 = vmul.f32 %v5205_v26, %v2227_v63  ;;  %2707 = vmatpush.bf16.msra.mxu0 %v5017_v37 }
 0xcac   :  { %v6164_v22 = vmul.f32 %v6161_v12, %v2263_v54  ;;  %v5019_v54 = vld [vmem:[#allocation2 + $0x88] sm:$0xff] }
 0xcad   :  { %v2232_v28 = vsel %vm2231_vm7, %v5205_v26, %v2228_v58  ;;  %v5021_v58 = vld [vmem:[#allocation2 + $0x98] sm:$0xff]  ;;  %2795 = vmatpush.bf16.msra.mxu1 %v5019_v54 }
 0xcae   :  { %v2254_v50 = vmul.f32 %v2232_v28, %v6121_v17  ;;  %v2343_v20 = vrot.slane %v6164_v22, 5  ;;  %v2296_v57 = vrot.slane %v6164_v22, 4  ;;  %v2464_v29 = vrot.slane %v6164_v22, 6  ;;  %v5014_v28 = vld [vmem:[#allocation2 + $0x60] sm:$0xff]  ;;  %2883 = vmatpush.bf16.msrb.mxu2 %v5021_v58 }
 0xcaf   :  { %v2551_v17 = vrot.slane %v6164_v22, 7  ;;  %2645 = vmatpush.bf16.msra.mxu3 %v5014_v28 }
 0xcb0   :  { %v2259_v23 = vmul.f32 %v6151_v24, %v2254_v50  ;;  %v2354_v40 = vsel %vm2342_vm9, 0.0, %v2343_v20  ;;  %v2307_v42 = vsel %vm2295_vm10, 0.0, %v2296_v57  ;;  %v2475_v49 = vsel %vm2463_vm3, 0.0, %v2464_v29  ;;  %v5016_v50 = vld [vmem:[#allocation2 + $0x70] sm:$0xff] }
 0xcb1   :  { %v2562_v27 = vsel %vm112_vm0, 0.0, %v2551_v17  ;;  %v2379_v8 = vsel %vm6870_vm6, %v2354_v40, 0.0  ;;  %v2332_v61 = vsel %vm6869_vm12, %v2307_v42, 0.0  ;;  %v2500_v39 = vsel %vm6868_vm14, %v2475_v49, 0.0  ;;  %2708 = vmatpush.bf16.msra.mxu0 %v5016_v50 }
 0xcb2   :  { %v2264_v0 = vadd.f32 %v6156_v51, %v2259_v23  ;;  %v2563_v43 = vsel %vm6867_vm2, %v2562_v27, 0.0  ;;  %v5018_v23 = vld [vmem:[#allocation2 + $0x80] sm:$0xff] }
 0xcb3   :  { %2796 = vmatpush.bf16.msra.mxu1 %v5018_v23 }
 0xcb4   :  { %v6187_v2 = vmul.f32 %v6144_v44, %v2264_v0 }
 0xcb6   :  { %v2344_v30 = vrot.slane %v6187_v2, 5  ;;  %v2297_v41 = vrot.slane %v6187_v2, 4  ;;  %v2465_v53 = vrot.slane %v6187_v2, 6  ;;  %v2552_v60 = vrot.slane %v6187_v2, 7 }
 0xcb8   :  { %v2345_v31 = vsel %vm2342_vm9, %v2343_v20, %v2344_v30  ;;  %v6210_v38 = vsel %vm2295_vm10, %v2296_v57, %v2297_v41  ;;  %v2466_v45 = vsel %vm2463_vm3, %v2464_v29, %v2465_v53  ;;  %v2553_v15 = vsel %vm112_vm0, %v2551_v17, %v2552_v60  ;;  %v5020_v57 = vld [vmem:[#allocation2 + $0x90] sm:$0xff] }
 0xcb9   :  { %v2201_v59 = vpop.xlane.xlu2 %2200  ;;  %v2387_v62 = vpack.c.bf16 %v2345_v31, %v2379_v8  ;;  %v2340_v55 = vpack.c.bf16 %v6210_v38, %v2332_v61  ;;  %v2508_v9 = vpack.c.bf16 %v2466_v45, %v2500_v39  ;;  %v2571_v56 = vpack.c.bf16 %v2553_v15, %v2563_v43  ;;  %2884 = vmatpush.bf16.msrb.mxu2 %v5020_v57 }
 0xcba   :  { %v2207_v4 = vmul.f32 %v2201_v59, %v5471_v34 }
 0xcbb   :  { %4732 = vmatmul.msk.bf16.vlgmr.msrb.gmra.mxu3 %vm177_vm4, %v2387_v62  ;;  %4742 = vmatmul.msk.bf16.vlgmr.msrb.gmra.mxu0 %vm177_vm4, %v2340_v55  ;;  %v6236_v55 = vadd.s32 4294967293, %v5407_v18 }
 0xcbc   :  { %v2211_v26 = vadd.f32 1e-05, %v2207_v4  ;;  %4752 = vmatmul.msk.bf16.vlgmr.msrb.gmra.mxu1 %vm177_vm4, %v2508_v9  ;;  %4762 = vmatmul.msk.bf16.vlgmr.msra.gmra.mxu2 %vm177_vm4, %v2571_v56  ;;  %v6239_v9 = vadd.s32 4294967292, %v5407_v18  ;;  %v6242_v56 = vadd.s32 4294967294, %v5407_v18 }
 0xcbe   :  { %5206 = vrsqrt.f32 %v2211_v26  ;;  %vm2239_vm7 = vweird.f32 %v2211_v26 }
 0xcc1   :  { %v2204_v3 = vpop.xlane.xlu0 %2203 }
 0xcc2   :  { %v2208_v46 = vmul.f32 %v2204_v3, %v5471_v34 }
 0xcc4   :  { %v5207_v5 = vpop.eup %5206  ;;  %v2212_v1 = vadd.f32 1e-05, %v2208_v46 }
 0xcc5   :  { %v2234_v33 = vmul.f32 %v5207_v5, %v2211_v26  ;;  %vm2240_vm15 = vweird.f32 %v5207_v5 }
 0xcc6   :  { %5208 = vrsqrt.f32 %v2212_v1  ;;  %vm2241_vm2 = vmor %vm2239_vm7, %vm2240_vm15  ;;  %vm2249_vm12 = vweird.f32 %v2212_v1  ;;  %vm6882_vm15 = vcmask 1045504   ;;  %vm6881_vm7 = vcmask 1044480  }
 0xcc7   :  { %v2235_v63 = vmul.f32 %v5207_v5, %v2234_v33  ;;  %v6272_v33 = vadd.s32 4, %v5409_v19 }
 0xcc9   :  { %v2236_v20 = vmul.f32 0.5, %v2235_v63 }
 0xccb   :  { %v2237_v29 = vsub.f32 1.5, %v2236_v20 }
 0xccc   :  { %v5209_v17 = vpop.eup %5208 }
 0xccd   :  { %v2238_v0 = vmul.f32 %v5207_v5, %v2237_v29  ;;  %v2244_v40 = vmul.f32 %v5209_v17, %v2212_v1  ;;  %vm2250_vm14 = vweird.f32 %v5209_v17 }
 0xcce   :  { %vm2251_vm6 = vmor %vm2249_vm12, %vm2250_vm14  ;;  %vm6873_vm12 = vcmp.ge.s32.totalorder %v6242_v56, 0  ;;  %vm6871_vm14 = vcmp.lt.s32.totalorder %v6272_v33, 16 }
 0xccf   :  { %v2242_v42 = vsel %vm2241_vm2, %v5207_v5, %v2238_v0  ;;  %v2245_v49 = vmul.f32 %v5209_v17, %v2244_v40  ;;  %v6249_v5 = vpop.permute.xlu2 %2284  ;;  %vm2361_vm2 = vcmp.ge.s32.totalorder %v6236_v55, 0  ;;  %v5023_v40 = vld [vmem:[#allocation2 + $0xa8] sm:$0xff] }
 0xcd0   :  { %v2255_v27 = vmul.f32 %v2242_v42, %v6127_v21  ;;  %2960 = vmatpush.bf16.msrb.mxu3 %v5023_v40 }
 0xcd1   :  { %v2246_v8 = vmul.f32 0.5, %v2245_v49 }
 0xcd2   :  { %v2260_v61 = vmul.f32 %v6151_v24, %v2255_v27  ;;  %v5022_v27 = vld [vmem:[#allocation2 + $0xa0] sm:$0xff] }
 0xcd3   :  { %v2247_v39 = vsub.f32 1.5, %v2246_v8 }
 0xcd4   :  { %v6227_v43 = vpop.permute.xlu0 %2279  ;;  %v2265_v31 = vadd.f32 %v6156_v51, %v2260_v61  ;;  %2961 = vmatpush.bf16.msrb.mxu3 %v5022_v27 }
 0xcd5   :  { %v2248_v45 = vmul.f32 %v5209_v17, %v2247_v39 }
 0xcd6   :  { %v6231_v15 = vmul.f32 %v6227_v43, %v2265_v31  ;;  %v6309_v31 = vadd.s32 2, %v5393_v7 }
 0xcd7   :  { %v2252_v59 = vsel %vm2251_vm6, %v5209_v17, %v2248_v45  ;;  %vm2314_vm6 = vcmp.ge.s32.totalorder %v6239_v9, 0 }
 0xcd8   :  { %v2256_v62 = vmul.f32 %v2252_v59, %v6133_v47  ;;  %v2346_v21 = vrot.slane %v6231_v15, 5  ;;  %v2299_v26 = vrot.slane %v6231_v15, 4  ;;  %v2467_v3 = vrot.slane %v6231_v15, 6 }
 0xcd9   :  { %v2554_v46 = vrot.slane %v6231_v15, 7  ;;  %v2664_v61 = vrot.slane %v6231_v15, 1  ;;  %v2728_v39 = vrot.slane %v6231_v15, 2  ;;  %v2816_v45 = vrot.slane %v6231_v15, 3 }
 0xcda   :  { %v2261_v4 = vmul.f32 %v6151_v24, %v2256_v62  ;;  %v2347_v1 = vsel %vm2342_vm9, %v2344_v30, %v2346_v21  ;;  %v6263_v24 = vsel %vm2295_vm10, %v2297_v41, %v2299_v26  ;;  %v6313_v59 = vadd.s32 3, %v5393_v7 }
 0xcdb   :  { %v2555_v30 = vsel %vm112_vm0, %v2552_v60, %v2554_v46  ;;  %v2381_v54 = vsel %vm2361_vm2, %v2347_v1, 0.0  ;;  %v2662_v62 = vrot.slane %v6187_v2, 1 }
 0xcdc   :  { %v2266_v47 = vadd.f32 %v6156_v51, %v2261_v4  ;;  %v2468_v51 = vsel %vm2463_vm3, %v2465_v53, %v2467_v3  ;;  %v2334_v53 = vsel %vm2314_vm6, %v6263_v24, 0.0  ;;  %v2565_v58 = vsel %vm6872_vm5, %v2555_v30, 0.0 }
 0xcdd   :  { %v2502_v60 = vsel %vm6873_vm12, %v2468_v51, 0.0  ;;  %v2814_v4 = vrot.slane %v6187_v2, 3  ;;  %vm6874_vm5 = vcmp.lt.s32.totalorder %v6313_v59, 16  ;;  %vm6900_vm12 = vcmp.lt.s32.totalorder %v5396_v14, 16 }
 0xcde   :  { %v6258_v18 = vmul.f32 %v6249_v5, %v2266_v47  ;;  %v2661_v47 = vrot.slane %v6164_v22, 1  ;;  %v2725_v51 = vrot.slane %v6164_v22, 2 }
 0xce0   :  { %v2348_v36 = vrot.slane %v6258_v18, 5  ;;  %v2301_v37 = vrot.slane %v6258_v18, 4  ;;  %v2469_v63 = vrot.slane %v6258_v18, 6  ;;  %v2556_v41 = vrot.slane %v6258_v18, 7 }
 0xce2   :  { %v2349_v28 = vsel %vm2342_vm9, %v2346_v21, %v2348_v36  ;;  %v6289_v50 = vsel %vm2295_vm10, %v2299_v26, %v2301_v37  ;;  %v2470_v20 = vsel %vm2463_vm3, %v2467_v3, %v2469_v63  ;;  %v2557_v23 = vsel %vm112_vm0, %v2554_v46, %v2556_v41 }
 0xce3   :  { %v2388_v57 = vpack.c.bf16 %v2349_v28, %v2381_v54  ;;  %v2341_v29 = vpack.c.bf16 %v6289_v50, %v2334_v53  ;;  %v2509_v17 = vpack.c.bf16 %v2470_v20, %v2502_v60  ;;  %v2572_v0 = vpack.c.bf16 %v2557_v23, %v2565_v58 }
 0xce4   :  { %v2901_v42 = vsel %vm2295_vm10, %v2301_v37, 0.0  ;;  %v2726_v21 = vrot.slane %v6187_v2, 2  ;;  %v2665_v26 = vsel %vm6883_vm1, %v2662_v62, %v2664_v61  ;;  %v2817_v46 = vsel %vm6881_vm7, %v2814_v4, %v2816_v45 }
 0xce5   :  { %4733 = vmatmul.msk.bf16.gmra.mxu3 %vm177_vm4, %v2388_v57  ;;  %4743 = vmatmul.msk.bf16.gmra.mxu0 %vm177_vm4, %v2341_v29  ;;  %v6302_v49 = vsel %vm6871_vm14, %v2901_v42, 0.0  ;;  %vm6875_vm14 = vcmp.lt.s32.totalorder %v6309_v31, 16  ;;  %v2674_v1 = vsel %vm6900_vm12, %v2665_v26, 0.0  ;;  %v2813_v36 = vrot.slane %v6164_v22, 3 }
 0xce6   :  { %4753 = vmatmul.msk.bf16.gmra.mxu1 %vm177_vm4, %v2509_v17  ;;  %4763 = vmatmul.msk.bf16.gmra.mxu2 %vm177_vm4, %v2572_v0  ;;  %v2935_v8 = vpack.c.bf16 %v6302_v49, %v6289_v50  ;;  %v2729_v3 = vsel %vm6882_vm15, %v2726_v21, %v2728_v39  ;;  %v2850_v37 = vsel %vm6874_vm5, %v2817_v46, 0.0  ;;  %v2663_v63 = vsel %vm6883_vm1, %v2661_v47, %v2662_v62  ;;  %v5026_v50 = vld [vmem:[#allocation2 + $0xc0] sm:$0xff] }
 0xce7   :  { %v2762_v30 = vsel %vm6875_vm14, %v2729_v3, 0.0  ;;  %v2618_v41 = vpack.c.bf16 %v6187_v2, %v6164_v22  ;;  %v2681_v54 = vpack.c.bf16 %v2674_v1, %v2663_v63  ;;  %v2727_v53 = vsel %vm6882_vm15, %v2725_v51, %v2726_v21 }
 0xce8   :  { %v2815_v60 = vsel %vm6881_vm7, %v2813_v36, %v2814_v4  ;;  %v2769_v58 = vpack.c.bf16 %v2762_v30, %v2727_v53  ;;  %v2666_v20 = vrot.slane %v6258_v18, 1  ;;  %v2730_v23 = vrot.slane %v6258_v18, 2 }
 0xce9   :  { %v2857_v28 = vpack.c.bf16 %v2850_v37, %v2815_v60  ;;  %v6344_v57 = vadd.s32 2, %v5409_v19  ;;  %v2818_v29 = vrot.slane %v6258_v18, 3  ;;  %v6348_v17 = vadd.s32 3, %v5409_v19 }
 0xcea   :  { %v2672_v0 = vsel %vm6883_vm1, %v2666_v20, 0.0  ;;  %v2736_v40 = vsel %vm6882_vm15, %v2730_v23, 0.0  ;;  %v2667_v27 = vsel %vm6883_vm1, %v2664_v61, %v2666_v20  ;;  %vm6902_vm14 = vcmp.lt.s32.totalorder %v5432_v35, 16  ;;  %v5027_v20 = vld [vmem:[#allocation2 + $0xc8] sm:$0xff] }
 0xceb   :  { %6901 = vst [vmem:[#allocation10_spill] sm:$0xff] %v6348_v17  ;;  %vm6880_vm12 = vcmp.lt.s32.totalorder %v6344_v57, 16  ;;  %v2824_v42 = vsel %vm6881_vm7, %v2818_v29, 0.0  ;;  %vm6879_vm5 = vcmp.lt.s32.totalorder %v6348_v17, 16  ;;  %v2676_v62 = vsel %vm6902_vm14, %v2672_v0, 0.0  ;;  %3033 = vmatpush.bf16.msrb.mxu0 %v5027_v20  ;;  %v5025_v0 = vld [vmem:[#allocation2 + $0xb8] sm:$0xff] }
 0xcec   :  { %v2731_v21 = vsel %vm6882_vm15, %v2728_v39, %v2730_v23  ;;  %v2764_v19 = vsel %vm6880_vm12, %v2736_v40, 0.0  ;;  %v2819_v4 = vsel %vm6881_vm7, %v2816_v45, %v2818_v29  ;;  %v2852_v26 = vsel %vm6879_vm5, %v2824_v42, 0.0  ;;  %v5024_v42 = vld [vmem:[#allocation2 + $0xb0] sm:$0xff] }
 0xced   :  { %v2619_v3 = vpack.c.bf16 %v6258_v18, %v6231_v15  ;;  %v2682_v46 = vpack.c.bf16 %v2676_v62, %v2667_v27  ;;  %v2770_v47 = vpack.c.bf16 %v2764_v19, %v2731_v21  ;;  %v2858_v1 = vpack.c.bf16 %v2852_v26, %v2819_v4 }
 0xcee   :  { %v6371_v61 = vadd.s32 4, %v5393_v7 }
 0xcef   :  { %3034 = vmatpush.bf16.msrb.mxu0 %v5026_v50 }
 0xcf0   :  { %6903 = vst [vmem:[#allocation11_spill] sm:$0xff] %v6371_v61  ;;  %vm6878_vm14 = vcmp.lt.s32.totalorder %v6371_v61, 16 }
 0xcf1   :  { %v2927_v39 = vsel %vm6878_vm14, %v6263_v24, 0.0  ;;  %vm6904_vm14 = vcmask 523264  }
 0xcf2   :  { %v2934_v45 = vpack.c.bf16 %v2927_v39, %v6210_v38  ;;  %vm6905_vm5 = vmmov %vm6904_vm14 }
 0xcf3   :  { %3035 = vmatpush.bf16.msrb.mxu0 %v5025_v0 }
 0xcf5   :  { %4772 = vmatmul.msk.bf16.vlgmr.msra.gmra.mxu3 %vm177_vm4, %v2618_v41  ;;  %4782 = vmatmul.msk.bf16.vlgmr.msra.gmra.mxu0 %vm177_vm4, %v2681_v54 }
 0xcf6   :  { %4792 = vmatmul.msk.bf16.vlgmr.msra.gmra.mxu1 %vm177_vm4, %v2769_v58  ;;  %4802 = vmatmul.msk.bf16.vlgmr.msrb.gmra.mxu2 %vm177_vm4, %v2857_v28 }
 0xcf7   :  { %3036 = vmatpush.bf16.msrb.mxu0 %v5024_v42 }
 0xd05   :  { %4773 = vmatmul.msk.bf16.gmra.mxu3 %vm177_vm4, %v2619_v3  ;;  %4783 = vmatmul.msk.bf16.gmra.mxu0 %vm177_vm4, %v2682_v46 }
 0xd06   :  { %4793 = vmatmul.msk.bf16.gmra.mxu1 %vm177_vm4, %v2770_v47  ;;  %4803 = vmatmul.msk.bf16.gmra.mxu2 %vm177_vm4, %v2858_v1 }
 0xd15   :  { %4812 = vmatmul.msk.bf16.vlgmr.msrb.gmra.mxu3 %vm177_vm4, %v2934_v45 }
 0xd25   :  { %4813 = vmatmul.msk.bf16.gmra.mxu3 %vm177_vm4, %v2935_v8 }
 0xd38   :  { %v2453_v36 = vpop.f32.mrf.mxu0 }
 0xd39   :  { %v2537_v7 = vpop.f32.mrf.mxu1 }
 0xd3e   :  { %v2416_v51 = vpop.f32.mrf.mxu3 }
 0xd3f   :  { %v2600_v63 = vpop.f32.mrf.mxu2  ;;  %v2454_v29 = vadd.f32 %v2453_v36, %v2416_v51 }
 0xd40   :  { %v2455_v41 = vpop.f32.mrf.mxu0 }
 0xd41   :  { %v2539_v54 = vpop.f32.mrf.mxu1  ;;  %v2547_v21 = vadd.f32 %v2537_v7, %v2454_v29 }
 0xd43   :  { %v2610_v26 = vadd.f32 %v2600_v63, %v2547_v21 }
 0xd46   :  { %v2418_v30 = vpop.f32.mrf.mxu3 }
 0xd47   :  { %v2602_v60 = vpop.f32.mrf.mxu2  ;;  %v2456_v19 = vadd.f32 %v2455_v41, %v2418_v30 }
 0xd49   :  { %v2548_v3 = vadd.f32 %v2539_v54, %v2456_v19 }
 0xd4b   :  { %v2611_v39 = vadd.f32 %v2602_v60, %v2548_v3  ;;  %v5123_v60 = vld [vmem:[%s6861_s6 + $0x20] ss:$0 sm:$0xff] }
 0xd62   :  { %v2458_v24 = vpop.f32.mrf.mxu0 }
 0xd63   :  { %v2542_v58 = vpop.f32.mrf.mxu1 }
 0xd68   :  { %v2421_v37 = vpop.f32.mrf.mxu3 }
 0xd69   :  { %v2605_v28 = vpop.f32.mrf.mxu2  ;;  %v2459_v51 = vadd.f32 %v2458_v24, %v2421_v37 }
 0xd6a   :  { %v2460_v23 = vpop.f32.mrf.mxu0 }
 0xd6b   :  { %v2544_v8 = vpop.f32.mrf.mxu1  ;;  %v2549_v61 = vadd.f32 %v2542_v58, %v2459_v51 }
 0xd6d   :  { %v2612_v63 = vadd.f32 %v2605_v28, %v2549_v61 }
 0xd70   :  { %v2423_v53 = vpop.f32.mrf.mxu3 }
 0xd71   :  { %v2607_v40 = vpop.f32.mrf.mxu2  ;;  %v2461_v17 = vadd.f32 %v2460_v23, %v2423_v53 }
 0xd72   :  { %v2710_v27 = vpop.f32.mrf.mxu0 }
 0xd73   :  { %v2798_v4 = vpop.f32.mrf.mxu1  ;;  %v2550_v54 = vadd.f32 %v2544_v8, %v2461_v17 }
 0xd78   :  { %v2647_v38 = vpop.f32.mrf.mxu3 }
 0xd79   :  { %v2657_v46 = vadd.f32 %v2647_v38, %v2610_v26  ;;  %v2886_v47 = vpop.f32.mrf.mxu2 }
 0xd7a   :  { %v2712_v45 = vpop.f32.mrf.mxu0 }
 0xd7b   :  { %v2720_v20 = vadd.f32 %v2710_v27, %v2657_v46  ;;  %v2800_v36 = vpop.f32.mrf.mxu1  ;;  %v2613_v27 = vadd.f32 %v2607_v40, %v2550_v54 }
 0xd7d   :  { %v2808_v16 = vadd.f32 %v2798_v4, %v2720_v20 }
 0xd7f   :  { %v2896_v30 = vadd.f32 %v2886_v47, %v2808_v16 }
 0xd80   :  { %v2649_v49 = vpop.f32.mrf.mxu3 }
 0xd81   :  { %v2658_v50 = vadd.f32 %v2649_v49, %v2611_v39  ;;  %v2888_v7 = vpop.f32.mrf.mxu2 }
 0xd82   :  { %v2715_v29 = vpop.f32.mrf.mxu0 }
 0xd83   :  { %v2721_v0 = vadd.f32 %v2712_v45, %v2658_v50  ;;  %v2803_v37 = vpop.f32.mrf.mxu1 }
 0xd85   :  { %v2809_v41 = vadd.f32 %v2800_v36, %v2721_v0 }
 0xd87   :  { %v2897_v42 = vadd.f32 %v2888_v7, %v2809_v41  ;;  %v5124_v7 = vld [vmem:[%s6861_s6 + $0x28] ss:$0 sm:$0xff] }
 0xd88   :  { %v2652_v62 = vpop.f32.mrf.mxu3 }
 0xd89   :  { %v2659_v49 = vadd.f32 %v2652_v62, %v2612_v63  ;;  %v2891_v16 = vpop.f32.mrf.mxu2 }
 0xd8a   :  { %v2717_v61 = vpop.f32.mrf.mxu0 }
 0xd8b   :  { %v2722_v58 = vadd.f32 %v2715_v29, %v2659_v49  ;;  %v2805_v3 = vpop.f32.mrf.mxu1 }
 0xd8d   :  { %v2810_v17 = vadd.f32 %v2803_v37, %v2722_v58 }
 0xd8f   :  { %v2898_v62 = vadd.f32 %v2891_v16, %v2810_v17 }
 0xd90   :  { %v2654_v1 = vpop.f32.mrf.mxu3 }
 0xd91   :  { %v2660_v53 = vadd.f32 %v2654_v1, %v2613_v27  ;;  %v2893_v40 = vpop.f32.mrf.mxu2 }
 0xd98   :  { %v2963_v10 = vpop.f32.mrf.mxu3 }
 0xd99   :  { %v2973_v38 = vadd.f32 %v2963_v10, %v2896_v30  ;;  %v2723_v10 = vadd.f32 %v2717_v61, %v2660_v53 }
 0xd9b   :  { %v2979_v21 = vadd.f32 %v5123_v60, %v2973_v38  ;;  %v2811_v46 = vadd.f32 %v2805_v3, %v2723_v10 }
 0xd9d   :  { %v2983_v4 = vmax.f32 %v2979_v21, 0.0  ;;  %v2899_v39 = vadd.f32 %v2893_v40, %v2811_v46 }
 0xda0   :  { %v2965_v24 = vpop.f32.mrf.mxu3 }
 0xda1   :  { %v2974_v19 = vadd.f32 %v2965_v24, %v2897_v42 }
 0xda3   :  { %v2980_v23 = vadd.f32 %v5123_v60, %v2974_v19 }
 0xda5   :  { %v2984_v26 = vmax.f32 %v2980_v23, 0.0 }
 0xda7   :  { %v2995_v28 = vpack.c.bf16 %v2984_v26, %v2983_v4 }
 0xda8   :  { %v2968_v8 = vpop.f32.mrf.mxu3 }
 0xda9   :  { %4830 = vmatmul.msk.bf16.vlgmr.msrb.gmra.mxu0 %vm6904_vm14, %v2995_v28  ;;  %v2975_v47 = vadd.f32 %v2968_v8, %v2898_v62 }
 0xdab   :  { %v2981_v20 = vadd.f32 %v5123_v60, %v2975_v47 }
 0xdad   :  { %v2985_v51 = vmax.f32 %v2981_v20, 0.0 }
 0xdb0   :  { %v2970_v45 = vpop.f32.mrf.mxu3 }
 0xdb1   :  { %v2976_v1 = vadd.f32 %v2970_v45, %v2899_v39 }
 0xdb3   :  { %v2982_v50 = vadd.f32 %v5123_v60, %v2976_v1 }
 0xdb5   :  { %v2986_v36 = vmax.f32 %v2982_v50, 0.0 }
 0xdb7   :  { %v2996_v0 = vpack.c.bf16 %v2986_v36, %v2985_v51  ;;  %v5029_v51 = vld [vmem:[#allocation2 + $0xd8] sm:$0xff] }
 0xdb8   :  { %3188 = vmatpush.bf16.msrb.mxu1 %v5029_v51 }
 0xdb9   :  { %4831 = vmatmul.msk.bf16.gmra.mxu0 %vm6905_vm5, %v2996_v0 }
 0xe26   :  { %v3038_v30 = vpop.f32.mrf.mxu0 }
 0xe27   :  { %v3039_v41 = vadd.f32 %v5124_v7, %v3038_v30 }
 0xe29   :  { %v3048_v29 = vadd.f32 %v3039_v41, %v6164_v22 }
 0xe2b   :  { %v3054_v63 = vsel %vm177_vm4, %v3048_v29, 0.0 }
 0xe2c   :  { %3055 = vadd.xlane.f32.xlu1 %v3054_v63 }
 0xe2e   :  { %v3040_v54 = vpop.f32.mrf.mxu0 }
 0xe2f   :  { %v3041_v38 = vadd.f32 %v5124_v7, %v3040_v54 }
 0xe31   :  { %v3049_v60 = vadd.f32 %v3041_v38, %v6187_v2 }
 0xe33   :  { %v3057_v42 = vsel %vm177_vm4, %v3049_v60, 0.0 }
 0xe34   :  { %3058 = vadd.xlane.f32.xlu0 %v3057_v42 }
 0xe36   :  { %v3043_v49 = vpop.f32.mrf.mxu0 }
 0xe37   :  { %v3044_v37 = vadd.f32 %v5124_v7, %v3043_v49 }
 0xe39   :  { %v3050_v24 = vadd.f32 %v3044_v37, %v6231_v15 }
 0xe3b   :  { %v3060_v27 = vsel %vm177_vm4, %v3050_v24, 0.0 }
 0xe3c   :  { %3061 = vadd.xlane.f32.xlu2 %v3060_v27 }
 0xe3e   :  { %v3045_v21 = vpop.f32.mrf.mxu0 }
 0xe3f   :  { %v3046_v19 = vadd.f32 %v5124_v7, %v3045_v21  ;;  %v5028_v7 = vld [vmem:[#allocation2 + $0xd0] sm:$0xff] }
 0xe40   :  { %3189 = vmatpush.bf16.msrb.mxu1 %v5028_v7 }
 0xe41   :  { %v3051_v22 = vadd.f32 %v3046_v19, %v6258_v18 }
 0xe43   :  { %v3063_v58 = vsel %vm177_vm4, %v3051_v22, 0.0 }
 0xe44   :  { %3064 = vadd.xlane.f32.xlu1 %v3063_v58 }
 0xe9f   :  { %v3056_v53 = vpop.xlane.xlu1 %3055 }
 0xea0   :  { %v3066_v2 = vmul.f32 %v3056_v53, %v5471_v34  ;;  %v5125_v53 = vld [vmem:[%s6861_s6 + $0x30] ss:$0 sm:$0xff] }
 0xea2   :  { %v3070_v23 = vsub.f32 %v3048_v29, %v3066_v2 }
 0xea4   :  { %v3074_v16 = vmul.f32 %v3070_v23, %v3070_v23 }
 0xea6   :  { %v3078_v4 = vsel %vm177_vm4, %v3074_v16, 0.0 }
 0xea7   :  { %v3059_v26 = vpop.xlane.xlu0 %3058  ;;  %3079 = vadd.xlane.f32.xlu0 %v3078_v4 }
 0xea8   :  { %v3067_v15 = vmul.f32 %v3059_v26, %v5471_v34 }
 0xeaa   :  { %v6402_v61 = vsub.f32 %v3049_v60, %v3067_v15 }
 0xeac   :  { %v3075_v17 = vmul.f32 %v6402_v61, %v6402_v61 }
 0xeae   :  { %v3081_v18 = vsel %vm177_vm4, %v3075_v17, 0.0 }
 0xeaf   :  { %v3062_v10 = vpop.xlane.xlu2 %3061  ;;  %3082 = vadd.xlane.f32.xlu2 %v3081_v18 }
 0xeb0   :  { %v3068_v28 = vmul.f32 %v3062_v10, %v5471_v34  ;;  %v5126_v10 = vld [vmem:[%s6861_s6 + $0x38] ss:$0 sm:$0xff] }
 0xeb2   :  { %v6408_v8 = vsub.f32 %v3050_v24, %v3068_v28 }
 0xeb4   :  { %v3076_v3 = vmul.f32 %v6408_v8, %v6408_v8 }
 0xeb6   :  { %v3084_v62 = vsel %vm177_vm4, %v3076_v3, 0.0 }
 0xeb7   :  { %3085 = vadd.xlane.f32.xlu1 %v3084_v62  ;;  %v3065_v46 = vpop.xlane.xlu1 %3064 }
 0xeb8   :  { %v3069_v47 = vmul.f32 %v3065_v46, %v5471_v34 }
 0xeba   :  { %v6414_v40 = vsub.f32 %v3051_v22, %v3069_v47 }
 0xebc   :  { %v3077_v39 = vmul.f32 %v6414_v40, %v6414_v40 }
 0xebe   :  { %v3087_v45 = vsel %vm177_vm4, %v3077_v39, 0.0 }
 0xebf   :  { %3088 = vadd.xlane.f32.xlu0 %v3087_v45 }
 0xf1a   :  { %v3080_v20 = vpop.xlane.xlu0 %3079 }
 0xf1b   :  { %v3090_v1 = vmul.f32 %v3080_v20, %v5471_v34 }
 0xf1d   :  { %v3094_v50 = vadd.f32 1e-05, %v3090_v1 }
 0xf1f   :  { %5210 = vrsqrt.f32 %v3094_v50  ;;  %vm3104_vm14 = vweird.f32 %v3094_v50 }
 0xf22   :  { %v3083_v36 = vpop.xlane.xlu2 %3082 }
 0xf23   :  { %v3091_v0 = vmul.f32 %v3083_v36, %v5471_v34 }
 0xf25   :  { %v5211_v30 = vpop.eup %5210  ;;  %v3095_v41 = vadd.f32 1e-05, %v3091_v0 }
 0xf26   :  { %v3099_v29 = vmul.f32 %v5211_v30, %v3094_v50  ;;  %vm3105_vm5 = vweird.f32 %v5211_v30 }
 0xf27   :  { %5212 = vrsqrt.f32 %v3095_v41  ;;  %vm3106_vm12 = vmor %vm3104_vm14, %vm3105_vm5  ;;  %vm3114_vm15 = vweird.f32 %v3095_v41 }
 0xf28   :  { %v3100_v63 = vmul.f32 %v5211_v30, %v3099_v29 }
 0xf2a   :  { %v3101_v54 = vmul.f32 0.5, %v3100_v63  ;;  %v3086_v38 = vpop.xlane.xlu1 %3085 }
 0xf2b   :  { %v3092_v60 = vmul.f32 %v3086_v38, %v5471_v34 }
 0xf2c   :  { %v3102_v42 = vsub.f32 1.5, %v3101_v54 }
 0xf2d   :  { %v5213_v49 = vpop.eup %5212  ;;  %v3096_v37 = vadd.f32 1e-05, %v3092_v60 }
 0xf2e   :  { %v3103_v24 = vmul.f32 %v5211_v30, %v3102_v42  ;;  %v3109_v27 = vmul.f32 %v5213_v49, %v3095_v41  ;;  %vm3115_vm7 = vweird.f32 %v5213_v49 }
 0xf2f   :  { %5214 = vrsqrt.f32 %v3096_v37  ;;  %vm3124_vm14 = vweird.f32 %v3096_v37 }
 0xf30   :  { %v3107_v21 = vsel %vm3106_vm12, %v5211_v30, %v3103_v24  ;;  %v3110_v19 = vmul.f32 %v5213_v49, %v3109_v27  ;;  %vm3116_vm12 = vmor %vm3114_vm15, %vm3115_vm7 }
 0xf31   :  { %v3138_v2 = vmul.f32 %v3107_v21, %v3070_v23 }
 0xf32   :  { %v3111_v22 = vmul.f32 0.5, %v3110_v19  ;;  %v3089_v58 = vpop.xlane.xlu0 %3088 }
 0xf33   :  { %v3093_v16 = vmul.f32 %v3089_v58, %v5471_v34  ;;  %v3143_v28 = vmul.f32 %v5125_v53, %v3138_v2 }
 0xf34   :  { %v3112_v4 = vsub.f32 1.5, %v3111_v22  ;;  %v5127_v22 = vld [vmem:[%s6861_s6 + $0x40] ss:$0 sm:$0xff] }
 0xf35   :  { %v5215_v26 = vpop.eup %5214  ;;  %v3097_v15 = vadd.f32 1e-05, %v3093_v16  ;;  %v3148_v47 = vadd.f32 %v5126_v10, %v3143_v28 }
 0xf36   :  { %v3113_v17 = vmul.f32 %v5213_v49, %v3112_v4  ;;  %v3119_v18 = vmul.f32 %v5215_v26, %v3096_v37  ;;  %vm3125_vm5 = vweird.f32 %v5215_v26 }
 0xf37   :  { %5216 = vrsqrt.f32 %v3097_v15  ;;  %v6431_v36 = vmul.f32 %v3148_v47, %v6161_v12  ;;  %vm3126_vm15 = vmor %vm3124_vm14, %vm3125_vm5 }
 0xf38   :  { %v3117_v3 = vsel %vm3116_vm12, %v5213_v49, %v3113_v17  ;;  %v3120_v62 = vmul.f32 %v5215_v26, %v3119_v18  ;;  %vm3134_vm12 = vweird.f32 %v3097_v15 }
 0xf39   :  { %v3139_v23 = vmul.f32 %v3117_v3, %v6402_v61 }
 0xf3a   :  { %v3121_v46 = vmul.f32 0.5, %v3120_v62 }
 0xf3b   :  { %v3144_v39 = vmul.f32 %v5125_v53, %v3139_v23 }
 0xf3c   :  { %v3122_v45 = vsub.f32 1.5, %v3121_v46 }
 0xf3d   :  { %v5217_v20 = vpop.eup %5216  ;;  %v3149_v1 = vadd.f32 %v5126_v10, %v3144_v39 }
 0xf3e   :  { %v3123_v50 = vmul.f32 %v5215_v26, %v3122_v45  ;;  %v3129_v51 = vmul.f32 %v5217_v20, %v3097_v15  ;;  %vm3135_vm7 = vweird.f32 %v5217_v20 }
 0xf3f   :  { %v6434_v0 = vmul.f32 %v3149_v1, %v6144_v44  ;;  %vm3136_vm1 = vmor %vm3134_vm12, %vm3135_vm7 }
 0xf40   :  { %v3127_v7 = vsel %vm3126_vm15, %v5215_v26, %v3123_v50  ;;  %v3130_v30 = vmul.f32 %v5217_v20, %v3129_v51 }
 0xf41   :  { %v3160_v61 = vpack.c.bf16 %v6434_v0, %v6431_v36  ;;  %v3140_v29 = vmul.f32 %v3127_v7, %v6408_v8 }
 0xf42   :  { %v3131_v41 = vmul.f32 0.5, %v3130_v30 }
 0xf43   :  { %4840 = vmatmul.msk.bf16.vlgmr.msrb.gmra.mxu1 %vm177_vm4, %v3160_v61  ;;  %v3145_v38 = vmul.f32 %v5125_v53, %v3140_v29 }
 0xf44   :  { %v3132_v63 = vsub.f32 1.5, %v3131_v41 }
 0xf45   :  { %v3150_v37 = vadd.f32 %v5126_v10, %v3145_v38 }
 0xf46   :  { %v3133_v54 = vmul.f32 %v5217_v20, %v3132_v63 }
 0xf47   :  { %v6442_v27 = vmul.f32 %v3150_v37, %v6227_v43 }
 0xf48   :  { %v3137_v60 = vsel %vm3136_vm1, %v5217_v20, %v3133_v54 }
 0xf49   :  { %v3141_v42 = vmul.f32 %v3137_v60, %v6414_v40 }
 0xf4b   :  { %v3146_v49 = vmul.f32 %v5125_v53, %v3141_v42 }
 0xf4d   :  { %v3151_v24 = vadd.f32 %v5126_v10, %v3146_v49 }
 0xf4f   :  { %v6445_v21 = vmul.f32 %v3151_v24, %v6249_v5 }
 0xf51   :  { %v3161_v8 = vpack.c.bf16 %v6445_v21, %v6442_v27 }
 0xf53   :  { %4841 = vmatmul.msk.bf16.gmra.mxu1 %vm177_vm4, %v3161_v8 }
 0xfc0   :  { %v3191_v19 = vpop.f32.mrf.mxu1 }
 0xfc1   :  { %v3192_v58 = vadd.f32 %v5127_v22, %v3191_v19 }
 0xfc8   :  { %v3193_v40 = vpop.f32.mrf.mxu1 }
 0xfc9   :  { %v3194_v53 = vadd.f32 %v5127_v22, %v3193_v40 }
 0xfcb   :  { %v6453_v2 = vpack.c.bf16 %v3194_v53, %v3192_v58 }
 0xfcd   :  { %3298 = vrot.lane.b32.xlu1 %v6453_v2, %s5331_s28  ;;  %3300 = vrot.lane.b32.xlu2 %v6453_v2, %s5330_s27 }
 0xfd0   :  { %v3196_v16 = vpop.f32.mrf.mxu1 }
 0xfd1   :  { %v3197_v26 = vadd.f32 %v5127_v22, %v3196_v16 }
 0xfd8   :  { %v3198_v4 = vpop.f32.mrf.mxu1 }
 0xfd9   :  { %v3199_v15 = vadd.f32 %v5127_v22, %v3198_v4 }
 0xfdb   :  { %v6459_v17 = vpack.c.bf16 %v3199_v15, %v3197_v26 }
 0xfdd   :  { %3407 = vrot.lane.b32.xlu1 %v6459_v17, %s5329_s0  ;;  %3502 = vrot.lane.b32.xlu2 %v6459_v17, %s5331_s28 }
 0xfde   :  { %3504 = vrot.lane.b32.xlu0 %v6459_v17, %s5330_s27 }
 0xfe6   :  { %3203 = vrot.lane.b32.xlu0 %v6453_v2, %s5329_s0 }
0x1027   :  { %v3301_v18 = vpop.permute.xlu2 %3300 }
0x1028   :  { %v3306_v10 = vsel %vm1707_vm8, %v3301_v18, 0 }
0x1029   :  { %3315 = vmatpush.bf16.xpose.msra.mxu0 %v3306_v10 }
0x1037   :  { %v3503_v46 = vpop.permute.xlu2 %3502 }
0x103f   :  { %v3299_v28 = vpop.permute.xlu1 %3298 }
0x1040   :  { %4844 = vmatmul.msk.bf16.vlgmr.msra.gmra.mxu0 %vm1707_vm8, %v3299_v28 }
0x104f   :  { %v3408_v23 = vpop.permute.xlu1 %3407 }
0x1050   :  { %v3505_v3 = vpop.permute.xlu0 %3504  ;;  %v3413_v45 = vsel %vm1707_vm8, %v3408_v23, 0 }
0x1051   :  { %v3510_v62 = vsel %vm1707_vm8, %v3505_v3, 0 }
0x1052   :  { %3519 = vmatpush.bf16.xpose.msrb.mxu0 %v3510_v62 }
0x1058   :  { %v3204_v47 = vpop.permute.xlu0 %3203 }
0x1059   :  { %v3209_v39 = vsel %vm1707_vm8, %v3204_v47, 0  ;;  %4848 = vmatmul.msk.bf16.vlgmr.msrb.gmra.mxu0 %vm1707_vm8, %v3503_v46 }
0x105a   :  { %3218 = vmatpush.bf16.xpose.msra.mxu2 %v3209_v39 }
0x1061   :  { %4842 = vmatmul.msk.bf16.vlgmr.msra.gmra.mxu2 %vm1707_vm8, %v6453_v2 }
0x1062   :  { %3422 = vmatpush.bf16.xpose.msrb.mxu2 %v3413_v45 }
0x1071   :  { %4846 = vmatmul.msk.bf16.vlgmr.msrb.gmra.mxu2 %vm1707_vm8, %v6459_v17 }
0x10bd   :  { %v3317_v20 = vpop.f32.mrf.mxu0 }
0x10be   :  { %v3322_v1 = vmul.f32 0.25, %v3317_v20 }
0x10c0   :  { %v3324_v50 = vsel %vm5984_vm11, %v3322_v1, -1e+09 }
0x10c1   :  { %v3326_v51 = vsel %vm1707_vm8, %v3324_v50, -inf }
0x10c2   :  { %3327 = vmax.xlane.f32.xlu2 %v3326_v51 }
0x10c5   :  { %v3319_v7 = vpop.f32.mrf.mxu0 }
0x10c6   :  { %v3323_v30 = vmul.f32 0.25, %v3319_v7 }
0x10c8   :  { %v3325_v61 = vsel %vm5984_vm11, %v3323_v30, -1e+09 }
0x10c9   :  { %v3329_v41 = vsel %vm1707_vm8, %v3325_v61, -inf }
0x10ca   :  { %3330 = vmax.xlane.f32.xlu0 %v3329_v41 }
0x10d6   :  { %v3521_v29 = vpop.f32.mrf.mxu0 }
0x10d7   :  { %v3526_v63 = vmul.f32 0.25, %v3521_v29 }
0x10d9   :  { %v3528_v54 = vsel %vm5997_vm13, %v3526_v63, -1e+09 }
0x10da   :  { %v3530_v38 = vsel %vm1707_vm8, %v3528_v54, -inf }
0x10db   :  { %3531 = vmax.xlane.f32.xlu1 %v3530_v38 }
0x10de   :  { %v3523_v60 = vpop.f32.mrf.mxu0 }
0x10df   :  { %v3527_v42 = vmul.f32 0.25, %v3523_v60 }
0x10e1   :  { %v3529_v49 = vsel %vm5997_vm13, %v3527_v42, -1e+09 }
0x10e2   :  { %v3533_v37 = vsel %vm1707_vm8, %v3529_v49, -inf }
0x10e3   :  { %3534 = vmax.xlane.f32.xlu2 %v3533_v37 }
0x10e4   :  { %v3220_v24 = vpop.f32.mrf.mxu2 }
0x10e5   :  { %v3225_v8 = vmul.f32 0.25, %v3220_v24 }
0x10e7   :  { %v3227_v19 = vsel %vm5984_vm11, %v3225_v8, -1e+09 }
0x10e8   :  { %v3229_v22 = vsel %vm1707_vm8, %v3227_v19, -inf }
0x10e9   :  { %3230 = vmax.xlane.f32.xlu0 %v3229_v22 }
0x10ec   :  { %v3222_v40 = vpop.f32.mrf.mxu2 }
0x10ed   :  { %v3226_v58 = vmul.f32 0.25, %v3222_v40 }
0x10ef   :  { %v3228_v53 = vsel %vm5984_vm11, %v3226_v58, -1e+09 }
0x10f0   :  { %v3232_v16 = vsel %vm1707_vm8, %v3228_v53, -inf }
0x10f1   :  { %3233 = vmax.xlane.f32.xlu1 %v3232_v16 }
0x10f4   :  { %v3424_v4 = vpop.f32.mrf.mxu2 }
0x10f5   :  { %v3429_v26 = vmul.f32 0.25, %v3424_v4 }
0x10f7   :  { %v3431_v15 = vsel %vm5997_vm13, %v3429_v26, -1e+09 }
0x10f8   :  { %v3433_v18 = vsel %vm1707_vm8, %v3431_v15, -inf }
0x10f9   :  { %3434 = vmax.xlane.f32.xlu2 %v3433_v18 }
0x10fc   :  { %v3426_v10 = vpop.f32.mrf.mxu2 }
0x10fd   :  { %v3430_v28 = vmul.f32 0.25, %v3426_v10 }
0x10ff   :  { %v3432_v3 = vsel %vm5997_vm13, %v3430_v28, -1e+09 }
0x1100   :  { %v3436_v62 = vsel %vm1707_vm8, %v3432_v3, -inf }
0x1101   :  { %3437 = vmax.xlane.f32.xlu0 %v3436_v62 }
0x1135   :  { %v3328_v13 = vpop.xlane.xlu2 %3327 }
0x1136   :  { %v3332_v23 = vsub.f32 %v3324_v50, %v3328_v13 }
0x1138   :  { %v3334_v46 = vmul.f32 1.442695, %v3332_v23 }
0x113a   :  { %5218 = vpow2.f32 %v3334_v46 }
0x113d   :  { %v3331_v47 = vpop.xlane.xlu0 %3330 }
0x113e   :  { %v3333_v39 = vsub.f32 %v3325_v61, %v3331_v47 }
0x1140   :  { %v6503_v45 = vpop.eup %5218  ;;  %v3336_v20 = vmul.f32 1.442695, %v3333_v39 }
0x1141   :  { %v3338_v1 = vsel %vm1707_vm8, %v6503_v45, 0.0 }
0x1142   :  { %5220 = vpow2.f32 %v3336_v20  ;;  %3339 = vadd.xlane.f32.xlu1 %v3338_v1 }
0x1148   :  { %v6507_v51 = vpop.eup %5220 }
0x1149   :  { %v3341_v25 = vsel %vm1707_vm8, %v6507_v51, 0.0 }
0x114a   :  { %3342 = vadd.xlane.f32.xlu2 %v3341_v25 }
0x114e   :  { %v3532_v7 = vpop.xlane.xlu1 %3531 }
0x114f   :  { %v3536_v41 = vsub.f32 %v3528_v54, %v3532_v7 }
0x1151   :  { %v3538_v61 = vmul.f32 1.442695, %v3536_v41 }
0x1156   :  { %v3535_v63 = vpop.xlane.xlu2 %3534 }
0x1157   :  { %v3537_v37 = vsub.f32 %v3529_v49, %v3535_v63 }
0x1159   :  { %v3540_v54 = vmul.f32 1.442695, %v3537_v37 }
0x115c   :  { %v3231_v50 = vpop.xlane.xlu0 %3230 }
0x115d   :  { %v3235_v30 = vsub.f32 %v3227_v19, %v3231_v50 }
0x115f   :  { %v3237_v29 = vmul.f32 1.442695, %v3235_v30 }
0x1161   :  { %5222 = vpow2.f32 %v3237_v29 }
0x1162   :  { %3375 = vrot.lane.b32.xlu2 %v6453_v2, %s5332_s2  ;;  %5224 = vpow2.f32 %v3538_v61 }
0x1164   :  { %v3234_v38 = vpop.xlane.xlu1 %3233 }
0x1165   :  { %v3236_v60 = vsub.f32 %v3228_v53, %v3234_v38 }
0x1167   :  { %v6513_v42 = vpop.eup %5222  ;;  %v3239_v24 = vmul.f32 1.442695, %v3236_v60 }
0x1168   :  { %v3241_v8 = vsel %vm1707_vm8, %v6513_v42, 0.0  ;;  %v6519_v22 = vpop.eup %5224 }
0x1169   :  { %5226 = vpow2.f32 %v3239_v24  ;;  %3242 = vadd.xlane.f32.xlu0 %v3241_v8  ;;  %v3542_v49 = vsel %vm1707_vm8, %v6519_v22, 0.0 }
0x116a   :  { %3278 = vrot.lane.b32.xlu2 %v6453_v2, %s5323_s10  ;;  %5228 = vpow2.f32 %v3540_v54 }
0x116c   :  { %v3435_v19 = vpop.xlane.xlu2 %3434 }
0x116d   :  { %v3439_v58 = vsub.f32 %v3431_v15, %v3435_v19 }
0x116f   :  { %v6521_v40 = vpop.eup %5226  ;;  %v3441_v16 = vmul.f32 1.442695, %v3439_v58 }
0x1170   :  { %v3244_v53 = vsel %vm1707_vm8, %v6521_v40, 0.0  ;;  %v6527_v26 = vpop.eup %5228 }
0x1171   :  { %3543 = vadd.xlane.f32.xlu0 %v3542_v49  ;;  %3245 = vadd.xlane.f32.xlu1 %v3244_v53  ;;  %5230 = vpow2.f32 %v3441_v16  ;;  %v3545_v18 = vsel %vm1707_vm8, %v6527_v26, 0.0 }
0x1174   :  { %v3438_v4 = vpop.xlane.xlu0 %3437 }
0x1175   :  { %v3440_v2 = vsub.f32 %v3432_v3, %v3438_v4 }
0x1177   :  { %v3443_v10 = vmul.f32 1.442695, %v3440_v2  ;;  %v6531_v15 = vpop.eup %5230 }
0x1178   :  { %v3445_v28 = vsel %vm1707_vm8, %v6531_v15, 0.0 }
0x1179   :  { %3546 = vadd.xlane.f32.xlu1 %v3545_v18  ;;  %5232 = vpow2.f32 %v3443_v10 }
0x117f   :  { %v6535_v62 = vpop.eup %5232 }
0x1180   :  { %v3448_v3 = vsel %vm1707_vm8, %v6535_v62, 0.0 }
0x1181   :  { %3446 = vadd.xlane.f32.xlu1 %v3445_v28 }
0x1185   :  { %3579 = vrot.lane.b32.xlu0 %v6459_v17, %s5332_s2 }
0x1189   :  { %3449 = vadd.xlane.f32.xlu1 %v3448_v3 }
0x11a2   :  { %3482 = vrot.lane.b32.xlu1 %v6459_v17, %s5323_s10 }
0x11b5   :  { %v3340_v13 = vpop.xlane.xlu1 %3339 }
0x11b6   :  { %5234 = vrcp.f32 %v3340_v13  ;;  %v3355_v30 = vand.u32 2147483648, %v3340_v13  ;;  %vm3349_vm11 = vweird.f32 %v3340_v13  ;;  %v3353_v41 = vand.u32 2147483647, %v3340_v13 }
0x11b8   :  { %v3356_v60 = vor.u32 1.1754944e-38, %v3355_v30  ;;  %vm3354_vm14 = vcmp.eq.f32.partialorder %v3353_v41, 8.507059e+37 }
0x11bc   :  { %v5235_v23 = vpop.eup %5234 }
0x11bd   :  { %v3345_v46 = vmul.f32 %v5235_v23, %v3340_v13  ;;  %v3343_v47 = vpop.xlane.xlu2 %3342  ;;  %vm3350_vm1 = vweird.f32 %v5235_v23 }
0x11be   :  { %5236 = vrcp.f32 %v3343_v47  ;;  %vm3351_vm13 = vmor %vm3349_vm11, %vm3350_vm1  ;;  %v3370_v17 = vand.u32 2147483648, %v3343_v47  ;;  %v3368_v38 = vand.u32 2147483647, %v3343_v47  ;;  %vm3364_vm15 = vweird.f32 %v3343_v47 }
0x11bf   :  { %v3346_v39 = vsub.f32 1.0, %v3345_v46 }
0x11c0   :  { %v3371_v8 = vor.u32 1.1754944e-38, %v3370_v17  ;;  %vm3369_vm12 = vcmp.eq.f32.partialorder %v3368_v38, 8.507059e+37 }
0x11c1   :  { %v3347_v20 = vmul.f32 %v5235_v23, %v3346_v39 }
0x11c3   :  { %v3348_v25 = vadd.f32 %v5235_v23, %v3347_v20 }
0x11c4   :  { %v5237_v1 = vpop.eup %5236 }
0x11c5   :  { %v3360_v7 = vmul.f32 %v5237_v1, %v3343_v47  ;;  %v3376_v50 = vpop.permute.xlu2 %3375  ;;  %v3352_v61 = vsel %vm3351_vm13, %v5235_v23, %v3348_v25  ;;  %vm3365_vm5 = vweird.f32 %v5237_v1 }
0x11c6   :  { %3388 = vmatpush.bf16.msra.mxu1 %v3376_v50  ;;  %v3357_v24 = vsel %vm3354_vm14, %v3356_v60, %v3352_v61  ;;  %vm3366_vm7 = vmor %vm3364_vm15, %vm3365_vm5 }
0x11c7   :  { %v3361_v29 = vsub.f32 1.0, %v3360_v7  ;;  %v3358_v49 = vmul.f32 %v6503_v45, %v3357_v24 }
0x11c9   :  { %v3362_v63 = vmul.f32 %v5237_v1, %v3361_v29 }
0x11cb   :  { %v3363_v37 = vadd.f32 %v5237_v1, %v3362_v63 }
0x11cd   :  { %v3367_v54 = vsel %vm3366_vm7, %v5237_v1, %v3363_v37  ;;  %v3279_v19 = vpop.permute.xlu2 %3278 }
0x11ce   :  { %v3372_v58 = vsel %vm3369_vm12, %v3371_v8, %v3367_v54  ;;  %3291 = vmatpush.bf16.msra.mxu3 %v3279_v19 }
0x11cf   :  { %v3373_v53 = vmul.f32 %v6507_v51, %v3372_v58 }
0x11d1   :  { %v3374_v16 = vpack.c.bf16 %v3373_v53, %v3358_v49 }
0x11d3   :  { %4845 = vmatmul.msk.bf16.vlgmr.msra.gmra.mxu1 %vm1707_vm8, %v3374_v16 }
0x11dc   :  { %v3243_v4 = vpop.xlane.xlu0 %3242 }
0x11dd   :  { %5238 = vrcp.f32 %v3243_v4  ;;  %v3258_v20 = vand.u32 2147483648, %v3243_v4  ;;  %vm3252_vm11 = vweird.f32 %v3243_v4  ;;  %v3256_v25 = vand.u32 2147483647, %v3243_v4 }
0x11df   :  { %v3259_v61 = vor.u32 1.1754944e-38, %v3258_v20  ;;  %vm3257_vm14 = vcmp.eq.f32.partialorder %v3256_v25, 8.507059e+37 }
0x11e3   :  { %v5239_v2 = vpop.eup %5238 }
0x11e4   :  { %v3248_v18 = vmul.f32 %v5239_v2, %v3243_v4  ;;  %v3544_v10 = vpop.xlane.xlu0 %3543  ;;  %v3246_v28 = vpop.xlane.xlu1 %3245  ;;  %vm3253_vm1 = vweird.f32 %v5239_v2 }
0x11e5   :  { %5240 = vrcp.f32 %v3544_v10  ;;  %v3273_v50 = vand.u32 2147483648, %v3246_v28  ;;  %vm3254_vm13 = vmor %vm3252_vm11, %vm3253_vm1  ;;  %v3271_v17 = vand.u32 2147483647, %v3246_v28  ;;  %vm3267_vm15 = vweird.f32 %v3246_v28 }
0x11e6   :  { %v3249_v3 = vsub.f32 1.0, %v3248_v18  ;;  %5242 = vrcp.f32 %v3246_v28  ;;  %v3559_v19 = vand.u32 2147483648, %v3544_v10  ;;  %vm3553_vm11 = vweird.f32 %v3544_v10 }
0x11e7   :  { %v3274_v60 = vor.u32 1.1754944e-38, %v3273_v50  ;;  %vm3272_vm1 = vcmp.eq.f32.partialorder %v3271_v17, 8.507059e+37  ;;  %v3557_v49 = vand.u32 2147483647, %v3544_v10 }
0x11e8   :  { %v3250_v13 = vmul.f32 %v5239_v2, %v3249_v3 }
0x11ea   :  { %v3251_v45 = vadd.f32 %v5239_v2, %v3250_v13 }
0x11eb   :  { %v5241_v23 = vpop.eup %5240 }
0x11ec   :  { %v5243_v46 = vpop.eup %5242  ;;  %v3549_v47 = vmul.f32 %v5241_v23, %v3544_v10  ;;  %v3547_v39 = vpop.xlane.xlu1 %3546  ;;  %v3255_v41 = vsel %vm3254_vm13, %v5239_v2, %v3251_v45  ;;  %vm3554_vm7 = vweird.f32 %v5241_v23  ;;  %v3560_v10 = vor.u32 1.1754944e-38, %v3559_v19 }
0x11ed   :  { %v3263_v51 = vmul.f32 %v5243_v46, %v3246_v28  ;;  %5244 = vrcp.f32 %v3547_v39  ;;  %vm3268_vm5 = vweird.f32 %v5243_v46  ;;  %v3260_v37 = vsel %vm3257_vm14, %v3259_v61, %v3255_v41  ;;  %vm6550_vm13 = vmor %vm3553_vm11, %vm3554_vm7 }
0x11ee   :  { %v3550_v1 = vsub.f32 1.0, %v3549_v47  ;;  %vm3269_vm12 = vmor %vm3267_vm15, %vm3268_vm5  ;;  %v3261_v4 = vmul.f32 %v6513_v42, %v3260_v37  ;;  %v3574_v28 = vand.u32 2147483648, %v3547_v39  ;;  %v3572_v47 = vand.u32 2147483647, %v3547_v39 }
0x11ef   :  { %v3264_v7 = vsub.f32 1.0, %v3263_v51  ;;  %vm3558_vm14 = vcmp.eq.f32.partialorder %v3557_v49, 8.507059e+37  ;;  %vm3568_vm15 = vweird.f32 %v3547_v39 }
0x11f0   :  { %v3551_v30 = vmul.f32 %v5241_v23, %v3550_v1  ;;  %v3575_v1 = vor.u32 1.1754944e-38, %v3574_v28 }
0x11f1   :  { %v3265_v29 = vmul.f32 %v5243_v46, %v3264_v7 }
0x11f2   :  { %v3552_v24 = vadd.f32 %v5241_v23, %v3551_v30 }
0x11f3   :  { %v5245_v63 = vpop.eup %5244  ;;  %v3266_v38 = vadd.f32 %v5243_v46, %v3265_v29 }
0x11f4   :  { %v3564_v8 = vmul.f32 %v5245_v63, %v3547_v39  ;;  %v6546_v54 = vpop.xlane.xlu1 %3446  ;;  %v3556_v13 = vsel %vm6550_vm13, %v5241_v23, %v3552_v24  ;;  %vm3569_vm5 = vweird.f32 %v5245_v63 }
0x11f5   :  { %v3270_v58 = vsel %vm3269_vm12, %v5243_v46, %v3266_v38  ;;  %5246 = vrcp.f32 %v6546_v54  ;;  %v3561_v20 = vsel %vm3558_vm14, %v3560_v10, %v3556_v13  ;;  %vm3570_vm7 = vmor %vm3568_vm15, %vm3569_vm5  ;;  %vm3573_vm12 = vcmp.eq.f32.partialorder %v3572_v47, 8.507059e+37  ;;  %v5031_v10 = vld [vmem:[#allocation2 + $0xe8] sm:$0xff] }
0x11f6   :  { %v3275_v53 = vsel %vm3272_vm1, %v3274_v60, %v3270_v58  ;;  %v3565_v16 = vsub.f32 1.0, %v3564_v8  ;;  %v3562_v23 = vmul.f32 %v6519_v22, %v3561_v20  ;;  %vm3456_vm14 = vweird.f32 %v6546_v54  ;;  %3641 = vmatpush.bf16.msra.mxu2 %v5031_v10 }
0x11f7   :  { %v3276_v18 = vmul.f32 %v6521_v40, %v3275_v53  ;;  %v3580_v3 = vpop.permute.xlu0 %3579  ;;  %v3460_v8 = vand.u32 2147483647, %v6546_v54 }
0x11f8   :  { %v3566_v46 = vmul.f32 %v5245_v63, %v3565_v16  ;;  %3592 = vmatpush.bf16.msrb.mxu1 %v3580_v3 }
0x11f9   :  { %v3277_v45 = vpack.c.bf16 %v3276_v18, %v3261_v4 }
0x11fa   :  { %v3567_v51 = vadd.f32 %v5245_v63, %v3566_v46 }
0x11fb   :  { %v5247_v42 = vpop.eup %5246  ;;  %4843 = vmatmul.msk.bf16.vlgmr.msra.gmra.mxu3 %vm1707_vm8, %v3277_v45 }
0x11fc   :  { %v3571_v40 = vsel %vm3570_vm7, %v5245_v63, %v3567_v51  ;;  %v3450_v25 = vpop.xlane.xlu1 %3449  ;;  %v3452_v30 = vmul.f32 %v5247_v42, %v6546_v54  ;;  %vm3457_vm11 = vweird.f32 %v5247_v42 }
0x11fd   :  { %v3576_v7 = vsel %vm3573_vm12, %v3575_v1, %v3571_v40  ;;  %5248 = vrcp.f32 %v3450_v25  ;;  %v3477_v63 = vand.u32 2147483648, %v3450_v25  ;;  %vm3471_vm13 = vweird.f32 %v3450_v25  ;;  %vm3458_vm15 = vmor %vm3456_vm14, %vm3457_vm11 }
0x11fe   :  { %v3577_v50 = vmul.f32 %v6527_v26, %v3576_v7  ;;  %v3453_v29 = vsub.f32 1.0, %v3452_v30  ;;  %v3475_v22 = vand.u32 2147483647, %v3450_v25  ;;  %v3462_v26 = vand.u32 2147483648, %v6546_v54 }
0x11ff   :  { %v3478_v58 = vor.u32 1.1754944e-38, %v3477_v63  ;;  %vm3461_vm12 = vcmp.eq.f32.partialorder %v3460_v8, 8.507059e+37 }
0x1200   :  { %v3578_v41 = vpack.c.bf16 %v3577_v50, %v3562_v23  ;;  %v3454_v61 = vmul.f32 %v5247_v42, %v3453_v29  ;;  %vm3476_vm7 = vcmp.eq.f32.partialorder %v3475_v22, 8.507059e+37  ;;  %v3463_v53 = vor.u32 1.1754944e-38, %v3462_v26 }
0x1202   :  { %4849 = vmatmul.msk.bf16.vlgmr.msrb.gmra.mxu1 %vm1707_vm8, %v3578_v41  ;;  %v3455_v37 = vadd.f32 %v5247_v42, %v3454_v61 }
0x1203   :  { %v5249_v39 = vpop.eup %5248 }
0x1204   :  { %v3467_v17 = vmul.f32 %v5249_v39, %v3450_v25  ;;  %vm3472_vm1 = vweird.f32 %v5249_v39  ;;  %v3459_v49 = vsel %vm3458_vm15, %v5247_v42, %v3455_v37 }
0x1205   :  { %vm3473_vm5 = vmor %vm3471_vm13, %vm3472_vm1  ;;  %v3464_v4 = vsel %vm3461_vm12, %v3463_v53, %v3459_v49  ;;  %vm6909_vm12 = vcmp.ge.s32.totalorder %v6172_v52, 0 }
0x1206   :  { %v3468_v38 = vsub.f32 1.0, %v3467_v17  ;;  %v3465_v18 = vmul.f32 %v6531_v15, %v3464_v4 }
0x1208   :  { %v3469_v60 = vmul.f32 %v5249_v39, %v3468_v38 }
0x120a   :  { %v3470_v24 = vadd.f32 %v5249_v39, %v3469_v60  ;;  %v5128_v60 = vld [vmem:[%s6861_s6 + $0x48] ss:$0 sm:$0xff] }
0x120c   :  { %v3474_v19 = vsel %vm3473_vm5, %v5249_v39, %v3470_v24 }
0x120d   :  { %v3479_v16 = vsel %vm3476_vm7, %v3478_v58, %v3474_v19  ;;  %vm6908_vm7 = vcmp.ge.s32.totalorder %v6168_v11, 0 }
0x120e   :  { %v3480_v2 = vmul.f32 %v6535_v62, %v3479_v16  ;;  %v5030_v62 = vld [vmem:[#allocation2 + $0xe0] sm:$0xff] }
0x120f   :  { %3642 = vmatpush.bf16.msra.mxu2 %v5030_v62 }
0x1210   :  { %v3481_v3 = vpack.c.bf16 %v3480_v2, %v3465_v18 }
0x1214   :  { %v3483_v28 = vpop.permute.xlu1 %3482 }
0x1215   :  { %3495 = vmatpush.bf16.msrb.mxu3 %v3483_v28 }
0x1218   :  { %4847 = vmatmul.msk.bf16.vlgmr.msrb.gmra.mxu3 %vm1707_vm8, %v3481_v3 }
0x1250   :  { %v3390_v13 = vpop.f32.mrf.mxu1 }
0x1258   :  { %v3392_v54 = vpop.f32.mrf.mxu1 }
0x1259   :  { %v5095_v46 = vpack.i.bf16 %v3392_v54, %v3390_v13 }
0x125b   :  { %5096 = vrot.lane.b32.xlu0 %v5095_v46, %s5333_s30 }
0x127e   :  { %v3293_v15 = vpop.f32.mrf.mxu3 }
0x127f   :  { %v3594_v47 = vpop.f32.mrf.mxu1 }
0x1286   :  { %v3295_v40 = vpop.f32.mrf.mxu3 }
0x1287   :  { %v3596_v45 = vpop.f32.mrf.mxu1 }
0x1288   :  { %v5100_v51 = vpack.i.bf16 %v3596_v45, %v3594_v47 }
0x128a   :  { %5101 = vrot.lane.b32.xlu2 %v5100_v51, %s5333_s30 }
0x129b   :  { %v3497_v50 = vpop.f32.mrf.mxu3 }
0x12a3   :  { %v3499_v39 = vpop.f32.mrf.mxu3 }
0x12cd   :  { %v5097_v42 = vpop.permute.xlu0 %5096 }
0x12ce   :  { %v5099_v20 = vunpack.i.h.bf16 %v5097_v42  ;;  %v5098_v1 = vunpack.i.l.bf16 %v5097_v42 }
0x12d0   :  { %v3403_v25 = vsel %vm1707_vm8, %v3293_v15, %v5098_v1  ;;  %v3404_v7 = vsel %vm1707_vm8, %v3295_v40, %v5099_v20 }
0x12d1   :  { %v3613_v23 = vpack.c.bf16 %v3404_v7, %v3403_v25 }
0x12d3   :  { %4858 = vmatmul.msk.bf16.vlgmr.msra.gmra.mxu2 %vm177_vm4, %v3613_v23 }
0x12e4   :  { %v5102_v30 = vpop.permute.xlu2 %5101 }
0x12e5   :  { %v5104_v41 = vunpack.i.h.bf16 %v5102_v30  ;;  %v5103_v29 = vunpack.i.l.bf16 %v5102_v30 }
0x12e7   :  { %v3607_v17 = vsel %vm1707_vm8, %v3497_v50, %v5103_v29  ;;  %v3608_v61 = vsel %vm1707_vm8, %v3499_v39, %v5104_v41  ;;  %v5035_v39 = vld [vmem:[#allocation2 + $0x108] sm:$0xff] }
0x12e8   :  { %v3614_v38 = vpack.c.bf16 %v3608_v61, %v3607_v17  ;;  %v5033_v17 = vld [vmem:[#allocation2 + $0xf8] sm:$0xff]  ;;  %3834 = vmatpush.bf16.msra.mxu3 %v5035_v39 }
0x12e9   :  { %v5037_v61 = vld [vmem:[#allocation2 + $0x118] sm:$0xff]  ;;  %3871 = vmatpush.bf16.msra.mxu0 %v5033_v17 }
0x12ea   :  { %4859 = vmatmul.msk.bf16.gmra.mxu2 %vm177_vm4, %v3614_v38  ;;  %3930 = vmatpush.bf16.msra.mxu1 %v5037_v61 }
0x1356   :  { %v3644_v63 = vpop.f32.mrf.mxu2 }
0x1357   :  { %v3645_v37 = vadd.f32 %v5128_v60, %v3644_v63 }
0x1359   :  { %v3654_v24 = vadd.f32 %v3645_v37, %v6431_v36 }
0x135b   :  { %v3660_v22 = vsel %vm177_vm4, %v3654_v24, 0.0 }
0x135c   :  { %3661 = vadd.xlane.f32.xlu0 %v3660_v22  ;;  %v5034_v22 = vld [vmem:[#allocation2 + $0x100] sm:$0xff] }
0x135d   :  { %3835 = vmatpush.bf16.msra.mxu3 %v5034_v22 }
0x135e   :  { %v3646_v26 = vpop.f32.mrf.mxu2 }
0x135f   :  { %v3647_v8 = vadd.f32 %v5128_v60, %v3646_v26  ;;  %v5032_v26 = vld [vmem:[#allocation2 + $0xf0] sm:$0xff] }
0x1360   :  { %3872 = vmatpush.bf16.msra.mxu0 %v5032_v26 }
0x1361   :  { %v3655_v19 = vadd.f32 %v3647_v8, %v6434_v0  ;;  %v5036_v8 = vld [vmem:[#allocation2 + $0x110] sm:$0xff] }
0x1362   :  { %3931 = vmatpush.bf16.msra.mxu1 %v5036_v8  ;;  %v5045_v8 = vld [vmem:[#allocation2 + $0x158] sm:$0xff] }
0x1363   :  { %v3663_v58 = vsel %vm177_vm4, %v3655_v19, 0.0 }
0x1364   :  { %3664 = vadd.xlane.f32.xlu2 %v3663_v58 }
0x1366   :  { %4166 = vmatpush.bf16.msrb.mxu1 %v5045_v8 }
0x136d   :  { %v3649_v49 = vpop.f32.mrf.mxu2 }
0x136e   :  { %v3650_v53 = vadd.f32 %v5128_v60, %v3649_v49 }
0x1370   :  { %v3656_v16 = vadd.f32 %v3650_v53, %v6442_v27 }
0x1372   :  { %v3666_v4 = vsel %vm177_vm4, %v3656_v16, 0.0 }
0x1373   :  { %3667 = vadd.xlane.f32.xlu1 %v3666_v4 }
0x1375   :  { %v3651_v2 = vpop.f32.mrf.mxu2 }
0x1376   :  { %v3652_v18 = vadd.f32 %v5128_v60, %v3651_v2  ;;  %v5039_v60 = vld [vmem:[#allocation2 + $0x128] sm:$0xff] }
0x1377   :  { %3993 = vmatpush.bf16.msrb.mxu2 %v5039_v60  ;;  %v5041_v60 = vld [vmem:[#allocation2 + $0x138] sm:$0xff] }
0x1378   :  { %v3657_v36 = vadd.f32 %v3652_v18, %v6445_v21  ;;  %v6612_v18 = vld [vmem:[%s6861_s6 + $0x50] ss:$0 sm:$0xff]  ;;  %4040 = vmatpush.bf16.msrb.mxu3 %v5041_v60 }
0x137a   :  { %v3669_v28 = vsel %vm177_vm4, %v3657_v36, 0.0 }
0x137b   :  { %3670 = vadd.xlane.f32.xlu0 %v3669_v28 }
0x13cf   :  { %v3662_v3 = vpop.xlane.xlu0 %3661 }
0x13d0   :  { %v3672_v0 = vmul.f32 %v3662_v3, %v5471_v34  ;;  %v6617_v3 = vld [vmem:[%s6861_s6 + $0x58] ss:$0 sm:$0xff] }
0x13d2   :  { %v3676_v13 = vsub.f32 %v3654_v24, %v3672_v0 }
0x13d4   :  { %v3680_v54 = vmul.f32 %v3676_v13, %v3676_v13 }
0x13d6   :  { %v3684_v46 = vsel %vm177_vm4, %v3680_v54, 0.0 }
0x13d7   :  { %3685 = vadd.xlane.f32.xlu2 %v3684_v46  ;;  %v3665_v47 = vpop.xlane.xlu2 %3664 }
0x13d8   :  { %v3673_v27 = vmul.f32 %v3665_v47, %v5471_v34 }
0x13da   :  { %v6590_v10 = vsub.f32 %v3655_v19, %v3673_v27  ;;  %v5038_v19 = vld [vmem:[#allocation2 + $0x120] sm:$0xff] }
0x13db   :  { %3994 = vmatpush.bf16.msrb.mxu2 %v5038_v19  ;;  %v5047_v19 = vld [vmem:[#allocation2 + $0x168] sm:$0xff] }
0x13dc   :  { %v3681_v45 = vmul.f32 %v6590_v10, %v6590_v10 }
0x13de   :  { %v3687_v21 = vsel %vm177_vm4, %v3681_v45, 0.0 }
0x13df   :  { %3688 = vadd.xlane.f32.xlu0 %v3687_v21  ;;  %4229 = vmatpush.bf16.msra.mxu2 %v5047_v19 }
0x13e6   :  { %v3668_v51 = vpop.xlane.xlu1 %3667 }
0x13e7   :  { %v3674_v62 = vmul.f32 %v3668_v51, %v5471_v34 }
0x13e9   :  { %v6596_v15 = vsub.f32 %v3656_v16, %v3674_v62 }
0x13eb   :  { %v3682_v42 = vmul.f32 %v6596_v15, %v6596_v15 }
0x13ed   :  { %v3690_v20 = vsel %vm177_vm4, %v3682_v42, 0.0 }
0x13ee   :  { %v3671_v1 = vpop.xlane.xlu0 %3670  ;;  %3691 = vadd.xlane.f32.xlu2 %v3690_v20 }
0x13ef   :  { %v3675_v40 = vmul.f32 %v3671_v1, %v5471_v34 }
0x13f1   :  { %v6602_v25 = vsub.f32 %v3657_v36, %v3675_v40 }
0x13f3   :  { %v3683_v7 = vmul.f32 %v6602_v25, %v6602_v25 }
0x13f5   :  { %v3693_v23 = vsel %vm177_vm4, %v3683_v7, 0.0 }
0x13f6   :  { %3694 = vadd.xlane.f32.xlu1 %v3693_v23 }
0x144a   :  { %v3686_v50 = vpop.xlane.xlu2 %3685 }
0x144b   :  { %v3696_v30 = vmul.f32 %v3686_v50, %v5471_v34 }
0x144d   :  { %v3700_v41 = vadd.f32 1e-05, %v3696_v30 }
0x144f   :  { %5250 = vrsqrt.f32 %v3700_v41  ;;  %vm3710_vm11 = vweird.f32 %v3700_v41 }
0x1452   :  { %v3689_v29 = vpop.xlane.xlu0 %3688 }
0x1453   :  { %v3697_v38 = vmul.f32 %v3689_v29, %v5471_v34 }
0x1455   :  { %v5251_v63 = vpop.eup %5250  ;;  %v3701_v37 = vadd.f32 1e-05, %v3697_v38 }
0x1456   :  { %v3705_v24 = vmul.f32 %v5251_v63, %v3700_v41  ;;  %vm3711_vm1 = vweird.f32 %v5251_v63 }
0x1457   :  { %5252 = vrsqrt.f32 %v3701_v37  ;;  %vm3712_vm13 = vmor %vm3710_vm11, %vm3711_vm1  ;;  %vm3720_vm14 = vweird.f32 %v3701_v37  ;;  %vm6910_vm11 = vcmp.ge.s32.totalorder %v6175_v48, 0 }
0x1458   :  { %v3706_v58 = vmul.f32 %v5251_v63, %v3705_v24 }
0x145a   :  { %v3707_v49 = vmul.f32 0.5, %v3706_v58 }
0x145c   :  { %v3708_v53 = vsub.f32 1.5, %v3707_v49 }
0x145d   :  { %v5253_v16 = vpop.eup %5252 }
0x145e   :  { %v3709_v4 = vmul.f32 %v5251_v63, %v3708_v53  ;;  %v3715_v2 = vmul.f32 %v5253_v16, %v3701_v37  ;;  %vm3721_vm5 = vweird.f32 %v5253_v16  ;;  %v5040_v53 = vld [vmem:[#allocation2 + $0x130] sm:$0xff] }
0x145f   :  { %vm3722_vm15 = vmor %vm3720_vm14, %vm3721_vm5  ;;  %4041 = vmatpush.bf16.msrb.mxu3 %v5040_v53 }
0x1460   :  { %v3713_v36 = vsel %vm3712_vm13, %v5251_v63, %v3709_v4  ;;  %v3716_v28 = vmul.f32 %v5253_v16, %v3715_v2  ;;  %v5043_v63 = vld [vmem:[#allocation2 + $0x148] sm:$0xff]  ;;  %vm6911_vm13 = vcmp.ge.s32.totalorder %v5391_v6, 0 }
0x1461   :  { %v3744_v0 = vmul.f32 %v3713_v36, %v3676_v13  ;;  %v3692_v54 = vpop.xlane.xlu2 %3691  ;;  %4103 = vmatpush.bf16.msrb.mxu0 %v5043_v63 }
0x1462   :  { %v3717_v46 = vmul.f32 0.5, %v3716_v28  ;;  %v3698_v47 = vmul.f32 %v3692_v54, %v5471_v34  ;;  %v5042_v28 = vld [vmem:[#allocation2 + $0x140] sm:$0xff] }
0x1463   :  { %v3749_v27 = vmul.f32 %v6612_v18, %v3744_v0  ;;  %v5044_v0 = vld [vmem:[#allocation2 + $0x150] sm:$0xff] }
0x1464   :  { %v3718_v45 = vsub.f32 1.5, %v3717_v46  ;;  %v6621_v21 = vadd.f32 1e-05, %v3698_v47  ;;  %4167 = vmatpush.bf16.msrb.mxu1 %v5044_v0 }
0x1465   :  { %v3754_v51 = vadd.f32 %v6617_v3, %v3749_v27  ;;  %4104 = vmatpush.bf16.msrb.mxu0 %v5042_v28 }
0x1466   :  { %v3719_v62 = vmul.f32 %v5253_v16, %v3718_v45  ;;  %5254 = vrsqrt.f32 %v6621_v21  ;;  %vm3730_vm5 = vweird.f32 %v6621_v21 }
0x1467   :  { %v6626_v42 = vmul.f32 %v3754_v51, %v6161_v12 }
0x1468   :  { %v3723_v13 = vsel %vm3722_vm15, %v5253_v16, %v3719_v62 }
0x1469   :  { %v3745_v20 = vmul.f32 %v3723_v13, %v6590_v10  ;;  %v3695_v1 = vpop.xlane.xlu1 %3694  ;;  %v3788_v40 = vrot.slane %v6626_v42, 5  ;;  %v3766_v7 = vrot.slane %v6626_v42, 4  ;;  %v3884_v30 = vrot.slane %v6626_v42, 6 }
0x146a   :  { %v3699_v23 = vmul.f32 %v3695_v1, %v5471_v34  ;;  %v3947_v41 = vrot.slane %v6626_v42, 7  ;;  %v5046_v1 = vld [vmem:[#allocation2 + $0x160] sm:$0xff] }
0x146b   :  { %v3750_v50 = vmul.f32 %v6612_v18, %v3745_v20  ;;  %v3799_v61 = vsel %vm2342_vm9, 0.0, %v3788_v40  ;;  %v3777_v38 = vsel %vm2295_vm10, 0.0, %v3766_v7  ;;  %v3895_v22 = vsel %vm2463_vm3, 0.0, %v3884_v30  ;;  %4230 = vmatpush.bf16.msra.mxu2 %v5046_v1 }
0x146c   :  { %v5255_v29 = vpop.eup %5254  ;;  %v6635_v39 = vadd.f32 1e-05, %v3699_v23  ;;  %v3958_v26 = vsel %vm112_vm0, 0.0, %v3947_v41  ;;  %v3800_v58 = vsel %vm6908_vm7, %v3799_v61, 0.0  ;;  %v3778_v49 = vsel %vm6909_vm12, %v3777_v38, 0.0 }
0x146d   :  { %v3755_v17 = vadd.f32 %v6617_v3, %v3750_v50  ;;  %v3725_v10 = vmul.f32 %v5255_v29, %v6621_v21  ;;  %vm3731_vm1 = vweird.f32 %v5255_v29  ;;  %v3896_v11 = vsel %vm6910_vm11, %v3895_v22, 0.0 }
0x146e   :  { %5256 = vrsqrt.f32 %v6635_v39  ;;  %v3959_v54 = vsel %vm6911_vm13, %v3958_v26, 0.0  ;;  %vm3732_vm14 = vmor %vm3730_vm5, %vm3731_vm1  ;;  %vm3740_vm7 = vweird.f32 %v6635_v39  ;;  %vm6912_vm1 = vcmp.ge.s32.totalorder %v6242_v56, 0 }
0x146f   :  { %v6643_v37 = vmul.f32 %v3755_v17, %v6144_v44  ;;  %v3726_v24 = vmul.f32 %v5255_v29, %v3725_v10  ;;  %vm6913_vm11 = vcmp.ge.s32.totalorder %v5425_v32, 0  ;;  %v5049_v32 = vld [vmem:[#allocation2 + $0x178] sm:$0xff]  ;;  %vm6919_vm13 = vcmp.lt.s32.totalorder %v6309_v31, 16 }
0x1470   :  { %vm6920_vm5 = vcmp.lt.s32.totalorder %v6313_v59, 16 }
0x1471   :  { %v3727_v16 = vmul.f32 0.5, %v3726_v24  ;;  %v3789_v4 = vrot.slane %v6643_v37, 5  ;;  %v3767_v2 = vrot.slane %v6643_v37, 4  ;;  %v3885_v36 = vrot.slane %v6643_v37, 6 }
0x1472   :  { %v3948_v52 = vrot.slane %v6643_v37, 7  ;;  %v4058_v1 = vrot.slane %v6643_v37, 1 }
0x1473   :  { %v3728_v46 = vsub.f32 1.5, %v3727_v16  ;;  %v3790_v47 = vsel %vm2342_vm9, %v3788_v40, %v3789_v4  ;;  %v6661_v27 = vsel %vm2295_vm10, %v3766_v7, %v3767_v2  ;;  %v3886_v45 = vsel %vm2463_vm3, %v3884_v30, %v3885_v36 }
0x1474   :  { %v5257_v51 = vpop.eup %5256  ;;  %v3808_v62 = vpack.c.bf16 %v3790_v47, %v3800_v58  ;;  %v3786_v13 = vpack.c.bf16 %v6661_v27, %v3778_v49  ;;  %v3904_v20 = vpack.c.bf16 %v3886_v45, %v3896_v11  ;;  %v3949_v48 = vsel %vm112_vm0, %v3947_v41, %v3948_v52 }
0x1475   :  { %v3729_v23 = vmul.f32 %v5255_v29, %v3728_v46  ;;  %v3735_v6 = vmul.f32 %v5257_v51, %v6635_v39  ;;  %v3967_v40 = vpack.c.bf16 %v3949_v48, %v3959_v54  ;;  %vm3741_vm15 = vweird.f32 %v5257_v51 }
0x1476   :  { %4868 = vmatmul.msk.bf16.vlgmr.msra.gmra.mxu3 %vm177_vm4, %v3808_v62  ;;  %4878 = vmatmul.msk.bf16.vlgmr.msra.gmra.mxu0 %vm177_vm4, %v3786_v13  ;;  %vm3742_vm12 = vmor %vm3740_vm7, %vm3741_vm15 }
0x1477   :  { %v3733_v7 = vsel %vm3732_vm14, %v5255_v29, %v3729_v23  ;;  %v3736_v50 = vmul.f32 %v5257_v51, %v3735_v6  ;;  %4888 = vmatmul.msk.bf16.vlgmr.msra.gmra.mxu1 %vm177_vm4, %v3904_v20  ;;  %4898 = vmatmul.msk.bf16.vlgmr.msrb.gmra.mxu2 %vm177_vm4, %v3967_v40  ;;  %v4121_v23 = vrot.slane %v6643_v37, 2  ;;  %v4184_v6 = vrot.slane %v6643_v37, 3 }
0x1478   :  { %v3746_v30 = vmul.f32 %v3733_v7, %v6596_v15  ;;  %4282 = vmatpush.bf16.msra.mxu3 %v5049_v32 }
0x1479   :  { %v3737_v21 = vmul.f32 0.5, %v3736_v50  ;;  %v4057_v50 = vrot.slane %v6626_v42, 1 }
0x147a   :  { %v3751_v41 = vmul.f32 %v6612_v18, %v3746_v30 }
0x147b   :  { %v3738_v17 = vsub.f32 1.5, %v3737_v21  ;;  %v4120_v21 = vrot.slane %v6626_v42, 2 }
0x147c   :  { %v3756_v10 = vadd.f32 %v6617_v3, %v3751_v41 }
0x147d   :  { %v3739_v61 = vmul.f32 %v5257_v51, %v3738_v17  ;;  %v4183_v17 = vrot.slane %v6626_v42, 3 }
0x147e   :  { %v6678_v29 = vmul.f32 %v3756_v10, %v6227_v43 }
0x147f   :  { %v3743_v38 = vsel %vm3742_vm12, %v5257_v51, %v3739_v61  ;;  %v5048_v51 = vld [vmem:[#allocation2 + $0x170] sm:$0xff] }
0x1480   :  { %v3747_v60 = vmul.f32 %v3743_v38, %v6602_v25  ;;  %v3791_v15 = vrot.slane %v6678_v29, 5  ;;  %v3769_v24 = vrot.slane %v6678_v29, 4  ;;  %v3887_v22 = vrot.slane %v6678_v29, 6  ;;  %4283 = vmatpush.bf16.msra.mxu3 %v5048_v51 }
0x1481   :  { %v3950_v26 = vrot.slane %v6678_v29, 7  ;;  %v4060_v13 = vrot.slane %v6678_v29, 1  ;;  %v4123_v20 = vrot.slane %v6678_v29, 2  ;;  %v4186_v48 = vrot.slane %v6678_v29, 3 }
0x1482   :  { %v3752_v63 = vmul.f32 %v6612_v18, %v3747_v60  ;;  %v3792_v39 = vsel %vm2342_vm9, %v3789_v4, %v3791_v15  ;;  %v6692_v58 = vsel %vm2295_vm10, %v3767_v2, %v3769_v24  ;;  %v3888_v25 = vsel %vm2463_vm3, %v3885_v36, %v3887_v22 }
0x1483   :  { %v3951_v18 = vsel %vm112_vm0, %v3948_v52, %v3950_v26  ;;  %v3802_v4 = vsel %vm2361_vm2, %v3792_v39, 0.0  ;;  %v3780_v2 = vsel %vm2314_vm6, %v6692_v58, 0.0  ;;  %v3898_v36 = vsel %vm6912_vm1, %v3888_v25, 0.0 }
0x1484   :  { %v3757_v8 = vadd.f32 %v6617_v3, %v3752_v63  ;;  %v3961_v28 = vsel %vm6913_vm11, %v3951_v18, 0.0  ;;  %vm6917_vm2 = vcmask 1044480   ;;  %vm6918_vm6 = vcmp.lt.s32.totalorder %v5396_v14, 16 }
0x1485   :  { %v4187_v7 = vsel %vm6917_vm2, %v4184_v6, %v4186_v48  ;;  %v4014_v38 = vpack.c.bf16 %v6643_v37, %v6626_v42  ;;  %vm6923_vm7 = vmmov %vm6917_vm2 }
0x1486   :  { %v6689_v19 = vmul.f32 %v3757_v8, %v6249_v5  ;;  %v4196_v10 = vsel %vm6920_vm5, %v4187_v7, 0.0  ;;  %v4185_v14 = vsel %vm6923_vm7, %v4183_v17, %v4184_v6  ;;  %vm6926_vm11 = vmmov %vm6917_vm2  ;;  %vm6930_vm2 = vcmp.lt.s32.totalorder %v6344_v57, 16 }
0x1488   :  { %v3793_v49 = vrot.slane %v6689_v19, 5  ;;  %v3771_v53 = vrot.slane %v6689_v19, 4  ;;  %v3889_v16 = vrot.slane %v6689_v19, 6  ;;  %v3952_v3 = vrot.slane %v6689_v19, 7 }
0x1489   :  { %v4062_v31 = vrot.slane %v6689_v19, 1  ;;  %v4125_v59 = vrot.slane %v6689_v19, 2 }
0x148a   :  { %v3794_v0 = vsel %vm2342_vm9, %v3791_v15, %v3793_v49  ;;  %v6711_v11 = vsel %vm2295_vm10, %v3769_v24, %v3771_v53  ;;  %v3890_v52 = vsel %vm2463_vm3, %v3887_v22, %v3889_v16  ;;  %v3953_v55 = vsel %vm112_vm0, %v3950_v26, %v3952_v3  ;;  %v6932_v3 = vld [vmem:[#allocation10_spill] sm:$0xff] }
0x148b   :  { %v3809_v54 = vpack.c.bf16 %v3794_v0, %v3802_v4  ;;  %v3787_v46 = vpack.c.bf16 %v6711_v11, %v3780_v2  ;;  %v3905_v9 = vpack.c.bf16 %v3890_v52, %v3898_v36  ;;  %v3968_v47 = vpack.c.bf16 %v3953_v55, %v3961_v28 }
0x148c   :  { %v4247_v56 = vsel %vm2295_vm10, %v3771_v53, 0.0  ;;  %vm6914_vm9 = vcmp.lt.s32.totalorder %v6272_v33, 16  ;;  %vm6915_vm10 = vcmask 1046528   ;;  %vm6916_vm3 = vcmask 1045504  }
0x148d   :  { %4869 = vmatmul.msk.bf16.gmra.mxu3 %vm177_vm4, %v3809_v54  ;;  %4879 = vmatmul.msk.bf16.gmra.mxu0 %vm177_vm4, %v3787_v46  ;;  %v4251_v45 = vsel %vm6914_vm9, %v4247_v56, 0.0  ;;  %v4061_v33 = vsel %vm6915_vm10, %v4058_v1, %v4060_v13  ;;  %v4124_v40 = vsel %vm6916_vm3, %v4121_v23, %v4123_v20  ;;  %vm6921_vm14 = vmmov %vm6915_vm10  ;;  %v4203_v24 = vpack.c.bf16 %v4196_v10, %v4185_v14 }
0x148e   :  { %4889 = vmatmul.msk.bf16.gmra.mxu1 %vm177_vm4, %v3905_v9  ;;  %4899 = vmatmul.msk.bf16.gmra.mxu2 %vm177_vm4, %v3968_v47  ;;  %v4257_v62 = vpack.c.bf16 %v4251_v45, %v6711_v11  ;;  %v4070_v30 = vsel %vm6918_vm6, %v4061_v33, 0.0  ;;  %v4133_v41 = vsel %vm6919_vm13, %v4124_v40, 0.0  ;;  %v4059_v61 = vsel %vm6921_vm14, %v4057_v50, %v4058_v1  ;;  %vm6922_vm15 = vmmov %vm6916_vm3  ;;  %v5053_v1 = vld [vmem:[#allocation2 + $0x198] sm:$0xff]  ;;  %v5051_v33 = vld [vmem:[#allocation2 + $0x188] sm:$0xff] }
0x148f   :  { %v4077_v60 = vpack.c.bf16 %v4070_v30, %v4059_v61  ;;  %v4122_v15 = vsel %vm6922_vm15, %v4120_v21, %v4121_v23  ;;  %v4188_v22 = vrot.slane %v6689_v19, 3  ;;  %vm6924_vm12 = vmmov %vm6915_vm10  ;;  %vm6933_vm13 = vcmp.lt.s32.totalorder %v6932_v3, 16  ;;  %4355 = vmatpush.bf16.msra.mxu0 %v5053_v1  ;;  %v5052_v23 = vld [vmem:[#allocation2 + $0x190] sm:$0xff]  ;;  %v5050_v50 = vld [vmem:[#allocation2 + $0x180] sm:$0xff] }
0x1490   :  { %v4140_v63 = vpack.c.bf16 %v4133_v41, %v4122_v15  ;;  %v4068_v26 = vsel %vm6924_vm12, %v4062_v31, 0.0  ;;  %vm6925_vm1 = vmmov %vm6916_vm3  ;;  %v4015_v2 = vpack.c.bf16 %v6689_v19, %v6678_v29  ;;  %vm6936_vm14 = vcmask 523264  }
0x1491   :  { %v4131_v8 = vsel %vm6925_vm1, %v4125_v59, 0.0  ;;  %v4194_v39 = vsel %vm6926_vm11, %v4188_v22, 0.0  ;;  %vm6927_vm9 = vmmov %vm6915_vm10  ;;  %vm6928_vm10 = vcmp.lt.s32.totalorder %v5432_v35, 16  ;;  %v6934_v35 = vld [vmem:[#allocation11_spill] sm:$0xff] }
0x1492   :  { %v4063_v25 = vsel %vm6927_vm9, %v4060_v13, %v4062_v31  ;;  %v4072_v18 = vsel %vm6928_vm10, %v4068_v26, 0.0  ;;  %vm6929_vm3 = vmmov %vm6925_vm1  ;;  %v4135_v53 = vsel %vm6930_vm2, %v4131_v8, 0.0  ;;  %v4198_v4 = vsel %vm6933_vm13, %v4194_v39, 0.0 }
0x1493   :  { %v4126_v49 = vsel %vm6929_vm3, %v4123_v20, %v4125_v59  ;;  %vm6931_vm6 = vmmov %vm6923_vm7  ;;  %v4078_v36 = vpack.c.bf16 %v4072_v18, %v4063_v25  ;;  %vm6935_vm5 = vcmp.lt.s32.totalorder %v6934_v35, 16  ;;  %4356 = vmatpush.bf16.msra.mxu0 %v5052_v23  ;;  %vm1290_vm2 = vcmask 254976  }
0x1494   :  { %v4189_v16 = vsel %vm6931_vm6, %v4186_v48, %v4188_v22  ;;  %v4141_v28 = vpack.c.bf16 %v4135_v53, %v4126_v49  ;;  %v4249_v57 = vsel %vm6935_vm5, %v6692_v58, 0.0  ;;  %vm6937_vm15 = vmmov %vm6936_vm14 }
0x1495   :  { %v4204_v0 = vpack.c.bf16 %v4198_v4, %v4189_v16  ;;  %v4256_v11 = vpack.c.bf16 %v4249_v57, %v6661_v27 }
0x1497   :  { %4357 = vmatpush.bf16.msra.mxu0 %v5051_v33 }
0x149b   :  { %4358 = vmatpush.bf16.msra.mxu0 %v5050_v50 }
0x149d   :  { %4908 = vmatmul.msk.bf16.vlgmr.msrb.gmra.mxu3 %vm177_vm4, %v4014_v38  ;;  %4918 = vmatmul.msk.bf16.vlgmr.msrb.gmra.mxu0 %vm177_vm4, %v4077_v60 }
0x149e   :  { %4928 = vmatmul.msk.bf16.vlgmr.msrb.gmra.mxu1 %vm177_vm4, %v4140_v63  ;;  %4938 = vmatmul.msk.bf16.vlgmr.msra.gmra.mxu2 %vm177_vm4, %v4203_v24 }
0x14ad   :  { %4909 = vmatmul.msk.bf16.gmra.mxu3 %vm177_vm4, %v4015_v2  ;;  %4919 = vmatmul.msk.bf16.gmra.mxu0 %vm177_vm4, %v4078_v36 }
0x14ae   :  { %4929 = vmatmul.msk.bf16.gmra.mxu1 %vm177_vm4, %v4141_v28  ;;  %4939 = vmatmul.msk.bf16.gmra.mxu2 %vm177_vm4, %v4204_v0  ;;  %v5131_v0 = vld [vmem:[%s6861_s6 + $0x60] ss:$0 sm:$0xff] }
0x14bd   :  { %4948 = vmatmul.msk.bf16.vlgmr.msra.gmra.mxu3 %vm177_vm4, %v4256_v11 }
0x14cd   :  { %4949 = vmatmul.msk.bf16.gmra.mxu3 %vm177_vm4, %v4257_v62 }
0x14f3   :  { %v3874_v54 = vpop.f32.mrf.mxu0 }
0x14f4   :  { %v3933_v46 = vpop.f32.mrf.mxu1 }
0x14f9   :  { %v3837_v52 = vpop.f32.mrf.mxu3 }
0x14fa   :  { %v3996_v47 = vpop.f32.mrf.mxu2  ;;  %v3875_v40 = vadd.f32 %v3874_v54, %v3837_v52 }
0x14fb   :  { %v3876_v32 = vpop.f32.mrf.mxu0 }
0x14fc   :  { %v3935_v56 = vpop.f32.mrf.mxu1  ;;  %v3943_v41 = vadd.f32 %v3933_v46, %v3875_v40 }
0x14fe   :  { %v4006_v61 = vadd.f32 %v3996_v47, %v3943_v41 }
0x1501   :  { %v3839_v55 = vpop.f32.mrf.mxu3 }
0x1502   :  { %v3998_v51 = vpop.f32.mrf.mxu2  ;;  %v3877_v17 = vadd.f32 %v3876_v32, %v3839_v55 }
0x1504   :  { %v3944_v38 = vadd.f32 %v3935_v56, %v3877_v17 }
0x1506   :  { %v4007_v63 = vadd.f32 %v3998_v51, %v3944_v38 }
0x150a   :  { %v3879_v13 = vpop.f32.mrf.mxu0 }
0x150b   :  { %v3938_v20 = vpop.f32.mrf.mxu1 }
0x1510   :  { %v3842_v9 = vpop.f32.mrf.mxu3 }
0x1511   :  { %v4001_v58 = vpop.f32.mrf.mxu2  ;;  %v3880_v22 = vadd.f32 %v3879_v13, %v3842_v9 }
0x1512   :  { %v3881_v27 = vpop.f32.mrf.mxu0 }
0x1513   :  { %v3940_v62 = vpop.f32.mrf.mxu1  ;;  %v3945_v18 = vadd.f32 %v3938_v20, %v3880_v22 }
0x1515   :  { %v4008_v2 = vadd.f32 %v4001_v58, %v3945_v18 }
0x1518   :  { %v3844_v45 = vpop.f32.mrf.mxu3 }
0x1519   :  { %v4003_v7 = vpop.f32.mrf.mxu2  ;;  %v3882_v49 = vadd.f32 %v3881_v27, %v3844_v45 }
0x151a   :  { %v4106_v30 = vpop.f32.mrf.mxu0 }
0x151b   :  { %v4169_v10 = vpop.f32.mrf.mxu1  ;;  %v3946_v36 = vadd.f32 %v3940_v62, %v3882_v49 }
0x151d   :  { %v4009_v55 = vadd.f32 %v4003_v7, %v3946_v36 }
0x1520   :  { %v4043_v48 = vpop.f32.mrf.mxu3 }
0x1521   :  { %v4053_v60 = vadd.f32 %v4043_v48, %v4006_v61  ;;  %v4232_v15 = vpop.f32.mrf.mxu2  ;;  %v5132_v61 = vld [vmem:[%s6861_s6 + $0x68] ss:$0 sm:$0xff] }
0x1522   :  { %v4108_v24 = vpop.f32.mrf.mxu0 }
0x1523   :  { %v4116_v31 = vadd.f32 %v4106_v30, %v4053_v60  ;;  %v4171_v26 = vpop.f32.mrf.mxu1 }
0x1525   :  { %v4179_v8 = vadd.f32 %v4169_v10, %v4116_v31 }
0x1527   :  { %v4242_v16 = vadd.f32 %v4232_v15, %v4179_v8 }
0x1528   :  { %v4045_v6 = vpop.f32.mrf.mxu3 }
0x1529   :  { %v4054_v59 = vadd.f32 %v4045_v6, %v4007_v63  ;;  %v4234_v53 = vpop.f32.mrf.mxu2 }
0x152a   :  { %v4111_v4 = vpop.f32.mrf.mxu0 }
0x152b   :  { %v4117_v39 = vadd.f32 %v4108_v24, %v4054_v59  ;;  %v4174_v11 = vpop.f32.mrf.mxu1 }
0x152d   :  { %v4180_v3 = vadd.f32 %v4171_v26, %v4117_v39 }
0x152f   :  { %v4243_v35 = vadd.f32 %v4234_v53, %v4180_v3 }
0x1530   :  { %v4048_v21 = vpop.f32.mrf.mxu3 }
0x1531   :  { %v4055_v57 = vadd.f32 %v4048_v21, %v4008_v2  ;;  %v4237_v56 = vpop.f32.mrf.mxu2 }
0x1532   :  { %v4113_v13 = vpop.f32.mrf.mxu0 }
0x1533   :  { %v4118_v9 = vadd.f32 %v4111_v4, %v4055_v57  ;;  %v4176_v27 = vpop.f32.mrf.mxu1 }
0x1535   :  { %v4181_v20 = vadd.f32 %v4174_v11, %v4118_v9 }
0x1537   :  { %v4244_v23 = vadd.f32 %v4237_v56, %v4181_v20  ;;  %v725_v56 = vld [vmem:[%s6861_s6 + $0xb8] sm:$0x1]  ;;  %v5055_v20 = vld [vmem:[#allocation2 + $0x268] sm:$0xff] }
0x1538   :  { %v4050_v14 = vpop.f32.mrf.mxu3  ;;  %4510 = vmatpush.bf16.msra.mxu1 %v5055_v20 }
0x1539   :  { %v4056_v47 = vadd.f32 %v4050_v14, %v4009_v55  ;;  %v4239_v33 = vpop.f32.mrf.mxu2 }
0x153b   :  { %v4119_v48 = vadd.f32 %v4113_v13, %v4056_v47 }
0x153d   :  { %v4182_v6 = vadd.f32 %v4176_v27, %v4119_v48 }
0x153f   :  { %v4245_v40 = vadd.f32 %v4239_v33, %v4182_v6 }
0x1540   :  { %v4285_v25 = vpop.f32.mrf.mxu3 }
0x1541   :  { %v4295_v28 = vadd.f32 %v4285_v25, %v4242_v16 }
0x1543   :  { %v4301_v54 = vadd.f32 %v5131_v0, %v4295_v28 }
0x1545   :  { %v4305_v45 = vmax.f32 %v4301_v54, 0.0 }
0x1548   :  { %v4287_v52 = vpop.f32.mrf.mxu3 }
0x1549   :  { %v4296_v46 = vadd.f32 %v4287_v52, %v4243_v35 }
0x154b   :  { %v4302_v32 = vadd.f32 %v5131_v0, %v4296_v46 }
0x154d   :  { %v4306_v51 = vmax.f32 %v4302_v32, 0.0  ;;  %v1255_v32 = vld [vmem:[%s6861_s6 + $0xf8] sm:$0x1] }
0x154f   :  { %v4317_v58 = vpack.c.bf16 %v4306_v51, %v4305_v45 }
0x1550   :  { %v4290_v1 = vpop.f32.mrf.mxu3 }
0x1551   :  { %4966 = vmatmul.msk.bf16.vlgmr.msra.gmra.mxu0 %vm6936_vm14, %v4317_v58  ;;  %v4297_v62 = vadd.f32 %v4290_v1, %v4244_v23  ;;  %v5054_v58 = vld [vmem:[#allocation2 + $0x260] sm:$0xff] }
0x1552   :  { %4511 = vmatpush.bf16.msra.mxu1 %v5054_v58 }
0x1553   :  { %v4303_v50 = vadd.f32 %v5131_v0, %v4297_v62 }
0x1555   :  { %v4307_v41 = vmax.f32 %v4303_v50, 0.0 }
0x1558   :  { %v4292_v7 = vpop.f32.mrf.mxu3 }
0x1559   :  { %v4298_v30 = vadd.f32 %v4292_v7, %v4245_v40 }
0x155b   :  { %v4304_v21 = vadd.f32 %v5131_v0, %v4298_v30 }
0x155d   :  { %v4308_v17 = vmax.f32 %v4304_v21, 0.0 }
0x155f   :  { %v4318_v10 = vpack.c.bf16 %v4308_v17, %v4307_v41 }
0x1561   :  { %4967 = vmatmul.msk.bf16.gmra.mxu0 %vm6937_vm15, %v4318_v10 }
0x15ce   :  { %v4360_v38 = vpop.f32.mrf.mxu0 }
0x15cf   :  { %v4361_v60 = vadd.f32 %v5132_v61, %v4360_v38 }
0x15d1   :  { %v4370_v15 = vadd.f32 %v4361_v60, %v6626_v42 }
0x15d3   :  { %v4376_v14 = vsel %vm177_vm4, %v4370_v15, 0.0 }
0x15d4   :  { %4377 = vadd.xlane.f32.xlu0 %v4376_v14 }
0x15d6   :  { %v4362_v63 = vpop.f32.mrf.mxu0 }
0x15d7   :  { %v4363_v24 = vadd.f32 %v5132_v61, %v4362_v63 }
0x15d9   :  { %v4371_v31 = vadd.f32 %v4363_v24, %v6643_v37 }
0x15db   :  { %v4379_v59 = vsel %vm177_vm4, %v4371_v31, 0.0 }
0x15dc   :  { %4380 = vadd.xlane.f32.xlu2 %v4379_v59 }
0x15de   :  { %v4365_v22 = vpop.f32.mrf.mxu0 }
0x15df   :  { %v4366_v26 = vadd.f32 %v5132_v61, %v4365_v22 }
0x15e1   :  { %v4372_v8 = vadd.f32 %v4366_v26, %v6678_v29 }
0x15e3   :  { %v4382_v39 = vsel %vm177_vm4, %v4372_v8, 0.0 }
0x15e4   :  { %4383 = vadd.xlane.f32.xlu1 %v4382_v39 }
0x15e6   :  { %v4367_v25 = vpop.f32.mrf.mxu0 }
0x15e7   :  { %v4368_v18 = vadd.f32 %v5132_v61, %v4367_v25 }
0x15e9   :  { %v4373_v42 = vadd.f32 %v4368_v18, %v6689_v19 }
0x15eb   :  { %v4385_v49 = vsel %vm177_vm4, %v4373_v42, 0.0 }
0x15ec   :  { %4386 = vadd.xlane.f32.xlu0 %v4385_v49 }
0x1647   :  { %v4378_v53 = vpop.xlane.xlu0 %4377 }
0x1648   :  { %v4388_v37 = vmul.f32 %v4378_v53, %v5471_v34 }
0x164a   :  { %v4392_v16 = vsub.f32 %v4370_v15, %v4388_v37  ;;  %v5133_v15 = vld [vmem:[%s6861_s6 + $0x70] ss:$0 sm:$0xff] }
0x164c   :  { %v4396_v3 = vmul.f32 %v4392_v16, %v4392_v16 }
0x164e   :  { %v4400_v4 = vsel %vm177_vm4, %v4396_v3, 0.0 }
0x164f   :  { %v4381_v2 = vpop.xlane.xlu2 %4380  ;;  %4401 = vadd.xlane.f32.xlu2 %v4400_v4 }
0x1650   :  { %v4389_v29 = vmul.f32 %v4381_v2, %v5471_v34 }
0x1652   :  { %v6797_v36 = vsub.f32 %v4371_v31, %v4389_v29 }
0x1654   :  { %v4397_v28 = vmul.f32 %v6797_v36, %v6797_v36 }
0x1656   :  { %v4403_v19 = vsel %vm177_vm4, %v4397_v28, 0.0 }
0x1657   :  { %4404 = vadd.xlane.f32.xlu1 %v4403_v19  ;;  %v4384_v0 = vpop.xlane.xlu1 %4383 }
0x1658   :  { %v4390_v35 = vmul.f32 %v4384_v0, %v5471_v34 }
0x165a   :  { %v6803_v57 = vsub.f32 %v4372_v8, %v4390_v35  ;;  %v5134_v8 = vld [vmem:[%s6861_s6 + $0x78] ss:$0 sm:$0xff] }
0x165c   :  { %v4398_v11 = vmul.f32 %v6803_v57, %v6803_v57 }
0x165e   :  { %v4406_v52 = vsel %vm177_vm4, %v4398_v11, 0.0  ;;  %v6939_v11 = vld [vmem:[#allocation8_spill] sm:$0xff] }
0x165f   :  { %v4387_v55 = vpop.xlane.xlu0 %4386  ;;  %4407 = vadd.xlane.f32.xlu0 %v4406_v52 }
0x1660   :  { %v4391_v54 = vmul.f32 %v4387_v55, %v5471_v34 }
0x1662   :  { %v6809_v46 = vsub.f32 %v4373_v42, %v4391_v54 }
0x1664   :  { %v4399_v9 = vmul.f32 %v6809_v46, %v6809_v46 }
0x1666   :  { %v4409_v47 = vsel %vm177_vm4, %v4399_v9, 0.0 }
0x1667   :  { %4410 = vadd.xlane.f32.xlu2 %v4409_v47 }
0x1670   :  { %1261 = vperm.xlu1 %5080, %v1255_v32  }
0x1673   :  { %731 = vperm.xlu0 %5083, %v725_v56  }
0x16c2   :  { %v4402_v45 = vpop.xlane.xlu2 %4401 }
0x16c3   :  { %v4412_v51 = vmul.f32 %v4402_v45, %v5471_v34 }
0x16c5   :  { %v4416_v13 = vadd.f32 1e-05, %v4412_v51 }
0x16c7   :  { %5258 = vrsqrt.f32 %v4416_v13  ;;  %vm4426_vm12 = vweird.f32 %v4416_v13 }
0x16ca   :  { %v4405_v48 = vpop.xlane.xlu1 %4404 }
0x16cb   :  { %v4413_v1 = vmul.f32 %v4405_v48, %v5471_v34 }
0x16cd   :  { %v5259_v27 = vpop.eup %5258  ;;  %v4417_v23 = vadd.f32 1e-05, %v4413_v1 }
0x16ce   :  { %v4421_v6 = vmul.f32 %v5259_v27, %v4416_v13  ;;  %vm4427_vm7 = vweird.f32 %v5259_v27 }
0x16cf   :  { %5260 = vrsqrt.f32 %v4417_v23  ;;  %vm4428_vm1 = vmor %vm4426_vm12, %vm4427_vm7  ;;  %vm4436_vm9 = vweird.f32 %v4417_v23 }
0x16d0   :  { %v4422_v62 = vmul.f32 %v5259_v27, %v4421_v6 }
0x16d2   :  { %v4423_v33 = vmul.f32 0.5, %v4422_v62  ;;  %v4408_v40 = vpop.xlane.xlu0 %4407 }
0x16d3   :  { %v4414_v7 = vmul.f32 %v4408_v40, %v5471_v34 }
0x16d4   :  { %v4424_v50 = vsub.f32 1.5, %v4423_v33 }
0x16d5   :  { %v5261_v30 = vpop.eup %5260  ;;  %v4418_v21 = vadd.f32 1e-05, %v4414_v7 }
0x16d6   :  { %v4425_v41 = vmul.f32 %v5259_v27, %v4424_v50  ;;  %v4431_v17 = vmul.f32 %v5261_v30, %v4417_v23  ;;  %vm4437_vm11 = vweird.f32 %v5261_v30 }
0x16d7   :  { %5262 = vrsqrt.f32 %v4418_v21  ;;  %vm4438_vm10 = vmor %vm4436_vm9, %vm4437_vm11  ;;  %vm4446_vm6 = vweird.f32 %v4418_v21 }
0x16d8   :  { %v4429_v10 = vsel %vm4428_vm1, %v5259_v27, %v4425_v41  ;;  %v4432_v61 = vmul.f32 %v5261_v30, %v4431_v17 }
0x16d9   :  { %v4460_v14 = vmul.f32 %v4429_v10, %v4392_v16  ;;  %v6938_v16 = vld [vmem:[#allocation9_spill] sm:$0xff] }
0x16da   :  { %v4433_v38 = vmul.f32 0.5, %v4432_v61  ;;  %v4411_v60 = vpop.xlane.xlu2 %4410 }
0x16db   :  { %v4415_v63 = vmul.f32 %v4411_v60, %v5471_v34  ;;  %v4465_v39 = vmul.f32 %v5133_v15, %v4460_v14 }
0x16dc   :  { %v4434_v24 = vsub.f32 1.5, %v4433_v38 }
0x16dd   :  { %v5263_v31 = vpop.eup %5262  ;;  %v4419_v59 = vadd.f32 1e-05, %v4415_v63  ;;  %v4470_v53 = vadd.f32 %v5134_v8, %v4465_v39 }
0x16de   :  { %v4435_v22 = vmul.f32 %v5261_v30, %v4434_v24  ;;  %v4441_v26 = vmul.f32 %v5263_v31, %v4418_v21  ;;  %vm4447_vm3 = vweird.f32 %v5263_v31 }
0x16df   :  { %5264 = vrsqrt.f32 %v4419_v59  ;;  %vm4448_vm13 = vmor %vm4446_vm6, %vm4447_vm3  ;;  %vm4456_vm14 = vweird.f32 %v4419_v59 }
0x16e0   :  { %v4439_v25 = vsel %vm4438_vm10, %v5261_v30, %v4435_v22  ;;  %v4442_v18 = vmul.f32 %v5263_v31, %v4441_v26 }
0x16e1   :  { %v4461_v42 = vmul.f32 %v4439_v25, %v6797_v36  ;;  %v4474_v36 = vmul.f32 %v4470_v53, %v6161_v12 }
0x16e2   :  { %v4443_v49 = vmul.f32 0.5, %v4442_v18  ;;  %v1262_v34 = vpop.permute.xlu1 %1261 }
0x16e3   :  { %v4466_v37 = vmul.f32 %v5133_v15, %v4461_v42  ;;  %v1283_v3 = vadd.f32 %v6938_v16, %v1262_v34 }
0x16e4   :  { %v4444_v4 = vsub.f32 1.5, %v4443_v49 }
0x16e5   :  { %v5265_v2 = vpop.eup %5264  ;;  %v4471_v29 = vadd.f32 %v5134_v8, %v4466_v37  ;;  %v1287_v28 = vrot.slane %v1283_v3, 7  ;;  %v732_v19 = vpop.permute.xlu0 %731 }
0x16e6   :  { %v4445_v0 = vmul.f32 %v5263_v31, %v4444_v4  ;;  %v4451_v35 = vmul.f32 %v5265_v2, %v4419_v59  ;;  %v753_v52 = vadd.f32 %v6939_v11, %v732_v19  ;;  %vm4457_vm5 = vweird.f32 %v5265_v2 }
0x16e7   :  { %v4475_v55 = vmul.f32 %v4471_v29, %v6144_v44  ;;  %vm4458_vm15 = vmor %vm4456_vm14, %vm4457_vm5 }
0x16e8   :  { %v4449_v54 = vsel %vm4448_vm13, %v5263_v31, %v4445_v0  ;;  %v4452_v9 = vmul.f32 %v5265_v2, %v4451_v35  ;;  %v1289_v47 = vsel %vm112_vm0, %v753_v52, %v1287_v28 }
0x16e9   :  { %1291 = vst.msk [vmem:[%s6863_s8] sm:$0x3] %vm1290_vm2, %v1289_v47  ;;  %v4482_v32 = vpack.c.bf16 %v4475_v55, %v4474_v36  ;;  %v4462_v45 = vmul.f32 %v4449_v54, %v6803_v57  ;;  %v5135_v57 = vld [vmem:[%s6861_s6 + $0x100] ss:$0 sm:$0xff]  ;;  %s5335_s6 = smov 128  }
0x16ea   :  { %v4453_v56 = vmul.f32 0.5, %v4452_v9 }
0x16eb   :  { %4976 = vmatmul.msk.bf16.vlgmr.msra.gmra.mxu1 %vm177_vm4, %v4482_v32  ;;  %v4467_v44 = vmul.f32 %v5133_v15, %v4462_v45 }
0x16ec   :  { %v4454_v51 = vsub.f32 1.5, %v4453_v56 }
0x16ed   :  { %v4472_v58 = vadd.f32 %v5134_v8, %v4467_v44 }
0x16ee   :  { %v4455_v12 = vmul.f32 %v5265_v2, %v4454_v51 }
0x16ef   :  { %v4476_v27 = vmul.f32 %v4472_v58, %v6227_v43 }
0x16f0   :  { %v4459_v13 = vsel %vm4458_vm15, %v5265_v2, %v4455_v12 }
0x16f1   :  { %v4463_v20 = vmul.f32 %v4459_v13, %v6809_v46 }
0x16f3   :  { %v4468_v48 = vmul.f32 %v5133_v15, %v4463_v20 }
0x16f5   :  { %v4473_v1 = vadd.f32 %v5134_v8, %v4468_v48 }
0x16f7   :  { %v4477_v23 = vmul.f32 %v4473_v1, %v6249_v5 }
0x16f9   :  { %v4483_v6 = vpack.c.bf16 %v4477_v23, %v4476_v27 }
0x16fb   :  { %4977 = vmatmul.msk.bf16.gmra.mxu1 %vm177_vm4, %v4483_v6 }
0x1768   :  { %v4513_v62 = vpop.f32.mrf.mxu1 }
0x1769   :  { %v4514_v33 = vadd.f32 %v5135_v57, %v4513_v62 }
0x176b   :  { %4523 = vst.msk [vmem:[#allocation5] sm:$0xff] %vm1707_vm8, %v4514_v33 }
0x1770   :  { %v4515_v40 = vpop.f32.mrf.mxu1 }
0x1771   :  { %v4516_v46 = vadd.f32 %v5135_v57, %v4515_v40 }
0x1773   :  { %4524 = vst.msk [vmem:[#allocation5 + $0x8] sm:$0xff] %vm1707_vm8, %v4516_v46 }
0x1778   :  { %v4518_v7 = vpop.f32.mrf.mxu1 }
0x1779   :  { %v4519_v50 = vadd.f32 %v5135_v57, %v4518_v7 }
0x177b   :  { %4525 = vst.msk [vmem:[#allocation5 + $0x10] sm:$0xff] %vm1707_vm8, %v4519_v50 }
0x1780   :  { %v4520_v43 = vpop.f32.mrf.mxu1 }
0x1781   :  { %v4521_v5 = vadd.f32 %v5135_v57, %v4520_v43 }
0x1783   :  { %4526 = vst.msk [vmem:[#allocation5 + $0x18] sm:$0xff] %vm1707_vm8, %v4521_v5 }
0x1784   :  { %4539 = dma.vmem_to_hbm [thread:$0]  %s4532_s25, 512, %s4534_s29, [#allocation4], %s5335_s6, %s5335_s6, %s5336_s9  }
0x1785   :  { %5320 = dma.done.wait [#allocation4], 512  }
0x1786   :  { %5321 = vsyncadd [#allocation4], 4294966784 }
0x1787   :  { %4548 = vsyncpa [#allocation3], 1 }
0x1788   :  { %4549 = vsyncpa [#allocation4], 1 }

</bundles_post_ra>
